<compile_context>
chip_gen: v7x
topology: tpu7x:2x2x1
jax: 0.10.0
libtpu: 0.0.40
codegen_flags: <defaults>
</compile_context>

<pallas_src>
import numpy as np

import jax
import jax.numpy as jnp
from jax.experimental import pallas as pl
from jax.experimental.pallas import tpu as pltpu


def _round_up(x, m):
    return (x + m - 1) // m * m


# ------------------------- fused conv+ReLU+pool kernel ---------------------- #

def _conv_relu_pool_kernel(x_ref, band_ref, bias_ref, o_ref):
    # x_ref:    (Mt, Kstk)        bf16  Mt = Bt*Ho rows; lanes = 6 stacked row taps
    # band_ref: (2, 2, Kstk, Np)  bf16  banded conv weights per pool offset (dh, dw)
    # bias_ref: (1, Np)           f32   bias tiled over wo (zero in padded lanes)
    # o_ref:    (Mt, Np)          bf16  pooled output, lane = wo*Cout + c
    x = x_ref[...]
    best = None
    for dh in range(2):
        for dw in range(2):
            acc = jnp.dot(x, band_ref[dh, dw], preferred_element_type=jnp.float32)
            best = acc if best is None else jnp.maximum(best, acc)
    # bias + ReLU commute with the max over (dh, dw)
    o_ref[...] = jnp.maximum(best + bias_ref[...], 0.0).astype(o_ref.dtype)


def conv_relu_pool(x_stk, bands, bias_row, *, ho, bt):
    """x_stk: (B_pad*ho, Kstk) bf16 -> (B_pad*ho, Npad) bf16 (conv+bias+ReLU+maxpool)."""
    M, Kstk = x_stk.shape
    Npad = bands.shape[-1]
    Mt = bt * ho                       # rows per grid step (Bt images)
    return pl.pallas_call(
        _conv_relu_pool_kernel,
        out_shape=jax.ShapeDtypeStruct((M, Npad), jnp.bfloat16),
        grid_spec=pltpu.PrefetchScalarGridSpec(
            num_scalar_prefetch=0,
            grid=(M // Mt,),
            in_specs=[
                pl.BlockSpec((Mt, Kstk), lambda i: (i, 0)),
                pl.BlockSpec(tuple(bands.shape), lambda i: (0, 0, 0, 0)),
                pl.BlockSpec((1, Npad), lambda i: (0, 0)),
            ],
            out_specs=pl.BlockSpec((Mt, Npad), lambda i: (i, 0)),
        ),
        compiler_params=pltpu.CompilerParams(
            dimension_semantics=("parallel",),
            vmem_limit_bytes=32 * 1024 * 1024,
        ),
    )(x_stk, bands, bias_row)


# ------------------------------ fused MLP head ------------------------------ #

def _mlp_kernel(x_ref, w1_ref, b1_ref, w2_ref, b2_ref, w3_ref, b3_ref, o_ref):
    h = jnp.dot(x_ref[...], w1_ref[...], preferred_element_type=jnp.float32)
    h = jnp.maximum(h + b1_ref[...], 0.0)
    h = jnp.dot(h.astype(jnp.bfloat16), w2_ref[...], preferred_element_type=jnp.float32)
    h = jnp.maximum(h + b2_ref[...], 0.0)
    out = jnp.dot(h.astype(jnp.bfloat16), w3_ref[...], preferred_element_type=jnp.float32)
    o_ref[...] = out + b3_ref[...]


def mlp_head(x_flat, w1, b1, w2, b2, w3, b3, *, bt):
    """x_flat:(B_pad,1792) bf16 -> padded logits (B_pad,128) f32 (fused 3 Linears)."""
    B, K1 = x_flat.shape
    N1, N2, N3 = w1.shape[1], w2.shape[1], w3.shape[1]
    return pl.pallas_call(
        _mlp_kernel,
        out_shape=jax.ShapeDtypeStruct((B, N3), jnp.float32),
        grid_spec=pltpu.PrefetchScalarGridSpec(
            num_scalar_prefetch=0,
            grid=(B // bt,),
            in_specs=[
                pl.BlockSpec((bt, K1), lambda i: (i, 0)),
                pl.BlockSpec((K1, N1), lambda i: (0, 0)),
                pl.BlockSpec((1, N1), lambda i: (0, 0)),
                pl.BlockSpec((N1, N2), lambda i: (0, 0)),
                pl.BlockSpec((1, N2), lambda i: (0, 0)),
                pl.BlockSpec((N2, N3), lambda i: (0, 0)),
                pl.BlockSpec((1, N3), lambda i: (0, 0)),
            ],
            out_specs=pl.BlockSpec((bt, N3), lambda i: (i, 0)),
        ),
        compiler_params=pltpu.CompilerParams(
            dimension_semantics=("parallel",),
            vmem_limit_bytes=32 * 1024 * 1024,
        ),
    )(x_flat, w1, b1, w2, b2, w3, b3)


# --------------------------- one-time parameter prep ------------------------ #

def _build_bands(w_oihw, W, l_tap, k_stk, n_pad):
    """Banded weights for Conv5x5(pad=2) fused with 2x2 maxpool over a 6-row-tap
    stacked, lane-dense layout.

    The stacked input row m = b*Ho + ho holds, at lane t*l_tap + s*Cin + c, the
    activation x[b, 2*ho + t - 2, s, c] (zero for out-of-range rows / unused lanes).
    bands[dh, dw] maps that row to the conv output at spatial (2*ho+dh, 2*wo+dw),
    at output column wo*Cout + o.
    """
    w = np.asarray(w_oihw, np.float32)              # (O, Cin, 5, 5)
    O, Cin, KH, KW = w.shape
    Wo = W // 2
    bands = np.zeros((2, 2, k_stk, n_pad), np.float32)
    for dh in range(2):
        for dw in range(2):
            for t in range(6):
                kh = t - dh
                if not 0 <= kh < KH:
                    continue
                for wo in range(Wo):
                    for kw in range(KW):
                        s = 2 * wo + dw + kw - 2     # unpadded input column
                        if not 0 <= s < W:
                            continue
                        r0 = t * l_tap + s * Cin
                        c0 = wo * O
                        bands[dh, dw, r0:r0 + Cin, c0:c0 + O] = w[:, :, kh, kw].T
    return jnp.asarray(bands, jnp.bfloat16)


def _bias_row(b, wo, n_pad):
    b = np.asarray(b, np.float32)
    row = np.zeros((1, n_pad), np.float32)
    row[0, :wo * b.size] = np.tile(b, wo)            # lane = wo*Cout + o
    return jnp.asarray(row)


def prepare_params(p):
    """Repack PyTorch-layout params into kernel-friendly constants (runs once)."""
    # f1: fold the NCHW flatten (c,h,w) and our (h, lane=w*32+c padded to 256) layout
    # into the weight rows -> (7*256, 512) with zero rows for the 32 padded lanes.
    f1 = np.asarray(p["f1_w"], np.float32).reshape(512, 32, 7, 7)
    f1 = f1.transpose(2, 3, 1, 0).reshape(7, 7 * 32, 512)            # (h, w*32+c, n)
    f1 = np.pad(f1, ((0, 0), (0, 32), (0, 0))).reshape(7 * 256, 512)
    f2 = np.asarray(p["f2_w"], np.float32).T                         # (512, 256)
    f3 = np.asarray(p["f3_w"], np.float32).T                         # (256, 10)
    f3p = np.zeros((256, 128), np.float32); f3p[:, :10] = f3         # pad N=10 -> 128
    b3p = np.zeros((1, 128), np.float32); b3p[0, :10] = np.asarray(p["f3_b"], np.float32)
    return {
        # conv1: per-tap lane width 28 (W*Cin), 6 taps = 168 -> K padded to 256; N 224->256
        "c1_bands": _build_bands(p["c1_w"], W=28, l_tap=28, k_stk=256, n_pad=256),
        "c1_bias": _bias_row(p["c1_b"], wo=14, n_pad=256),
        # conv2: per-tap lane width 256 = conv1's padded output row (lane = w*16+c),
        #        6 taps = 1536 (12*128); N 224->256.  W-pad / channel layout live in the band.
        "c2_bands": _build_bands(p["c2_w"], W=14, l_tap=256, k_stk=1536, n_pad=256),
        "c2_bias": _bias_row(p["c2_b"], wo=7, n_pad=256),
        "f1_w": jnp.asarray(f1, jnp.bfloat16),
        "f1_b": jnp.asarray(p["f1_b"], jnp.float32).reshape(1, 512),
        "f2_w": jnp.asarray(f2, jnp.bfloat16),
        "f2_b": jnp.asarray(p["f2_b"], jnp.float32).reshape(1, 256),
        "f3_w": jnp.asarray(f3p, jnp.bfloat16),
        "f3_b": jnp.asarray(b3p, jnp.float32),
    }


def init_params(key):
    ks = jax.random.split(key, 10)
    s = 0.05
    return {
        "c1_w": s * jax.random.normal(ks[0], (16, 1, 5, 5), jnp.float32),
        "c1_b": s * jax.random.normal(ks[1], (16,), jnp.float32),
        "c2_w": s * jax.random.normal(ks[2], (32, 16, 5, 5), jnp.float32),
        "c2_b": s * jax.random.normal(ks[3], (32,), jnp.float32),
        "f1_w": s * jax.random.normal(ks[4], (512, 1568), jnp.float32),
        "f1_b": s * jax.random.normal(ks[5], (512,), jnp.float32),
        "f2_w": s * jax.random.normal(ks[6], (256, 512), jnp.float32),
        "f2_b": s * jax.random.normal(ks[7], (256,), jnp.float32),
        "f3_w": s * jax.random.normal(ks[8], (10, 256), jnp.float32),
        "f3_b": s * jax.random.normal(ks[9], (10,), jnp.float32),
    }


# --------------------------------- forward ---------------------------------- #

def _stack_conv_rows(x, k_stk):
    """(B, H, L) activation rows -> (B*(H//2), k_stk) bf16 with the 6 vertically
    overlapping row taps (stride 2, conv pad 2 in rows) concatenated along lanes and
    zero-padded to k_stk lanes.  Only cheap XLA glue: pad + strided slices + concat."""
    B, H, L = x.shape
    Ho = H // 2
    xp = jnp.pad(x, ((0, 0), (2, 2), (0, 0)))
    taps = [xp[:, t:t + 2 * Ho:2, :] for t in range(6)]          # 6 x (B, Ho, L)
    stk = jnp.concatenate(taps, axis=-1)                         # (B, Ho, 6L)
    if 6 * L < k_stk:
        stk = jnp.pad(stk, ((0, 0), (0, 0), (0, k_stk - 6 * L)))
    return stk.reshape(B * Ho, k_stk).astype(jnp.bfloat16)


@jax.jit
def mnist_cnn_forward(prepped, x_nchw):
    """x_nchw: (B, 1, 28, 28) float32 -> logits (B, 10) float32."""
    B = x_nchw.shape[0]
    # Batch tile: multiple of 16 (layout-friendly M blocks), >=2 grid steps for large B
    # (v7x megacore), capped at 128 (M = 896..1792 fills the MXU; VMEM stays small).
    Bt = min(128, max(16, _round_up((B + 1) // 2, 16)))
    B_pad = _round_up(B, Bt)

    x = x_nchw.reshape(B, 28, 28)                                # Cin = 1
    if B_pad != B:
        x = jnp.pad(x, ((0, B_pad - B), (0, 0), (0, 0)))
    x = x.astype(jnp.bfloat16)

    # Conv(1->16,5x5,pad2)+ReLU+MaxPool2 fused: (B_pad*14, 256), lane = w*16 + c.
    x1 = conv_relu_pool(_stack_conv_rows(x, 256),
                        prepped["c1_bands"], prepped["c1_bias"], ho=14, bt=Bt)

    # Conv(16->32,5x5,pad2)+ReLU+MaxPool2 fused: (B_pad*7, 256), lane = w*32 + c.
    # TODO(synk): the two conv stages (and MLP) could be fused into one pallas_call
    # per batch tile with the row-pad/tap-stack done into VMEM scratch in-kernel.
    x1 = x1.reshape(B_pad, 14, 256)
    x2 = conv_relu_pool(_stack_conv_rows(x1, 1536),
                        prepped["c2_bands"], prepped["c2_bias"], ho=7, bt=Bt)

    # Flatten (the (h, w, c)-with-lane-padding order is folded into f1_w) -> fused MLP.
    xf = x2.reshape(B_pad, 7 * 256)                              # (B_pad, 1792) bf16
    logits_pad = mlp_head(xf, prepped["f1_w"], prepped["f1_b"],
                          prepped["f2_w"], prepped["f2_b"],
                          prepped["f3_w"], prepped["f3_b"], bt=Bt)   # (B_pad, 128) f32
    return logits_pad[:B, :10]


# ----------------------------------- main ------------------------------------ #

if __name__ == "__main__":
    key = jax.random.PRNGKey(0)
    pkey, xkey = jax.random.split(key)
    params = init_params(pkey)
    prepped = prepare_params(params)

    # MNIST-shaped input: batch=2, 1 channel, 28x28 (required by Linear(1568, ...)).
    x = jax.random.normal(xkey, (2, 1, 28, 28), jnp.float32)

    logits = mnist_cnn_forward(prepped, x)
    logits = jax.block_until_ready(logits)
    assert logits.shape == (2, 10) and logits.dtype == jnp.float32
    print("KERNEL_OK")
</pallas_src>

<mosaic_0001>
module attributes {stable_mosaic.version = 11 : i64} {
  func.func @_conv_relu_pool_kernel(%arg0: i32, %arg1: memref<224x256xbf16, #tpu.memory_space<vmem>>, %arg2: memref<2x2x256x256xbf16, #tpu.memory_space<vmem>>, %arg3: memref<1x256xf32, #tpu.memory_space<vmem>>, %arg4: memref<224x256xbf16, #tpu.memory_space<vmem>>) attributes {dimension_semantics = [#tpu.dimension_semantics<parallel>], iteration_bounds = array<i64: 1>, scalar_prefetch = 0 : i64, scratch_operands = 0 : i64, tpu.core_type = #tpu.core_type<tc>, window_params = [{transform_indices = @transform_0, window_bounds = array<i64: 224, 256>}, {pipeline_mode = #tpu.pipeline_mode<synchronous>, transform_indices = @transform_1, window_bounds = array<i64: 2, 2, 256, 256>}, {pipeline_mode = #tpu.pipeline_mode<synchronous>, transform_indices = @transform_2, window_bounds = array<i64: 1, 256>}, {transform_indices = @transform_3, window_bounds = array<i64: 224, 256>}]} {
    %c0 = arith.constant 0 : index
    %c0_0 = arith.constant 0 : index
    %0 = vector.load %arg1[%c0, %c0_0] : memref<224x256xbf16, #tpu.memory_space<vmem>>, vector<224x256xbf16>
    %c0_1 = arith.constant 0 : index
    %c0_2 = arith.constant 0 : index
    %c0_3 = arith.constant 0 : index
    %c0_4 = arith.constant 0 : index
    %1 = vector.load %arg2[%c0_1, %c0_2, %c0_3, %c0_4] : memref<2x2x256x256xbf16, #tpu.memory_space<vmem>>, vector<1x1x256x256xbf16>
    %2 = vector.shape_cast %1 : vector<1x1x256x256xbf16> to vector<256x256xbf16>
    %cst = arith.constant dense<0.000000e+00> : vector<224x256xf32>
    %3 = tpu.matmul %0, %2, %cst {dimension_numbers = #tpu.dot_dimension_numbers<[1], [0], [0], [1], [0, 0, 1, 1], [], []>} : vector<224x256xbf16>, vector<256x256xbf16>, vector<224x256xf32> -> vector<224x256xf32>
    %c0_5 = arith.constant 0 : index
    %c1 = arith.constant 1 : index
    %c0_6 = arith.constant 0 : index
    %c0_7 = arith.constant 0 : index
    %4 = vector.load %arg2[%c0_5, %c1, %c0_6, %c0_7] : memref<2x2x256x256xbf16, #tpu.memory_space<vmem>>, vector<1x1x256x256xbf16>
    %5 = vector.shape_cast %4 : vector<1x1x256x256xbf16> to vector<256x256xbf16>
    %cst_8 = arith.constant dense<0.000000e+00> : vector<224x256xf32>
    %6 = tpu.matmul %0, %5, %cst_8 {dimension_numbers = #tpu.dot_dimension_numbers<[1], [0], [0], [1], [0, 0, 1, 1], [], []>} : vector<224x256xbf16>, vector<256x256xbf16>, vector<224x256xf32> -> vector<224x256xf32>
    %7 = arith.maximumf %3, %6 : vector<224x256xf32>
    %c1_9 = arith.constant 1 : index
    %c0_10 = arith.constant 0 : index
    %c0_11 = arith.constant 0 : index
    %c0_12 = arith.constant 0 : index
    %8 = vector.load %arg2[%c1_9, %c0_10, %c0_11, %c0_12] : memref<2x2x256x256xbf16, #tpu.memory_space<vmem>>, vector<1x1x256x256xbf16>
    %9 = vector.shape_cast %8 : vector<1x1x256x256xbf16> to vector<256x256xbf16>
    %cst_13 = arith.constant dense<0.000000e+00> : vector<224x256xf32>
    %10 = tpu.matmul %0, %9, %cst_13 {dimension_numbers = #tpu.dot_dimension_numbers<[1], [0], [0], [1], [0, 0, 1, 1], [], []>} : vector<224x256xbf16>, vector<256x256xbf16>, vector<224x256xf32> -> vector<224x256xf32>
    %11 = arith.maximumf %7, %10 : vector<224x256xf32>
    %c1_14 = arith.constant 1 : index
    %c1_15 = arith.constant 1 : index
    %c0_16 = arith.constant 0 : index
    %c0_17 = arith.constant 0 : index
    %12 = vector.load %arg2[%c1_14, %c1_15, %c0_16, %c0_17] : memref<2x2x256x256xbf16, #tpu.memory_space<vmem>>, vector<1x1x256x256xbf16>
    %13 = vector.shape_cast %12 : vector<1x1x256x256xbf16> to vector<256x256xbf16>
    %cst_18 = arith.constant dense<0.000000e+00> : vector<224x256xf32>
    %14 = tpu.matmul %0, %13, %cst_18 {dimension_numbers = #tpu.dot_dimension_numbers<[1], [0], [0], [1], [0, 0, 1, 1], [], []>} : vector<224x256xbf16>, vector<256x256xbf16>, vector<224x256xf32> -> vector<224x256xf32>
    %15 = arith.maximumf %11, %14 : vector<224x256xf32>
    %c0_19 = arith.constant 0 : index
    %c0_20 = arith.constant 0 : index
    %16 = vector.load %arg3[%c0_19, %c0_20] : memref<1x256xf32, #tpu.memory_space<vmem>>, vector<1x256xf32>
    %17 = vector.broadcast %16 : vector<1x256xf32> to vector<224x256xf32>
    %18 = arith.addf %15, %17 : vector<224x256xf32>
    %cst_21 = arith.constant 0.000000e+00 : f32
    %19 = vector.broadcast %cst_21 : f32 to vector<224x256xf32>
    %20 = arith.maximumf %18, %19 : vector<224x256xf32>
    %21 = arith.truncf %20 : vector<224x256xf32> to vector<224x256xbf16>
    %c0_22 = arith.constant 0 : index
    %c0_23 = arith.constant 0 : index
    %22 = vector.load %arg4[%c0_22, %c0_23] : memref<224x256xbf16, #tpu.memory_space<vmem>>, vector<224x256xbf16>
    tpu.vector_store %arg4[%c0_22, %c0_23], %21 {strides = array<i32>} : memref<224x256xbf16, #tpu.memory_space<vmem>>, vector<224x256xbf16>,
    return
  }
  func.func @transform_0(%arg0: i32) -> (i32, i32) {
    %c0_i32 = arith.constant 0 : i32
    %c0_i32_0 = arith.constant 0 : i32
    return %arg0, %c0_i32 : i32, i32
  }
  func.func @transform_1(%arg0: i32) -> (i32, i32, i32, i32) {
    %c0_i32 = arith.constant 0 : i32
    %c0_i32_0 = arith.constant 0 : i32
    %c0_i32_1 = arith.constant 0 : i32
    %c0_i32_2 = arith.constant 0 : i32
    %c0_i32_3 = arith.constant 0 : i32
    return %c0_i32, %c0_i32_0, %c0_i32_1, %c0_i32_2 : i32, i32, i32, i32
  }
  func.func @transform_2(%arg0: i32) -> (i32, i32) {
    %c0_i32 = arith.constant 0 : i32
    %c0_i32_0 = arith.constant 0 : i32
    %c0_i32_1 = arith.constant 0 : i32
    return %c0_i32, %c0_i32_0 : i32, i32
  }
  func.func @transform_3(%arg0: i32) -> (i32, i32) {
    %c0_i32 = arith.constant 0 : i32
    %c0_i32_0 = arith.constant 0 : i32
    return %arg0, %c0_i32 : i32, i32
  }
}

module attributes {stable_mosaic.version = 11 : i64} {
  func.func @_conv_relu_pool_kernel(%arg0: i32, %arg1: memref<112x1536xbf16, #tpu.memory_space<vmem>>, %arg2: memref<2x2x1536x256xbf16, #tpu.memory_space<vmem>>, %arg3: memref<1x256xf32, #tpu.memory_space<vmem>>, %arg4: memref<112x256xbf16, #tpu.memory_space<vmem>>) attributes {dimension_semantics = [#tpu.dimension_semantics<parallel>], iteration_bounds = array<i64: 1>, scalar_prefetch = 0 : i64, scratch_operands = 0 : i64, tpu.core_type = #tpu.core_type<tc>, window_params = [{transform_indices = @transform_0, window_bounds = array<i64: 112, 1536>}, {pipeline_mode = #tpu.pipeline_mode<synchronous>, transform_indices = @transform_1, window_bounds = array<i64: 2, 2, 1536, 256>}, {pipeline_mode = #tpu.pipeline_mode<synchronous>, transform_indices = @transform_2, window_bounds = array<i64: 1, 256>}, {transform_indices = @transform_3, window_bounds = array<i64: 112, 256>}]} {
    %c0 = arith.constant 0 : index
    %c0_0 = arith.constant 0 : index
    %0 = vector.load %arg1[%c0, %c0_0] : memref<112x1536xbf16, #tpu.memory_space<vmem>>, vector<112x1536xbf16>
    %c0_1 = arith.constant 0 : index
    %c0_2 = arith.constant 0 : index
    %c0_3 = arith.constant 0 : index
    %c0_4 = arith.constant 0 : index
    %1 = vector.load %arg2[%c0_1, %c0_2, %c0_3, %c0_4] : memref<2x2x1536x256xbf16, #tpu.memory_space<vmem>>, vector<1x1x1536x256xbf16>
    %2 = vector.shape_cast %1 : vector<1x1x1536x256xbf16> to vector<1536x256xbf16>
    %cst = arith.constant dense<0.000000e+00> : vector<112x256xf32>
    %3 = tpu.matmul %0, %2, %cst {dimension_numbers = #tpu.dot_dimension_numbers<[1], [0], [0], [1], [0, 0, 1, 1], [], []>} : vector<112x1536xbf16>, vector<1536x256xbf16>, vector<112x256xf32> -> vector<112x256xf32>
    %c0_5 = arith.constant 0 : index
    %c1 = arith.constant 1 : index
    %c0_6 = arith.constant 0 : index
    %c0_7 = arith.constant 0 : index
    %4 = vector.load %arg2[%c0_5, %c1, %c0_6, %c0_7] : memref<2x2x1536x256xbf16, #tpu.memory_space<vmem>>, vector<1x1x1536x256xbf16>
    %5 = vector.shape_cast %4 : vector<1x1x1536x256xbf16> to vector<1536x256xbf16>
    %cst_8 = arith.constant dense<0.000000e+00> : vector<112x256xf32>
    %6 = tpu.matmul %0, %5, %cst_8 {dimension_numbers = #tpu.dot_dimension_numbers<[1], [0], [0], [1], [0, 0, 1, 1], [], []>} : vector<112x1536xbf16>, vector<1536x256xbf16>, vector<112x256xf32> -> vector<112x256xf32>
    %7 = arith.maximumf %3, %6 : vector<112x256xf32>
    %c1_9 = arith.constant 1 : index
    %c0_10 = arith.constant 0 : index
    %c0_11 = arith.constant 0 : index
    %c0_12 = arith.constant 0 : index
    %8 = vector.load %arg2[%c1_9, %c0_10, %c0_11, %c0_12] : memref<2x2x1536x256xbf16, #tpu.memory_space<vmem>>, vector<1x1x1536x256xbf16>
    %9 = vector.shape_cast %8 : vector<1x1x1536x256xbf16> to vector<1536x256xbf16>
    %cst_13 = arith.constant dense<0.000000e+00> : vector<112x256xf32>
    %10 = tpu.matmul %0, %9, %cst_13 {dimension_numbers = #tpu.dot_dimension_numbers<[1], [0], [0], [1], [0, 0, 1, 1], [], []>} : vector<112x1536xbf16>, vector<1536x256xbf16>, vector<112x256xf32> -> vector<112x256xf32>
    %11 = arith.maximumf %7, %10 : vector<112x256xf32>
    %c1_14 = arith.constant 1 : index
    %c1_15 = arith.constant 1 : index
    %c0_16 = arith.constant 0 : index
    %c0_17 = arith.constant 0 : index
    %12 = vector.load %arg2[%c1_14, %c1_15, %c0_16, %c0_17] : memref<2x2x1536x256xbf16, #tpu.memory_space<vmem>>, vector<1x1x1536x256xbf16>
    %13 = vector.shape_cast %12 : vector<1x1x1536x256xbf16> to vector<1536x256xbf16>
    %cst_18 = arith.constant dense<0.000000e+00> : vector<112x256xf32>
    %14 = tpu.matmul %0, %13, %cst_18 {dimension_numbers = #tpu.dot_dimension_numbers<[1], [0], [0], [1], [0, 0, 1, 1], [], []>} : vector<112x1536xbf16>, vector<1536x256xbf16>, vector<112x256xf32> -> vector<112x256xf32>
    %15 = arith.maximumf %11, %14 : vector<112x256xf32>
    %c0_19 = arith.constant 0 : index
    %c0_20 = arith.constant 0 : index
    %16 = vector.load %arg3[%c0_19, %c0_20] : memref<1x256xf32, #tpu.memory_space<vmem>>, vector<1x256xf32>
    %17 = vector.broadcast %16 : vector<1x256xf32> to vector<112x256xf32>
    %18 = arith.addf %15, %17 : vector<112x256xf32>
    %cst_21 = arith.constant 0.000000e+00 : f32
    %19 = vector.broadcast %cst_21 : f32 to vector<112x256xf32>
    %20 = arith.maximumf %18, %19 : vector<112x256xf32>
    %21 = arith.truncf %20 : vector<112x256xf32> to vector<112x256xbf16>
    %c0_22 = arith.constant 0 : index
    %c0_23 = arith.constant 0 : index
    %22 = vector.load %arg4[%c0_22, %c0_23] : memref<112x256xbf16, #tpu.memory_space<vmem>>, vector<112x256xbf16>
    tpu.vector_store %arg4[%c0_22, %c0_23], %21 {strides = array<i32>} : memref<112x256xbf16, #tpu.memory_space<vmem>>, vector<112x256xbf16>,
    return
  }
  func.func @transform_0(%arg0: i32) -> (i32, i32) {
    %c0_i32 = arith.constant 0 : i32
    %c0_i32_0 = arith.constant 0 : i32
    return %arg0, %c0_i32 : i32, i32
  }
  func.func @transform_1(%arg0: i32) -> (i32, i32, i32, i32) {
    %c0_i32 = arith.constant 0 : i32
    %c0_i32_0 = arith.constant 0 : i32
    %c0_i32_1 = arith.constant 0 : i32
    %c0_i32_2 = arith.constant 0 : i32
    %c0_i32_3 = arith.constant 0 : i32
    return %c0_i32, %c0_i32_0, %c0_i32_1, %c0_i32_2 : i32, i32, i32, i32
  }
  func.func @transform_2(%arg0: i32) -> (i32, i32) {
    %c0_i32 = arith.constant 0 : i32
    %c0_i32_0 = arith.constant 0 : i32
    %c0_i32_1 = arith.constant 0 : i32
    return %c0_i32, %c0_i32_0 : i32, i32
  }
  func.func @transform_3(%arg0: i32) -> (i32, i32) {
    %c0_i32 = arith.constant 0 : i32
    %c0_i32_0 = arith.constant 0 : i32
    return %arg0, %c0_i32 : i32, i32
  }
}

module attributes {stable_mosaic.version = 11 : i64} {
  func.func @_mlp_kernel(%arg0: i32, %arg1: memref<16x1792xbf16, #tpu.memory_space<vmem>>, %arg2: memref<1792x512xbf16, #tpu.memory_space<vmem>>, %arg3: memref<1x512xf32, #tpu.memory_space<vmem>>, %arg4: memref<512x256xbf16, #tpu.memory_space<vmem>>, %arg5: memref<1x256xf32, #tpu.memory_space<vmem>>, %arg6: memref<256x128xbf16, #tpu.memory_space<vmem>>, %arg7: memref<1x128xf32, #tpu.memory_space<vmem>>, %arg8: memref<16x128xf32, #tpu.memory_space<vmem>>) attributes {dimension_semantics = [#tpu.dimension_semantics<parallel>], iteration_bounds = array<i64: 1>, scalar_prefetch = 0 : i64, scratch_operands = 0 : i64, tpu.core_type = #tpu.core_type<tc>, window_params = [{transform_indices = @transform_0, window_bounds = array<i64: 16, 1792>}, {pipeline_mode = #tpu.pipeline_mode<synchronous>, transform_indices = @transform_1, window_bounds = array<i64: 1792, 512>}, {pipeline_mode = #tpu.pipeline_mode<synchronous>, transform_indices = @transform_2, window_bounds = array<i64: 1, 512>}, {pipeline_mode = #tpu.pipeline_mode<synchronous>, transform_indices = @transform_3, window_bounds = array<i64: 512, 256>}, {pipeline_mode = #tpu.pipeline_mode<synchronous>, transform_indices = @transform_4, window_bounds = array<i64: 1, 256>}, {pipeline_mode = #tpu.pipeline_mode<synchronous>, transform_indices = @transform_5, window_bounds = array<i64: 256, 128>}, {pipeline_mode = #tpu.pipeline_mode<synchronous>, transform_indices = @transform_6, window_bounds = array<i64: 1, 128>}, {transform_indices = @transform_7, window_bounds = array<i64: 16, 128>}]} {
    %c0 = arith.constant 0 : index
    %c0_0 = arith.constant 0 : index
    %0 = vector.load %arg1[%c0, %c0_0] : memref<16x1792xbf16, #tpu.memory_space<vmem>>, vector<16x1792xbf16>
    %c0_1 = arith.constant 0 : index
    %c0_2 = arith.constant 0 : index
    %1 = vector.load %arg2[%c0_1, %c0_2] : memref<1792x512xbf16, #tpu.memory_space<vmem>>, vector<1792x512xbf16>
    %cst = arith.constant dense<0.000000e+00> : vector<16x512xf32>
    %2 = tpu.matmul %0, %1, %cst {dimension_numbers = #tpu.dot_dimension_numbers<[1], [0], [0], [1], [0, 0, 1, 1], [], []>} : vector<16x1792xbf16>, vector<1792x512xbf16>, vector<16x512xf32> -> vector<16x512xf32>
    %c0_3 = arith.constant 0 : index
    %c0_4 = arith.constant 0 : index
    %3 = vector.load %arg3[%c0_3, %c0_4] : memref<1x512xf32, #tpu.memory_space<vmem>>, vector<1x512xf32>
    %4 = vector.broadcast %3 : vector<1x512xf32> to vector<16x512xf32>
    %5 = arith.addf %2, %4 : vector<16x512xf32>
    %cst_5 = arith.constant 0.000000e+00 : f32
    %6 = vector.broadcast %cst_5 : f32 to vector<16x512xf32>
    %7 = arith.maximumf %5, %6 : vector<16x512xf32>
    %8 = arith.truncf %7 : vector<16x512xf32> to vector<16x512xbf16>
    %c0_6 = arith.constant 0 : index
    %c0_7 = arith.constant 0 : index
    %9 = vector.load %arg4[%c0_6, %c0_7] : memref<512x256xbf16, #tpu.memory_space<vmem>>, vector<512x256xbf16>
    %cst_8 = arith.constant dense<0.000000e+00> : vector<16x256xf32>
    %10 = tpu.matmul %8, %9, %cst_8 {dimension_numbers = #tpu.dot_dimension_numbers<[1], [0], [0], [1], [0, 0, 1, 1], [], []>} : vector<16x512xbf16>, vector<512x256xbf16>, vector<16x256xf32> -> vector<16x256xf32>
    %c0_9 = arith.constant 0 : index
    %c0_10 = arith.constant 0 : index
    %11 = vector.load %arg5[%c0_9, %c0_10] : memref<1x256xf32, #tpu.memory_space<vmem>>, vector<1x256xf32>
    %12 = vector.broadcast %11 : vector<1x256xf32> to vector<16x256xf32>
    %13 = arith.addf %10, %12 : vector<16x256xf32>
    %cst_11 = arith.constant 0.000000e+00 : f32
    %14 = vector.broadcast %cst_11 : f32 to vector<16x256xf32>
    %15 = arith.maximumf %13, %14 : vector<16x256xf32>
    %16 = arith.truncf %15 : vector<16x256xf32> to vector<16x256xbf16>
    %c0_12 = arith.constant 0 : index
    %c0_13 = arith.constant 0 : index
    %17 = vector.load %arg6[%c0_12, %c0_13] : memref<256x128xbf16, #tpu.memory_space<vmem>>, vector<256x128xbf16>
    %cst_14 = arith.constant dense<0.000000e+00> : vector<16x128xf32>
    %18 = tpu.matmul %16, %17, %cst_14 {dimension_numbers = #tpu.dot_dimension_numbers<[1], [0], [0], [1], [0, 0, 1, 1], [], []>} : vector<16x256xbf16>, vector<256x128xbf16>, vector<16x128xf32> -> vector<16x128xf32>
    %c0_15 = arith.constant 0 : index
    %c0_16 = arith.constant 0 : index
    %19 = vector.load %arg7[%c0_15, %c0_16] : memref<1x128xf32, #tpu.memory_space<vmem>>, vector<1x128xf32>
    %20 = vector.broadcast %19 : vector<1x128xf32> to vector<16x128xf32>
    %21 = arith.addf %18, %20 : vector<16x128xf32>
    %c0_17 = arith.constant 0 : index
    %c0_18 = arith.constant 0 : index
    %22 = vector.load %arg8[%c0_17, %c0_18] : memref<16x128xf32, #tpu.memory_space<vmem>>, vector<16x128xf32>
    tpu.vector_store %arg8[%c0_17, %c0_18], %21 {strides = array<i32>} : memref<16x128xf32, #tpu.memory_space<vmem>>, vector<16x128xf32>,
    return
  }
  func.func @transform_0(%arg0: i32) -> (i32, i32) {
    %c0_i32 = arith.constant 0 : i32
    %c0_i32_0 = arith.constant 0 : i32
    return %arg0, %c0_i32 : i32, i32
  }
  func.func @transform_1(%arg0: i32) -> (i32, i32) {
    %c0_i32 = arith.constant 0 : i32
    %c0_i32_0 = arith.constant 0 : i32
    %c0_i32_1 = arith.constant 0 : i32
    return %c0_i32, %c0_i32_0 : i32, i32
  }
  func.func @transform_2(%arg0: i32) -> (i32, i32) {
    %c0_i32 = arith.constant 0 : i32
    %c0_i32_0 = arith.constant 0 : i32
    %c0_i32_1 = arith.constant 0 : i32
    return %c0_i32, %c0_i32_0 : i32, i32
  }
  func.func @transform_3(%arg0: i32) -> (i32, i32) {
    %c0_i32 = arith.constant 0 : i32
    %c0_i32_0 = arith.constant 0 : i32
    %c0_i32_1 = arith.constant 0 : i32
    return %c0_i32, %c0_i32_0 : i32, i32
  }
  func.func @transform_4(%arg0: i32) -> (i32, i32) {
    %c0_i32 = arith.constant 0 : i32
    %c0_i32_0 = arith.constant 0 : i32
    %c0_i32_1 = arith.constant 0 : i32
    return %c0_i32, %c0_i32_0 : i32, i32
  }
  func.func @transform_5(%arg0: i32) -> (i32, i32) {
    %c0_i32 = arith.constant 0 : i32
    %c0_i32_0 = arith.constant 0 : i32
    %c0_i32_1 = arith.constant 0 : i32
    return %c0_i32, %c0_i32_0 : i32, i32
  }
  func.func @transform_6(%arg0: i32) -> (i32, i32) {
    %c0_i32 = arith.constant 0 : i32
    %c0_i32_0 = arith.constant 0 : i32
    %c0_i32_1 = arith.constant 0 : i32
    return %c0_i32, %c0_i32_0 : i32, i32
  }
  func.func @transform_7(%arg0: i32) -> (i32, i32) {
    %c0_i32 = arith.constant 0 : i32
    %c0_i32_0 = arith.constant 0 : i32
    return %arg0, %c0_i32 : i32, i32
  }
}

</mosaic_0001>

<bundles_post_ra>
// kernel: mnist_cnn_forward.3
= control target key start
LH: loop header
LB: loop body
LE: loop exit
PB: predicated region body
PF: predicated region fallthrough
CT: control target
= control target key end

     0   :  { %8 = vsyncpa [#allocation3], 0  ;;  %s3587_s0 = inlined_call_operand.vmem [shape: bf16[224,256], index: 0, kind: input, shape index: {}]   ;;  %s3588_s1 = inlined_call_operand.hbm [shape: bf16[2,2,256,256], index: 1, kind: input, shape index: {}]   ;;  %s3589_s2 = inlined_call_operand.hbm [shape: f32[1,256], index: 2, kind: input, shape index: {}]   ;;  %s3590_s3 = inlined_call_operand.vmem [shape: bf16[224,256], index: 3, kind: output, shape index: {}]  }
   0x1   :  { %9 = vsyncpa [#allocation5], 0  ;;  %s2663_s12 = smov [#allocation2]   ;;  %s2615_s16 = scalar_lea.hbm %s3588_s1, 16384 }
   0x2   :  { %s17_s13 = sshll.u32 %s2663_s12, 4  ;;  %p2616_p0 = scmp.ne.s32.totalorder %s3588_s1, %s2615_s16  ;;  %s18_s13 = int_to_ptr.vmem [resolvable:$true] %s17_s13 }
   0x3   :  { %p2619_p1 = scmp.lt.u32.totalorder %s2615_s16, %s3588_s1 }
   0x5   :  { %p2621_p2 = pnand %p2619_p1, %p2616_p0 }
   0x7   :  { %2624 = shalt.err (!%p2621_p2)
}
   0x8   :  { %s2625_s21 = scalar_lea.vmem %s18_s13, 16384  ;;  %p2630_p4 = scmp.lt.s32.totalorder %s18_s13, %s18_s13 }
   0x9   :  { %p2626_p3 = scmp.ne.s32.totalorder %s18_s13, %s2625_s21  ;;  %p2631_p5 = scmp.lt.s32.totalorder %s2625_s21, %s2625_s21 }
   0xb   :  { %p2632_p6 = por %p2631_p5, %p2630_p4 }
   0xd   :  { %p2633_p7 = pnand %p2632_p6, %p2626_p3 }
   0xf   :  { %2636 = shalt.err (!%p2633_p7)
}
  0x10   :  { %s2664_s22 = smov 128   ;;  %s2665_s23 = smov 8  }
  0x11   :  { %23 = dma.hbm_to_vmem [thread:$0]  %s3588_s1, 16384, %s18_s13, [#allocation3], %s2664_s22, %s2664_s22, %s2665_s23  }
  0x12   :  { %s2666_s26 = smov [#allocation4]   ;;  %s2637_s30 = scalar_lea.hbm %s3589_s2, 32 }
  0x13   :  { %s30_s27 = sshll.u32 %s2666_s26, 4  ;;  %p2638_p8 = scmp.ne.s32.totalorder %s3589_s2, %s2637_s30  ;;  %s31_s27 = int_to_ptr.vmem [resolvable:$true] %s30_s27 }
  0x14   :  { %p2641_p9 = scmp.lt.u32.totalorder %s2637_s30, %s3589_s2 }
  0x16   :  { %p2643_p10 = pnand %p2641_p9, %p2638_p8 }
  0x18   :  { %2646 = shalt.err (!%p2643_p10)
}
  0x19   :  { %s2647_s8 = scalar_lea.vmem %s31_s27, 32  ;;  %p2652_p12 = scmp.lt.s32.totalorder %s31_s27, %s31_s27 }
  0x1a   :  { %p2648_p11 = scmp.ne.s32.totalorder %s31_s27, %s2647_s8  ;;  %p2653_p13 = scmp.lt.s32.totalorder %s2647_s8, %s2647_s8 }
  0x1c   :  { %p2654_p0 = por %p2653_p13, %p2652_p12 }
  0x1e   :  { %p2655_p1 = pnand %p2654_p0, %p2648_p11 }
  0x20   :  { %2658 = shalt.err (!%p2655_p1)
}
  0x21   :  { %33 = dma.hbm_to_vmem [thread:$0]  %s3589_s2, 32, %s31_s27, [#allocation5]  }
  0x22   :  { %2659 = dma.done.wait [#allocation3], 16384  }
  0x23   :  { %2660 = vsyncadd [#allocation3], 4294950912 }
  0x24   :  { %2661 = dma.done.wait [#allocation5], 32  }
  0x25   :  { %2662 = vsyncadd [#allocation5], 4294967264  ;;  %v2381_v0 = vld [vmem:[#allocation2 + $0x4] ss:$8 sps:$4 sm:$0xff]   ;;  %v2385_v2 = vld [vmem:[#allocation2] ss:$8 sps:$4 sm:$0xff]  }
  0x26   :  { %v2383_v1 = vld [vmem:[#allocation2 + $0x104] ss:$8 sps:$4 sm:$0xff]   ;;  %400 = vmatprep.subr.bf16.mxu0 %v2381_v0  ;;  %v2386_v3 = vld [vmem:[#allocation2 + $0x100] ss:$8 sps:$4 sm:$0xff]   ;;  %v2387_v4 = vld [vmem:[#allocation2 + $0x14] ss:$8 sps:$4 sm:$0xff]  }
  0x27   :  { %766 = vmatprep.subr.bf16.mxu1 %v2383_v1  ;;  %401 = vmatpush1.bf16.msra.mxu0 %v2385_v2  ;;  %v2389_v5 = vld [vmem:[#allocation2 + $0x114] ss:$8 sps:$4 sm:$0xff]   ;;  %v2391_v6 = vld [vmem:[#allocation2 + $0x10] ss:$8 sps:$4 sm:$0xff]   ;;  %v2393_v8 = vld [vmem:[#allocation2 + $0x24] ss:$8 sps:$4 sm:$0xff]  }
  0x28   :  { %767 = vmatpush1.bf16.msra.mxu1 %v2386_v3  ;;  %402 = vmatprep.subr.bf16.mxu0 %v2387_v4  ;;  %v2392_v7 = vld [vmem:[#allocation2 + $0x110] ss:$8 sps:$4 sm:$0xff]   ;;  %v2395_v9 = vld [vmem:[#allocation2 + $0x124] ss:$8 sps:$4 sm:$0xff]   ;;  %v2397_v10 = vld [vmem:[#allocation2 + $0x20] ss:$8 sps:$4 sm:$0xff]  }
  0x29   :  { %768 = vmatprep.subr.bf16.mxu1 %v2389_v5  ;;  %v2398_v11 = vld [vmem:[#allocation2 + $0x120] ss:$8 sps:$4 sm:$0xff]   ;;  %v2399_v12 = vld [vmem:[#allocation2 + $0x34] ss:$8 sps:$4 sm:$0xff]   ;;  %v2403_v14 = vld [vmem:[#allocation2 + $0x30] ss:$8 sps:$4 sm:$0xff]  }
  0x2a   :  { %v2401_v13 = vld [vmem:[#allocation2 + $0x134] ss:$8 sps:$4 sm:$0xff]   ;;  %v2404_v15 = vld [vmem:[#allocation2 + $0x130] ss:$8 sps:$4 sm:$0xff]   ;;  %v2405_v16 = vld [vmem:[#allocation2 + $0x44] ss:$8 sps:$4 sm:$0xff]  }
  0x2b   :  { %403 = vmatpush1.bf16.msra.mxu0 %v2391_v6  ;;  %v2407_v17 = vld [vmem:[#allocation2 + $0x144] ss:$8 sps:$4 sm:$0xff]   ;;  %v2409_v18 = vld [vmem:[#allocation2 + $0x40] ss:$8 sps:$4 sm:$0xff]   ;;  %v2411_v20 = vld [vmem:[#allocation2 + $0x54] ss:$8 sps:$4 sm:$0xff]  }
  0x2c   :  { %769 = vmatpush1.bf16.msra.mxu1 %v2392_v7  ;;  %404 = vmatprep.subr.bf16.mxu0 %v2393_v8  ;;  %v2410_v19 = vld [vmem:[#allocation2 + $0x140] ss:$8 sps:$4 sm:$0xff]   ;;  %v2413_v21 = vld [vmem:[#allocation2 + $0x154] ss:$8 sps:$4 sm:$0xff]   ;;  %v2415_v22 = vld [vmem:[#allocation2 + $0x50] ss:$8 sps:$4 sm:$0xff]  }
  0x2d   :  { %770 = vmatprep.subr.bf16.mxu1 %v2395_v9  ;;  %v2416_v23 = vld [vmem:[#allocation2 + $0x150] ss:$8 sps:$4 sm:$0xff]   ;;  %v2417_v24 = vld [vmem:[#allocation2 + $0x64] ss:$8 sps:$4 sm:$0xff]   ;;  %v2421_v26 = vld [vmem:[#allocation2 + $0x60] ss:$8 sps:$4 sm:$0xff]  }
  0x2e   :  { %v2419_v25 = vld [vmem:[#allocation2 + $0x164] ss:$8 sps:$4 sm:$0xff]   ;;  %v2422_v27 = vld [vmem:[#allocation2 + $0x160] ss:$8 sps:$4 sm:$0xff]   ;;  %v2423_v28 = vld [vmem:[#allocation2 + $0x74] ss:$8 sps:$4 sm:$0xff]  }
  0x2f   :  { %405 = vmatpush1.bf16.msra.mxu0 %v2397_v10  ;;  %v2425_v29 = vld [vmem:[#allocation2 + $0x174] ss:$8 sps:$4 sm:$0xff]   ;;  %v2427_v30 = vld [vmem:[#allocation2 + $0x70] ss:$8 sps:$4 sm:$0xff]   ;;  %v2429_v32 = vld [vmem:[#allocation2 + $0x84] ss:$8 sps:$4 sm:$0xff]  }
  0x30   :  { %771 = vmatpush1.bf16.msra.mxu1 %v2398_v11  ;;  %406 = vmatprep.subr.bf16.mxu0 %v2399_v12  ;;  %v2428_v31 = vld [vmem:[#allocation2 + $0x170] ss:$8 sps:$4 sm:$0xff]   ;;  %v2431_v33 = vld [vmem:[#allocation2 + $0x184] ss:$8 sps:$4 sm:$0xff]   ;;  %v2433_v34 = vld [vmem:[#allocation2 + $0x80] ss:$8 sps:$4 sm:$0xff]  }
  0x31   :  { %772 = vmatprep.subr.bf16.mxu1 %v2401_v13  ;;  %v2434_v35 = vld [vmem:[#allocation2 + $0x180] ss:$8 sps:$4 sm:$0xff]   ;;  %v2435_v36 = vld [vmem:[#allocation2 + $0x94] ss:$8 sps:$4 sm:$0xff]   ;;  %v2439_v38 = vld [vmem:[#allocation2 + $0x90] ss:$8 sps:$4 sm:$0xff]  }
  0x32   :  { %v2437_v37 = vld [vmem:[#allocation2 + $0x194] ss:$8 sps:$4 sm:$0xff]   ;;  %v2440_v39 = vld [vmem:[#allocation2 + $0x190] ss:$8 sps:$4 sm:$0xff]   ;;  %v2441_v40 = vld [vmem:[#allocation2 + $0xa4] ss:$8 sps:$4 sm:$0xff]  }
  0x33   :  { %407 = vmatpush1.bf16.msra.mxu0 %v2403_v14  ;;  %v2443_v41 = vld [vmem:[#allocation2 + $0x1a4] ss:$8 sps:$4 sm:$0xff]   ;;  %v2445_v42 = vld [vmem:[#allocation2 + $0xa0] ss:$8 sps:$4 sm:$0xff]   ;;  %v2447_v44 = vld [vmem:[#allocation2 + $0xb4] ss:$8 sps:$4 sm:$0xff]  }
  0x34   :  { %773 = vmatpush1.bf16.msra.mxu1 %v2404_v15  ;;  %408 = vmatprep.subr.bf16.mxu0 %v2405_v16  ;;  %v2446_v43 = vld [vmem:[#allocation2 + $0x1a0] ss:$8 sps:$4 sm:$0xff]   ;;  %v2449_v45 = vld [vmem:[#allocation2 + $0x1b4] ss:$8 sps:$4 sm:$0xff]   ;;  %v2451_v46 = vld [vmem:[#allocation2 + $0xb0] ss:$8 sps:$4 sm:$0xff]  }
  0x35   :  { %774 = vmatprep.subr.bf16.mxu1 %v2407_v17  ;;  %v2452_v47 = vld [vmem:[#allocation2 + $0x1b0] ss:$8 sps:$4 sm:$0xff]   ;;  %v2714_v48 = vld [vmem:[%s3587_s0 + $0x4] ss:$8 sps:$4 sm:$0xff]   ;;  %v2457_v51 = vld [vmem:[#allocation2 + $0xc0] ss:$8 sps:$4 sm:$0xff]  }
  0x36   :  { %v2453_v49 = vld [vmem:[#allocation2 + $0xc4] ss:$8 sps:$4 sm:$0xff]   ;;  %432 = vmatprep.mubr.bf16.mxu0 %v2714_v48  ;;  %798 = vmatprep.mubr.bf16.mxu1 %v2714_v48  ;;  %v2458_v52 = vld [vmem:[#allocation2 + $0x1c0] ss:$8 sps:$4 sm:$0xff]   ;;  %v2459_v53 = vld [vmem:[#allocation2 + $0xd4] ss:$8 sps:$4 sm:$0xff]  }
  0x37   :  { %409 = vmatpush1.bf16.msra.mxu0 %v2409_v18  ;;  %v2455_v50 = vld [vmem:[#allocation2 + $0x1c4] ss:$8 sps:$4 sm:$0xff]   ;;  %v2461_v54 = vld [vmem:[#allocation2 + $0x1d4] ss:$8 sps:$4 sm:$0xff]   ;;  %v2463_v55 = vld [vmem:[#allocation2 + $0xd0] ss:$8 sps:$4 sm:$0xff]  }
  0x38   :  { %775 = vmatpush1.bf16.msra.mxu1 %v2410_v19  ;;  %410 = vmatprep.subr.bf16.mxu0 %v2411_v20  ;;  %v2464_v56 = vld [vmem:[#allocation2 + $0x1d0] ss:$8 sps:$4 sm:$0xff]   ;;  %v2465_v57 = vld [vmem:[#allocation2 + $0xe4] ss:$8 sps:$4 sm:$0xff]   ;;  %v2469_v59 = vld [vmem:[#allocation2 + $0xe0] ss:$8 sps:$4 sm:$0xff]  }
  0x39   :  { %776 = vmatprep.subr.bf16.mxu1 %v2413_v21  ;;  %v2467_v58 = vld [vmem:[#allocation2 + $0x1e4] ss:$8 sps:$4 sm:$0xff]   ;;  %v2470_v60 = vld [vmem:[#allocation2 + $0x1e0] ss:$8 sps:$4 sm:$0xff]   ;;  %v2471_v61 = vld [vmem:[#allocation2 + $0xf4] ss:$8 sps:$4 sm:$0xff]  }
  0x3a   :  { %v2473_v62 = vld [vmem:[#allocation2 + $0x1f4] ss:$8 sps:$4 sm:$0xff]   ;;  %v2475_v63 = vld [vmem:[#allocation2 + $0xf0] ss:$8 sps:$4 sm:$0xff]   ;;  %v2482_v1 = vld [vmem:[#allocation2 + $0x204] ss:$8 sps:$4 sm:$0xff]  }
  0x3b   :  { %411 = vmatpush1.bf16.msra.mxu0 %v2415_v22  ;;  %v2476_v0 = vld [vmem:[#allocation2 + $0x1f0] ss:$8 sps:$4 sm:$0xff]   ;;  %v2485_v2 = vld [vmem:[#allocation2 + $0x304] ss:$8 sps:$4 sm:$0xff]   ;;  %v2721_v3 = vld [vmem:[%s3587_s0] ss:$8 sps:$4 sm:$0xff]  }
  0x3c   :  { %777 = vmatpush1.bf16.msra.mxu1 %v2416_v23  ;;  %412 = vmatprep.subr.bf16.mxu0 %v2417_v24  ;;  %v2480_v4 = vld [vmem:[#allocation2 + $0x200] ss:$8 sps:$4 sm:$0xff]   ;;  %v2726_v6 = vld [vmem:[%s3587_s0 + $0x14] ss:$8 sps:$4 sm:$0xff]   ;;  %v2488_v9 = vld [vmem:[#allocation2 + $0x210] ss:$8 sps:$4 sm:$0xff]  }
  0x3d   :  { %778 = vmatprep.subr.bf16.mxu1 %v2419_v25  ;;  %v2483_v5 = vld [vmem:[#allocation2 + $0x300] ss:$8 sps:$4 sm:$0xff]   ;;  %v2490_v7 = vld [vmem:[#allocation2 + $0x214] ss:$8 sps:$4 sm:$0xff]   ;;  %v2492_v10 = vld [vmem:[#allocation2 + $0x310] ss:$8 sps:$4 sm:$0xff]  }
  0x3e   :  { %v2494_v8 = vld [vmem:[#allocation2 + $0x314] ss:$8 sps:$4 sm:$0xff]   ;;  %v2497_v11 = vld [vmem:[#allocation2 + $0x224] ss:$8 sps:$4 sm:$0xff]   ;;  %v2735_v13 = vld [vmem:[%s3587_s0 + $0x10] ss:$8 sps:$4 sm:$0xff]  }
  0x3f   :  { %413 = vmatpush1.bf16.msra.mxu0 %v2421_v26  ;;  %v2503_v12 = vld [vmem:[#allocation2 + $0x324] ss:$8 sps:$4 sm:$0xff]   ;;  %v2495_v14 = vld [vmem:[#allocation2 + $0x220] ss:$8 sps:$4 sm:$0xff]   ;;  %v2506_v17 = vld [vmem:[#allocation2 + $0x234] ss:$8 sps:$4 sm:$0xff]  }
  0x40   :  { %779 = vmatpush1.bf16.msra.mxu1 %v2422_v27  ;;  %414 = vmatprep.subr.bf16.mxu0 %v2423_v28  ;;  %v2740_v15 = vld [vmem:[%s3587_s0 + $0x24] ss:$8 sps:$4 sm:$0xff]   ;;  %v2501_v16 = vld [vmem:[#allocation2 + $0x320] ss:$8 sps:$4 sm:$0xff]   ;;  %v2511_v18 = vld [vmem:[#allocation2 + $0x334] ss:$8 sps:$4 sm:$0xff]  }
  0x41   :  { %780 = vmatprep.subr.bf16.mxu1 %v2425_v29  ;;  %v2504_v19 = vld [vmem:[#allocation2 + $0x230] ss:$8 sps:$4 sm:$0xff]   ;;  %v2515_v21 = vld [vmem:[#allocation2 + $0x244] ss:$8 sps:$4 sm:$0xff]   ;;  %v2749_v23 = vld [vmem:[%s3587_s0 + $0x20] ss:$8 sps:$4 sm:$0xff]  }
  0x42   :  { %v2509_v20 = vld [vmem:[#allocation2 + $0x330] ss:$8 sps:$4 sm:$0xff]   ;;  %v2518_v22 = vld [vmem:[#allocation2 + $0x344] ss:$8 sps:$4 sm:$0xff]   ;;  %v2754_v24 = vld [vmem:[%s3587_s0 + $0x34] ss:$8 sps:$4 sm:$0xff]  }
  0x43   :  { %415 = vmatpush1.bf16.msra.mxu0 %v2427_v30  ;;  %v2513_v25 = vld [vmem:[#allocation2 + $0x240] ss:$8 sps:$4 sm:$0xff]   ;;  %v2524_v27 = vld [vmem:[#allocation2 + $0x254] ss:$8 sps:$4 sm:$0xff]   ;;  %v2522_v29 = vld [vmem:[#allocation2 + $0x250] ss:$8 sps:$4 sm:$0xff]  }
  0x44   :  { %781 = vmatpush1.bf16.msra.mxu1 %v2428_v31  ;;  %416 = vmatprep.subr.bf16.mxu0 %v2429_v32  ;;  %v2516_v26 = vld [vmem:[#allocation2 + $0x340] ss:$8 sps:$4 sm:$0xff]   ;;  %v2527_v28 = vld [vmem:[#allocation2 + $0x354] ss:$8 sps:$4 sm:$0xff]   ;;  %v2525_v30 = vld [vmem:[#allocation2 + $0x350] ss:$8 sps:$4 sm:$0xff]  }
  0x45   :  { %782 = vmatprep.subr.bf16.mxu1 %v2431_v33  ;;  %v2533_v31 = vld [vmem:[#allocation2 + $0x264] ss:$8 sps:$4 sm:$0xff]   ;;  %v2763_v33 = vld [vmem:[%s3587_s0 + $0x30] ss:$8 sps:$4 sm:$0xff]  }
  0x46   :  { %v2536_v32 = vld [vmem:[#allocation2 + $0x364] ss:$8 sps:$4 sm:$0xff]  }
  0x47   :  { %417 = vmatpush1.bf16.msra.mxu0 %v2433_v34  ;;  %v2768_v34 = vld [vmem:[%s3587_s0 + $0x44] ss:$8 sps:$4 sm:$0xff]  }
  0x48   :  { %783 = vmatpush1.bf16.msra.mxu1 %v2434_v35  ;;  %418 = vmatprep.subr.bf16.mxu0 %v2435_v36  ;;  %v2531_v35 = vld [vmem:[#allocation2 + $0x260] ss:$8 sps:$4 sm:$0xff]  }
  0x49   :  { %784 = vmatprep.subr.bf16.mxu1 %v2437_v37  ;;  %v2534_v36 = vld [vmem:[#allocation2 + $0x360] ss:$8 sps:$4 sm:$0xff]   ;;  %v2542_v37 = vld [vmem:[#allocation2 + $0x274] ss:$8 sps:$4 sm:$0xff]  }
  0x4b   :  { %419 = vmatpush1.bf16.msra.mxu0 %v2439_v38  ;;  %v2545_v38 = vld [vmem:[#allocation2 + $0x374] ss:$8 sps:$4 sm:$0xff]  }
  0x4c   :  { %785 = vmatpush1.bf16.msra.mxu1 %v2440_v39  ;;  %420 = vmatprep.subr.bf16.mxu0 %v2441_v40  ;;  %v2540_v39 = vld [vmem:[#allocation2 + $0x270] ss:$8 sps:$4 sm:$0xff]  }
  0x4d   :  { %786 = vmatprep.subr.bf16.mxu1 %v2443_v41  ;;  %v2543_v40 = vld [vmem:[#allocation2 + $0x370] ss:$8 sps:$4 sm:$0xff]   ;;  %v2551_v41 = vld [vmem:[#allocation2 + $0x284] ss:$8 sps:$4 sm:$0xff]  }
  0x4f   :  { %421 = vmatpush1.bf16.msra.mxu0 %v2445_v42  ;;  %v2554_v42 = vld [vmem:[#allocation2 + $0x384] ss:$8 sps:$4 sm:$0xff]  }
  0x50   :  { %787 = vmatpush1.bf16.msra.mxu1 %v2446_v43  ;;  %422 = vmatprep.subr.bf16.mxu0 %v2447_v44  ;;  %v2777_v43 = vld [vmem:[%s3587_s0 + $0x40] ss:$8 sps:$4 sm:$0xff]   ;;  %v2782_v44 = vld [vmem:[%s3587_s0 + $0x54] ss:$8 sps:$4 sm:$0xff]  }
  0x51   :  { %788 = vmatprep.subr.bf16.mxu1 %v2449_v45  ;;  %v2549_v45 = vld [vmem:[#allocation2 + $0x280] ss:$8 sps:$4 sm:$0xff]  }
  0x53   :  { %423 = vmatpush1.bf16.msra.mxu0 %v2451_v46  ;;  %v2552_v46 = vld [vmem:[#allocation2 + $0x380] ss:$8 sps:$4 sm:$0xff]  }
  0x54   :  { %789 = vmatpush1.bf16.msra.mxu1 %v2452_v47  ;;  %424 = vmatprep.subr.bf16.mxu0 %v2453_v49  ;;  %v2559_v47 = vld [vmem:[#allocation2 + $0x294] ss:$8 sps:$4 sm:$0xff]  }
  0x55   :  { %790 = vmatprep.subr.bf16.mxu1 %v2455_v50  ;;  %v2563_v49 = vld [vmem:[#allocation2 + $0x394] ss:$8 sps:$4 sm:$0xff]   ;;  %v2557_v50 = vld [vmem:[#allocation2 + $0x290] ss:$8 sps:$4 sm:$0xff]  }
  0x57   :  { %425 = vmatpush1.bf16.msra.mxu0 %v2457_v51  ;;  %v2561_v51 = vld [vmem:[#allocation2 + $0x390] ss:$8 sps:$4 sm:$0xff]  }
  0x58   :  { %791 = vmatpush1.bf16.msra.mxu1 %v2458_v52  ;;  %426 = vmatprep.subr.bf16.mxu0 %v2459_v53  ;;  %v2566_v52 = vld [vmem:[#allocation2 + $0x2a4] ss:$8 sps:$4 sm:$0xff]  }
  0x59   :  { %792 = vmatprep.subr.bf16.mxu1 %v2461_v54  ;;  %v2572_v53 = vld [vmem:[#allocation2 + $0x3a4] ss:$8 sps:$4 sm:$0xff]   ;;  %v2791_v54 = vld [vmem:[%s3587_s0 + $0x50] ss:$8 sps:$4 sm:$0xff]  }
  0x5b   :  { %427 = vmatpush1.bf16.msra.mxu0 %v2463_v55  ;;  %v2796_v55 = vld [vmem:[%s3587_s0 + $0x64] ss:$8 sps:$4 sm:$0xff]  }
  0x5c   :  { %793 = vmatpush1.bf16.msra.mxu1 %v2464_v56  ;;  %428 = vmatprep.subr.bf16.mxu0 %v2465_v57  ;;  %v2564_v56 = vld [vmem:[#allocation2 + $0x2a0] ss:$8 sps:$4 sm:$0xff]  }
  0x5d   :  { %794 = vmatprep.subr.bf16.mxu1 %v2467_v58  ;;  %v2570_v57 = vld [vmem:[#allocation2 + $0x3a0] ss:$8 sps:$4 sm:$0xff]   ;;  %v2575_v58 = vld [vmem:[#allocation2 + $0x2b4] ss:$8 sps:$4 sm:$0xff]  }
  0x5f   :  { %429 = vmatpush1.bf16.msra.mxu0 %v2469_v59  ;;  %v2580_v59 = vld [vmem:[#allocation2 + $0x3b4] ss:$8 sps:$4 sm:$0xff]  }
  0x60   :  { %795 = vmatpush1.bf16.msra.mxu1 %v2470_v60  ;;  %430 = vmatprep.subr.bf16.mxu0 %v2471_v61  ;;  %v2573_v60 = vld [vmem:[#allocation2 + $0x2b0] ss:$8 sps:$4 sm:$0xff]  }
  0x61   :  { %796 = vmatprep.subr.bf16.mxu1 %v2473_v62  ;;  %v2578_v61 = vld [vmem:[#allocation2 + $0x3b0] ss:$8 sps:$4 sm:$0xff]   ;;  %v2584_v62 = vld [vmem:[#allocation2 + $0x2c4] ss:$8 sps:$4 sm:$0xff]  }
  0x63   :  { %431 = vmatpush1.bf16.msra.mxu0 %v2475_v63  ;;  %v2587_v63 = vld [vmem:[#allocation2 + $0x3c4] ss:$8 sps:$4 sm:$0xff]  }
  0x64   :  { %797 = vmatpush1.bf16.msra.mxu1 %v2476_v0  ;;  %1188 = vmatprep.subr.bf16.mxu0 %v2482_v1  ;;  %v2805_v0 = vld [vmem:[%s3587_s0 + $0x60] ss:$8 sps:$4 sm:$0xff]   ;;  %v2810_v1 = vld [vmem:[%s3587_s0 + $0x74] ss:$8 sps:$4 sm:$0xff]  }
  0x65   :  { %1610 = vmatprep.subr.bf16.mxu1 %v2485_v2  ;;  %v2582_v2 = vld [vmem:[#allocation2 + $0x2c0] ss:$8 sps:$4 sm:$0xff]  }
  0x66   :  { %433 = vmatmul.mubr.bf16.vlgmr.msra.gmra.mrb[0].mxu0 %v2721_v3 }
  0x67   :  { %799 = vmatmul.mubr.bf16.vlgmr.msra.gmra.mrb[0].mxu1 %v2721_v3  ;;  %1189 = vmatpush1.bf16.msra.mxu0 %v2480_v4  ;;  %v2585_v4 = vld [vmem:[#allocation2 + $0x3c0] ss:$8 sps:$4 sm:$0xff]  }
  0x68   :  { %1611 = vmatpush1.bf16.msra.mxu1 %v2483_v5  ;;  %442 = vmatprep.mubr.bf16.mxu0 %v2726_v6  ;;  %v2593_v5 = vld [vmem:[#allocation2 + $0x2d4] ss:$8 sps:$4 sm:$0xff]  }
  0x69   :  { %808 = vmatprep.mubr.bf16.mxu1 %v2726_v6  ;;  %1190 = vmatprep.subr.bf16.mxu0 %v2490_v7  ;;  %v2596_v7 = vld [vmem:[#allocation2 + $0x3d4] ss:$8 sps:$4 sm:$0xff]  }
  0x6a   :  { %1612 = vmatprep.subr.bf16.mxu1 %v2494_v8  ;;  %v2591_v8 = vld [vmem:[#allocation2 + $0x2d0] ss:$8 sps:$4 sm:$0xff]  }
  0x6b   :  { %1191 = vmatpush1.bf16.msra.mxu0 %v2488_v9  ;;  %v2594_v9 = vld [vmem:[#allocation2 + $0x3d0] ss:$8 sps:$4 sm:$0xff]  }
  0x6c   :  { %1613 = vmatpush1.bf16.msra.mxu1 %v2492_v10  ;;  %1192 = vmatprep.subr.bf16.mxu0 %v2497_v11  ;;  %v2602_v10 = vld [vmem:[#allocation2 + $0x2e4] ss:$8 sps:$4 sm:$0xff]  }
  0x6d   :  { %1614 = vmatprep.subr.bf16.mxu1 %v2503_v12  ;;  %v2605_v11 = vld [vmem:[#allocation2 + $0x3e4] ss:$8 sps:$4 sm:$0xff]   ;;  %v2819_v12 = vld [vmem:[%s3587_s0 + $0x70] ss:$8 sps:$4 sm:$0xff]  }
  0x6e   :  { %443 = vmatmul.mubr.bf16.gmra.mrb[4].mxu0 %v2735_v13 }
  0x6f   :  { %809 = vmatmul.mubr.bf16.gmra.mrb[4].mxu1 %v2735_v13  ;;  %452 = vmatprep.mubr.bf16.mxu0 %v2740_v15 }
  0x70   :  { %818 = vmatprep.mubr.bf16.mxu1 %v2740_v15  ;;  %1193 = vmatpush1.bf16.msra.mxu0 %v2495_v14  ;;  %v2824_v14 = vld [vmem:[%s3587_s0 + $0x84] ss:$8 sps:$4 sm:$0xff]  }
  0x71   :  { %1615 = vmatpush1.bf16.msra.mxu1 %v2501_v16  ;;  %1194 = vmatprep.subr.bf16.mxu0 %v2506_v17  ;;  %v2600_v16 = vld [vmem:[#allocation2 + $0x2e0] ss:$8 sps:$4 sm:$0xff]  }
  0x72   :  { %1616 = vmatprep.subr.bf16.mxu1 %v2511_v18  ;;  %v2603_v17 = vld [vmem:[#allocation2 + $0x3e0] ss:$8 sps:$4 sm:$0xff]   ;;  %v2611_v18 = vld [vmem:[#allocation2 + $0x2f4] ss:$8 sps:$4 sm:$0xff]  }
  0x74   :  { %1195 = vmatpush1.bf16.msra.mxu0 %v2504_v19  ;;  %v2614_v19 = vld [vmem:[#allocation2 + $0x3f4] ss:$8 sps:$4 sm:$0xff]  }
  0x75   :  { %1617 = vmatpush1.bf16.msra.mxu1 %v2509_v20  ;;  %1196 = vmatprep.subr.bf16.mxu0 %v2515_v21  ;;  %v2609_v20 = vld [vmem:[#allocation2 + $0x2f0] ss:$8 sps:$4 sm:$0xff]  }
  0x76   :  { %1618 = vmatprep.subr.bf16.mxu1 %v2518_v22  ;;  %453 = vmatmul.mubr.bf16.gmra.mrb[8].mxu0 %v2749_v23  ;;  %v2612_v21 = vld [vmem:[#allocation2 + $0x3f0] ss:$8 sps:$4 sm:$0xff]   ;;  %v2833_v22 = vld [vmem:[%s3587_s0 + $0x80] ss:$8 sps:$4 sm:$0xff]  }
  0x77   :  { %819 = vmatmul.mubr.bf16.gmra.mrb[8].mxu1 %v2749_v23  ;;  %462 = vmatprep.mubr.bf16.mxu0 %v2754_v24 }
  0x78   :  { %828 = vmatprep.mubr.bf16.mxu1 %v2754_v24  ;;  %1197 = vmatpush1.bf16.msra.mxu0 %v2513_v25  ;;  %v2838_v25 = vld [vmem:[%s3587_s0 + $0x94] ss:$8 sps:$4 sm:$0xff]  }
  0x79   :  { %1619 = vmatpush1.bf16.msra.mxu1 %v2516_v26  ;;  %1198 = vmatprep.subr.bf16.mxu0 %v2524_v27  ;;  %v2847_v26 = vld [vmem:[%s3587_s0 + $0x90] ss:$8 sps:$4 sm:$0xff]   ;;  %v2852_v27 = vld [vmem:[%s3587_s0 + $0xa4] ss:$8 sps:$4 sm:$0xff]  }
  0x7a   :  { %1620 = vmatprep.subr.bf16.mxu1 %v2527_v28  ;;  %v2861_v28 = vld [vmem:[%s3587_s0 + $0xa0] ss:$8 sps:$4 sm:$0xff]  }
  0x7c   :  { %1199 = vmatpush1.bf16.msra.mxu0 %v2522_v29  ;;  %v2866_v29 = vld [vmem:[%s3587_s0 + $0xb4] ss:$8 sps:$4 sm:$0xff]  }
  0x7d   :  { %1621 = vmatpush1.bf16.msra.mxu1 %v2525_v30  ;;  %1200 = vmatprep.subr.bf16.mxu0 %v2533_v31  ;;  %v2590_v30 = vld [vmem:[%s3587_s0 + $0xb0] ss:$8 sps:$4 sm:$0xff]   ;;  %v2597_v31 = vld [vmem:[%s3587_s0 + $0xc4] ss:$8 sps:$4 sm:$0xff]  }
  0x7e   :  { %1622 = vmatprep.subr.bf16.mxu1 %v2536_v32  ;;  %463 = vmatmul.mubr.bf16.gmra.mrb[12].mxu0 %v2763_v33  ;;  %v2599_v32 = vld [vmem:[%s3587_s0 + $0xc0] ss:$8 sps:$4 sm:$0xff]  }
  0x7f   :  { %829 = vmatmul.mubr.bf16.gmra.mrb[12].mxu1 %v2763_v33  ;;  %472 = vmatprep.mubr.bf16.mxu0 %v2768_v34 }
  0x80   :  { %838 = vmatprep.mubr.bf16.mxu1 %v2768_v34  ;;  %1201 = vmatpush1.bf16.msra.mxu0 %v2531_v35  ;;  %v2606_v35 = vld [vmem:[%s3587_s0 + $0xd4] ss:$8 sps:$4 sm:$0xff]  }
  0x81   :  { %1623 = vmatpush1.bf16.msra.mxu1 %v2534_v36  ;;  %1202 = vmatprep.subr.bf16.mxu0 %v2542_v37  ;;  %v2887_v36 = vld [vmem:[%s3587_s0 + $0xd0] ss:$8 sps:$4 sm:$0xff]  }
  0x82   :  { %1624 = vmatprep.subr.bf16.mxu1 %v2545_v38 }
  0x84   :  { %1203 = vmatpush1.bf16.msra.mxu0 %v2540_v39 }
  0x85   :  { %1625 = vmatpush1.bf16.msra.mxu1 %v2543_v40  ;;  %1204 = vmatprep.subr.bf16.mxu0 %v2551_v41 }
  0x86   :  { %1626 = vmatprep.subr.bf16.mxu1 %v2554_v42  ;;  %473 = vmatmul.mubr.bf16.gmra.mrb[16].mxu0 %v2777_v43 }
  0x87   :  { %839 = vmatmul.mubr.bf16.gmra.mrb[16].mxu1 %v2777_v43  ;;  %482 = vmatprep.mubr.bf16.mxu0 %v2782_v44 }
  0x88   :  { %848 = vmatprep.mubr.bf16.mxu1 %v2782_v44  ;;  %1205 = vmatpush1.bf16.msra.mxu0 %v2549_v45 }
  0x89   :  { %1627 = vmatpush1.bf16.msra.mxu1 %v2552_v46  ;;  %1206 = vmatprep.subr.bf16.mxu0 %v2559_v47 }
  0x8a   :  { %1628 = vmatprep.subr.bf16.mxu1 %v2563_v49 }
  0x8c   :  { %1207 = vmatpush1.bf16.msra.mxu0 %v2557_v50 }
  0x8d   :  { %1629 = vmatpush1.bf16.msra.mxu1 %v2561_v51  ;;  %1208 = vmatprep.subr.bf16.mxu0 %v2566_v52 }
  0x8e   :  { %1630 = vmatprep.subr.bf16.mxu1 %v2572_v53  ;;  %483 = vmatmul.mubr.bf16.gmra.mrb[20].mxu0 %v2791_v54 }
  0x8f   :  { %849 = vmatmul.mubr.bf16.gmra.mrb[20].mxu1 %v2791_v54  ;;  %492 = vmatprep.mubr.bf16.mxu0 %v2796_v55 }
  0x90   :  { %858 = vmatprep.mubr.bf16.mxu1 %v2796_v55  ;;  %1209 = vmatpush1.bf16.msra.mxu0 %v2564_v56 }
  0x91   :  { %1631 = vmatpush1.bf16.msra.mxu1 %v2570_v57  ;;  %1210 = vmatprep.subr.bf16.mxu0 %v2575_v58 }
  0x92   :  { %1632 = vmatprep.subr.bf16.mxu1 %v2580_v59 }
  0x94   :  { %1211 = vmatpush1.bf16.msra.mxu0 %v2573_v60 }
  0x95   :  { %1633 = vmatpush1.bf16.msra.mxu1 %v2578_v61  ;;  %1212 = vmatprep.subr.bf16.mxu0 %v2584_v62 }
  0x96   :  { %1634 = vmatprep.subr.bf16.mxu1 %v2587_v63  ;;  %493 = vmatmul.mubr.bf16.gmra.mrb[24].mxu0 %v2805_v0 }
  0x97   :  { %859 = vmatmul.mubr.bf16.gmra.mrb[24].mxu1 %v2805_v0  ;;  %502 = vmatprep.mubr.bf16.mxu0 %v2810_v1 }
  0x98   :  { %868 = vmatprep.mubr.bf16.mxu1 %v2810_v1  ;;  %1213 = vmatpush1.bf16.msra.mxu0 %v2582_v2 }
  0x99   :  { %1635 = vmatpush1.bf16.msra.mxu1 %v2585_v4  ;;  %1214 = vmatprep.subr.bf16.mxu0 %v2593_v5 }
  0x9a   :  { %1636 = vmatprep.subr.bf16.mxu1 %v2596_v7 }
  0x9c   :  { %1215 = vmatpush1.bf16.msra.mxu0 %v2591_v8 }
  0x9d   :  { %1637 = vmatpush1.bf16.msra.mxu1 %v2594_v9  ;;  %1216 = vmatprep.subr.bf16.mxu0 %v2602_v10 }
  0x9e   :  { %1638 = vmatprep.subr.bf16.mxu1 %v2605_v11  ;;  %503 = vmatmul.mubr.bf16.gmra.mrb[28].mxu0 %v2819_v12 }
  0x9f   :  { %869 = vmatmul.mubr.bf16.gmra.mrb[28].mxu1 %v2819_v12  ;;  %512 = vmatprep.mubr.bf16.mxu0 %v2824_v14 }
  0xa0   :  { %878 = vmatprep.mubr.bf16.mxu1 %v2824_v14  ;;  %1217 = vmatpush1.bf16.msra.mxu0 %v2600_v16 }
  0xa1   :  { %1639 = vmatpush1.bf16.msra.mxu1 %v2603_v17  ;;  %1218 = vmatprep.subr.bf16.mxu0 %v2611_v18 }
  0xa2   :  { %1640 = vmatprep.subr.bf16.mxu1 %v2614_v19 }
  0xa4   :  { %1219 = vmatpush1.bf16.msra.mxu0 %v2609_v20 }
  0xa5   :  { %1641 = vmatpush1.bf16.msra.mxu1 %v2612_v21 }
  0xa6   :  { %513 = vmatmul.mubr.bf16.gmra.mrb[32].mxu0 %v2833_v22 }
  0xa7   :  { %879 = vmatmul.mubr.bf16.gmra.mrb[32].mxu1 %v2833_v22  ;;  %522 = vmatprep.mubr.bf16.mxu0 %v2838_v25 }
  0xa8   :  { %888 = vmatprep.mubr.bf16.mxu1 %v2838_v25 }
  0xae   :  { %523 = vmatmul.mubr.bf16.gmra.mrb[36].mxu0 %v2847_v26 }
  0xaf   :  { %889 = vmatmul.mubr.bf16.gmra.mrb[36].mxu1 %v2847_v26  ;;  %532 = vmatprep.mubr.bf16.mxu0 %v2852_v27 }
  0xb0   :  { %898 = vmatprep.mubr.bf16.mxu1 %v2852_v27 }
  0xb6   :  { %533 = vmatmul.mubr.bf16.gmra.mrb[40].mxu0 %v2861_v28 }
  0xb7   :  { %899 = vmatmul.mubr.bf16.gmra.mrb[40].mxu1 %v2861_v28  ;;  %542 = vmatprep.mubr.bf16.mxu0 %v2866_v29 }
  0xb8   :  { %908 = vmatprep.mubr.bf16.mxu1 %v2866_v29 }
  0xbe   :  { %543 = vmatmul.mubr.bf16.gmra.mrb[44].mxu0 %v2590_v30 }
  0xbf   :  { %909 = vmatmul.mubr.bf16.gmra.mrb[44].mxu1 %v2590_v30  ;;  %552 = vmatprep.mubr.bf16.mxu0 %v2597_v31 }
  0xc0   :  { %918 = vmatprep.mubr.bf16.mxu1 %v2597_v31 }
  0xc6   :  { %553 = vmatmul.mubr.bf16.gmra.mrb[48].mxu0 %v2599_v32 }
  0xc7   :  { %919 = vmatmul.mubr.bf16.gmra.mrb[48].mxu1 %v2599_v32  ;;  %562 = vmatprep.mubr.bf16.mxu0 %v2606_v35 }
  0xc8   :  { %928 = vmatprep.mubr.bf16.mxu1 %v2606_v35 }
  0xce   :  { %563 = vmatmul.mubr.bf16.gmra.mrb[52].mxu0 %v2887_v36 }
  0xcf   :  { %929 = vmatmul.mubr.bf16.gmra.mrb[52].mxu1 %v2887_v36  ;;  %1220 = vmatprep.mubr.bf16.mxu0 %v2714_v48 }
  0xd0   :  { %1642 = vmatprep.mubr.bf16.mxu1 %v2714_v48 }
  0xd6   :  { %1221 = vmatmul.mubr.bf16.vlgmr.msra.gmra.mrb[56].mxu0 %v2721_v3 }
  0xd7   :  { %1643 = vmatmul.mubr.bf16.vlgmr.msra.gmra.mrb[56].mxu1 %v2721_v3  ;;  %1230 = vmatprep.mubr.bf16.mxu0 %v2726_v6 }
  0xd8   :  { %1652 = vmatprep.mubr.bf16.mxu1 %v2726_v6 }
  0xde   :  { %1231 = vmatmul.mubr.bf16.gmra.mrb[60].mxu0 %v2735_v13 }
  0xdf   :  { %1653 = vmatmul.mubr.bf16.gmra.mrb[60].mxu1 %v2735_v13  ;;  %1240 = vmatprep.mubr.bf16.mxu0 %v2740_v15 }
  0xe0   :  { %1662 = vmatprep.mubr.bf16.mxu1 %v2740_v15 }
  0xe6   :  { %1241 = vmatmul.mubr.bf16.gmra.mrb[64].mxu0 %v2749_v23 }
  0xe7   :  { %1663 = vmatmul.mubr.bf16.gmra.mrb[64].mxu1 %v2749_v23  ;;  %1250 = vmatprep.mubr.bf16.mxu0 %v2754_v24 }
  0xe8   :  { %1672 = vmatprep.mubr.bf16.mxu1 %v2754_v24 }
  0xee   :  { %1251 = vmatmul.mubr.bf16.gmra.mrb[68].mxu0 %v2763_v33 }
  0xef   :  { %1673 = vmatmul.mubr.bf16.gmra.mrb[68].mxu1 %v2763_v33  ;;  %1260 = vmatprep.mubr.bf16.mxu0 %v2768_v34 }
  0xf0   :  { %1682 = vmatprep.mubr.bf16.mxu1 %v2768_v34 }
  0xf6   :  { %1261 = vmatmul.mubr.bf16.gmra.mrb[72].mxu0 %v2777_v43 }
  0xf7   :  { %1683 = vmatmul.mubr.bf16.gmra.mrb[72].mxu1 %v2777_v43  ;;  %1270 = vmatprep.mubr.bf16.mxu0 %v2782_v44 }
  0xf8   :  { %1692 = vmatprep.mubr.bf16.mxu1 %v2782_v44 }
  0xfe   :  { %1271 = vmatmul.mubr.bf16.gmra.mrb[76].mxu0 %v2791_v54 }
  0xff   :  { %1693 = vmatmul.mubr.bf16.gmra.mrb[76].mxu1 %v2791_v54  ;;  %1280 = vmatprep.mubr.bf16.mxu0 %v2796_v55 }
 0x100   :  { %1702 = vmatprep.mubr.bf16.mxu1 %v2796_v55 }
 0x106   :  { %1281 = vmatmul.mubr.bf16.gmra.mrb[80].mxu0 %v2805_v0 }
 0x107   :  { %1703 = vmatmul.mubr.bf16.gmra.mrb[80].mxu1 %v2805_v0  ;;  %1290 = vmatprep.mubr.bf16.mxu0 %v2810_v1 }
 0x108   :  { %1712 = vmatprep.mubr.bf16.mxu1 %v2810_v1 }
 0x10e   :  { %1291 = vmatmul.mubr.bf16.gmra.mrb[84].mxu0 %v2819_v12 }
 0x10f   :  { %1713 = vmatmul.mubr.bf16.gmra.mrb[84].mxu1 %v2819_v12  ;;  %1300 = vmatprep.mubr.bf16.mxu0 %v2824_v14 }
 0x110   :  { %1722 = vmatprep.mubr.bf16.mxu1 %v2824_v14 }
 0x116   :  { %1301 = vmatmul.mubr.bf16.gmra.mrb[88].mxu0 %v2833_v22 }
 0x117   :  { %1723 = vmatmul.mubr.bf16.gmra.mrb[88].mxu1 %v2833_v22  ;;  %1310 = vmatprep.mubr.bf16.mxu0 %v2838_v25 }
 0x118   :  { %1732 = vmatprep.mubr.bf16.mxu1 %v2838_v25 }
 0x11e   :  { %1311 = vmatmul.mubr.bf16.gmra.mrb[92].mxu0 %v2847_v26 }
 0x11f   :  { %1733 = vmatmul.mubr.bf16.gmra.mrb[92].mxu1 %v2847_v26  ;;  %1320 = vmatprep.mubr.bf16.mxu0 %v2852_v27 }
 0x120   :  { %1742 = vmatprep.mubr.bf16.mxu1 %v2852_v27 }
 0x126   :  { %1321 = vmatmul.mubr.bf16.gmra.mrb[96].mxu0 %v2861_v28 }
 0x127   :  { %1743 = vmatmul.mubr.bf16.gmra.mrb[96].mxu1 %v2861_v28  ;;  %1330 = vmatprep.mubr.bf16.mxu0 %v2866_v29 }
 0x128   :  { %1752 = vmatprep.mubr.bf16.mxu1 %v2866_v29 }
 0x12e   :  { %1331 = vmatmul.mubr.bf16.gmra.mrb[100].mxu0 %v2590_v30 }
 0x12f   :  { %1753 = vmatmul.mubr.bf16.gmra.mrb[100].mxu1 %v2590_v30  ;;  %1340 = vmatprep.mubr.bf16.mxu0 %v2597_v31 }
 0x130   :  { %1762 = vmatprep.mubr.bf16.mxu1 %v2597_v31 }
 0x136   :  { %1341 = vmatmul.mubr.bf16.gmra.mrb[104].mxu0 %v2599_v32 }
 0x137   :  { %1763 = vmatmul.mubr.bf16.gmra.mrb[104].mxu1 %v2599_v32  ;;  %1350 = vmatprep.mubr.bf16.mxu0 %v2606_v35 }
 0x138   :  { %1772 = vmatprep.mubr.bf16.mxu1 %v2606_v35 }
 0x139   :  { %v2937_v48 = vpop.f32.mrb[0].mxu0 }
 0x13a   :  { %v2939_v3 = vpop.f32.mrb[0].mxu1  ;;  %v2943_v13 = vpop.f32.mrb[1].mxu0 }
 0x13b   :  { %v2945_v15 = vpop.f32.mrb[1].mxu1  ;;  %v2949_v24 = vpop.f32.mrb[2].mxu0 }
 0x13c   :  { %v2951_v33 = vpop.f32.mrb[2].mxu1  ;;  %v2955_v37 = vpop.f32.mrb[3].mxu0 }
 0x13d   :  { %v2957_v38 = vpop.f32.mrb[3].mxu1 }
 0x13e   :  { %1351 = vmatmul.mubr.bf16.gmra.mrb[108].mxu0 %v2887_v36 }
 0x13f   :  { %1773 = vmatmul.mubr.bf16.gmra.mrb[108].mxu1 %v2887_v36 }
 0x141   :  { %v2963_v40 = vpop.f32.mrb[4].mxu0 }
 0x142   :  { %v2965_v41 = vpop.f32.mrb[4].mxu1  ;;  %v2969_v43 = vpop.f32.mrb[5].mxu0 }
 0x143   :  { %v2971_v44 = vpop.f32.mrb[5].mxu1  ;;  %v2975_v46 = vpop.f32.mrb[6].mxu0 }
 0x144   :  { %v2977_v47 = vpop.f32.mrb[6].mxu1  ;;  %v2981_v50 = vpop.f32.mrb[7].mxu0 }
 0x145   :  { %v2983_v51 = vpop.f32.mrb[7].mxu1 }
 0x149   :  { %v2987_v53 = vpop.f32.mrb[8].mxu0 }
 0x14a   :  { %v2989_v54 = vpop.f32.mrb[8].mxu1  ;;  %v2993_v56 = vpop.f32.mrb[9].mxu0 }
 0x14b   :  { %v2995_v57 = vpop.f32.mrb[9].mxu1  ;;  %v2999_v59 = vpop.f32.mrb[10].mxu0 }
 0x14c   :  { %v3001_v60 = vpop.f32.mrb[10].mxu1  ;;  %v3005_v62 = vpop.f32.mrb[11].mxu0 }
 0x14d   :  { %v3007_v63 = vpop.f32.mrb[11].mxu1 }
 0x151   :  { %v3011_v1 = vpop.f32.mrb[12].mxu0 }
 0x152   :  { %v3013_v2 = vpop.f32.mrb[12].mxu1  ;;  %v3017_v5 = vpop.f32.mrb[13].mxu0 }
 0x153   :  { %v3019_v7 = vpop.f32.mrb[13].mxu1  ;;  %v3023_v9 = vpop.f32.mrb[14].mxu0 }
 0x154   :  { %v3025_v10 = vpop.f32.mrb[14].mxu1  ;;  %v3029_v12 = vpop.f32.mrb[15].mxu0 }
 0x155   :  { %v3031_v14 = vpop.f32.mrb[15].mxu1 }
 0x159   :  { %v3035_v17 = vpop.f32.mrb[16].mxu0 }
 0x15a   :  { %v3037_v18 = vpop.f32.mrb[16].mxu1  ;;  %v3041_v20 = vpop.f32.mrb[17].mxu0 }
 0x15b   :  { %v3043_v21 = vpop.f32.mrb[17].mxu1  ;;  %v3047_v25 = vpop.f32.mrb[18].mxu0 }
 0x15c   :  { %v3049_v26 = vpop.f32.mrb[18].mxu1  ;;  %v3053_v28 = vpop.f32.mrb[19].mxu0 }
 0x15d   :  { %v3055_v29 = vpop.f32.mrb[19].mxu1 }
 0x161   :  { %v3059_v31 = vpop.f32.mrb[20].mxu0 }
 0x162   :  { %v3061_v32 = vpop.f32.mrb[20].mxu1  ;;  %v3065_v36 = vpop.f32.mrb[21].mxu0 }
 0x163   :  { %v3067_v22 = vpop.f32.mrb[21].mxu1  ;;  %v3071_v19 = vpop.f32.mrb[22].mxu0 }
 0x164   :  { %v3073_v16 = vpop.f32.mrb[22].mxu1  ;;  %v3077_v11 = vpop.f32.mrb[23].mxu0 }
 0x165   :  { %3658 = vst [vmem:[#allocation8_spill] sm:$0xff] %v3073_v16  ;;  %3659 = vst [vmem:[#allocation9_spill] sm:$0xff] %v3077_v11  ;;  %v3079_v8 = vpop.f32.mrb[23].mxu1 }
 0x166   :  { %3660 = vst [vmem:[#allocation10_spill] sm:$0xff] %v3079_v8 }
 0x169   :  { %v3083_v4 = vpop.f32.mrb[24].mxu0 }
 0x16a   :  { %3661 = vst [vmem:[#allocation11_spill] sm:$0xff] %v3083_v4  ;;  %v3085_v0 = vpop.f32.mrb[24].mxu1  ;;  %v3089_v61 = vpop.f32.mrb[25].mxu0 }
 0x16b   :  { %3662 = vst [vmem:[#allocation12_spill] sm:$0xff] %v3085_v0  ;;  %3663 = vst [vmem:[#allocation13_spill] sm:$0xff] %v3089_v61  ;;  %v3091_v58 = vpop.f32.mrb[25].mxu1  ;;  %v3095_v55 = vpop.f32.mrb[26].mxu0 }
 0x16c   :  { %3664 = vst [vmem:[#allocation14_spill] sm:$0xff] %v3091_v58  ;;  %3665 = vst [vmem:[#allocation15_spill] sm:$0xff] %v3095_v55  ;;  %v3097_v52 = vpop.f32.mrb[26].mxu1  ;;  %v3101_v49 = vpop.f32.mrb[27].mxu0 }
 0x16d   :  { %3666 = vst [vmem:[#allocation16_spill] sm:$0xff] %v3097_v52  ;;  %3667 = vst [vmem:[#allocation17_spill] sm:$0xff] %v3101_v49  ;;  %v3103_v45 = vpop.f32.mrb[27].mxu1 }
 0x16e   :  { %3668 = vst [vmem:[#allocation18_spill] sm:$0xff] %v3103_v45 }
 0x171   :  { %v3107_v42 = vpop.f32.mrb[28].mxu0 }
 0x172   :  { %3669 = vst [vmem:[#allocation19_spill] sm:$0xff] %v3107_v42  ;;  %v3109_v39 = vpop.f32.mrb[28].mxu1  ;;  %v3113_v34 = vpop.f32.mrb[29].mxu0 }
 0x173   :  { %3670 = vst [vmem:[#allocation20_spill] sm:$0xff] %v3109_v39  ;;  %3671 = vst [vmem:[#allocation21_spill] sm:$0xff] %v3113_v34  ;;  %v3115_v23 = vpop.f32.mrb[29].mxu1  ;;  %v3119_v6 = vpop.f32.mrb[30].mxu0 }
 0x174   :  { %3672 = vst [vmem:[#allocation22_spill] sm:$0xff] %v3115_v23  ;;  %3673 = vst [vmem:[#allocation23_spill] sm:$0xff] %v3119_v6  ;;  %v3121_v52 = vpop.f32.mrb[30].mxu1  ;;  %v3125_v45 = vpop.f32.mrb[31].mxu0 }
 0x175   :  { %3674 = vst [vmem:[#allocation24_spill] sm:$0xff] %v3121_v52  ;;  %3675 = vst [vmem:[#allocation25_spill] sm:$0xff] %v3125_v45  ;;  %v3127_v49 = vpop.f32.mrb[31].mxu1 }
 0x176   :  { %3676 = vst [vmem:[#allocation26_spill] sm:$0xff] %v3127_v49 }
 0x179   :  { %v3131_v39 = vpop.f32.mrb[32].mxu0 }
 0x17a   :  { %3677 = vst [vmem:[#allocation27_spill] sm:$0xff] %v3131_v39  ;;  %v3133_v42 = vpop.f32.mrb[32].mxu1  ;;  %v3137_v23 = vpop.f32.mrb[33].mxu0 }
 0x17b   :  { %3678 = vst [vmem:[#allocation28_spill] sm:$0xff] %v3133_v42  ;;  %3679 = vst [vmem:[#allocation29_spill] sm:$0xff] %v3137_v23  ;;  %v3139_v34 = vpop.f32.mrb[33].mxu1  ;;  %v3143_v52 = vpop.f32.mrb[34].mxu0 }
 0x17c   :  { %3680 = vst [vmem:[#allocation30_spill] sm:$0xff] %v3139_v34  ;;  %3681 = vst [vmem:[#allocation31_spill] sm:$0xff] %v3143_v52  ;;  %v3145_v6 = vpop.f32.mrb[34].mxu1  ;;  %v3149_v49 = vpop.f32.mrb[35].mxu0 }
 0x17d   :  { %3682 = vst [vmem:[#allocation32_spill] sm:$0xff] %v3145_v6  ;;  %3683 = vst [vmem:[#allocation33_spill] sm:$0xff] %v3149_v49  ;;  %v3151_v45 = vpop.f32.mrb[35].mxu1 }
 0x17e   :  { %3684 = vst [vmem:[#allocation34_spill] sm:$0xff] %v3151_v45 }
 0x181   :  { %v3155_v42 = vpop.f32.mrb[36].mxu0 }
 0x182   :  { %3685 = vst [vmem:[#allocation35_spill] sm:$0xff] %v3155_v42  ;;  %v3157_v39 = vpop.f32.mrb[36].mxu1  ;;  %v3161_v34 = vpop.f32.mrb[37].mxu0 }
 0x183   :  { %3686 = vst [vmem:[#allocation36_spill] sm:$0xff] %v3157_v39  ;;  %3687 = vst [vmem:[#allocation37_spill] sm:$0xff] %v3161_v34  ;;  %v3163_v23 = vpop.f32.mrb[37].mxu1  ;;  %v3167_v6 = vpop.f32.mrb[38].mxu0 }
 0x184   :  { %3688 = vst [vmem:[#allocation38_spill] sm:$0xff] %v3163_v23  ;;  %3689 = vst [vmem:[#allocation39_spill] sm:$0xff] %v3167_v6  ;;  %v3169_v52 = vpop.f32.mrb[38].mxu1  ;;  %v3173_v45 = vpop.f32.mrb[39].mxu0 }
 0x185   :  { %3690 = vst [vmem:[#allocation40_spill] sm:$0xff] %v3169_v52  ;;  %3691 = vst [vmem:[#allocation41_spill] sm:$0xff] %v3173_v45  ;;  %v3175_v49 = vpop.f32.mrb[39].mxu1 }
 0x186   :  { %3692 = vst [vmem:[#allocation42_spill] sm:$0xff] %v3175_v49 }
 0x189   :  { %v3179_v39 = vpop.f32.mrb[40].mxu0 }
 0x18a   :  { %3693 = vst [vmem:[#allocation43_spill] sm:$0xff] %v3179_v39  ;;  %v3181_v42 = vpop.f32.mrb[40].mxu1  ;;  %v3185_v23 = vpop.f32.mrb[41].mxu0 }
 0x18b   :  { %3694 = vst [vmem:[#allocation44_spill] sm:$0xff] %v3181_v42  ;;  %3695 = vst [vmem:[#allocation45_spill] sm:$0xff] %v3185_v23  ;;  %v3187_v34 = vpop.f32.mrb[41].mxu1  ;;  %v3191_v52 = vpop.f32.mrb[42].mxu0 }
 0x18c   :  { %3696 = vst [vmem:[#allocation46_spill] sm:$0xff] %v3187_v34  ;;  %3697 = vst [vmem:[#allocation47_spill] sm:$0xff] %v3191_v52  ;;  %v3193_v6 = vpop.f32.mrb[42].mxu1  ;;  %v3197_v49 = vpop.f32.mrb[43].mxu0 }
 0x18d   :  { %3698 = vst [vmem:[#allocation48_spill] sm:$0xff] %v3193_v6  ;;  %3699 = vst [vmem:[#allocation49_spill] sm:$0xff] %v3197_v49  ;;  %v3199_v45 = vpop.f32.mrb[43].mxu1 }
 0x18e   :  { %3700 = vst [vmem:[#allocation50_spill] sm:$0xff] %v3199_v45 }
 0x191   :  { %v3203_v42 = vpop.f32.mrb[44].mxu0 }
 0x192   :  { %3701 = vst [vmem:[#allocation51_spill] sm:$0xff] %v3203_v42  ;;  %v3205_v39 = vpop.f32.mrb[44].mxu1  ;;  %v3209_v34 = vpop.f32.mrb[45].mxu0 }
 0x193   :  { %3702 = vst [vmem:[#allocation52_spill] sm:$0xff] %v3205_v39  ;;  %3703 = vst [vmem:[#allocation53_spill] sm:$0xff] %v3209_v34  ;;  %v3211_v23 = vpop.f32.mrb[45].mxu1  ;;  %v3215_v6 = vpop.f32.mrb[46].mxu0 }
 0x194   :  { %3704 = vst [vmem:[#allocation54_spill] sm:$0xff] %v3211_v23  ;;  %3705 = vst [vmem:[#allocation55_spill] sm:$0xff] %v3215_v6  ;;  %v3217_v52 = vpop.f32.mrb[46].mxu1  ;;  %v3221_v45 = vpop.f32.mrb[47].mxu0 }
 0x195   :  { %3706 = vst [vmem:[#allocation56_spill] sm:$0xff] %v3217_v52  ;;  %3707 = vst [vmem:[#allocation57_spill] sm:$0xff] %v3221_v45  ;;  %v3223_v49 = vpop.f32.mrb[47].mxu1 }
 0x196   :  { %3708 = vst [vmem:[#allocation58_spill] sm:$0xff] %v3223_v49 }
 0x199   :  { %v3227_v39 = vpop.f32.mrb[48].mxu0 }
 0x19a   :  { %3709 = vst [vmem:[#allocation59_spill] sm:$0xff] %v3227_v39  ;;  %v3229_v42 = vpop.f32.mrb[48].mxu1  ;;  %v3233_v23 = vpop.f32.mrb[49].mxu0 }
 0x19b   :  { %3710 = vst [vmem:[#allocation60_spill] sm:$0xff] %v3229_v42  ;;  %3711 = vst [vmem:[#allocation61_spill] sm:$0xff] %v3233_v23  ;;  %v3235_v34 = vpop.f32.mrb[49].mxu1  ;;  %v3239_v52 = vpop.f32.mrb[50].mxu0  ;;  %v1841_v42 = vlaneseq }
 0x19c   :  { %3712 = vst [vmem:[#allocation62_spill] sm:$0xff] %v3235_v34  ;;  %3713 = vst [vmem:[#allocation63_spill] sm:$0xff] %v3239_v52  ;;  %v3241_v6 = vpop.f32.mrb[50].mxu1  ;;  %v3245_v49 = vpop.f32.mrb[51].mxu0 }
 0x19d   :  { %3714 = vst [vmem:[#allocation64_spill] sm:$0xff] %v3241_v6  ;;  %3715 = vst [vmem:[#allocation65_spill] sm:$0xff] %v3245_v49  ;;  %v3247_v45 = vpop.f32.mrb[51].mxu1  ;;  %v1842_v35 = vshrl.u32 %v1841_v42, 7  ;;  %v3725_v6 = vmax.f32 %v2937_v48, %v2939_v3 }
 0x19e   :  { %3716 = vst [vmem:[#allocation66_spill] sm:$0xff] %v3247_v45 }
 0x19f   :  { %v1847_v42 = vsub.s32 1, %v1842_v35 }
 0x1a1   :  { %v3251_v39 = vpop.f32.mrb[52].mxu0 }
 0x1a2   :  { %3717 = vst [vmem:[#allocation67_spill] sm:$0xff] %v3251_v39  ;;  %v3253_v55 = vpop.f32.mrb[52].mxu1  ;;  %v3257_v34 = vpop.f32.mrb[53].mxu0  ;;  %v1839_v39 = vld [vmem:[#allocation4] sm:$0x3] }
 0x1a3   :  { %3718 = vst [vmem:[#allocation68_spill] sm:$0xff] %v3253_v55  ;;  %3719 = vst [vmem:[#allocation69_spill] sm:$0xff] %v3257_v34  ;;  %v3259_v23 = vpop.f32.mrb[53].mxu1  ;;  %v3263_v52 = vpop.f32.mrb[54].mxu0  ;;  %v1843_v55 = vsub.s32 0, %v1842_v35  ;;  %v3283_v8 = vrot.slane %v1839_v39, %v1847_v42  ;;  %v3727_v35 = vmax.f32 %v2949_v24, %v2951_v33 }
 0x1a4   :  { %3720 = vst [vmem:[#allocation70_spill] sm:$0xff] %v3259_v23  ;;  %3721 = vst [vmem:[#allocation71_spill] sm:$0xff] %v3263_v52  ;;  %v3265_v58 = vpop.f32.mrb[54].mxu1  ;;  %v3269_v45 = vpop.f32.mrb[55].mxu0 }
 0x1a5   :  { %3722 = vst [vmem:[#allocation72_spill] sm:$0xff] %v3265_v58  ;;  %3723 = vst [vmem:[#allocation73_spill] sm:$0xff] %v3269_v45  ;;  %v3271_v49 = vpop.f32.mrb[55].mxu1  ;;  %v3278_v34 = vrot.slane %v1839_v39, %v1843_v55  ;;  %v3726_v58 = vmax.f32 %v2943_v13, %v2945_v15 }
 0x1a6   :  { %3724 = vst [vmem:[#allocation74_spill] sm:$0xff] %v3271_v49 }
 0x1a9   :  { %v1222_v61 = vpop.f32.mrb[56].mxu0 }
 0x1aa   :  { %v1644_v0 = vpop.f32.mrb[56].mxu1  ;;  %v1361_v23 = vmax.f32 %v3725_v6, %v1222_v61  ;;  %v1224_v4 = vpop.f32.mrb[57].mxu0  ;;  %v3728_v6 = vmax.f32 %v2955_v37, %v2957_v38 }
 0x1ab   :  { %v1646_v27 = vpop.f32.mrb[57].mxu1  ;;  %v1362_v52 = vmax.f32 %v3726_v58, %v1224_v4  ;;  %v1226_v30 = vpop.f32.mrb[58].mxu0 }
 0x1ac   :  { %v1648_v49 = vpop.f32.mrb[58].mxu1  ;;  %v1783_v45 = vmax.f32 %v1361_v23, %v1644_v0  ;;  %v1363_v11 = vmax.f32 %v3727_v35, %v1226_v30  ;;  %v1228_v16 = vpop.f32.mrb[59].mxu0 }
 0x1ad   :  { %v1650_v48 = vpop.f32.mrb[59].mxu1  ;;  %v1784_v3 = vmax.f32 %v1362_v52, %v1646_v27  ;;  %v1364_v55 = vmax.f32 %v3728_v6, %v1228_v16  ;;  %v3729_v52 = vmax.f32 %v2963_v40, %v2965_v41 }
 0x1ae   :  { %v1851_v61 = vadd.f32 %v3278_v34, %v1783_v45  ;;  %v1785_v13 = vmax.f32 %v1363_v11, %v1648_v49  ;;  %v3730_v11 = vmax.f32 %v2969_v43, %v2971_v44 }
 0x1af   :  { %v1852_v15 = vadd.f32 %v3283_v8, %v1784_v3  ;;  %v1786_v39 = vmax.f32 %v1364_v55, %v1650_v48  ;;  %v3731_v3 = vmax.f32 %v2975_v46, %v2977_v47 }
 0x1b0   :  { %v1907_v58 = vmax.f32 %v1851_v61, 0.0  ;;  %v1853_v23 = vadd.f32 %v3278_v34, %v1785_v13  ;;  %v3732_v13 = vmax.f32 %v2981_v50, %v2983_v51  ;;  %v3733_v51 = vmax.f32 %v2987_v53, %v2989_v54 }
 0x1b1   :  { %v1908_v0 = vmax.f32 %v1852_v15, 0.0  ;;  %v1854_v24 = vadd.f32 %v3283_v8, %v1786_v39  ;;  %v1232_v33 = vpop.f32.mrb[60].mxu0 }
 0x1b2   :  { %v1654_v4 = vpop.f32.mrb[60].mxu1  ;;  %v1909_v30 = vmax.f32 %v1853_v23, 0.0  ;;  %v1365_v37 = vmax.f32 %v3729_v52, %v1232_v33  ;;  %v1234_v38 = vpop.f32.mrb[61].mxu0 }
 0x1b3   :  { %v1656_v16 = vpop.f32.mrb[61].mxu1  ;;  %v2349_v45 = vpack.c.bf16 %v1908_v0, %v1907_v58  ;;  %v1910_v49 = vmax.f32 %v1854_v24, 0.0  ;;  %v1366_v27 = vmax.f32 %v3730_v11, %v1234_v38  ;;  %v1236_v42 = vpop.f32.mrb[62].mxu0 }
 0x1b4   :  { %v1658_v35 = vpop.f32.mrb[62].mxu1  ;;  %v1787_v48 = vmax.f32 %v1365_v37, %v1654_v4  ;;  %v1367_v6 = vmax.f32 %v3731_v3, %v1236_v42  ;;  %v1238_v55 = vpop.f32.mrb[63].mxu0  ;;  %v3735_v42 = vmax.f32 %v2999_v59, %v3001_v60 }
 0x1b5   :  { %v1660_v61 = vpop.f32.mrb[63].mxu1  ;;  %2131 = vst [vmem:[%s3590_s3] sm:$0xff] %v2349_v45  ;;  %v2350_v40 = vpack.c.bf16 %v1910_v49, %v1909_v30  ;;  %v1788_v41 = vmax.f32 %v1366_v27, %v1656_v16  ;;  %v1368_v43 = vmax.f32 %v3732_v13, %v1238_v55  ;;  %v3734_v16 = vmax.f32 %v2993_v56, %v2995_v57 }
 0x1b6   :  { %v1855_v44 = vadd.f32 %v3278_v34, %v1787_v48  ;;  %v1789_v15 = vmax.f32 %v1367_v6, %v1658_v35  ;;  %v3736_v6 = vmax.f32 %v3005_v62, %v3007_v63  ;;  %v3737_v63 = vmax.f32 %v3011_v1, %v3013_v2 }
 0x1b7   :  { %2132 = vst [vmem:[%s3590_s3 + $0x8] sm:$0xff] %v2350_v40  ;;  %v1856_v46 = vadd.f32 %v3283_v8, %v1788_v41  ;;  %v1790_v47 = vmax.f32 %v1368_v43, %v1660_v61 }
 0x1b8   :  { %v1911_v39 = vmax.f32 %v1855_v44, 0.0  ;;  %v1857_v58 = vadd.f32 %v3278_v34, %v1789_v15 }
 0x1b9   :  { %v1912_v23 = vmax.f32 %v1856_v46, 0.0  ;;  %v1858_v0 = vadd.f32 %v3283_v8, %v1790_v47  ;;  %v1242_v24 = vpop.f32.mrb[64].mxu0 }
 0x1ba   :  { %v1664_v33 = vpop.f32.mrb[64].mxu1  ;;  %v1913_v50 = vmax.f32 %v1857_v58, 0.0  ;;  %v1369_v4 = vmax.f32 %v3733_v51, %v1242_v24  ;;  %v1244_v30 = vpop.f32.mrb[65].mxu0  ;;  %v3739_v51 = vmax.f32 %v3023_v9, %v3025_v10 }
 0x1bb   :  { %v1666_v52 = vpop.f32.mrb[65].mxu1  ;;  %v2351_v37 = vpack.c.bf16 %v1912_v23, %v1911_v39  ;;  %v1914_v38 = vmax.f32 %v1858_v0, 0.0  ;;  %v1370_v45 = vmax.f32 %v3734_v16, %v1244_v30  ;;  %v1246_v49 = vpop.f32.mrb[66].mxu0  ;;  %v3738_v23 = vmax.f32 %v3017_v5, %v3019_v7 }
 0x1bc   :  { %v1668_v11 = vpop.f32.mrb[66].mxu1  ;;  %v1791_v27 = vmax.f32 %v1369_v4, %v1664_v33  ;;  %v1371_v35 = vmax.f32 %v3735_v42, %v1246_v49  ;;  %v1248_v48 = vpop.f32.mrb[67].mxu0 }
 0x1bd   :  { %v1670_v3 = vpop.f32.mrb[67].mxu1  ;;  %2133 = vst [vmem:[%s3590_s3 + $0x10] sm:$0xff] %v2351_v37  ;;  %v2352_v53 = vpack.c.bf16 %v1914_v38, %v1913_v50  ;;  %v1792_v54 = vmax.f32 %v1370_v45, %v1666_v52  ;;  %v1372_v56 = vmax.f32 %v3736_v6, %v1248_v48  ;;  %v3740_v37 = vmax.f32 %v3029_v12, %v3031_v14 }
 0x1be   :  { %v1859_v57 = vadd.f32 %v3278_v34, %v1791_v27  ;;  %v1793_v55 = vmax.f32 %v1371_v35, %v1668_v11  ;;  %v3741_v14 = vmax.f32 %v3035_v17, %v3037_v18  ;;  %v3742_v6 = vmax.f32 %v3041_v20, %v3043_v21 }
 0x1bf   :  { %2134 = vst [vmem:[%s3590_s3 + $0x18] sm:$0xff] %v2352_v53  ;;  %v1860_v59 = vadd.f32 %v3283_v8, %v1792_v54  ;;  %v1794_v60 = vmax.f32 %v1372_v56, %v1670_v3 }
 0x1c0   :  { %v1915_v61 = vmax.f32 %v1859_v57, 0.0  ;;  %v1861_v40 = vadd.f32 %v3278_v34, %v1793_v55 }
 0x1c1   :  { %v1916_v41 = vmax.f32 %v1860_v59, 0.0  ;;  %v1862_v13 = vadd.f32 %v3283_v8, %v1794_v60  ;;  %v1252_v43 = vpop.f32.mrb[68].mxu0  ;;  %v3743_v60 = vmax.f32 %v3047_v25, %v3049_v26 }
 0x1c2   :  { %v1674_v44 = vpop.f32.mrb[68].mxu1  ;;  %v1917_v62 = vmax.f32 %v1861_v40, 0.0  ;;  %v1373_v15 = vmax.f32 %v3737_v63, %v1252_v43  ;;  %v1254_v46 = vpop.f32.mrb[69].mxu0 }
 0x1c3   :  { %v1676_v47 = vpop.f32.mrb[69].mxu1  ;;  %v2353_v39 = vpack.c.bf16 %v1916_v41, %v1915_v61  ;;  %v1918_v58 = vmax.f32 %v1862_v13, 0.0  ;;  %v1374_v0 = vmax.f32 %v3738_v23, %v1254_v46  ;;  %v1256_v24 = vpop.f32.mrb[70].mxu0  ;;  %v3744_v13 = vmax.f32 %v3053_v28, %v3055_v29 }
 0x1c4   :  { %v1678_v33 = vpop.f32.mrb[70].mxu1  ;;  %v1795_v50 = vmax.f32 %v1373_v15, %v1674_v44  ;;  %v1375_v4 = vmax.f32 %v3739_v51, %v1256_v24  ;;  %v1258_v30 = vpop.f32.mrb[71].mxu0  ;;  %v3745_v29 = vmax.f32 %v3059_v31, %v3061_v32 }
 0x1c5   :  { %v1680_v52 = vpop.f32.mrb[71].mxu1  ;;  %2135 = vst [vmem:[%s3590_s3 + $0x20] sm:$0xff] %v2353_v39  ;;  %v2354_v1 = vpack.c.bf16 %v1918_v58, %v1917_v62  ;;  %v1796_v2 = vmax.f32 %v1374_v0, %v1676_v47  ;;  %v1376_v5 = vmax.f32 %v3740_v37, %v1258_v30 }
 0x1c6   :  { %v1863_v7 = vadd.f32 %v3278_v34, %v1795_v50  ;;  %v1797_v38 = vmax.f32 %v1375_v4, %v1678_v33  ;;  %v3746_v33 = vmax.f32 %v3065_v36, %v3067_v22 }
 0x1c7   :  { %2136 = vst [vmem:[%s3590_s3 + $0x28] sm:$0xff] %v2354_v1  ;;  %v1864_v9 = vadd.f32 %v3283_v8, %v1796_v2  ;;  %v1798_v10 = vmax.f32 %v1376_v5, %v1680_v52  ;;  %v3747_v52 = vld [vmem:[#allocation8_spill] sm:$0xff] }
 0x1c8   :  { %v1919_v16 = vmax.f32 %v1863_v7, 0.0  ;;  %v1865_v45 = vadd.f32 %v3278_v34, %v1797_v38  ;;  %v3748_v1 = vmax.f32 %v3071_v19, %v3747_v52  ;;  %v3749_v7 = vld [vmem:[#allocation9_spill] sm:$0xff]  ;;  %v3750_v38 = vld [vmem:[#allocation10_spill] sm:$0xff] }
 0x1c9   :  { %v1920_v49 = vmax.f32 %v1864_v9, 0.0  ;;  %v1866_v11 = vadd.f32 %v3283_v8, %v1798_v10  ;;  %v1262_v27 = vpop.f32.mrb[72].mxu0  ;;  %v3751_v9 = vmax.f32 %v3749_v7, %v3750_v38  ;;  %v3768_v7 = vld [vmem:[#allocation22_spill] sm:$0xff] }
 0x1ca   :  { %v1684_v42 = vpop.f32.mrb[72].mxu1  ;;  %v1921_v12 = vmax.f32 %v1865_v45, 0.0  ;;  %v1377_v35 = vmax.f32 %v3741_v14, %v1262_v27  ;;  %v1264_v48 = vpop.f32.mrb[73].mxu0 }
 0x1cb   :  { %v1686_v3 = vpop.f32.mrb[73].mxu1  ;;  %v2355_v53 = vpack.c.bf16 %v1920_v49, %v1919_v16  ;;  %v1922_v54 = vmax.f32 %v1866_v11, 0.0  ;;  %v1378_v56 = vmax.f32 %v3742_v6, %v1264_v48  ;;  %v1266_v57 = vpop.f32.mrb[74].mxu0  ;;  %v3753_v48 = vld [vmem:[#allocation12_spill] sm:$0xff] }
 0x1cc   :  { %v1688_v55 = vpop.f32.mrb[74].mxu1  ;;  %v1799_v59 = vmax.f32 %v1377_v35, %v1684_v42  ;;  %v1379_v61 = vmax.f32 %v3743_v60, %v1266_v57  ;;  %v1268_v40 = vpop.f32.mrb[75].mxu0  ;;  %v3752_v35 = vld [vmem:[#allocation11_spill] sm:$0xff] }
 0x1cd   :  { %v1690_v41 = vpop.f32.mrb[75].mxu1  ;;  %2137 = vst [vmem:[%s3590_s3 + $0x30] sm:$0xff] %v2355_v53  ;;  %v2356_v17 = vpack.c.bf16 %v1922_v54, %v1921_v12  ;;  %v1800_v18 = vmax.f32 %v1378_v56, %v1686_v3  ;;  %v1380_v20 = vmax.f32 %v3744_v13, %v1268_v40  ;;  %v3754_v3 = vmax.f32 %v3752_v35, %v3753_v48  ;;  %v3759_v13 = vld [vmem:[#allocation16_spill] sm:$0xff]  ;;  %v3774_v35 = vld [vmem:[#allocation26_spill] sm:$0xff] }
 0x1ce   :  { %v1867_v21 = vadd.f32 %v3278_v34, %v1799_v59  ;;  %v1801_v43 = vmax.f32 %v1379_v61, %v1688_v55  ;;  %v3755_v55 = vld [vmem:[#allocation13_spill] sm:$0xff]  ;;  %v3756_v59 = vld [vmem:[#allocation14_spill] sm:$0xff] }
 0x1cf   :  { %2138 = vst [vmem:[%s3590_s3 + $0x38] sm:$0xff] %v2356_v17  ;;  %v1868_v25 = vadd.f32 %v3283_v8, %v1800_v18  ;;  %v1802_v26 = vmax.f32 %v1380_v20, %v1690_v41  ;;  %v3757_v60 = vmax.f32 %v3755_v55, %v3756_v59  ;;  %v3758_v18 = vld [vmem:[#allocation15_spill] sm:$0xff] }
 0x1d0   :  { %v1923_v44 = vmax.f32 %v1867_v21, 0.0  ;;  %v1869_v62 = vadd.f32 %v3278_v34, %v1801_v43  ;;  %v3760_v20 = vmax.f32 %v3758_v18, %v3759_v13  ;;  %v3777_v18 = vld [vmem:[#allocation28_spill] sm:$0xff] }
 0x1d1   :  { %v1924_v63 = vmax.f32 %v1868_v25, 0.0  ;;  %v1870_v15 = vadd.f32 %v3283_v8, %v1802_v26  ;;  %v1272_v46 = vpop.f32.mrb[76].mxu0 }
 0x1d2   :  { %v1694_v47 = vpop.f32.mrb[76].mxu1  ;;  %v1925_v28 = vmax.f32 %v1869_v62, 0.0  ;;  %v1381_v39 = vmax.f32 %v3745_v29, %v1272_v46  ;;  %v1274_v58 = vpop.f32.mrb[77].mxu0  ;;  %v3761_v62 = vld [vmem:[#allocation17_spill] sm:$0xff] }
 0x1d3   :  { %v1696_v23 = vpop.f32.mrb[77].mxu1  ;;  %v2357_v0 = vpack.c.bf16 %v1924_v63, %v1923_v44  ;;  %v1926_v24 = vmax.f32 %v1870_v15, 0.0  ;;  %v1382_v50 = vmax.f32 %v3746_v33, %v1274_v58  ;;  %v1276_v51 = vpop.f32.mrb[78].mxu0  ;;  %v3762_v63 = vld [vmem:[#allocation18_spill] sm:$0xff] }
 0x1d4   :  { %v1698_v4 = vpop.f32.mrb[78].mxu1  ;;  %v1803_v30 = vmax.f32 %v1381_v39, %v1694_v47  ;;  %v1383_v2 = vmax.f32 %v3748_v1, %v1276_v51  ;;  %v1278_v37 = vpop.f32.mrb[79].mxu0  ;;  %v3763_v15 = vmax.f32 %v3761_v62, %v3762_v63  ;;  %v3780_v62 = vld [vmem:[#allocation30_spill] sm:$0xff] }
 0x1d5   :  { %v1700_v5 = vpop.f32.mrb[79].mxu1  ;;  %2139 = vst [vmem:[%s3590_s3 + $0x40] sm:$0xff] %v2357_v0  ;;  %v2358_v31 = vpack.c.bf16 %v1926_v24, %v1925_v28  ;;  %v1804_v32 = vmax.f32 %v1382_v50, %v1696_v23  ;;  %v1384_v22 = vmax.f32 %v3751_v9, %v1278_v37 }
 0x1d6   :  { %v1871_v36 = vadd.f32 %v3278_v34, %v1803_v30  ;;  %v1805_v10 = vmax.f32 %v1383_v2, %v1698_v4  ;;  %v3764_v4 = vld [vmem:[#allocation19_spill] sm:$0xff]  ;;  %v3765_v30 = vld [vmem:[#allocation20_spill] sm:$0xff] }
 0x1d7   :  { %2140 = vst [vmem:[%s3590_s3 + $0x48] sm:$0xff] %v2358_v31  ;;  %v1872_v19 = vadd.f32 %v3283_v8, %v1804_v32  ;;  %v1806_v16 = vmax.f32 %v1384_v22, %v1700_v5  ;;  %v3766_v52 = vmax.f32 %v3764_v4, %v3765_v30  ;;  %v3767_v32 = vld [vmem:[#allocation21_spill] sm:$0xff]  ;;  %v3786_v4 = vld [vmem:[#allocation34_spill] sm:$0xff] }
 0x1d8   :  { %v1927_v45 = vmax.f32 %v1871_v36, 0.0  ;;  %v1873_v49 = vadd.f32 %v3278_v34, %v1805_v10  ;;  %v3769_v38 = vmax.f32 %v3767_v32, %v3768_v7 }
 0x1d9   :  { %v1928_v11 = vmax.f32 %v1872_v19, 0.0  ;;  %v1874_v27 = vadd.f32 %v3283_v8, %v1806_v16  ;;  %v1282_v42 = vpop.f32.mrb[80].mxu0  ;;  %v3770_v19 = vld [vmem:[#allocation23_spill] sm:$0xff]  ;;  %v3771_v16 = vld [vmem:[#allocation24_spill] sm:$0xff] }
 0x1da   :  { %v1704_v12 = vpop.f32.mrb[80].mxu1  ;;  %v1929_v14 = vmax.f32 %v1873_v49, 0.0  ;;  %v1385_v53 = vmax.f32 %v3754_v3, %v1282_v42  ;;  %v1284_v54 = vpop.f32.mrb[81].mxu0 }
 0x1db   :  { %v1706_v6 = vpop.f32.mrb[81].mxu1  ;;  %v2359_v56 = vpack.c.bf16 %v1928_v11, %v1927_v45  ;;  %v1930_v57 = vmax.f32 %v1874_v27, 0.0  ;;  %v1386_v61 = vmax.f32 %v3757_v60, %v1284_v54  ;;  %v1286_v40 = vpop.f32.mrb[82].mxu0  ;;  %v3772_v45 = vmax.f32 %v3770_v19, %v3771_v16  ;;  %v3789_v19 = vld [vmem:[#allocation36_spill] sm:$0xff] }
 0x1dc   :  { %v1708_v41 = vpop.f32.mrb[82].mxu1  ;;  %v1807_v17 = vmax.f32 %v1385_v53, %v1704_v12  ;;  %v1387_v21 = vmax.f32 %v3760_v20, %v1286_v40  ;;  %v1288_v43 = vpop.f32.mrb[83].mxu0 }
 0x1dd   :  { %v1710_v25 = vpop.f32.mrb[83].mxu1  ;;  %2141 = vst [vmem:[%s3590_s3 + $0x50] sm:$0xff] %v2359_v56  ;;  %v2360_v26 = vpack.c.bf16 %v1930_v57, %v1929_v14  ;;  %v1808_v44 = vmax.f32 %v1386_v61, %v1706_v6  ;;  %v1388_v46 = vmax.f32 %v3763_v15, %v1288_v43  ;;  %v3773_v14 = vld [vmem:[#allocation25_spill] sm:$0xff] }
 0x1de   :  { %v1875_v47 = vadd.f32 %v3278_v34, %v1807_v17  ;;  %v1809_v28 = vmax.f32 %v1387_v21, %v1708_v41  ;;  %v3775_v48 = vmax.f32 %v3773_v14, %v3774_v35  ;;  %v3776_v17 = vld [vmem:[#allocation27_spill] sm:$0xff]  ;;  %v3792_v14 = vld [vmem:[#allocation38_spill] sm:$0xff] }
 0x1df   :  { %2142 = vst [vmem:[%s3590_s3 + $0x58] sm:$0xff] %v2360_v26  ;;  %v1876_v29 = vadd.f32 %v3283_v8, %v1808_v44  ;;  %v1810_v39 = vmax.f32 %v1388_v46, %v1710_v25  ;;  %v3778_v13 = vmax.f32 %v3776_v17, %v3777_v18  ;;  %v3779_v44 = vld [vmem:[#allocation29_spill] sm:$0xff]  ;;  %v3798_v17 = vld [vmem:[#allocation42_spill] sm:$0xff] }
 0x1e0   :  { %v1931_v58 = vmax.f32 %v1875_v47, 0.0  ;;  %v1877_v23 = vadd.f32 %v3278_v34, %v1809_v28  ;;  %v3781_v63 = vmax.f32 %v3779_v44, %v3780_v62 }
 0x1e1   :  { %v1932_v0 = vmax.f32 %v1876_v29, 0.0  ;;  %v1878_v24 = vadd.f32 %v3283_v8, %v1810_v39  ;;  %v1292_v33 = vpop.f32.mrb[84].mxu0  ;;  %v3782_v29 = vld [vmem:[#allocation31_spill] sm:$0xff]  ;;  %v3783_v39 = vld [vmem:[#allocation32_spill] sm:$0xff] }
 0x1e2   :  { %v1714_v50 = vpop.f32.mrb[84].mxu1  ;;  %v1933_v51 = vmax.f32 %v1877_v23, 0.0  ;;  %v1389_v1 = vmax.f32 %v3766_v52, %v1292_v33  ;;  %v1294_v2 = vpop.f32.mrb[85].mxu0 }
 0x1e3   :  { %v1716_v37 = vpop.f32.mrb[85].mxu1  ;;  %v2361_v5 = vpack.c.bf16 %v1932_v0, %v1931_v58  ;;  %v1934_v31 = vmax.f32 %v1878_v24, 0.0  ;;  %v1390_v9 = vmax.f32 %v3769_v38, %v1294_v2  ;;  %v1296_v22 = vpop.f32.mrb[86].mxu0  ;;  %v3784_v58 = vmax.f32 %v3782_v29, %v3783_v39  ;;  %v3801_v29 = vld [vmem:[#allocation44_spill] sm:$0xff] }
 0x1e4   :  { %v1718_v36 = vpop.f32.mrb[86].mxu1  ;;  %v1811_v10 = vmax.f32 %v1389_v1, %v1714_v50  ;;  %v1391_v49 = vmax.f32 %v3772_v45, %v1296_v22  ;;  %v1298_v11 = vpop.f32.mrb[87].mxu0 }
 0x1e5   :  { %v1720_v27 = vpop.f32.mrb[87].mxu1  ;;  %2143 = vst [vmem:[%s3590_s3 + $0x60] sm:$0xff] %v2361_v5  ;;  %v2362_v42 = vpack.c.bf16 %v1934_v31, %v1933_v51  ;;  %v1812_v12 = vmax.f32 %v1390_v9, %v1716_v37  ;;  %v1392_v3 = vmax.f32 %v3775_v48, %v1298_v11  ;;  %v3785_v51 = vld [vmem:[#allocation33_spill] sm:$0xff] }
 0x1e6   :  { %v1879_v53 = vadd.f32 %v3278_v34, %v1811_v10  ;;  %v1813_v54 = vmax.f32 %v1391_v49, %v1718_v36  ;;  %v3787_v30 = vmax.f32 %v3785_v51, %v3786_v4  ;;  %v3788_v10 = vld [vmem:[#allocation35_spill] sm:$0xff]  ;;  %v3804_v51 = vld [vmem:[#allocation46_spill] sm:$0xff] }
 0x1e7   :  { %2144 = vst [vmem:[%s3590_s3 + $0x68] sm:$0xff] %v2362_v42  ;;  %v1880_v6 = vadd.f32 %v3283_v8, %v1812_v12  ;;  %v1814_v56 = vmax.f32 %v1392_v3, %v1720_v27  ;;  %v3790_v16 = vmax.f32 %v3788_v10, %v3789_v19  ;;  %v3791_v12 = vld [vmem:[#allocation37_spill] sm:$0xff]  ;;  %v3810_v10 = vld [vmem:[#allocation50_spill] sm:$0xff] }
 0x1e8   :  { %v1935_v57 = vmax.f32 %v1879_v53, 0.0  ;;  %v1881_v55 = vadd.f32 %v3278_v34, %v1813_v54  ;;  %v3793_v35 = vmax.f32 %v3791_v12, %v3792_v14 }
 0x1e9   :  { %v1936_v59 = vmax.f32 %v1880_v6, 0.0  ;;  %v1882_v60 = vadd.f32 %v3283_v8, %v1814_v56  ;;  %v1302_v61 = vpop.f32.mrb[88].mxu0  ;;  %v3794_v6 = vld [vmem:[#allocation39_spill] sm:$0xff]  ;;  %v3795_v56 = vld [vmem:[#allocation40_spill] sm:$0xff] }
 0x1ea   :  { %v1724_v40 = vpop.f32.mrb[88].mxu1  ;;  %v1937_v41 = vmax.f32 %v1881_v55, 0.0  ;;  %v1393_v20 = vmax.f32 %v3778_v13, %v1302_v61  ;;  %v1304_v21 = vpop.f32.mrb[89].mxu0 }
 0x1eb   :  { %v1726_v43 = vpop.f32.mrb[89].mxu1  ;;  %v2363_v25 = vpack.c.bf16 %v1936_v59, %v1935_v57  ;;  %v1938_v26 = vmax.f32 %v1882_v60, 0.0  ;;  %v1394_v15 = vmax.f32 %v3781_v63, %v1304_v21  ;;  %v1306_v46 = vpop.f32.mrb[90].mxu0  ;;  %v3796_v57 = vmax.f32 %v3794_v6, %v3795_v56  ;;  %v3813_v6 = vld [vmem:[#allocation52_spill] sm:$0xff] }
 0x1ec   :  { %v1728_v47 = vpop.f32.mrb[90].mxu1  ;;  %v1815_v28 = vmax.f32 %v1393_v20, %v1724_v40  ;;  %v1395_v23 = vmax.f32 %v3784_v58, %v1306_v46  ;;  %v1308_v0 = vpop.f32.mrb[91].mxu0 }
 0x1ed   :  { %v1730_v24 = vpop.f32.mrb[91].mxu1  ;;  %2145 = vst [vmem:[%s3590_s3 + $0x70] sm:$0xff] %v2363_v25  ;;  %v2364_v33 = vpack.c.bf16 %v1938_v26, %v1937_v41  ;;  %v1816_v50 = vmax.f32 %v1394_v15, %v1726_v43  ;;  %v1396_v52 = vmax.f32 %v3787_v30, %v1308_v0  ;;  %v3797_v41 = vld [vmem:[#allocation41_spill] sm:$0xff] }
 0x1ee   :  { %v1883_v1 = vadd.f32 %v3278_v34, %v1815_v28  ;;  %v1817_v2 = vmax.f32 %v1395_v23, %v1728_v47  ;;  %v3799_v18 = vmax.f32 %v3797_v41, %v3798_v17  ;;  %v3800_v28 = vld [vmem:[#allocation43_spill] sm:$0xff]  ;;  %v3816_v41 = vld [vmem:[#allocation54_spill] sm:$0xff] }
 0x1ef   :  { %2146 = vst [vmem:[%s3590_s3 + $0x78] sm:$0xff] %v2364_v33  ;;  %v1884_v37 = vadd.f32 %v3283_v8, %v1816_v50  ;;  %v1818_v5 = vmax.f32 %v1396_v52, %v1730_v24  ;;  %v3802_v39 = vmax.f32 %v3800_v28, %v3801_v29  ;;  %v3803_v50 = vld [vmem:[#allocation45_spill] sm:$0xff]  ;;  %v3822_v28 = vld [vmem:[#allocation58_spill] sm:$0xff] }
 0x1f0   :  { %v1939_v31 = vmax.f32 %v1883_v1, 0.0  ;;  %v1885_v32 = vadd.f32 %v3278_v34, %v1817_v2  ;;  %v3805_v4 = vmax.f32 %v3803_v50, %v3804_v51 }
 0x1f1   :  { %v1940_v7 = vmax.f32 %v1884_v37, 0.0  ;;  %v1886_v38 = vadd.f32 %v3283_v8, %v1818_v5  ;;  %v1312_v9 = vpop.f32.mrb[92].mxu0  ;;  %v3806_v37 = vld [vmem:[#allocation47_spill] sm:$0xff]  ;;  %v3807_v5 = vld [vmem:[#allocation48_spill] sm:$0xff] }
 0x1f2   :  { %v1734_v22 = vpop.f32.mrb[92].mxu1  ;;  %v1941_v36 = vmax.f32 %v1885_v32, 0.0  ;;  %v1397_v45 = vmax.f32 %v3790_v16, %v1312_v9  ;;  %v1314_v49 = vpop.f32.mrb[93].mxu0 }
 0x1f3   :  { %v1736_v11 = vpop.f32.mrb[93].mxu1  ;;  %v2365_v27 = vpack.c.bf16 %v1940_v7, %v1939_v31  ;;  %v1942_v42 = vmax.f32 %v1886_v38, 0.0  ;;  %v1398_v48 = vmax.f32 %v3793_v35, %v1314_v49  ;;  %v1316_v3 = vpop.f32.mrb[94].mxu0  ;;  %v3808_v31 = vmax.f32 %v3806_v37, %v3807_v5  ;;  %v3825_v37 = vld [vmem:[#allocation60_spill] sm:$0xff] }
 0x1f4   :  { %v1738_v53 = vpop.f32.mrb[94].mxu1  ;;  %v1819_v54 = vmax.f32 %v1397_v45, %v1734_v22  ;;  %v1399_v55 = vmax.f32 %v3796_v57, %v1316_v3  ;;  %v1318_v59 = vpop.f32.mrb[95].mxu0 }
 0x1f5   :  { %v1740_v60 = vpop.f32.mrb[95].mxu1  ;;  %2147 = vst [vmem:[%s3590_s3 + $0x80] sm:$0xff] %v2365_v27  ;;  %v2366_v61 = vpack.c.bf16 %v1942_v42, %v1941_v36  ;;  %v1820_v40 = vmax.f32 %v1398_v48, %v1736_v11  ;;  %v1400_v13 = vmax.f32 %v3799_v18, %v1318_v59  ;;  %v3809_v36 = vld [vmem:[#allocation49_spill] sm:$0xff] }
 0x1f6   :  { %v1887_v20 = vadd.f32 %v3278_v34, %v1819_v54  ;;  %v1821_v21 = vmax.f32 %v1399_v55, %v1738_v53  ;;  %v3811_v19 = vmax.f32 %v3809_v36, %v3810_v10  ;;  %v3812_v54 = vld [vmem:[#allocation51_spill] sm:$0xff]  ;;  %v3828_v36 = vld [vmem:[#allocation62_spill] sm:$0xff] }
 0x1f7   :  { %2148 = vst [vmem:[%s3590_s3 + $0x88] sm:$0xff] %v2366_v61  ;;  %v1888_v43 = vadd.f32 %v3283_v8, %v1820_v40  ;;  %v1822_v25 = vmax.f32 %v1400_v13, %v1740_v60  ;;  %v3814_v56 = vmax.f32 %v3812_v54, %v3813_v6  ;;  %v3815_v40 = vld [vmem:[#allocation53_spill] sm:$0xff]  ;;  %v3834_v54 = vld [vmem:[#allocation66_spill] sm:$0xff] }
 0x1f8   :  { %v1943_v26 = vmax.f32 %v1887_v20, 0.0  ;;  %v1889_v44 = vadd.f32 %v3278_v34, %v1821_v21  ;;  %v3817_v17 = vmax.f32 %v3815_v40, %v3816_v41 }
 0x1f9   :  { %v1944_v62 = vmax.f32 %v1888_v43, 0.0  ;;  %v1890_v63 = vadd.f32 %v3283_v8, %v1822_v25  ;;  %v1322_v15 = vpop.f32.mrb[96].mxu0  ;;  %v3818_v43 = vld [vmem:[#allocation55_spill] sm:$0xff]  ;;  %v3819_v25 = vld [vmem:[#allocation56_spill] sm:$0xff] }
 0x1fa   :  { %v1744_v46 = vpop.f32.mrb[96].mxu1  ;;  %v1945_v47 = vmax.f32 %v1889_v44, 0.0  ;;  %v1401_v58 = vmax.f32 %v3802_v39, %v1322_v15  ;;  %v1324_v23 = vpop.f32.mrb[97].mxu0 }
 0x1fb   :  { %v1746_v0 = vpop.f32.mrb[97].mxu1  ;;  %v2367_v24 = vpack.c.bf16 %v1944_v62, %v1943_v26  ;;  %v1946_v33 = vmax.f32 %v1890_v63, 0.0  ;;  %v1402_v30 = vmax.f32 %v3805_v4, %v1324_v23  ;;  %v1326_v52 = vpop.f32.mrb[98].mxu0  ;;  %v3820_v26 = vmax.f32 %v3818_v43, %v3819_v25  ;;  %v3837_v43 = vld [vmem:[#allocation68_spill] sm:$0xff] }
 0x1fc   :  { %v1748_v1 = vpop.f32.mrb[98].mxu1  ;;  %v1823_v2 = vmax.f32 %v1401_v58, %v1744_v46  ;;  %v1403_v32 = vmax.f32 %v3808_v31, %v1326_v52  ;;  %v1328_v7 = vpop.f32.mrb[99].mxu0 }
 0x1fd   :  { %v1750_v38 = vpop.f32.mrb[99].mxu1  ;;  %2149 = vst [vmem:[%s3590_s3 + $0x90] sm:$0xff] %v2367_v24  ;;  %v2368_v9 = vpack.c.bf16 %v1946_v33, %v1945_v47  ;;  %v1824_v22 = vmax.f32 %v1402_v30, %v1746_v0  ;;  %v1404_v16 = vmax.f32 %v3811_v19, %v1328_v7  ;;  %v3821_v47 = vld [vmem:[#allocation57_spill] sm:$0xff] }
 0x1fe   :  { %v1891_v45 = vadd.f32 %v3278_v34, %v1823_v2  ;;  %v1825_v49 = vmax.f32 %v1403_v32, %v1748_v1  ;;  %v3823_v29 = vmax.f32 %v3821_v47, %v3822_v28  ;;  %v3824_v2 = vld [vmem:[#allocation59_spill] sm:$0xff]  ;;  %v3840_v47 = vld [vmem:[#allocation70_spill] sm:$0xff] }
 0x1ff   :  { %2150 = vst [vmem:[%s3590_s3 + $0x98] sm:$0xff] %v2368_v9  ;;  %v1892_v11 = vadd.f32 %v3283_v8, %v1824_v22  ;;  %v1826_v27 = vmax.f32 %v1404_v16, %v1750_v38  ;;  %v3826_v5 = vmax.f32 %v3824_v2, %v3825_v37  ;;  %v3827_v22 = vld [vmem:[#allocation61_spill] sm:$0xff]  ;;  %v3846_v2 = vld [vmem:[#allocation74_spill] sm:$0xff] }
 0x200   :  { %v1947_v42 = vmax.f32 %v1891_v45, 0.0  ;;  %v1893_v12 = vadd.f32 %v3278_v34, %v1825_v49  ;;  %v3829_v10 = vmax.f32 %v3827_v22, %v3828_v36 }
 0x201   :  { %v1948_v14 = vmax.f32 %v1892_v11, 0.0  ;;  %v1894_v35 = vadd.f32 %v3283_v8, %v1826_v27  ;;  %v1332_v48 = vpop.f32.mrb[100].mxu0  ;;  %v3830_v11 = vld [vmem:[#allocation63_spill] sm:$0xff]  ;;  %v3831_v27 = vld [vmem:[#allocation64_spill] sm:$0xff] }
 0x202   :  { %v1754_v3 = vpop.f32.mrb[100].mxu1  ;;  %v1949_v53 = vmax.f32 %v1893_v12, 0.0  ;;  %v1405_v57 = vmax.f32 %v3814_v56, %v1332_v48  ;;  %v1334_v55 = vpop.f32.mrb[101].mxu0 }
 0x203   :  { %v1756_v59 = vpop.f32.mrb[101].mxu1  ;;  %v2369_v60 = vpack.c.bf16 %v1948_v14, %v1947_v42  ;;  %v1950_v61 = vmax.f32 %v1894_v35, 0.0  ;;  %v1406_v18 = vmax.f32 %v3817_v17, %v1334_v55  ;;  %v1336_v13 = vpop.f32.mrb[102].mxu0  ;;  %v3832_v42 = vmax.f32 %v3830_v11, %v3831_v27 }
 0x204   :  { %v1758_v20 = vpop.f32.mrb[102].mxu1  ;;  %v1827_v21 = vmax.f32 %v1405_v57, %v1754_v3  ;;  %v1407_v44 = vmax.f32 %v3820_v26, %v1336_v13  ;;  %v1338_v62 = vpop.f32.mrb[103].mxu0 }
 0x205   :  { %v1760_v63 = vpop.f32.mrb[103].mxu1  ;;  %2151 = vst [vmem:[%s3590_s3 + $0xa0] sm:$0xff] %v2369_v60  ;;  %v2370_v15 = vpack.c.bf16 %v1950_v61, %v1949_v53  ;;  %v1828_v46 = vmax.f32 %v1406_v18, %v1756_v59  ;;  %v1408_v39 = vmax.f32 %v3823_v29, %v1338_v62  ;;  %v3833_v53 = vld [vmem:[#allocation65_spill] sm:$0xff] }
 0x206   :  { %v1895_v58 = vadd.f32 %v3278_v34, %v1827_v21  ;;  %v1829_v23 = vmax.f32 %v1407_v44, %v1758_v20  ;;  %v3835_v6 = vmax.f32 %v3833_v53, %v3834_v54  ;;  %v3836_v21 = vld [vmem:[#allocation67_spill] sm:$0xff] }
 0x207   :  { %2152 = vst [vmem:[%s3590_s3 + $0xa8] sm:$0xff] %v2370_v15  ;;  %v1896_v0 = vadd.f32 %v3283_v8, %v1828_v46  ;;  %v1830_v24 = vmax.f32 %v1408_v39, %v1760_v63  ;;  %v3838_v25 = vmax.f32 %v3836_v21, %v3837_v43  ;;  %v3839_v46 = vld [vmem:[#allocation69_spill] sm:$0xff] }
 0x208   :  { %v1951_v33 = vmax.f32 %v1895_v58, 0.0  ;;  %v1897_v50 = vadd.f32 %v3278_v34, %v1829_v23  ;;  %v3841_v28 = vmax.f32 %v3839_v46, %v3840_v47 }
 0x209   :  { %v1952_v51 = vmax.f32 %v1896_v0, 0.0  ;;  %v1898_v4 = vadd.f32 %v3283_v8, %v1830_v24  ;;  %v1342_v30 = vpop.f32.mrb[104].mxu0  ;;  %v3842_v0 = vld [vmem:[#allocation71_spill] sm:$0xff]  ;;  %v3843_v24 = vld [vmem:[#allocation72_spill] sm:$0xff] }
 0x20a   :  { %v1764_v52 = vpop.f32.mrb[104].mxu1  ;;  %v1953_v1 = vmax.f32 %v1897_v50, 0.0  ;;  %v1409_v31 = vmax.f32 %v3826_v5, %v1342_v30  ;;  %v1344_v32 = vpop.f32.mrb[105].mxu0 }
 0x20b   :  { %v1766_v7 = vpop.f32.mrb[105].mxu1  ;;  %v2371_v38 = vpack.c.bf16 %v1952_v51, %v1951_v33  ;;  %v1954_v9 = vmax.f32 %v1898_v4, 0.0  ;;  %v1410_v19 = vmax.f32 %v3829_v10, %v1344_v32  ;;  %v1346_v16 = vpop.f32.mrb[106].mxu0  ;;  %v3844_v33 = vmax.f32 %v3842_v0, %v3843_v24 }
 0x20c   :  { %v1768_v45 = vpop.f32.mrb[106].mxu1  ;;  %v1831_v49 = vmax.f32 %v1409_v31, %v1764_v52  ;;  %v1411_v12 = vmax.f32 %v3832_v42, %v1346_v16  ;;  %v1348_v14 = vpop.f32.mrb[107].mxu0 }
 0x20d   :  { %v1770_v35 = vpop.f32.mrb[107].mxu1  ;;  %2153 = vst [vmem:[%s3590_s3 + $0xb0] sm:$0xff] %v2371_v38  ;;  %v2372_v48 = vpack.c.bf16 %v1954_v9, %v1953_v1  ;;  %v1832_v3 = vmax.f32 %v1410_v19, %v1766_v7  ;;  %v1412_v56 = vmax.f32 %v3835_v6, %v1348_v14  ;;  %v3845_v1 = vld [vmem:[#allocation73_spill] sm:$0xff] }
 0x20e   :  { %v1899_v57 = vadd.f32 %v3278_v34, %v1831_v49  ;;  %v1833_v55 = vmax.f32 %v1411_v12, %v1768_v45  ;;  %v3847_v37 = vmax.f32 %v3845_v1, %v3846_v2 }
 0x20f   :  { %2154 = vst [vmem:[%s3590_s3 + $0xb8] sm:$0xff] %v2372_v48  ;;  %v1900_v59 = vadd.f32 %v3283_v8, %v1832_v3  ;;  %v1834_v60 = vmax.f32 %v1412_v56, %v1770_v35 }
 0x210   :  { %v1955_v61 = vmax.f32 %v1899_v57, 0.0  ;;  %v1901_v40 = vadd.f32 %v3278_v34, %v1833_v55 }
 0x211   :  { %v1956_v41 = vmax.f32 %v1900_v59, 0.0  ;;  %v1902_v17 = vadd.f32 %v3283_v8, %v1834_v60  ;;  %v1352_v18 = vpop.f32.mrb[108].mxu0 }
 0x212   :  { %v1774_v13 = vpop.f32.mrb[108].mxu1  ;;  %v1957_v20 = vmax.f32 %v1901_v40, 0.0  ;;  %v1413_v26 = vmax.f32 %v3838_v25, %v1352_v18  ;;  %v1354_v44 = vpop.f32.mrb[109].mxu0 }
 0x213   :  { %v1776_v62 = vpop.f32.mrb[109].mxu1  ;;  %v2373_v63 = vpack.c.bf16 %v1956_v41, %v1955_v61  ;;  %v1958_v15 = vmax.f32 %v1902_v17, 0.0  ;;  %v1414_v29 = vmax.f32 %v3841_v28, %v1354_v44  ;;  %v1356_v39 = vpop.f32.mrb[110].mxu0 }
 0x214   :  { %v1778_v58 = vpop.f32.mrb[110].mxu1  ;;  %v1835_v23 = vmax.f32 %v1413_v26, %v1774_v13  ;;  %v1415_v50 = vmax.f32 %v3844_v33, %v1356_v39  ;;  %v1358_v51 = vpop.f32.mrb[111].mxu0 }
 0x215   :  { %v1780_v4 = vpop.f32.mrb[111].mxu1  ;;  %2155 = vst [vmem:[%s3590_s3 + $0xc0] sm:$0xff] %v2373_v63  ;;  %v2374_v30 = vpack.c.bf16 %v1958_v15, %v1957_v20  ;;  %v1836_v52 = vmax.f32 %v1414_v29, %v1776_v62  ;;  %v1416_v5 = vmax.f32 %v3847_v37, %v1358_v51 }
 0x216   :  { %v1903_v31 = vadd.f32 %v3278_v34, %v1835_v23  ;;  %v1837_v32 = vmax.f32 %v1415_v50, %v1778_v58 }
 0x217   :  { %2156 = vst [vmem:[%s3590_s3 + $0xc8] sm:$0xff] %v2374_v30  ;;  %v1904_v7 = vadd.f32 %v3283_v8, %v1836_v52  ;;  %v1838_v38 = vmax.f32 %v1416_v5, %v1780_v4 }
 0x218   :  { %v1959_v9 = vmax.f32 %v1903_v31, 0.0  ;;  %v1905_v22 = vadd.f32 %v3278_v34, %v1837_v32 }
 0x219   :  { %v1960_v36 = vmax.f32 %v1904_v7, 0.0  ;;  %v1906_v10 = vadd.f32 %v3283_v8, %v1838_v38 }
 0x21a   :  { %v1961_v19 = vmax.f32 %v1905_v22, 0.0 }
 0x21b   :  { %v2375_v16 = vpack.c.bf16 %v1960_v36, %v1959_v9  ;;  %v1962_v45 = vmax.f32 %v1906_v10, 0.0 }
 0x21d   :  { %2157 = vst [vmem:[%s3590_s3 + $0xd0] sm:$0xff] %v2375_v16  ;;  %v2376_v49 = vpack.c.bf16 %v1962_v45, %v1961_v19 }
 0x21f   :  { %2158 = vst [vmem:[%s3590_s3 + $0xd8] sm:$0xff] %v2376_v49 }
 0x220   :  { %2163 = vsyncpa [#allocation3], 1 }
 0x221   :  { %2164 = vsyncpa [#allocation5], 1 }

// kernel: mnist_cnn_forward.5
= control target key start
LH: loop header
LB: loop body
LE: loop exit
PB: predicated region body
PF: predicated region fallthrough
CT: control target
= control target key end

     0   :  { %s7304_s1 = inlined_call_operand.vmem [shape: bf16[1792,512], index: 1, kind: input, shape index: {}]   ;;  %s7305_s0 = inlined_call_operand.vmem [shape: bf16[16,1792], index: 0, kind: input, shape index: {}]   ;;  %s7306_s3 = inlined_call_operand.vmem [shape: bf16[512,256], index: 3, kind: input, shape index: {}]   ;;  %s7307_s2 = inlined_call_operand.vmem [shape: f32[1,512], index: 2, kind: input, shape index: {}]   ;;  %s7308_s5 = inlined_call_operand.vmem [shape: bf16[256,128], index: 5, kind: input, shape index: {}]   ;;  %s7309_s4 = inlined_call_operand.vmem [shape: f32[1,256], index: 4, kind: input, shape index: {}]   ;;  %s7310_s6 = inlined_call_operand.vmem [shape: f32[1,128], index: 6, kind: input, shape index: {}]   ;;  %s7311_s7 = inlined_call_operand.vmem [shape: f32[16,128], index: 7, kind: output, shape index: {}]  }
   0x1   :  { %v4734_v0 = vld [vmem:[%s7304_s1 + $0x4] ss:$16 sps:$4 sm:$0xff]   ;;  %v4738_v2 = vld [vmem:[%s7304_s1] ss:$16 sps:$4 sm:$0xff]  }
   0x2   :  { %v4736_v1 = vld [vmem:[%s7304_s1 + $0x204] ss:$16 sps:$4 sm:$0xff]   ;;  %2821 = vmatprep.subr.bf16.mxu1 %v4734_v0  ;;  %v4739_v3 = vld [vmem:[%s7304_s1 + $0x200] ss:$16 sps:$4 sm:$0xff]  }
   0x3   :  { %2864 = vmatprep.subr.bf16.mxu0 %v4736_v1  ;;  %v4740_v4 = vld [vmem:[%s7304_s1 + $0x24] ss:$16 sps:$4 sm:$0xff]   ;;  %2822 = vmatpush1.bf16.msra.mxu1 %v4738_v2  ;;  %v4744_v6 = vld [vmem:[%s7304_s1 + $0x20] ss:$16 sps:$4 sm:$0xff]  }
   0x4   :  { %2865 = vmatpush1.bf16.msra.mxu0 %v4739_v3  ;;  %v4742_v5 = vld [vmem:[%s7304_s1 + $0x224] ss:$16 sps:$4 sm:$0xff]   ;;  %2823 = vmatprep.subr.bf16.mxu1 %v4740_v4  ;;  %v4745_v7 = vld [vmem:[%s7304_s1 + $0x220] ss:$16 sps:$4 sm:$0xff]   ;;  %v4841_v3 = vld [vmem:[%s7304_s1 + $0xc] ss:$16 sps:$4 sm:$0xff]  }
   0x5   :  { %2866 = vmatprep.subr.bf16.mxu0 %v4742_v5  ;;  %v4746_v8 = vld [vmem:[%s7304_s1 + $0x44] ss:$16 sps:$4 sm:$0xff]   ;;  %v4750_v10 = vld [vmem:[%s7304_s1 + $0x40] ss:$16 sps:$4 sm:$0xff]  }
   0x6   :  { %v4748_v9 = vld [vmem:[%s7304_s1 + $0x244] ss:$16 sps:$4 sm:$0xff]   ;;  %v4751_v11 = vld [vmem:[%s7304_s1 + $0x240] ss:$16 sps:$4 sm:$0xff]  }
   0x7   :  { %2824 = vmatpush1.bf16.msra.mxu1 %v4744_v6  ;;  %v4752_v12 = vld [vmem:[%s7304_s1 + $0x64] ss:$16 sps:$4 sm:$0xff]   ;;  %v4756_v14 = vld [vmem:[%s7304_s1 + $0x60] ss:$16 sps:$4 sm:$0xff]  }
   0x8   :  { %2867 = vmatpush1.bf16.msra.mxu0 %v4745_v7  ;;  %2825 = vmatprep.subr.bf16.mxu1 %v4746_v8  ;;  %v4754_v13 = vld [vmem:[%s7304_s1 + $0x264] ss:$16 sps:$4 sm:$0xff]   ;;  %v4757_v15 = vld [vmem:[%s7304_s1 + $0x260] ss:$16 sps:$4 sm:$0xff]   ;;  %v4839_v7 = vld [vmem:[%s7304_s1 + $0x8] ss:$16 sps:$4 sm:$0xff]  }
   0x9   :  { %2868 = vmatprep.subr.bf16.mxu0 %v4748_v9  ;;  %v4758_v16 = vld [vmem:[%s7304_s1 + $0x84] ss:$16 sps:$4 sm:$0xff]   ;;  %v4762_v18 = vld [vmem:[%s7304_s1 + $0x80] ss:$16 sps:$4 sm:$0xff]   ;;  %v4847_v9 = vld [vmem:[%s7304_s1 + $0x2c] ss:$16 sps:$4 sm:$0xff]  }
   0xa   :  { %v4760_v17 = vld [vmem:[%s7304_s1 + $0x284] ss:$16 sps:$4 sm:$0xff]   ;;  %v4763_v19 = vld [vmem:[%s7304_s1 + $0x280] ss:$16 sps:$4 sm:$0xff]  }
   0xb   :  { %2826 = vmatpush1.bf16.msra.mxu1 %v4750_v10  ;;  %v4764_v20 = vld [vmem:[%s7304_s1 + $0xa4] ss:$16 sps:$4 sm:$0xff]   ;;  %v4768_v22 = vld [vmem:[%s7304_s1 + $0xa0] ss:$16 sps:$4 sm:$0xff]  }
   0xc   :  { %2869 = vmatpush1.bf16.msra.mxu0 %v4751_v11  ;;  %2827 = vmatprep.subr.bf16.mxu1 %v4752_v12  ;;  %v4766_v21 = vld [vmem:[%s7304_s1 + $0x2a4] ss:$16 sps:$4 sm:$0xff]   ;;  %v4769_v23 = vld [vmem:[%s7304_s1 + $0x2a0] ss:$16 sps:$4 sm:$0xff]   ;;  %v4845_v11 = vld [vmem:[%s7304_s1 + $0x28] ss:$16 sps:$4 sm:$0xff]  }
   0xd   :  { %2870 = vmatprep.subr.bf16.mxu0 %v4754_v13  ;;  %v4770_v24 = vld [vmem:[%s7304_s1 + $0xc4] ss:$16 sps:$4 sm:$0xff]   ;;  %v4774_v26 = vld [vmem:[%s7304_s1 + $0xc0] ss:$16 sps:$4 sm:$0xff]   ;;  %v4853_v13 = vld [vmem:[%s7304_s1 + $0x4c] ss:$16 sps:$4 sm:$0xff]  }
   0xe   :  { %v4772_v25 = vld [vmem:[%s7304_s1 + $0x2c4] ss:$16 sps:$4 sm:$0xff]   ;;  %v4775_v27 = vld [vmem:[%s7304_s1 + $0x2c0] ss:$16 sps:$4 sm:$0xff]  }
   0xf   :  { %2828 = vmatpush1.bf16.msra.mxu1 %v4756_v14  ;;  %v4776_v28 = vld [vmem:[%s7304_s1 + $0xe4] ss:$16 sps:$4 sm:$0xff]   ;;  %v4780_v30 = vld [vmem:[%s7304_s1 + $0xe0] ss:$16 sps:$4 sm:$0xff]  }
  0x10   :  { %2871 = vmatpush1.bf16.msra.mxu0 %v4757_v15  ;;  %2829 = vmatprep.subr.bf16.mxu1 %v4758_v16  ;;  %v4778_v29 = vld [vmem:[%s7304_s1 + $0x2e4] ss:$16 sps:$4 sm:$0xff]   ;;  %v4781_v31 = vld [vmem:[%s7304_s1 + $0x2e0] ss:$16 sps:$4 sm:$0xff]   ;;  %v4851_v15 = vld [vmem:[%s7304_s1 + $0x48] ss:$16 sps:$4 sm:$0xff]  }
  0x11   :  { %2872 = vmatprep.subr.bf16.mxu0 %v4760_v17  ;;  %v4782_v32 = vld [vmem:[%s7304_s1 + $0x104] ss:$16 sps:$4 sm:$0xff]   ;;  %v4786_v34 = vld [vmem:[%s7304_s1 + $0x100] ss:$16 sps:$4 sm:$0xff]   ;;  %v4859_v17 = vld [vmem:[%s7304_s1 + $0x6c] ss:$16 sps:$4 sm:$0xff]  }
  0x12   :  { %v4784_v33 = vld [vmem:[%s7304_s1 + $0x304] ss:$16 sps:$4 sm:$0xff]   ;;  %v4787_v35 = vld [vmem:[%s7304_s1 + $0x300] ss:$16 sps:$4 sm:$0xff]  }
  0x13   :  { %2830 = vmatpush1.bf16.msra.mxu1 %v4762_v18  ;;  %v4788_v36 = vld [vmem:[%s7304_s1 + $0x124] ss:$16 sps:$4 sm:$0xff]   ;;  %v4792_v38 = vld [vmem:[%s7304_s1 + $0x120] ss:$16 sps:$4 sm:$0xff]  }
  0x14   :  { %2873 = vmatpush1.bf16.msra.mxu0 %v4763_v19  ;;  %2831 = vmatprep.subr.bf16.mxu1 %v4764_v20  ;;  %v4790_v37 = vld [vmem:[%s7304_s1 + $0x324] ss:$16 sps:$4 sm:$0xff]   ;;  %v4793_v39 = vld [vmem:[%s7304_s1 + $0x320] ss:$16 sps:$4 sm:$0xff]   ;;  %v4857_v19 = vld [vmem:[%s7304_s1 + $0x68] ss:$16 sps:$4 sm:$0xff]  }
  0x15   :  { %2874 = vmatprep.subr.bf16.mxu0 %v4766_v21  ;;  %v4794_v40 = vld [vmem:[%s7304_s1 + $0x144] ss:$16 sps:$4 sm:$0xff]   ;;  %v4798_v42 = vld [vmem:[%s7304_s1 + $0x140] ss:$16 sps:$4 sm:$0xff]   ;;  %v4865_v21 = vld [vmem:[%s7304_s1 + $0x8c] ss:$16 sps:$4 sm:$0xff]  }
  0x16   :  { %v4796_v41 = vld [vmem:[%s7304_s1 + $0x344] ss:$16 sps:$4 sm:$0xff]   ;;  %v4799_v43 = vld [vmem:[%s7304_s1 + $0x340] ss:$16 sps:$4 sm:$0xff]  }
  0x17   :  { %2832 = vmatpush1.bf16.msra.mxu1 %v4768_v22  ;;  %v4800_v44 = vld [vmem:[%s7304_s1 + $0x164] ss:$16 sps:$4 sm:$0xff]   ;;  %v4804_v46 = vld [vmem:[%s7304_s1 + $0x160] ss:$16 sps:$4 sm:$0xff]  }
  0x18   :  { %2875 = vmatpush1.bf16.msra.mxu0 %v4769_v23  ;;  %2833 = vmatprep.subr.bf16.mxu1 %v4770_v24  ;;  %v4802_v45 = vld [vmem:[%s7304_s1 + $0x364] ss:$16 sps:$4 sm:$0xff]   ;;  %v4805_v47 = vld [vmem:[%s7304_s1 + $0x360] ss:$16 sps:$4 sm:$0xff]   ;;  %v4863_v23 = vld [vmem:[%s7304_s1 + $0x88] ss:$16 sps:$4 sm:$0xff]  }
  0x19   :  { %2876 = vmatprep.subr.bf16.mxu0 %v4772_v25  ;;  %v4806_v48 = vld [vmem:[%s7304_s1 + $0x184] ss:$16 sps:$4 sm:$0xff]   ;;  %v4810_v52 = vld [vmem:[%s7304_s1 + $0x180] ss:$16 sps:$4 sm:$0xff]   ;;  %v4871_v25 = vld [vmem:[%s7304_s1 + $0xac] ss:$16 sps:$4 sm:$0xff]  }
  0x1a   :  { %v4832_v49 = vld [vmem:[%s7305_s0 + $0x4] ss:$56 sps:$4 sm:$0xff]   ;;  %v4811_v53 = vld [vmem:[%s7304_s1 + $0x380] ss:$16 sps:$4 sm:$0xff]  }
  0x1b   :  { %2834 = vmatpush1.bf16.msra.mxu1 %v4774_v26  ;;  %v4808_v50 = vld [vmem:[%s7304_s1 + $0x384] ss:$16 sps:$4 sm:$0xff]   ;;  %2853 = vmatprep.mubr.bf16.mxu1 %v4832_v49  ;;  %v4816_v56 = vld [vmem:[%s7304_s1 + $0x1a0] ss:$16 sps:$4 sm:$0xff]  }
  0x1c   :  { %2877 = vmatpush1.bf16.msra.mxu0 %v4775_v27  ;;  %2835 = vmatprep.subr.bf16.mxu1 %v4776_v28  ;;  %v5735_v51 = vld [vmem:[%s7305_s0 + $0xc] ss:$56 sps:$4 sm:$0xff]   ;;  %v4817_v57 = vld [vmem:[%s7304_s1 + $0x3a0] ss:$16 sps:$4 sm:$0xff]   ;;  %v4869_v27 = vld [vmem:[%s7304_s1 + $0xa8] ss:$16 sps:$4 sm:$0xff]  }
  0x1d   :  { %2878 = vmatprep.subr.bf16.mxu0 %v4778_v29  ;;  %2896 = vmatprep.mubr.bf16.mxu0 %v5735_v51  ;;  %v4812_v54 = vld [vmem:[%s7304_s1 + $0x1a4] ss:$16 sps:$4 sm:$0xff]   ;;  %v4822_v60 = vld [vmem:[%s7304_s1 + $0x1c0] ss:$16 sps:$4 sm:$0xff]   ;;  %v4877_v29 = vld [vmem:[%s7304_s1 + $0xcc] ss:$16 sps:$4 sm:$0xff]  }
  0x1e   :  { %v4814_v55 = vld [vmem:[%s7304_s1 + $0x3a4] ss:$16 sps:$4 sm:$0xff]   ;;  %v4823_v61 = vld [vmem:[%s7304_s1 + $0x3c0] ss:$16 sps:$4 sm:$0xff]  }
  0x1f   :  { %2836 = vmatpush1.bf16.msra.mxu1 %v4780_v30  ;;  %v4818_v58 = vld [vmem:[%s7304_s1 + $0x1c4] ss:$16 sps:$4 sm:$0xff]   ;;  %v4828_v0 = vld [vmem:[%s7304_s1 + $0x1e0] ss:$16 sps:$4 sm:$0xff]  }
  0x20   :  { %2879 = vmatpush1.bf16.msra.mxu0 %v4781_v31  ;;  %2837 = vmatprep.subr.bf16.mxu1 %v4782_v32  ;;  %v4820_v59 = vld [vmem:[%s7304_s1 + $0x3c4] ss:$16 sps:$4 sm:$0xff]   ;;  %v4829_v1 = vld [vmem:[%s7304_s1 + $0x3e0] ss:$16 sps:$4 sm:$0xff]   ;;  %v4875_v31 = vld [vmem:[%s7304_s1 + $0xc8] ss:$16 sps:$4 sm:$0xff]  }
  0x21   :  { %2880 = vmatprep.subr.bf16.mxu0 %v4784_v33  ;;  %v4824_v62 = vld [vmem:[%s7304_s1 + $0x1e4] ss:$16 sps:$4 sm:$0xff]   ;;  %v5789_v4 = vld [vmem:[%s7305_s0] ss:$56 sps:$4 sm:$0xff]   ;;  %v4883_v33 = vld [vmem:[%s7304_s1 + $0xec] ss:$16 sps:$4 sm:$0xff]  }
  0x22   :  { %v4826_v63 = vld [vmem:[%s7304_s1 + $0x3e4] ss:$16 sps:$4 sm:$0xff]   ;;  %v5794_v5 = vld [vmem:[%s7305_s0 + $0x8] ss:$56 sps:$4 sm:$0xff]  }
  0x23   :  { %2838 = vmatpush1.bf16.msra.mxu1 %v4786_v34  ;;  %v4838_v2 = vld [vmem:[%s7304_s1 + $0x404] ss:$16 sps:$4 sm:$0xff]   ;;  %v4836_v6 = vld [vmem:[%s7304_s1 + $0x400] ss:$16 sps:$4 sm:$0xff]  }
  0x24   :  { %2881 = vmatpush1.bf16.msra.mxu0 %v4787_v35  ;;  %2839 = vmatprep.subr.bf16.mxu1 %v4788_v36  ;;  %v4844_v8 = vld [vmem:[%s7304_s1 + $0x424] ss:$16 sps:$4 sm:$0xff]   ;;  %v4842_v10 = vld [vmem:[%s7304_s1 + $0x420] ss:$16 sps:$4 sm:$0xff]   ;;  %v4881_v36 = vld [vmem:[%s7304_s1 + $0xe8] ss:$16 sps:$4 sm:$0xff]  }
  0x25   :  { %2882 = vmatprep.subr.bf16.mxu0 %v4790_v37  ;;  %v4850_v12 = vld [vmem:[%s7304_s1 + $0x444] ss:$16 sps:$4 sm:$0xff]   ;;  %v4848_v14 = vld [vmem:[%s7304_s1 + $0x440] ss:$16 sps:$4 sm:$0xff]  }
  0x26   :  { %v4856_v16 = vld [vmem:[%s7304_s1 + $0x464] ss:$16 sps:$4 sm:$0xff]   ;;  %v4854_v18 = vld [vmem:[%s7304_s1 + $0x460] ss:$16 sps:$4 sm:$0xff]  }
  0x27   :  { %2840 = vmatpush1.bf16.msra.mxu1 %v4792_v38  ;;  %v4862_v20 = vld [vmem:[%s7304_s1 + $0x484] ss:$16 sps:$4 sm:$0xff]   ;;  %v4860_v22 = vld [vmem:[%s7304_s1 + $0x480] ss:$16 sps:$4 sm:$0xff]   ;;  %v4889_v38 = vld [vmem:[%s7304_s1 + $0x10c] ss:$16 sps:$4 sm:$0xff]  }
  0x28   :  { %2883 = vmatpush1.bf16.msra.mxu0 %v4793_v39  ;;  %2841 = vmatprep.subr.bf16.mxu1 %v4794_v40  ;;  %v4868_v24 = vld [vmem:[%s7304_s1 + $0x4a4] ss:$16 sps:$4 sm:$0xff]   ;;  %v4866_v26 = vld [vmem:[%s7304_s1 + $0x4a0] ss:$16 sps:$4 sm:$0xff]   ;;  %v4887_v40 = vld [vmem:[%s7304_s1 + $0x108] ss:$16 sps:$4 sm:$0xff]  }
  0x29   :  { %2884 = vmatprep.subr.bf16.mxu0 %v4796_v41  ;;  %v4874_v28 = vld [vmem:[%s7304_s1 + $0x4c4] ss:$16 sps:$4 sm:$0xff]   ;;  %v4872_v30 = vld [vmem:[%s7304_s1 + $0x4c0] ss:$16 sps:$4 sm:$0xff]  }
  0x2a   :  { %v4880_v32 = vld [vmem:[%s7304_s1 + $0x4e4] ss:$16 sps:$4 sm:$0xff]   ;;  %v4878_v35 = vld [vmem:[%s7304_s1 + $0x4e0] ss:$16 sps:$4 sm:$0xff]  }
  0x2b   :  { %2842 = vmatpush1.bf16.msra.mxu1 %v4798_v42  ;;  %v5885_v34 = vld [vmem:[%s7305_s0 + $0x14] ss:$56 sps:$4 sm:$0xff]   ;;  %v4884_v39 = vld [vmem:[%s7304_s1 + $0x500] ss:$16 sps:$4 sm:$0xff]  }
  0x2c   :  { %2885 = vmatpush1.bf16.msra.mxu0 %v4799_v43  ;;  %2843 = vmatprep.subr.bf16.mxu1 %v4800_v44  ;;  %v4886_v37 = vld [vmem:[%s7304_s1 + $0x504] ss:$16 sps:$4 sm:$0xff]   ;;  %v4895_v42 = vld [vmem:[%s7304_s1 + $0x12c] ss:$16 sps:$4 sm:$0xff]   ;;  %v4890_v43 = vld [vmem:[%s7304_s1 + $0x520] ss:$16 sps:$4 sm:$0xff]  }
  0x2d   :  { %2886 = vmatprep.subr.bf16.mxu0 %v4802_v45  ;;  %v4892_v41 = vld [vmem:[%s7304_s1 + $0x524] ss:$16 sps:$4 sm:$0xff]   ;;  %v4893_v44 = vld [vmem:[%s7304_s1 + $0x128] ss:$16 sps:$4 sm:$0xff]  }
  0x2e   :  { %v4898_v45 = vld [vmem:[%s7304_s1 + $0x544] ss:$16 sps:$4 sm:$0xff]  }
  0x2f   :  { %2844 = vmatpush1.bf16.msra.mxu1 %v4804_v46  ;;  %v4901_v46 = vld [vmem:[%s7304_s1 + $0x14c] ss:$16 sps:$4 sm:$0xff]  }
  0x30   :  { %2887 = vmatpush1.bf16.msra.mxu0 %v4805_v47  ;;  %2845 = vmatprep.subr.bf16.mxu1 %v4806_v48  ;;  %v4896_v47 = vld [vmem:[%s7304_s1 + $0x540] ss:$16 sps:$4 sm:$0xff]   ;;  %v4899_v48 = vld [vmem:[%s7304_s1 + $0x148] ss:$16 sps:$4 sm:$0xff]  }
  0x31   :  { %2888 = vmatprep.subr.bf16.mxu0 %v4808_v50  ;;  %v4907_v50 = vld [vmem:[%s7304_s1 + $0x16c] ss:$16 sps:$4 sm:$0xff]  }
  0x33   :  { %2846 = vmatpush1.bf16.msra.mxu1 %v4810_v52  ;;  %v4902_v52 = vld [vmem:[%s7304_s1 + $0x560] ss:$16 sps:$4 sm:$0xff]  }
  0x34   :  { %2889 = vmatpush1.bf16.msra.mxu0 %v4811_v53  ;;  %2847 = vmatprep.subr.bf16.mxu1 %v4812_v54  ;;  %v4905_v53 = vld [vmem:[%s7304_s1 + $0x168] ss:$16 sps:$4 sm:$0xff]   ;;  %v4910_v54 = vld [vmem:[%s7304_s1 + $0x584] ss:$16 sps:$4 sm:$0xff]  }
  0x35   :  { %2890 = vmatprep.subr.bf16.mxu0 %v4814_v55  ;;  %v4913_v55 = vld [vmem:[%s7304_s1 + $0x18c] ss:$16 sps:$4 sm:$0xff]  }
  0x37   :  { %2848 = vmatpush1.bf16.msra.mxu1 %v4816_v56  ;;  %v4908_v56 = vld [vmem:[%s7304_s1 + $0x580] ss:$16 sps:$4 sm:$0xff]  }
  0x38   :  { %2891 = vmatpush1.bf16.msra.mxu0 %v4817_v57  ;;  %2849 = vmatprep.subr.bf16.mxu1 %v4818_v58  ;;  %v4911_v57 = vld [vmem:[%s7304_s1 + $0x188] ss:$16 sps:$4 sm:$0xff]   ;;  %v4916_v58 = vld [vmem:[%s7304_s1 + $0x5a4] ss:$16 sps:$4 sm:$0xff]  }
  0x39   :  { %2892 = vmatprep.subr.bf16.mxu0 %v4820_v59  ;;  %v4919_v59 = vld [vmem:[%s7304_s1 + $0x1ac] ss:$16 sps:$4 sm:$0xff]  }
  0x3b   :  { %2850 = vmatpush1.bf16.msra.mxu1 %v4822_v60  ;;  %v4914_v60 = vld [vmem:[%s7304_s1 + $0x5a0] ss:$16 sps:$4 sm:$0xff]  }
  0x3c   :  { %2893 = vmatpush1.bf16.msra.mxu0 %v4823_v61  ;;  %2851 = vmatprep.subr.bf16.mxu1 %v4824_v62  ;;  %v4917_v61 = vld [vmem:[%s7304_s1 + $0x1a8] ss:$16 sps:$4 sm:$0xff]   ;;  %v4922_v62 = vld [vmem:[%s7304_s1 + $0x5c4] ss:$16 sps:$4 sm:$0xff]  }
  0x3d   :  { %2894 = vmatprep.subr.bf16.mxu0 %v4826_v63  ;;  %v4925_v63 = vld [vmem:[%s7304_s1 + $0x1cc] ss:$16 sps:$4 sm:$0xff]  }
  0x3f   :  { %2852 = vmatpush1.bf16.msra.mxu1 %v4828_v0  ;;  %v4920_v0 = vld [vmem:[%s7304_s1 + $0x5c0] ss:$16 sps:$4 sm:$0xff]  }
  0x40   :  { %2895 = vmatpush1.bf16.msra.mxu0 %v4829_v1  ;;  %3122 = vmatprep.subr.bf16.mxu1 %v4841_v3  ;;  %v4923_v1 = vld [vmem:[%s7304_s1 + $0x1c8] ss:$16 sps:$4 sm:$0xff]   ;;  %v4931_v3 = vld [vmem:[%s7304_s1 + $0x1ec] ss:$16 sps:$4 sm:$0xff]  }
  0x41   :  { %2907 = vmatprep.subr.bf16.mxu0 %v4838_v2  ;;  %v4928_v2 = vld [vmem:[%s7304_s1 + $0x5e4] ss:$16 sps:$4 sm:$0xff]  }
  0x42   :  { %2854 = vmatmul.mubr.bf16.vlgmr.msra.gmra.mrb[0].mxu1 %v5789_v4 }
  0x43   :  { %2897 = vmatmul.mubr.bf16.vlgmr.msra.gmra.mrb[0].mxu0 %v5794_v5  ;;  %3123 = vmatpush1.bf16.msra.mxu1 %v4839_v7  ;;  %v4929_v7 = vld [vmem:[%s7304_s1 + $0x1e8] ss:$16 sps:$4 sm:$0xff]  }
  0x44   :  { %2908 = vmatpush1.bf16.msra.mxu0 %v4836_v6  ;;  %3124 = vmatprep.subr.bf16.mxu1 %v4847_v9  ;;  %v4926_v6 = vld [vmem:[%s7304_s1 + $0x5e0] ss:$16 sps:$4 sm:$0xff]   ;;  %v4940_v9 = vld [vmem:[%s7304_s1 + $0x20c] ss:$16 sps:$4 sm:$0xff]  }
  0x45   :  { %2909 = vmatprep.subr.bf16.mxu0 %v4844_v8  ;;  %3154 = vmatprep.mubr.bf16.mxu1 %v4832_v49  ;;  %v4904_v49 = vld [vmem:[%s7304_s1 + $0x564] ss:$16 sps:$4 sm:$0xff]  }
  0x46   :  { %2939 = vmatprep.mubr.bf16.mxu0 %v5885_v34  ;;  %v4937_v8 = vld [vmem:[%s7304_s1 + $0x604] ss:$16 sps:$4 sm:$0xff]  }
  0x47   :  { %3125 = vmatpush1.bf16.msra.mxu1 %v4845_v11  ;;  %v4935_v11 = vld [vmem:[%s7304_s1 + $0x600] ss:$16 sps:$4 sm:$0xff]  }
  0x48   :  { %2910 = vmatpush1.bf16.msra.mxu0 %v4842_v10  ;;  %3126 = vmatprep.subr.bf16.mxu1 %v4853_v13  ;;  %v5999_v10 = vld [vmem:[%s7305_s0 + $0x10] ss:$56 sps:$4 sm:$0xff]   ;;  %v4943_v13 = vld [vmem:[%s7304_s1 + $0x624] ss:$16 sps:$4 sm:$0xff]  }
  0x49   :  { %2911 = vmatprep.subr.bf16.mxu0 %v4850_v12  ;;  %v4938_v12 = vld [vmem:[%s7304_s1 + $0x208] ss:$16 sps:$4 sm:$0xff]  }
  0x4b   :  { %3127 = vmatpush1.bf16.msra.mxu1 %v4851_v15  ;;  %v4941_v15 = vld [vmem:[%s7304_s1 + $0x620] ss:$16 sps:$4 sm:$0xff]  }
  0x4c   :  { %2912 = vmatpush1.bf16.msra.mxu0 %v4848_v14  ;;  %3128 = vmatprep.subr.bf16.mxu1 %v4859_v17  ;;  %v4946_v14 = vld [vmem:[%s7304_s1 + $0x22c] ss:$16 sps:$4 sm:$0xff]   ;;  %v4949_v17 = vld [vmem:[%s7304_s1 + $0x644] ss:$16 sps:$4 sm:$0xff]  }
  0x4d   :  { %2913 = vmatprep.subr.bf16.mxu0 %v4856_v16  ;;  %v4944_v16 = vld [vmem:[%s7304_s1 + $0x228] ss:$16 sps:$4 sm:$0xff]  }
  0x4f   :  { %3129 = vmatpush1.bf16.msra.mxu1 %v4857_v19  ;;  %v4947_v19 = vld [vmem:[%s7304_s1 + $0x640] ss:$16 sps:$4 sm:$0xff]  }
  0x50   :  { %2914 = vmatpush1.bf16.msra.mxu0 %v4854_v18  ;;  %3130 = vmatprep.subr.bf16.mxu1 %v4865_v21  ;;  %v4952_v18 = vld [vmem:[%s7304_s1 + $0x24c] ss:$16 sps:$4 sm:$0xff]   ;;  %v4955_v21 = vld [vmem:[%s7304_s1 + $0x664] ss:$16 sps:$4 sm:$0xff]  }
  0x51   :  { %2915 = vmatprep.subr.bf16.mxu0 %v4862_v20  ;;  %v4950_v20 = vld [vmem:[%s7304_s1 + $0x248] ss:$16 sps:$4 sm:$0xff]  }
  0x53   :  { %3131 = vmatpush1.bf16.msra.mxu1 %v4863_v23  ;;  %v4956_v23 = vld [vmem:[%s7304_s1 + $0x268] ss:$16 sps:$4 sm:$0xff]  }
  0x54   :  { %2916 = vmatpush1.bf16.msra.mxu0 %v4860_v22  ;;  %3132 = vmatprep.subr.bf16.mxu1 %v4871_v25  ;;  %v4953_v22 = vld [vmem:[%s7304_s1 + $0x660] ss:$16 sps:$4 sm:$0xff]   ;;  %v4964_v25 = vld [vmem:[%s7304_s1 + $0x28c] ss:$16 sps:$4 sm:$0xff]  }
  0x55   :  { %2917 = vmatprep.subr.bf16.mxu0 %v4868_v24  ;;  %v4961_v24 = vld [vmem:[%s7304_s1 + $0x684] ss:$16 sps:$4 sm:$0xff]  }
  0x57   :  { %3133 = vmatpush1.bf16.msra.mxu1 %v4869_v27  ;;  %v4962_v27 = vld [vmem:[%s7304_s1 + $0x288] ss:$16 sps:$4 sm:$0xff]  }
  0x58   :  { %2918 = vmatpush1.bf16.msra.mxu0 %v4866_v26  ;;  %3134 = vmatprep.subr.bf16.mxu1 %v4877_v29  ;;  %v4959_v26 = vld [vmem:[%s7304_s1 + $0x680] ss:$16 sps:$4 sm:$0xff]   ;;  %v4970_v29 = vld [vmem:[%s7304_s1 + $0x2ac] ss:$16 sps:$4 sm:$0xff]  }
  0x59   :  { %2919 = vmatprep.subr.bf16.mxu0 %v4874_v28  ;;  %v4967_v28 = vld [vmem:[%s7304_s1 + $0x6a4] ss:$16 sps:$4 sm:$0xff]  }
  0x5b   :  { %3135 = vmatpush1.bf16.msra.mxu1 %v4875_v31  ;;  %v4968_v31 = vld [vmem:[%s7304_s1 + $0x2a8] ss:$16 sps:$4 sm:$0xff]  }
  0x5c   :  { %2920 = vmatpush1.bf16.msra.mxu0 %v4872_v30  ;;  %3136 = vmatprep.subr.bf16.mxu1 %v4883_v33  ;;  %v4965_v30 = vld [vmem:[%s7304_s1 + $0x6a0] ss:$16 sps:$4 sm:$0xff]   ;;  %v4976_v33 = vld [vmem:[%s7304_s1 + $0x2cc] ss:$16 sps:$4 sm:$0xff]  }
  0x5d   :  { %2921 = vmatprep.subr.bf16.mxu0 %v4880_v32  ;;  %v4973_v32 = vld [vmem:[%s7304_s1 + $0x6c4] ss:$16 sps:$4 sm:$0xff]  }
  0x5f   :  { %3137 = vmatpush1.bf16.msra.mxu1 %v4881_v36  ;;  %v4974_v36 = vld [vmem:[%s7304_s1 + $0x2c8] ss:$16 sps:$4 sm:$0xff]  }
  0x60   :  { %2922 = vmatpush1.bf16.msra.mxu0 %v4878_v35  ;;  %3138 = vmatprep.subr.bf16.mxu1 %v4889_v38  ;;  %v4971_v35 = vld [vmem:[%s7304_s1 + $0x6c0] ss:$16 sps:$4 sm:$0xff]   ;;  %v4982_v38 = vld [vmem:[%s7304_s1 + $0x2ec] ss:$16 sps:$4 sm:$0xff]  }
  0x61   :  { %2923 = vmatprep.subr.bf16.mxu0 %v4886_v37  ;;  %v4979_v37 = vld [vmem:[%s7304_s1 + $0x6e4] ss:$16 sps:$4 sm:$0xff]  }
  0x63   :  { %3139 = vmatpush1.bf16.msra.mxu1 %v4887_v40  ;;  %v4980_v40 = vld [vmem:[%s7304_s1 + $0x2e8] ss:$16 sps:$4 sm:$0xff]  }
  0x64   :  { %2924 = vmatpush1.bf16.msra.mxu0 %v4884_v39  ;;  %3140 = vmatprep.subr.bf16.mxu1 %v4895_v42  ;;  %v4977_v39 = vld [vmem:[%s7304_s1 + $0x6e0] ss:$16 sps:$4 sm:$0xff]   ;;  %v4988_v42 = vld [vmem:[%s7304_s1 + $0x30c] ss:$16 sps:$4 sm:$0xff]  }
  0x65   :  { %2925 = vmatprep.subr.bf16.mxu0 %v4892_v41  ;;  %v4985_v41 = vld [vmem:[%s7304_s1 + $0x704] ss:$16 sps:$4 sm:$0xff]  }
  0x67   :  { %3141 = vmatpush1.bf16.msra.mxu1 %v4893_v44  ;;  %v4986_v44 = vld [vmem:[%s7304_s1 + $0x308] ss:$16 sps:$4 sm:$0xff]  }
  0x68   :  { %2926 = vmatpush1.bf16.msra.mxu0 %v4890_v43  ;;  %3142 = vmatprep.subr.bf16.mxu1 %v4901_v46  ;;  %v4983_v43 = vld [vmem:[%s7304_s1 + $0x700] ss:$16 sps:$4 sm:$0xff]   ;;  %v4994_v46 = vld [vmem:[%s7304_s1 + $0x32c] ss:$16 sps:$4 sm:$0xff]  }
  0x69   :  { %2927 = vmatprep.subr.bf16.mxu0 %v4898_v45  ;;  %v4991_v45 = vld [vmem:[%s7304_s1 + $0x724] ss:$16 sps:$4 sm:$0xff]  }
  0x6b   :  { %3143 = vmatpush1.bf16.msra.mxu1 %v4899_v48  ;;  %v4992_v48 = vld [vmem:[%s7304_s1 + $0x328] ss:$16 sps:$4 sm:$0xff]  }
  0x6c   :  { %2928 = vmatpush1.bf16.msra.mxu0 %v4896_v47  ;;  %3144 = vmatprep.subr.bf16.mxu1 %v4907_v50  ;;  %v4989_v47 = vld [vmem:[%s7304_s1 + $0x720] ss:$16 sps:$4 sm:$0xff]   ;;  %v5000_v50 = vld [vmem:[%s7304_s1 + $0x34c] ss:$16 sps:$4 sm:$0xff]  }
  0x6d   :  { %2929 = vmatprep.subr.bf16.mxu0 %v4904_v49  ;;  %v4997_v49 = vld [vmem:[%s7304_s1 + $0x744] ss:$16 sps:$4 sm:$0xff]  }
  0x6f   :  { %3145 = vmatpush1.bf16.msra.mxu1 %v4905_v53  ;;  %v4998_v53 = vld [vmem:[%s7304_s1 + $0x348] ss:$16 sps:$4 sm:$0xff]  }
  0x70   :  { %2930 = vmatpush1.bf16.msra.mxu0 %v4902_v52  ;;  %3146 = vmatprep.subr.bf16.mxu1 %v4913_v55  ;;  %v4995_v52 = vld [vmem:[%s7304_s1 + $0x740] ss:$16 sps:$4 sm:$0xff]   ;;  %v5006_v55 = vld [vmem:[%s7304_s1 + $0x36c] ss:$16 sps:$4 sm:$0xff]  }
  0x71   :  { %2931 = vmatprep.subr.bf16.mxu0 %v4910_v54  ;;  %v5003_v54 = vld [vmem:[%s7304_s1 + $0x764] ss:$16 sps:$4 sm:$0xff]  }
  0x73   :  { %3147 = vmatpush1.bf16.msra.mxu1 %v4911_v57  ;;  %v5004_v57 = vld [vmem:[%s7304_s1 + $0x368] ss:$16 sps:$4 sm:$0xff]  }
  0x74   :  { %2932 = vmatpush1.bf16.msra.mxu0 %v4908_v56  ;;  %3148 = vmatprep.subr.bf16.mxu1 %v4919_v59  ;;  %v5001_v56 = vld [vmem:[%s7304_s1 + $0x760] ss:$16 sps:$4 sm:$0xff]   ;;  %v5012_v59 = vld [vmem:[%s7304_s1 + $0x38c] ss:$16 sps:$4 sm:$0xff]  }
  0x75   :  { %2933 = vmatprep.subr.bf16.mxu0 %v4916_v58  ;;  %v5009_v58 = vld [vmem:[%s7304_s1 + $0x784] ss:$16 sps:$4 sm:$0xff]  }
  0x77   :  { %3149 = vmatpush1.bf16.msra.mxu1 %v4917_v61  ;;  %v5010_v61 = vld [vmem:[%s7304_s1 + $0x388] ss:$16 sps:$4 sm:$0xff]  }
  0x78   :  { %2934 = vmatpush1.bf16.msra.mxu0 %v4914_v60  ;;  %3150 = vmatprep.subr.bf16.mxu1 %v4925_v63  ;;  %v5007_v60 = vld [vmem:[%s7304_s1 + $0x780] ss:$16 sps:$4 sm:$0xff]   ;;  %v5018_v63 = vld [vmem:[%s7304_s1 + $0x3ac] ss:$16 sps:$4 sm:$0xff]  }
  0x79   :  { %2935 = vmatprep.subr.bf16.mxu0 %v4922_v62  ;;  %v5015_v62 = vld [vmem:[%s7304_s1 + $0x7a4] ss:$16 sps:$4 sm:$0xff]  }
  0x7b   :  { %3151 = vmatpush1.bf16.msra.mxu1 %v4923_v1  ;;  %v5016_v1 = vld [vmem:[%s7304_s1 + $0x3a8] ss:$16 sps:$4 sm:$0xff]  }
  0x7c   :  { %2936 = vmatpush1.bf16.msra.mxu0 %v4920_v0  ;;  %3152 = vmatprep.subr.bf16.mxu1 %v4931_v3  ;;  %v5013_v0 = vld [vmem:[%s7304_s1 + $0x7a0] ss:$16 sps:$4 sm:$0xff]   ;;  %v5024_v3 = vld [vmem:[%s7304_s1 + $0x3cc] ss:$16 sps:$4 sm:$0xff]  }
  0x7d   :  { %2937 = vmatprep.subr.bf16.mxu0 %v4928_v2  ;;  %v5021_v2 = vld [vmem:[%s7304_s1 + $0x7c4] ss:$16 sps:$4 sm:$0xff]  }
  0x7f   :  { %3153 = vmatpush1.bf16.msra.mxu1 %v4929_v7  ;;  %v5022_v7 = vld [vmem:[%s7304_s1 + $0x3c8] ss:$16 sps:$4 sm:$0xff]  }
  0x80   :  { %2938 = vmatpush1.bf16.msra.mxu0 %v4926_v6  ;;  %3165 = vmatprep.subr.bf16.mxu1 %v4940_v9  ;;  %v5019_v6 = vld [vmem:[%s7304_s1 + $0x7c0] ss:$16 sps:$4 sm:$0xff]   ;;  %v5030_v9 = vld [vmem:[%s7304_s1 + $0x3ec] ss:$16 sps:$4 sm:$0xff]  }
  0x81   :  { %2950 = vmatprep.subr.bf16.mxu0 %v4937_v8  ;;  %v5027_v8 = vld [vmem:[%s7304_s1 + $0x7e4] ss:$16 sps:$4 sm:$0xff]  }
  0x82   :  { %3155 = vmatmul.mubr.bf16.vlgmr.msra.gmra.mrb[4].mxu1 %v5789_v4  ;;  %v6030_v4 = vld [vmem:[%s7305_s0 + $0x1c] ss:$56 sps:$4 sm:$0xff]  }
  0x83   :  { %2940 = vmatmul.mubr.bf16.vlgmr.msra.gmra.mrb[0].mxu0 %v5999_v10  ;;  %3166 = vmatpush1.bf16.msra.mxu1 %v4938_v12  ;;  %v5028_v12 = vld [vmem:[%s7304_s1 + $0x3e8] ss:$16 sps:$4 sm:$0xff]  }
  0x84   :  { %2951 = vmatpush1.bf16.msra.mxu0 %v4935_v11  ;;  %3167 = vmatprep.subr.bf16.mxu1 %v4946_v14  ;;  %v5025_v11 = vld [vmem:[%s7304_s1 + $0x7e0] ss:$16 sps:$4 sm:$0xff]   ;;  %v5039_v14 = vld [vmem:[%s7304_s1 + $0x40c] ss:$16 sps:$4 sm:$0xff]  }
  0x85   :  { %2952 = vmatprep.subr.bf16.mxu0 %v4943_v13  ;;  %3197 = vmatprep.mubr.bf16.mxu1 %v5735_v51  ;;  %v4958_v51 = vld [vmem:[%s7304_s1 + $0x26c] ss:$16 sps:$4 sm:$0xff]   ;;  %v5036_v13 = vld [vmem:[%s7304_s1 + $0x804] ss:$16 sps:$4 sm:$0xff]  }
  0x86   :  { %2982 = vmatprep.mubr.bf16.mxu0 %v6030_v4 }
  0x87   :  { %3168 = vmatpush1.bf16.msra.mxu1 %v4944_v16  ;;  %v5034_v16 = vld [vmem:[%s7304_s1 + $0x800] ss:$16 sps:$4 sm:$0xff]  }
  0x88   :  { %2953 = vmatpush1.bf16.msra.mxu0 %v4941_v15  ;;  %3169 = vmatprep.subr.bf16.mxu1 %v4952_v18  ;;  %v6205_v15 = vld [vmem:[%s7305_s0 + $0x18] ss:$56 sps:$4 sm:$0xff]   ;;  %v5042_v18 = vld [vmem:[%s7304_s1 + $0x824] ss:$16 sps:$4 sm:$0xff]  }
  0x89   :  { %2954 = vmatprep.subr.bf16.mxu0 %v4949_v17  ;;  %v5037_v17 = vld [vmem:[%s7304_s1 + $0x408] ss:$16 sps:$4 sm:$0xff]  }
  0x8b   :  { %3170 = vmatpush1.bf16.msra.mxu1 %v4950_v20  ;;  %v6222_v20 = vld [vmem:[%s7305_s0 + $0x24] ss:$56 sps:$4 sm:$0xff]  }
  0x8c   :  { %2955 = vmatpush1.bf16.msra.mxu0 %v4947_v19  ;;  %3171 = vmatprep.subr.bf16.mxu1 %v4958_v51  ;;  %v5045_v19 = vld [vmem:[%s7304_s1 + $0x42c] ss:$16 sps:$4 sm:$0xff]   ;;  %v5043_v51 = vld [vmem:[%s7304_s1 + $0x428] ss:$16 sps:$4 sm:$0xff]  }
  0x8d   :  { %2956 = vmatprep.subr.bf16.mxu0 %v4955_v21  ;;  %v5040_v21 = vld [vmem:[%s7304_s1 + $0x820] ss:$16 sps:$4 sm:$0xff]  }
  0x8f   :  { %3172 = vmatpush1.bf16.msra.mxu1 %v4956_v23  ;;  %v5046_v23 = vld [vmem:[%s7304_s1 + $0x840] ss:$16 sps:$4 sm:$0xff]  }
  0x90   :  { %2957 = vmatpush1.bf16.msra.mxu0 %v4953_v22  ;;  %3173 = vmatprep.subr.bf16.mxu1 %v4964_v25  ;;  %v5048_v22 = vld [vmem:[%s7304_s1 + $0x844] ss:$16 sps:$4 sm:$0xff]  }
  0x91   :  { %2958 = vmatprep.subr.bf16.mxu0 %v4961_v24  ;;  %v5049_v24 = vld [vmem:[%s7304_s1 + $0x448] ss:$16 sps:$4 sm:$0xff]   ;;  %v5054_v25 = vld [vmem:[%s7304_s1 + $0x864] ss:$16 sps:$4 sm:$0xff]  }
  0x93   :  { %3174 = vmatpush1.bf16.msra.mxu1 %v4962_v27  ;;  %v5055_v27 = vld [vmem:[%s7304_s1 + $0x468] ss:$16 sps:$4 sm:$0xff]  }
  0x94   :  { %2959 = vmatpush1.bf16.msra.mxu0 %v4959_v26  ;;  %3175 = vmatprep.subr.bf16.mxu1 %v4970_v29  ;;  %v5052_v26 = vld [vmem:[%s7304_s1 + $0x860] ss:$16 sps:$4 sm:$0xff]   ;;  %v5063_v29 = vld [vmem:[%s7304_s1 + $0x48c] ss:$16 sps:$4 sm:$0xff]  }
  0x95   :  { %2960 = vmatprep.subr.bf16.mxu0 %v4967_v28  ;;  %v5060_v28 = vld [vmem:[%s7304_s1 + $0x884] ss:$16 sps:$4 sm:$0xff]  }
  0x97   :  { %3176 = vmatpush1.bf16.msra.mxu1 %v4968_v31  ;;  %v5061_v31 = vld [vmem:[%s7304_s1 + $0x488] ss:$16 sps:$4 sm:$0xff]  }
  0x98   :  { %2961 = vmatpush1.bf16.msra.mxu0 %v4965_v30  ;;  %3177 = vmatprep.subr.bf16.mxu1 %v4976_v33  ;;  %v5058_v30 = vld [vmem:[%s7304_s1 + $0x880] ss:$16 sps:$4 sm:$0xff]   ;;  %v5069_v33 = vld [vmem:[%s7304_s1 + $0x4ac] ss:$16 sps:$4 sm:$0xff]  }
  0x99   :  { %2962 = vmatprep.subr.bf16.mxu0 %v4973_v32  ;;  %v5066_v32 = vld [vmem:[%s7304_s1 + $0x8a4] ss:$16 sps:$4 sm:$0xff]  }
  0x9b   :  { %3178 = vmatpush1.bf16.msra.mxu1 %v4974_v36  ;;  %v5067_v36 = vld [vmem:[%s7304_s1 + $0x4a8] ss:$16 sps:$4 sm:$0xff]  }
  0x9c   :  { %2963 = vmatpush1.bf16.msra.mxu0 %v4971_v35  ;;  %3179 = vmatprep.subr.bf16.mxu1 %v4982_v38  ;;  %v5064_v35 = vld [vmem:[%s7304_s1 + $0x8a0] ss:$16 sps:$4 sm:$0xff]   ;;  %v5075_v38 = vld [vmem:[%s7304_s1 + $0x4cc] ss:$16 sps:$4 sm:$0xff]  }
  0x9d   :  { %2964 = vmatprep.subr.bf16.mxu0 %v4979_v37  ;;  %v5072_v37 = vld [vmem:[%s7304_s1 + $0x8c4] ss:$16 sps:$4 sm:$0xff]  }
  0x9f   :  { %3180 = vmatpush1.bf16.msra.mxu1 %v4980_v40  ;;  %v5073_v40 = vld [vmem:[%s7304_s1 + $0x4c8] ss:$16 sps:$4 sm:$0xff]  }
  0xa0   :  { %2965 = vmatpush1.bf16.msra.mxu0 %v4977_v39  ;;  %3181 = vmatprep.subr.bf16.mxu1 %v4988_v42  ;;  %v5070_v39 = vld [vmem:[%s7304_s1 + $0x8c0] ss:$16 sps:$4 sm:$0xff]   ;;  %v5081_v42 = vld [vmem:[%s7304_s1 + $0x4ec] ss:$16 sps:$4 sm:$0xff]  }
  0xa1   :  { %2966 = vmatprep.subr.bf16.mxu0 %v4985_v41  ;;  %v5078_v41 = vld [vmem:[%s7304_s1 + $0x8e4] ss:$16 sps:$4 sm:$0xff]  }
  0xa3   :  { %3182 = vmatpush1.bf16.msra.mxu1 %v4986_v44  ;;  %v5079_v44 = vld [vmem:[%s7304_s1 + $0x4e8] ss:$16 sps:$4 sm:$0xff]  }
  0xa4   :  { %2967 = vmatpush1.bf16.msra.mxu0 %v4983_v43  ;;  %3183 = vmatprep.subr.bf16.mxu1 %v4994_v46  ;;  %v5076_v43 = vld [vmem:[%s7304_s1 + $0x8e0] ss:$16 sps:$4 sm:$0xff]   ;;  %v5087_v46 = vld [vmem:[%s7304_s1 + $0x50c] ss:$16 sps:$4 sm:$0xff]  }
  0xa5   :  { %2968 = vmatprep.subr.bf16.mxu0 %v4991_v45  ;;  %v5084_v45 = vld [vmem:[%s7304_s1 + $0x904] ss:$16 sps:$4 sm:$0xff]  }
  0xa7   :  { %3184 = vmatpush1.bf16.msra.mxu1 %v4992_v48  ;;  %v5085_v48 = vld [vmem:[%s7304_s1 + $0x508] ss:$16 sps:$4 sm:$0xff]  }
  0xa8   :  { %2969 = vmatpush1.bf16.msra.mxu0 %v4989_v47  ;;  %3185 = vmatprep.subr.bf16.mxu1 %v5000_v50  ;;  %v5082_v47 = vld [vmem:[%s7304_s1 + $0x900] ss:$16 sps:$4 sm:$0xff]   ;;  %v5093_v50 = vld [vmem:[%s7304_s1 + $0x52c] ss:$16 sps:$4 sm:$0xff]  }
  0xa9   :  { %2970 = vmatprep.subr.bf16.mxu0 %v4997_v49  ;;  %v5090_v49 = vld [vmem:[%s7304_s1 + $0x924] ss:$16 sps:$4 sm:$0xff]  }
  0xab   :  { %3186 = vmatpush1.bf16.msra.mxu1 %v4998_v53  ;;  %v5091_v53 = vld [vmem:[%s7304_s1 + $0x528] ss:$16 sps:$4 sm:$0xff]  }
  0xac   :  { %2971 = vmatpush1.bf16.msra.mxu0 %v4995_v52  ;;  %3187 = vmatprep.subr.bf16.mxu1 %v5006_v55  ;;  %v5088_v52 = vld [vmem:[%s7304_s1 + $0x920] ss:$16 sps:$4 sm:$0xff]   ;;  %v5099_v55 = vld [vmem:[%s7304_s1 + $0x54c] ss:$16 sps:$4 sm:$0xff]  }
  0xad   :  { %2972 = vmatprep.subr.bf16.mxu0 %v5003_v54  ;;  %v5096_v54 = vld [vmem:[%s7304_s1 + $0x944] ss:$16 sps:$4 sm:$0xff]  }
  0xaf   :  { %3188 = vmatpush1.bf16.msra.mxu1 %v5004_v57  ;;  %v5097_v57 = vld [vmem:[%s7304_s1 + $0x548] ss:$16 sps:$4 sm:$0xff]  }
  0xb0   :  { %2973 = vmatpush1.bf16.msra.mxu0 %v5001_v56  ;;  %3189 = vmatprep.subr.bf16.mxu1 %v5012_v59  ;;  %v5094_v56 = vld [vmem:[%s7304_s1 + $0x940] ss:$16 sps:$4 sm:$0xff]   ;;  %v5105_v59 = vld [vmem:[%s7304_s1 + $0x56c] ss:$16 sps:$4 sm:$0xff]  }
  0xb1   :  { %2974 = vmatprep.subr.bf16.mxu0 %v5009_v58  ;;  %v5102_v58 = vld [vmem:[%s7304_s1 + $0x964] ss:$16 sps:$4 sm:$0xff]  }
  0xb3   :  { %3190 = vmatpush1.bf16.msra.mxu1 %v5010_v61  ;;  %v5103_v61 = vld [vmem:[%s7304_s1 + $0x568] ss:$16 sps:$4 sm:$0xff]  }
  0xb4   :  { %2975 = vmatpush1.bf16.msra.mxu0 %v5007_v60  ;;  %3191 = vmatprep.subr.bf16.mxu1 %v5018_v63  ;;  %v5100_v60 = vld [vmem:[%s7304_s1 + $0x960] ss:$16 sps:$4 sm:$0xff]   ;;  %v5111_v63 = vld [vmem:[%s7304_s1 + $0x58c] ss:$16 sps:$4 sm:$0xff]  }
  0xb5   :  { %2976 = vmatprep.subr.bf16.mxu0 %v5015_v62  ;;  %v5108_v62 = vld [vmem:[%s7304_s1 + $0x984] ss:$16 sps:$4 sm:$0xff]  }
  0xb7   :  { %3192 = vmatpush1.bf16.msra.mxu1 %v5016_v1  ;;  %v5109_v1 = vld [vmem:[%s7304_s1 + $0x588] ss:$16 sps:$4 sm:$0xff]  }
  0xb8   :  { %2977 = vmatpush1.bf16.msra.mxu0 %v5013_v0  ;;  %3193 = vmatprep.subr.bf16.mxu1 %v5024_v3  ;;  %v5106_v0 = vld [vmem:[%s7304_s1 + $0x980] ss:$16 sps:$4 sm:$0xff]   ;;  %v5117_v3 = vld [vmem:[%s7304_s1 + $0x5ac] ss:$16 sps:$4 sm:$0xff]  }
  0xb9   :  { %2978 = vmatprep.subr.bf16.mxu0 %v5021_v2  ;;  %v5114_v2 = vld [vmem:[%s7304_s1 + $0x9a4] ss:$16 sps:$4 sm:$0xff]  }
  0xbb   :  { %3194 = vmatpush1.bf16.msra.mxu1 %v5022_v7  ;;  %v5115_v7 = vld [vmem:[%s7304_s1 + $0x5a8] ss:$16 sps:$4 sm:$0xff]  }
  0xbc   :  { %2979 = vmatpush1.bf16.msra.mxu0 %v5019_v6  ;;  %3195 = vmatprep.subr.bf16.mxu1 %v5030_v9  ;;  %v5112_v6 = vld [vmem:[%s7304_s1 + $0x9a0] ss:$16 sps:$4 sm:$0xff]   ;;  %v5123_v9 = vld [vmem:[%s7304_s1 + $0x5cc] ss:$16 sps:$4 sm:$0xff]  }
  0xbd   :  { %2980 = vmatprep.subr.bf16.mxu0 %v5027_v8  ;;  %v5120_v8 = vld [vmem:[%s7304_s1 + $0x9c4] ss:$16 sps:$4 sm:$0xff]  }
  0xbf   :  { %3196 = vmatpush1.bf16.msra.mxu1 %v5028_v12  ;;  %v5121_v12 = vld [vmem:[%s7304_s1 + $0x5c8] ss:$16 sps:$4 sm:$0xff]  }
  0xc0   :  { %2981 = vmatpush1.bf16.msra.mxu0 %v5025_v11  ;;  %3208 = vmatprep.subr.bf16.mxu1 %v5039_v14  ;;  %v5118_v11 = vld [vmem:[%s7304_s1 + $0x9c0] ss:$16 sps:$4 sm:$0xff]   ;;  %v5129_v14 = vld [vmem:[%s7304_s1 + $0x5ec] ss:$16 sps:$4 sm:$0xff]  }
  0xc1   :  { %2993 = vmatprep.subr.bf16.mxu0 %v5036_v13  ;;  %v5126_v13 = vld [vmem:[%s7304_s1 + $0x9e4] ss:$16 sps:$4 sm:$0xff]  }
  0xc2   :  { %3198 = vmatmul.mubr.bf16.vlgmr.msra.gmra.mrb[4].mxu1 %v5794_v5  ;;  %v5051_v5 = vld [vmem:[%s7304_s1 + $0x44c] ss:$16 sps:$4 sm:$0xff]  }
  0xc3   :  { %2983 = vmatmul.mubr.bf16.vlgmr.msra.gmra.mrb[0].mxu0 %v6205_v15  ;;  %3209 = vmatpush1.bf16.msra.mxu1 %v5037_v17  ;;  %v5127_v17 = vld [vmem:[%s7304_s1 + $0x5e8] ss:$16 sps:$4 sm:$0xff]  }
  0xc4   :  { %2994 = vmatpush1.bf16.msra.mxu0 %v5034_v16  ;;  %3210 = vmatprep.subr.bf16.mxu1 %v5045_v19  ;;  %v5124_v16 = vld [vmem:[%s7304_s1 + $0x9e0] ss:$16 sps:$4 sm:$0xff]   ;;  %v5138_v19 = vld [vmem:[%s7304_s1 + $0x60c] ss:$16 sps:$4 sm:$0xff]  }
  0xc5   :  { %2995 = vmatprep.subr.bf16.mxu0 %v5042_v18  ;;  %3025 = vmatprep.mubr.bf16.mxu0 %v6222_v20  ;;  %v5135_v18 = vld [vmem:[%s7304_s1 + $0xa04] ss:$16 sps:$4 sm:$0xff]  }
  0xc6   :  { %3240 = vmatprep.mubr.bf16.mxu1 %v5885_v34  ;;  %v5057_v34 = vld [vmem:[%s7304_s1 + $0x46c] ss:$16 sps:$4 sm:$0xff]  }
  0xc7   :  { %3211 = vmatpush1.bf16.msra.mxu1 %v5043_v51  ;;  %v5133_v51 = vld [vmem:[%s7304_s1 + $0xa00] ss:$16 sps:$4 sm:$0xff]  }
  0xc8   :  { %2996 = vmatpush1.bf16.msra.mxu0 %v5040_v21  ;;  %3212 = vmatprep.subr.bf16.mxu1 %v5051_v5  ;;  %v6411_v21 = vld [vmem:[%s7305_s0 + $0x20] ss:$56 sps:$4 sm:$0xff]   ;;  %v5141_v5 = vld [vmem:[%s7304_s1 + $0xa24] ss:$16 sps:$4 sm:$0xff]  }
  0xc9   :  { %2997 = vmatprep.subr.bf16.mxu0 %v5048_v22  ;;  %v5136_v22 = vld [vmem:[%s7304_s1 + $0x608] ss:$16 sps:$4 sm:$0xff]  }
  0xcb   :  { %3213 = vmatpush1.bf16.msra.mxu1 %v5049_v24  ;;  %v6428_v24 = vld [vmem:[%s7305_s0 + $0x2c] ss:$56 sps:$4 sm:$0xff]  }
  0xcc   :  { %2998 = vmatpush1.bf16.msra.mxu0 %v5046_v23  ;;  %3214 = vmatprep.subr.bf16.mxu1 %v5057_v34  ;;  %v5144_v23 = vld [vmem:[%s7304_s1 + $0x62c] ss:$16 sps:$4 sm:$0xff]   ;;  %v5142_v34 = vld [vmem:[%s7304_s1 + $0x628] ss:$16 sps:$4 sm:$0xff]  }
  0xcd   :  { %2999 = vmatprep.subr.bf16.mxu0 %v5054_v25  ;;  %v5139_v25 = vld [vmem:[%s7304_s1 + $0xa20] ss:$16 sps:$4 sm:$0xff]  }
  0xcf   :  { %3215 = vmatpush1.bf16.msra.mxu1 %v5055_v27  ;;  %v5145_v27 = vld [vmem:[%s7304_s1 + $0xa40] ss:$16 sps:$4 sm:$0xff]  }
  0xd0   :  { %3000 = vmatpush1.bf16.msra.mxu0 %v5052_v26  ;;  %3216 = vmatprep.subr.bf16.mxu1 %v5063_v29  ;;  %v5147_v26 = vld [vmem:[%s7304_s1 + $0xa44] ss:$16 sps:$4 sm:$0xff]  }
  0xd1   :  { %3001 = vmatprep.subr.bf16.mxu0 %v5060_v28  ;;  %v5148_v28 = vld [vmem:[%s7304_s1 + $0x648] ss:$16 sps:$4 sm:$0xff]   ;;  %v5153_v29 = vld [vmem:[%s7304_s1 + $0xa64] ss:$16 sps:$4 sm:$0xff]  }
  0xd3   :  { %3217 = vmatpush1.bf16.msra.mxu1 %v5061_v31  ;;  %v5154_v31 = vld [vmem:[%s7304_s1 + $0x668] ss:$16 sps:$4 sm:$0xff]  }
  0xd4   :  { %3002 = vmatpush1.bf16.msra.mxu0 %v5058_v30  ;;  %3218 = vmatprep.subr.bf16.mxu1 %v5069_v33  ;;  %v5151_v30 = vld [vmem:[%s7304_s1 + $0xa60] ss:$16 sps:$4 sm:$0xff]   ;;  %v5162_v33 = vld [vmem:[%s7304_s1 + $0x68c] ss:$16 sps:$4 sm:$0xff]  }
  0xd5   :  { %3003 = vmatprep.subr.bf16.mxu0 %v5066_v32  ;;  %v5159_v32 = vld [vmem:[%s7304_s1 + $0xa84] ss:$16 sps:$4 sm:$0xff]  }
  0xd7   :  { %3219 = vmatpush1.bf16.msra.mxu1 %v5067_v36  ;;  %v5160_v36 = vld [vmem:[%s7304_s1 + $0x688] ss:$16 sps:$4 sm:$0xff]  }
  0xd8   :  { %3004 = vmatpush1.bf16.msra.mxu0 %v5064_v35  ;;  %3220 = vmatprep.subr.bf16.mxu1 %v5075_v38  ;;  %v5157_v35 = vld [vmem:[%s7304_s1 + $0xa80] ss:$16 sps:$4 sm:$0xff]   ;;  %v5168_v38 = vld [vmem:[%s7304_s1 + $0x6ac] ss:$16 sps:$4 sm:$0xff]  }
  0xd9   :  { %3005 = vmatprep.subr.bf16.mxu0 %v5072_v37  ;;  %v5165_v37 = vld [vmem:[%s7304_s1 + $0xaa4] ss:$16 sps:$4 sm:$0xff]  }
  0xdb   :  { %3221 = vmatpush1.bf16.msra.mxu1 %v5073_v40  ;;  %v5166_v40 = vld [vmem:[%s7304_s1 + $0x6a8] ss:$16 sps:$4 sm:$0xff]  }
  0xdc   :  { %3006 = vmatpush1.bf16.msra.mxu0 %v5070_v39  ;;  %3222 = vmatprep.subr.bf16.mxu1 %v5081_v42  ;;  %v5163_v39 = vld [vmem:[%s7304_s1 + $0xaa0] ss:$16 sps:$4 sm:$0xff]   ;;  %v5174_v42 = vld [vmem:[%s7304_s1 + $0x6cc] ss:$16 sps:$4 sm:$0xff]  }
  0xdd   :  { %3007 = vmatprep.subr.bf16.mxu0 %v5078_v41  ;;  %v5171_v41 = vld [vmem:[%s7304_s1 + $0xac4] ss:$16 sps:$4 sm:$0xff]  }
  0xdf   :  { %3223 = vmatpush1.bf16.msra.mxu1 %v5079_v44  ;;  %v5169_v44 = vld [vmem:[%s7304_s1 + $0xac0] ss:$16 sps:$4 sm:$0xff]  }
  0xe0   :  { %3008 = vmatpush1.bf16.msra.mxu0 %v5076_v43  ;;  %3224 = vmatprep.subr.bf16.mxu1 %v5087_v46 }
  0xe1   :  { %3009 = vmatprep.subr.bf16.mxu0 %v5084_v45  ;;  %v5172_v45 = vld [vmem:[%s7304_s1 + $0x6c8] ss:$16 sps:$4 sm:$0xff]  }
  0xe3   :  { %3225 = vmatpush1.bf16.msra.mxu1 %v5085_v48  ;;  %v5177_v48 = vld [vmem:[%s7304_s1 + $0xae4] ss:$16 sps:$4 sm:$0xff]  }
  0xe4   :  { %3010 = vmatpush1.bf16.msra.mxu0 %v5082_v47  ;;  %3226 = vmatprep.subr.bf16.mxu1 %v5093_v50 }
  0xe5   :  { %3011 = vmatprep.subr.bf16.mxu0 %v5090_v49  ;;  %v5180_v49 = vld [vmem:[%s7304_s1 + $0x6ec] ss:$16 sps:$4 sm:$0xff]  }
  0xe7   :  { %3227 = vmatpush1.bf16.msra.mxu1 %v5091_v53  ;;  %v5178_v53 = vld [vmem:[%s7304_s1 + $0x6e8] ss:$16 sps:$4 sm:$0xff]  }
  0xe8   :  { %3012 = vmatpush1.bf16.msra.mxu0 %v5088_v52  ;;  %3228 = vmatprep.subr.bf16.mxu1 %v5099_v55  ;;  %v5175_v52 = vld [vmem:[%s7304_s1 + $0xae0] ss:$16 sps:$4 sm:$0xff]   ;;  %v5186_v55 = vld [vmem:[%s7304_s1 + $0x70c] ss:$16 sps:$4 sm:$0xff]  }
  0xe9   :  { %3013 = vmatprep.subr.bf16.mxu0 %v5096_v54  ;;  %v5183_v54 = vld [vmem:[%s7304_s1 + $0xb04] ss:$16 sps:$4 sm:$0xff]  }
  0xeb   :  { %3229 = vmatpush1.bf16.msra.mxu1 %v5097_v57  ;;  %v5184_v57 = vld [vmem:[%s7304_s1 + $0x708] ss:$16 sps:$4 sm:$0xff]  }
  0xec   :  { %3014 = vmatpush1.bf16.msra.mxu0 %v5094_v56  ;;  %3230 = vmatprep.subr.bf16.mxu1 %v5105_v59  ;;  %v5181_v56 = vld [vmem:[%s7304_s1 + $0xb00] ss:$16 sps:$4 sm:$0xff]   ;;  %v5192_v59 = vld [vmem:[%s7304_s1 + $0x72c] ss:$16 sps:$4 sm:$0xff]  }
  0xed   :  { %3015 = vmatprep.subr.bf16.mxu0 %v5102_v58  ;;  %v5189_v58 = vld [vmem:[%s7304_s1 + $0xb24] ss:$16 sps:$4 sm:$0xff]  }
  0xef   :  { %3231 = vmatpush1.bf16.msra.mxu1 %v5103_v61  ;;  %v5190_v61 = vld [vmem:[%s7304_s1 + $0x728] ss:$16 sps:$4 sm:$0xff]  }
  0xf0   :  { %3016 = vmatpush1.bf16.msra.mxu0 %v5100_v60  ;;  %3232 = vmatprep.subr.bf16.mxu1 %v5111_v63  ;;  %v5187_v60 = vld [vmem:[%s7304_s1 + $0xb20] ss:$16 sps:$4 sm:$0xff]   ;;  %v5198_v63 = vld [vmem:[%s7304_s1 + $0x74c] ss:$16 sps:$4 sm:$0xff]  }
  0xf1   :  { %3017 = vmatprep.subr.bf16.mxu0 %v5108_v62  ;;  %v5195_v62 = vld [vmem:[%s7304_s1 + $0xb44] ss:$16 sps:$4 sm:$0xff]  }
  0xf3   :  { %3233 = vmatpush1.bf16.msra.mxu1 %v5109_v1  ;;  %v5196_v1 = vld [vmem:[%s7304_s1 + $0x748] ss:$16 sps:$4 sm:$0xff]  }
  0xf4   :  { %3018 = vmatpush1.bf16.msra.mxu0 %v5106_v0  ;;  %3234 = vmatprep.subr.bf16.mxu1 %v5117_v3  ;;  %v5193_v0 = vld [vmem:[%s7304_s1 + $0xb40] ss:$16 sps:$4 sm:$0xff]   ;;  %v5204_v3 = vld [vmem:[%s7304_s1 + $0x76c] ss:$16 sps:$4 sm:$0xff]  }
  0xf5   :  { %3019 = vmatprep.subr.bf16.mxu0 %v5114_v2  ;;  %v5201_v2 = vld [vmem:[%s7304_s1 + $0xb64] ss:$16 sps:$4 sm:$0xff]  }
  0xf7   :  { %3235 = vmatpush1.bf16.msra.mxu1 %v5115_v7  ;;  %v5202_v7 = vld [vmem:[%s7304_s1 + $0x768] ss:$16 sps:$4 sm:$0xff]  }
  0xf8   :  { %3020 = vmatpush1.bf16.msra.mxu0 %v5112_v6  ;;  %3236 = vmatprep.subr.bf16.mxu1 %v5123_v9  ;;  %v5199_v6 = vld [vmem:[%s7304_s1 + $0xb60] ss:$16 sps:$4 sm:$0xff]   ;;  %v5210_v9 = vld [vmem:[%s7304_s1 + $0x78c] ss:$16 sps:$4 sm:$0xff]  }
  0xf9   :  { %3021 = vmatprep.subr.bf16.mxu0 %v5120_v8  ;;  %v5207_v8 = vld [vmem:[%s7304_s1 + $0xb84] ss:$16 sps:$4 sm:$0xff]  }
  0xfb   :  { %3237 = vmatpush1.bf16.msra.mxu1 %v5121_v12  ;;  %v5208_v12 = vld [vmem:[%s7304_s1 + $0x788] ss:$16 sps:$4 sm:$0xff]  }
  0xfc   :  { %3022 = vmatpush1.bf16.msra.mxu0 %v5118_v11  ;;  %3238 = vmatprep.subr.bf16.mxu1 %v5129_v14  ;;  %v5205_v11 = vld [vmem:[%s7304_s1 + $0xb80] ss:$16 sps:$4 sm:$0xff]   ;;  %v5216_v14 = vld [vmem:[%s7304_s1 + $0x7ac] ss:$16 sps:$4 sm:$0xff]  }
  0xfd   :  { %3023 = vmatprep.subr.bf16.mxu0 %v5126_v13  ;;  %v5213_v13 = vld [vmem:[%s7304_s1 + $0xba4] ss:$16 sps:$4 sm:$0xff]  }
  0xff   :  { %3239 = vmatpush1.bf16.msra.mxu1 %v5127_v17  ;;  %v5214_v17 = vld [vmem:[%s7304_s1 + $0x7a8] ss:$16 sps:$4 sm:$0xff]  }
 0x100   :  { %3024 = vmatpush1.bf16.msra.mxu0 %v5124_v16  ;;  %3251 = vmatprep.subr.bf16.mxu1 %v5138_v19  ;;  %v5211_v16 = vld [vmem:[%s7304_s1 + $0xba0] ss:$16 sps:$4 sm:$0xff]   ;;  %v5222_v19 = vld [vmem:[%s7304_s1 + $0x7cc] ss:$16 sps:$4 sm:$0xff]  }
 0x101   :  { %3036 = vmatprep.subr.bf16.mxu0 %v5135_v18  ;;  %v5219_v18 = vld [vmem:[%s7304_s1 + $0xbc4] ss:$16 sps:$4 sm:$0xff]  }
 0x102   :  { %3241 = vmatmul.mubr.bf16.vlgmr.msra.gmra.mrb[4].mxu1 %v5999_v10  ;;  %v5150_v10 = vld [vmem:[%s7304_s1 + $0x64c] ss:$16 sps:$4 sm:$0xff]  }
 0x103   :  { %3026 = vmatmul.mubr.bf16.vlgmr.msra.gmra.mrb[0].mxu0 %v6411_v21  ;;  %3252 = vmatpush1.bf16.msra.mxu1 %v5136_v22  ;;  %v5220_v22 = vld [vmem:[%s7304_s1 + $0x7c8] ss:$16 sps:$4 sm:$0xff]  }
 0x104   :  { %3037 = vmatpush1.bf16.msra.mxu0 %v5133_v51  ;;  %3253 = vmatprep.subr.bf16.mxu1 %v5144_v23  ;;  %v5217_v51 = vld [vmem:[%s7304_s1 + $0xbc0] ss:$16 sps:$4 sm:$0xff]   ;;  %v5228_v23 = vld [vmem:[%s7304_s1 + $0x7ec] ss:$16 sps:$4 sm:$0xff]  }
 0x105   :  { %3038 = vmatprep.subr.bf16.mxu0 %v5141_v5  ;;  %3068 = vmatprep.mubr.bf16.mxu0 %v6428_v24  ;;  %v5225_v5 = vld [vmem:[%s7304_s1 + $0xbe4] ss:$16 sps:$4 sm:$0xff]  }
 0x106   :  { %3283 = vmatprep.mubr.bf16.mxu1 %v6030_v4  ;;  %v5156_v4 = vld [vmem:[%s7304_s1 + $0x66c] ss:$16 sps:$4 sm:$0xff]  }
 0x107   :  { %3254 = vmatpush1.bf16.msra.mxu1 %v5142_v34  ;;  %v5226_v34 = vld [vmem:[%s7304_s1 + $0x7e8] ss:$16 sps:$4 sm:$0xff]  }
 0x108   :  { %3039 = vmatpush1.bf16.msra.mxu0 %v5139_v25  ;;  %3255 = vmatprep.subr.bf16.mxu1 %v5150_v10  ;;  %v5223_v25 = vld [vmem:[%s7304_s1 + $0xbe0] ss:$16 sps:$4 sm:$0xff]   ;;  %v5237_v10 = vld [vmem:[%s7304_s1 + $0x80c] ss:$16 sps:$4 sm:$0xff]  }
 0x109   :  { %3040 = vmatprep.subr.bf16.mxu0 %v5147_v26  ;;  %v5234_v26 = vld [vmem:[%s7304_s1 + $0xc04] ss:$16 sps:$4 sm:$0xff]  }
 0x10b   :  { %3256 = vmatpush1.bf16.msra.mxu1 %v5148_v28  ;;  %v5232_v28 = vld [vmem:[%s7304_s1 + $0xc00] ss:$16 sps:$4 sm:$0xff]  }
 0x10c   :  { %3041 = vmatpush1.bf16.msra.mxu0 %v5145_v27  ;;  %3257 = vmatprep.subr.bf16.mxu1 %v5156_v4  ;;  %v6625_v27 = vld [vmem:[%s7305_s0 + $0x28] ss:$56 sps:$4 sm:$0xff]   ;;  %v5240_v4 = vld [vmem:[%s7304_s1 + $0xc24] ss:$16 sps:$4 sm:$0xff]  }
 0x10d   :  { %3042 = vmatprep.subr.bf16.mxu0 %v5153_v29  ;;  %v5235_v29 = vld [vmem:[%s7304_s1 + $0x808] ss:$16 sps:$4 sm:$0xff]  }
 0x10f   :  { %3258 = vmatpush1.bf16.msra.mxu1 %v5154_v31  ;;  %v6642_v31 = vld [vmem:[%s7305_s0 + $0x34] ss:$56 sps:$4 sm:$0xff]  }
 0x110   :  { %3043 = vmatpush1.bf16.msra.mxu0 %v5151_v30  ;;  %3259 = vmatprep.subr.bf16.mxu1 %v5162_v33  ;;  %v5243_v30 = vld [vmem:[%s7304_s1 + $0x82c] ss:$16 sps:$4 sm:$0xff]   ;;  %v5241_v33 = vld [vmem:[%s7304_s1 + $0x828] ss:$16 sps:$4 sm:$0xff]  }
 0x111   :  { %3044 = vmatprep.subr.bf16.mxu0 %v5159_v32  ;;  %v5238_v32 = vld [vmem:[%s7304_s1 + $0xc20] ss:$16 sps:$4 sm:$0xff]  }
 0x113   :  { %3260 = vmatpush1.bf16.msra.mxu1 %v5160_v36  ;;  %v5244_v36 = vld [vmem:[%s7304_s1 + $0xc40] ss:$16 sps:$4 sm:$0xff]  }
 0x114   :  { %3045 = vmatpush1.bf16.msra.mxu0 %v5157_v35  ;;  %3261 = vmatprep.subr.bf16.mxu1 %v5168_v38  ;;  %v5246_v35 = vld [vmem:[%s7304_s1 + $0xc44] ss:$16 sps:$4 sm:$0xff]  }
 0x115   :  { %3046 = vmatprep.subr.bf16.mxu0 %v5165_v37  ;;  %v6494_v43 = vpop.f32.mrb[0].mxu1  ;;  %v5247_v37 = vld [vmem:[%s7304_s1 + $0x848] ss:$16 sps:$4 sm:$0xff]   ;;  %v5252_v38 = vld [vmem:[%s7304_s1 + $0xc64] ss:$16 sps:$4 sm:$0xff]  }
 0x116   :  { %v6502_v46 = vpop.f32.mrb[1].mxu1 }
 0x117   :  { %v6504_v47 = vpop.f32.mrb[2].mxu1  ;;  %3262 = vmatpush1.bf16.msra.mxu1 %v5166_v40  ;;  %v5253_v40 = vld [vmem:[%s7304_s1 + $0x868] ss:$16 sps:$4 sm:$0xff]  }
 0x118   :  { %3047 = vmatpush1.bf16.msra.mxu0 %v5163_v39  ;;  %v6512_v50 = vpop.f32.mrb[3].mxu1  ;;  %3263 = vmatprep.subr.bf16.mxu1 %v5174_v42  ;;  %v5250_v39 = vld [vmem:[%s7304_s1 + $0xc60] ss:$16 sps:$4 sm:$0xff]   ;;  %v5261_v42 = vld [vmem:[%s7304_s1 + $0x88c] ss:$16 sps:$4 sm:$0xff]  }
 0x119   :  { %3048 = vmatprep.subr.bf16.mxu0 %v5171_v41  ;;  %v5258_v41 = vld [vmem:[%s7304_s1 + $0xc84] ss:$16 sps:$4 sm:$0xff]  }
 0x11b   :  { %3264 = vmatpush1.bf16.msra.mxu1 %v5172_v45  ;;  %v5259_v45 = vld [vmem:[%s7304_s1 + $0x888] ss:$16 sps:$4 sm:$0xff]  }
 0x11c   :  { %3049 = vmatpush1.bf16.msra.mxu0 %v5169_v44  ;;  %3265 = vmatprep.subr.bf16.mxu1 %v5180_v49  ;;  %v5256_v44 = vld [vmem:[%s7304_s1 + $0xc80] ss:$16 sps:$4 sm:$0xff]   ;;  %v5267_v49 = vld [vmem:[%s7304_s1 + $0x8ac] ss:$16 sps:$4 sm:$0xff]  }
 0x11d   :  { %3050 = vmatprep.subr.bf16.mxu0 %v5177_v48  ;;  %v5264_v48 = vld [vmem:[%s7304_s1 + $0xca4] ss:$16 sps:$4 sm:$0xff]  }
 0x11f   :  { %3266 = vmatpush1.bf16.msra.mxu1 %v5178_v53  ;;  %v5265_v53 = vld [vmem:[%s7304_s1 + $0x8a8] ss:$16 sps:$4 sm:$0xff]  }
 0x120   :  { %3051 = vmatpush1.bf16.msra.mxu0 %v5175_v52  ;;  %3267 = vmatprep.subr.bf16.mxu1 %v5186_v55  ;;  %v5262_v52 = vld [vmem:[%s7304_s1 + $0xca0] ss:$16 sps:$4 sm:$0xff]   ;;  %v5273_v55 = vld [vmem:[%s7304_s1 + $0x8cc] ss:$16 sps:$4 sm:$0xff]  }
 0x121   :  { %3052 = vmatprep.subr.bf16.mxu0 %v5183_v54  ;;  %v5270_v54 = vld [vmem:[%s7304_s1 + $0xcc4] ss:$16 sps:$4 sm:$0xff]  }
 0x123   :  { %3268 = vmatpush1.bf16.msra.mxu1 %v5184_v57  ;;  %v5271_v57 = vld [vmem:[%s7304_s1 + $0x8c8] ss:$16 sps:$4 sm:$0xff]  }
 0x124   :  { %3053 = vmatpush1.bf16.msra.mxu0 %v5181_v56  ;;  %3269 = vmatprep.subr.bf16.mxu1 %v5192_v59  ;;  %v5268_v56 = vld [vmem:[%s7304_s1 + $0xcc0] ss:$16 sps:$4 sm:$0xff]   ;;  %v5279_v59 = vld [vmem:[%s7304_s1 + $0x8ec] ss:$16 sps:$4 sm:$0xff]  }
 0x125   :  { %3054 = vmatprep.subr.bf16.mxu0 %v5189_v58  ;;  %v5276_v58 = vld [vmem:[%s7304_s1 + $0xce4] ss:$16 sps:$4 sm:$0xff]  }
 0x127   :  { %3270 = vmatpush1.bf16.msra.mxu1 %v5190_v61  ;;  %v5277_v61 = vld [vmem:[%s7304_s1 + $0x8e8] ss:$16 sps:$4 sm:$0xff]  }
 0x128   :  { %3055 = vmatpush1.bf16.msra.mxu0 %v5187_v60  ;;  %3271 = vmatprep.subr.bf16.mxu1 %v5198_v63  ;;  %v5274_v60 = vld [vmem:[%s7304_s1 + $0xce0] ss:$16 sps:$4 sm:$0xff]   ;;  %v5285_v63 = vld [vmem:[%s7304_s1 + $0x90c] ss:$16 sps:$4 sm:$0xff]  }
 0x129   :  { %3056 = vmatprep.subr.bf16.mxu0 %v5195_v62  ;;  %v5282_v62 = vld [vmem:[%s7304_s1 + $0xd04] ss:$16 sps:$4 sm:$0xff]  }
 0x12b   :  { %3272 = vmatpush1.bf16.msra.mxu1 %v5196_v1  ;;  %v5283_v1 = vld [vmem:[%s7304_s1 + $0x908] ss:$16 sps:$4 sm:$0xff]  }
 0x12c   :  { %3057 = vmatpush1.bf16.msra.mxu0 %v5193_v0  ;;  %3273 = vmatprep.subr.bf16.mxu1 %v5204_v3  ;;  %v5280_v0 = vld [vmem:[%s7304_s1 + $0xd00] ss:$16 sps:$4 sm:$0xff]   ;;  %v5291_v3 = vld [vmem:[%s7304_s1 + $0x92c] ss:$16 sps:$4 sm:$0xff]  }
 0x12d   :  { %3058 = vmatprep.subr.bf16.mxu0 %v5201_v2  ;;  %v5288_v2 = vld [vmem:[%s7304_s1 + $0xd24] ss:$16 sps:$4 sm:$0xff]  }
 0x12f   :  { %3274 = vmatpush1.bf16.msra.mxu1 %v5202_v7  ;;  %v5289_v7 = vld [vmem:[%s7304_s1 + $0x928] ss:$16 sps:$4 sm:$0xff]  }
 0x130   :  { %3059 = vmatpush1.bf16.msra.mxu0 %v5199_v6  ;;  %3275 = vmatprep.subr.bf16.mxu1 %v5210_v9  ;;  %v5286_v6 = vld [vmem:[%s7304_s1 + $0xd20] ss:$16 sps:$4 sm:$0xff]   ;;  %v5297_v9 = vld [vmem:[%s7304_s1 + $0x94c] ss:$16 sps:$4 sm:$0xff]  }
 0x131   :  { %3060 = vmatprep.subr.bf16.mxu0 %v5207_v8  ;;  %v5294_v8 = vld [vmem:[%s7304_s1 + $0xd44] ss:$16 sps:$4 sm:$0xff]  }
 0x133   :  { %3276 = vmatpush1.bf16.msra.mxu1 %v5208_v12  ;;  %v5295_v12 = vld [vmem:[%s7304_s1 + $0x948] ss:$16 sps:$4 sm:$0xff]  }
 0x134   :  { %3061 = vmatpush1.bf16.msra.mxu0 %v5205_v11  ;;  %3277 = vmatprep.subr.bf16.mxu1 %v5216_v14  ;;  %v5292_v11 = vld [vmem:[%s7304_s1 + $0xd40] ss:$16 sps:$4 sm:$0xff]   ;;  %v5303_v14 = vld [vmem:[%s7304_s1 + $0x96c] ss:$16 sps:$4 sm:$0xff]  }
 0x135   :  { %3062 = vmatprep.subr.bf16.mxu0 %v5213_v13  ;;  %v5300_v13 = vld [vmem:[%s7304_s1 + $0xd64] ss:$16 sps:$4 sm:$0xff]  }
 0x137   :  { %3278 = vmatpush1.bf16.msra.mxu1 %v5214_v17  ;;  %v5301_v17 = vld [vmem:[%s7304_s1 + $0x968] ss:$16 sps:$4 sm:$0xff]  }
 0x138   :  { %3063 = vmatpush1.bf16.msra.mxu0 %v5211_v16  ;;  %3279 = vmatprep.subr.bf16.mxu1 %v5222_v19  ;;  %v5298_v16 = vld [vmem:[%s7304_s1 + $0xd60] ss:$16 sps:$4 sm:$0xff]   ;;  %v5309_v19 = vld [vmem:[%s7304_s1 + $0x98c] ss:$16 sps:$4 sm:$0xff]  }
 0x139   :  { %3064 = vmatprep.subr.bf16.mxu0 %v5219_v18  ;;  %v5306_v18 = vld [vmem:[%s7304_s1 + $0xd84] ss:$16 sps:$4 sm:$0xff]  }
 0x13b   :  { %3280 = vmatpush1.bf16.msra.mxu1 %v5220_v22  ;;  %v5307_v22 = vld [vmem:[%s7304_s1 + $0x988] ss:$16 sps:$4 sm:$0xff]  }
 0x13c   :  { %3065 = vmatpush1.bf16.msra.mxu0 %v5217_v51  ;;  %3281 = vmatprep.subr.bf16.mxu1 %v5228_v23  ;;  %v5304_v51 = vld [vmem:[%s7304_s1 + $0xd80] ss:$16 sps:$4 sm:$0xff]   ;;  %v5315_v23 = vld [vmem:[%s7304_s1 + $0x9ac] ss:$16 sps:$4 sm:$0xff]  }
 0x13d   :  { %3066 = vmatprep.subr.bf16.mxu0 %v5225_v5  ;;  %v5312_v5 = vld [vmem:[%s7304_s1 + $0xda4] ss:$16 sps:$4 sm:$0xff]  }
 0x13f   :  { %3282 = vmatpush1.bf16.msra.mxu1 %v5226_v34  ;;  %v5313_v34 = vld [vmem:[%s7304_s1 + $0x9a8] ss:$16 sps:$4 sm:$0xff]  }
 0x140   :  { %3067 = vmatpush1.bf16.msra.mxu0 %v5223_v25  ;;  %3294 = vmatprep.subr.bf16.mxu1 %v5237_v10  ;;  %v5310_v25 = vld [vmem:[%s7304_s1 + $0xda0] ss:$16 sps:$4 sm:$0xff]   ;;  %v5321_v10 = vld [vmem:[%s7304_s1 + $0x9cc] ss:$16 sps:$4 sm:$0xff]  }
 0x141   :  { %3079 = vmatprep.subr.bf16.mxu0 %v5234_v26  ;;  %v5318_v26 = vld [vmem:[%s7304_s1 + $0xdc4] ss:$16 sps:$4 sm:$0xff]  }
 0x142   :  { %3284 = vmatmul.mubr.bf16.vlgmr.msra.gmra.mrb[4].mxu1 %v6205_v15  ;;  %v5249_v15 = vld [vmem:[%s7304_s1 + $0x84c] ss:$16 sps:$4 sm:$0xff]  }
 0x143   :  { %3069 = vmatmul.mubr.bf16.vlgmr.msra.gmra.mrb[0].mxu0 %v6625_v27  ;;  %3295 = vmatpush1.bf16.msra.mxu1 %v5235_v29  ;;  %v5319_v29 = vld [vmem:[%s7304_s1 + $0x9c8] ss:$16 sps:$4 sm:$0xff]  }
 0x144   :  { %3080 = vmatpush1.bf16.msra.mxu0 %v5232_v28  ;;  %3296 = vmatprep.subr.bf16.mxu1 %v5243_v30  ;;  %v5316_v28 = vld [vmem:[%s7304_s1 + $0xdc0] ss:$16 sps:$4 sm:$0xff]   ;;  %v5327_v30 = vld [vmem:[%s7304_s1 + $0x9ec] ss:$16 sps:$4 sm:$0xff]  }
 0x145   :  { %3081 = vmatprep.subr.bf16.mxu0 %v5240_v4  ;;  %3111 = vmatprep.mubr.bf16.mxu0 %v6642_v31  ;;  %v5324_v4 = vld [vmem:[%s7304_s1 + $0xde4] ss:$16 sps:$4 sm:$0xff]  }
 0x146   :  { %3326 = vmatprep.mubr.bf16.mxu1 %v6222_v20  ;;  %v5255_v20 = vld [vmem:[%s7304_s1 + $0x86c] ss:$16 sps:$4 sm:$0xff]  }
 0x147   :  { %3297 = vmatpush1.bf16.msra.mxu1 %v5241_v33  ;;  %v5325_v33 = vld [vmem:[%s7304_s1 + $0x9e8] ss:$16 sps:$4 sm:$0xff]  }
 0x148   :  { %3082 = vmatpush1.bf16.msra.mxu0 %v5238_v32  ;;  %3298 = vmatprep.subr.bf16.mxu1 %v5249_v15  ;;  %v5322_v32 = vld [vmem:[%s7304_s1 + $0xde0] ss:$16 sps:$4 sm:$0xff]  }
 0x149   :  { %3083 = vmatprep.subr.bf16.mxu0 %v5246_v35  ;;  %v5333_v35 = vld [vmem:[%s7304_s1 + $0xa0c] ss:$16 sps:$4 sm:$0xff]   ;;  %v6828_v15 = vld [vmem:[%s7305_s0 + $0x30] ss:$56 sps:$4 sm:$0xff]  }
 0x14b   :  { %3299 = vmatpush1.bf16.msra.mxu1 %v5247_v37  ;;  %v5336_v37 = vld [vmem:[%s7304_s1 + $0xa2c] ss:$16 sps:$4 sm:$0xff]  }
 0x14c   :  { %3084 = vmatpush1.bf16.msra.mxu0 %v5244_v36  ;;  %3300 = vmatprep.subr.bf16.mxu1 %v5255_v20  ;;  %v5331_v36 = vld [vmem:[%s7304_s1 + $0xa08] ss:$16 sps:$4 sm:$0xff]   ;;  %v5339_v20 = vld [vmem:[%s7304_s1 + $0xa4c] ss:$16 sps:$4 sm:$0xff]  }
 0x14d   :  { %3085 = vmatprep.subr.bf16.mxu0 %v5252_v38  ;;  %v5334_v38 = vld [vmem:[%s7304_s1 + $0xa28] ss:$16 sps:$4 sm:$0xff]  }
 0x14f   :  { %3301 = vmatpush1.bf16.msra.mxu1 %v5253_v40  ;;  %v5432_v40 = vld [vmem:[%s7306_s3 + $0x14] ss:$8 sps:$4 sm:$0xff]  }
 0x150   :  { %3086 = vmatpush1.bf16.msra.mxu0 %v5250_v39  ;;  %3302 = vmatprep.subr.bf16.mxu1 %v5261_v42  ;;  %v5427_v39 = vld [vmem:[%s7306_s3] ss:$8 sps:$4 sm:$0xff]   ;;  %v5430_v42 = vld [vmem:[%s7306_s3 + $0x10] ss:$8 sps:$4 sm:$0xff]  }
 0x151   :  { %3087 = vmatprep.subr.bf16.mxu0 %v5258_v41  ;;  %v5337_v41 = vld [vmem:[%s7304_s1 + $0xa48] ss:$16 sps:$4 sm:$0xff]  }
 0x153   :  { %3303 = vmatpush1.bf16.msra.mxu1 %v5259_v45  ;;  %v5340_v45 = vld [vmem:[%s7304_s1 + $0xa68] ss:$16 sps:$4 sm:$0xff]  }
 0x154   :  { %3088 = vmatpush1.bf16.msra.mxu0 %v5256_v44  ;;  %3304 = vmatprep.subr.bf16.mxu1 %v5267_v49  ;;  %v5435_v44 = vld [vmem:[%s7306_s3 + $0x24] ss:$8 sps:$4 sm:$0xff]   ;;  %v5433_v49 = vld [vmem:[%s7306_s3 + $0x20] ss:$8 sps:$4 sm:$0xff]  }
 0x155   :  { %3089 = vmatprep.subr.bf16.mxu0 %v5264_v48  ;;  %v5345_v48 = vld [vmem:[%s7304_s1 + $0xa8c] ss:$16 sps:$4 sm:$0xff]  }
 0x157   :  { %3305 = vmatpush1.bf16.msra.mxu1 %v5265_v53  ;;  %v5343_v53 = vld [vmem:[%s7304_s1 + $0xa88] ss:$16 sps:$4 sm:$0xff]  }
 0x158   :  { %3090 = vmatpush1.bf16.msra.mxu0 %v5262_v52  ;;  %3306 = vmatprep.subr.bf16.mxu1 %v5273_v55  ;;  %v5438_v52 = vld [vmem:[%s7306_s3 + $0x34] ss:$8 sps:$4 sm:$0xff]   ;;  %v5436_v55 = vld [vmem:[%s7306_s3 + $0x30] ss:$8 sps:$4 sm:$0xff]  }
 0x159   :  { %3091 = vmatprep.subr.bf16.mxu0 %v5270_v54  ;;  %v5348_v54 = vld [vmem:[%s7304_s1 + $0xaac] ss:$16 sps:$4 sm:$0xff]  }
 0x15b   :  { %3307 = vmatpush1.bf16.msra.mxu1 %v5271_v57  ;;  %v5346_v57 = vld [vmem:[%s7304_s1 + $0xaa8] ss:$16 sps:$4 sm:$0xff]  }
 0x15c   :  { %3092 = vmatpush1.bf16.msra.mxu0 %v5268_v56  ;;  %3308 = vmatprep.subr.bf16.mxu1 %v5279_v59  ;;  %v5441_v56 = vld [vmem:[%s7306_s3 + $0x44] ss:$8 sps:$4 sm:$0xff]   ;;  %v5439_v59 = vld [vmem:[%s7306_s3 + $0x40] ss:$8 sps:$4 sm:$0xff]  }
 0x15d   :  { %3093 = vmatprep.subr.bf16.mxu0 %v5276_v58  ;;  %v5351_v58 = vld [vmem:[%s7304_s1 + $0xacc] ss:$16 sps:$4 sm:$0xff]  }
 0x15f   :  { %3309 = vmatpush1.bf16.msra.mxu1 %v5277_v61  ;;  %v5349_v61 = vld [vmem:[%s7304_s1 + $0xac8] ss:$16 sps:$4 sm:$0xff]  }
 0x160   :  { %3094 = vmatpush1.bf16.msra.mxu0 %v5274_v60  ;;  %3310 = vmatprep.subr.bf16.mxu1 %v5285_v63  ;;  %v5444_v60 = vld [vmem:[%s7306_s3 + $0x54] ss:$8 sps:$4 sm:$0xff]  }
 0x161   :  { %3095 = vmatprep.subr.bf16.mxu0 %v5282_v62  ;;  %v5442_v62 = vld [vmem:[%s7306_s3 + $0x50] ss:$8 sps:$4 sm:$0xff]   ;;  %v5354_v63 = vld [vmem:[%s7304_s1 + $0xaec] ss:$16 sps:$4 sm:$0xff]  }
 0x163   :  { %3311 = vmatpush1.bf16.msra.mxu1 %v5283_v1  ;;  %v5352_v1 = vld [vmem:[%s7304_s1 + $0xae8] ss:$16 sps:$4 sm:$0xff]  }
 0x164   :  { %3096 = vmatpush1.bf16.msra.mxu0 %v5280_v0  ;;  %3312 = vmatprep.subr.bf16.mxu1 %v5291_v3  ;;  %v5447_v0 = vld [vmem:[%s7306_s3 + $0x64] ss:$8 sps:$4 sm:$0xff]  }
 0x165   :  { %3097 = vmatprep.subr.bf16.mxu0 %v5288_v2  ;;  %v5445_v2 = vld [vmem:[%s7306_s3 + $0x60] ss:$8 sps:$4 sm:$0xff]   ;;  %v5357_v3 = vld [vmem:[%s7304_s1 + $0xb0c] ss:$16 sps:$4 sm:$0xff]  }
 0x167   :  { %3313 = vmatpush1.bf16.msra.mxu1 %v5289_v7  ;;  %v5355_v7 = vld [vmem:[%s7304_s1 + $0xb08] ss:$16 sps:$4 sm:$0xff]  }
 0x168   :  { %3098 = vmatpush1.bf16.msra.mxu0 %v5286_v6  ;;  %3314 = vmatprep.subr.bf16.mxu1 %v5297_v9  ;;  %v5450_v6 = vld [vmem:[%s7306_s3 + $0x74] ss:$8 sps:$4 sm:$0xff]  }
 0x169   :  { %3099 = vmatprep.subr.bf16.mxu0 %v5294_v8  ;;  %v5448_v8 = vld [vmem:[%s7306_s3 + $0x70] ss:$8 sps:$4 sm:$0xff]   ;;  %v5360_v9 = vld [vmem:[%s7304_s1 + $0xb2c] ss:$16 sps:$4 sm:$0xff]  }
 0x16b   :  { %3315 = vmatpush1.bf16.msra.mxu1 %v5295_v12  ;;  %v5358_v12 = vld [vmem:[%s7304_s1 + $0xb28] ss:$16 sps:$4 sm:$0xff]  }
 0x16c   :  { %3100 = vmatpush1.bf16.msra.mxu0 %v5292_v11  ;;  %3316 = vmatprep.subr.bf16.mxu1 %v5303_v14  ;;  %v5453_v11 = vld [vmem:[%s7306_s3 + $0x84] ss:$8 sps:$4 sm:$0xff]  }
 0x16d   :  { %3101 = vmatprep.subr.bf16.mxu0 %v5300_v13  ;;  %v5451_v13 = vld [vmem:[%s7306_s3 + $0x80] ss:$8 sps:$4 sm:$0xff]   ;;  %v5363_v14 = vld [vmem:[%s7304_s1 + $0xb4c] ss:$16 sps:$4 sm:$0xff]  }
 0x16f   :  { %3317 = vmatpush1.bf16.msra.mxu1 %v5301_v17  ;;  %v5361_v17 = vld [vmem:[%s7304_s1 + $0xb48] ss:$16 sps:$4 sm:$0xff]  }
 0x170   :  { %3102 = vmatpush1.bf16.msra.mxu0 %v5298_v16  ;;  %3318 = vmatprep.subr.bf16.mxu1 %v5309_v19  ;;  %v5456_v16 = vld [vmem:[%s7306_s3 + $0x94] ss:$8 sps:$4 sm:$0xff]  }
 0x171   :  { %3103 = vmatprep.subr.bf16.mxu0 %v5306_v18  ;;  %v5454_v18 = vld [vmem:[%s7306_s3 + $0x90] ss:$8 sps:$4 sm:$0xff]   ;;  %v5366_v19 = vld [vmem:[%s7304_s1 + $0xb6c] ss:$16 sps:$4 sm:$0xff]  }
 0x173   :  { %3319 = vmatpush1.bf16.msra.mxu1 %v5307_v22  ;;  %v5364_v22 = vld [vmem:[%s7304_s1 + $0xb68] ss:$16 sps:$4 sm:$0xff]  }
 0x174   :  { %3104 = vmatpush1.bf16.msra.mxu0 %v5304_v51  ;;  %3320 = vmatprep.subr.bf16.mxu1 %v5315_v23  ;;  %v5459_v51 = vld [vmem:[%s7306_s3 + $0xa4] ss:$8 sps:$4 sm:$0xff]  }
 0x175   :  { %3105 = vmatprep.subr.bf16.mxu0 %v5312_v5  ;;  %v5457_v5 = vld [vmem:[%s7306_s3 + $0xa0] ss:$8 sps:$4 sm:$0xff]   ;;  %v5369_v23 = vld [vmem:[%s7304_s1 + $0xb8c] ss:$16 sps:$4 sm:$0xff]  }
 0x177   :  { %3321 = vmatpush1.bf16.msra.mxu1 %v5313_v34  ;;  %v5367_v34 = vld [vmem:[%s7304_s1 + $0xb88] ss:$16 sps:$4 sm:$0xff]  }
 0x178   :  { %3106 = vmatpush1.bf16.msra.mxu0 %v5310_v25  ;;  %3322 = vmatprep.subr.bf16.mxu1 %v5321_v10  ;;  %v5462_v25 = vld [vmem:[%s7306_s3 + $0xb4] ss:$8 sps:$4 sm:$0xff]  }
 0x179   :  { %3107 = vmatprep.subr.bf16.mxu0 %v5318_v26  ;;  %v5460_v26 = vld [vmem:[%s7306_s3 + $0xb0] ss:$8 sps:$4 sm:$0xff]   ;;  %v5372_v10 = vld [vmem:[%s7304_s1 + $0xbac] ss:$16 sps:$4 sm:$0xff]  }
 0x17b   :  { %3323 = vmatpush1.bf16.msra.mxu1 %v5319_v29  ;;  %v5370_v29 = vld [vmem:[%s7304_s1 + $0xba8] ss:$16 sps:$4 sm:$0xff]  }
 0x17c   :  { %3108 = vmatpush1.bf16.msra.mxu0 %v5316_v28  ;;  %3324 = vmatprep.subr.bf16.mxu1 %v5327_v30  ;;  %v5465_v28 = vld [vmem:[%s7306_s3 + $0xc4] ss:$8 sps:$4 sm:$0xff]  }
 0x17d   :  { %3109 = vmatprep.subr.bf16.mxu0 %v5324_v4  ;;  %v5463_v4 = vld [vmem:[%s7306_s3 + $0xc0] ss:$8 sps:$4 sm:$0xff]   ;;  %v5375_v30 = vld [vmem:[%s7304_s1 + $0xbcc] ss:$16 sps:$4 sm:$0xff]  }
 0x17f   :  { %3325 = vmatpush1.bf16.msra.mxu1 %v5325_v33  ;;  %v5373_v33 = vld [vmem:[%s7304_s1 + $0xbc8] ss:$16 sps:$4 sm:$0xff]  }
 0x180   :  { %3110 = vmatpush1.bf16.msra.mxu0 %v5322_v32  ;;  %3337 = vmatprep.subr.bf16.mxu1 %v5333_v35  ;;  %v5468_v32 = vld [vmem:[%s7306_s3 + $0xd4] ss:$8 sps:$4 sm:$0xff]   ;;  %v5466_v35 = vld [vmem:[%s7306_s3 + $0xd0] ss:$8 sps:$4 sm:$0xff]  }
 0x182   :  { %3327 = vmatmul.mubr.bf16.vlgmr.msra.gmra.mrb[4].mxu1 %v6411_v21  ;;  %v5429_v21 = vld [vmem:[%s7306_s3 + $0x4] ss:$8 sps:$4 sm:$0xff]  }
 0x183   :  { %3112 = vmatmul.mubr.bf16.vlgmr.msra.gmra.mrb[0].mxu0 %v6828_v15  ;;  %3338 = vmatpush1.bf16.msra.mxu1 %v5331_v36  ;;  %v5378_v36 = vld [vmem:[%s7304_s1 + $0xbec] ss:$16 sps:$4 sm:$0xff]  }
 0x184   :  { %3369 = vmatprep.mubr.bf16.mxu1 %v6428_v24  ;;  %3339 = vmatprep.subr.bf16.mxu1 %v5336_v37  ;;  %v5342_v24 = vld [vmem:[%s7304_s1 + $0xa6c] ss:$16 sps:$4 sm:$0xff]   ;;  %v5376_v37 = vld [vmem:[%s7304_s1 + $0xbe8] ss:$16 sps:$4 sm:$0xff]  }
 0x185   :  { %3831 = vmatprep.subr.bf16.mxu0 %v5429_v21  ;;  %v5382_v21 = vld [vmem:[%s7304_s1 + $0xc28] ss:$16 sps:$4 sm:$0xff]  }
 0x186   :  { %3832 = vmatpush1.bf16.msra.mxu0 %v5427_v39  ;;  %v5384_v39 = vld [vmem:[%s7304_s1 + $0xc2c] ss:$16 sps:$4 sm:$0xff]  }
 0x187   :  { %3340 = vmatpush1.bf16.msra.mxu1 %v5334_v38  ;;  %3833 = vmatprep.subr.bf16.mxu0 %v5432_v40  ;;  %v5381_v38 = vld [vmem:[%s7304_s1 + $0xc0c] ss:$16 sps:$4 sm:$0xff]  }
 0x188   :  { %3341 = vmatprep.subr.bf16.mxu1 %v5339_v20  ;;  %v5379_v20 = vld [vmem:[%s7304_s1 + $0xc08] ss:$16 sps:$4 sm:$0xff]   ;;  %v5387_v40 = vld [vmem:[%s7304_s1 + $0xc4c] ss:$16 sps:$4 sm:$0xff]  }
 0x18a   :  { %3834 = vmatpush1.bf16.msra.mxu0 %v5430_v42  ;;  %v5391_v42 = vld [vmem:[%s7304_s1 + $0xc88] ss:$16 sps:$4 sm:$0xff]  }
 0x18b   :  { %3342 = vmatpush1.bf16.msra.mxu1 %v5337_v41  ;;  %3835 = vmatprep.subr.bf16.mxu0 %v5435_v44  ;;  %v5385_v41 = vld [vmem:[%s7304_s1 + $0xc48] ss:$16 sps:$4 sm:$0xff]   ;;  %v5396_v44 = vld [vmem:[%s7304_s1 + $0xcac] ss:$16 sps:$4 sm:$0xff]  }
 0x18c   :  { %3343 = vmatprep.subr.bf16.mxu1 %v5342_v24  ;;  %v5393_v24 = vld [vmem:[%s7304_s1 + $0xc8c] ss:$16 sps:$4 sm:$0xff]  }
 0x18e   :  { %3836 = vmatpush1.bf16.msra.mxu0 %v5433_v49  ;;  %v5471_v49 = vld [vmem:[%s7306_s3 + $0xe4] ss:$8 sps:$4 sm:$0xff]  }
 0x18f   :  { %3344 = vmatpush1.bf16.msra.mxu1 %v5340_v45  ;;  %3837 = vmatprep.subr.bf16.mxu0 %v5438_v52  ;;  %v5394_v45 = vld [vmem:[%s7304_s1 + $0xca8] ss:$16 sps:$4 sm:$0xff]  }
 0x190   :  { %3345 = vmatprep.subr.bf16.mxu1 %v5345_v48  ;;  %v5399_v48 = vld [vmem:[%s7304_s1 + $0xccc] ss:$16 sps:$4 sm:$0xff]   ;;  %v5397_v52 = vld [vmem:[%s7304_s1 + $0xcc8] ss:$16 sps:$4 sm:$0xff]  }
 0x192   :  { %3838 = vmatpush1.bf16.msra.mxu0 %v5436_v55  ;;  %v5474_v55 = vld [vmem:[%s7306_s3 + $0xf4] ss:$8 sps:$4 sm:$0xff]  }
 0x193   :  { %3346 = vmatpush1.bf16.msra.mxu1 %v5343_v53  ;;  %3839 = vmatprep.subr.bf16.mxu0 %v5441_v56  ;;  %v5469_v53 = vld [vmem:[%s7306_s3 + $0xe0] ss:$8 sps:$4 sm:$0xff]  }
 0x194   :  { %3347 = vmatprep.subr.bf16.mxu1 %v5348_v54  ;;  %v5402_v54 = vld [vmem:[%s7304_s1 + $0xcec] ss:$16 sps:$4 sm:$0xff]   ;;  %v5400_v56 = vld [vmem:[%s7304_s1 + $0xce8] ss:$16 sps:$4 sm:$0xff]  }
 0x196   :  { %3840 = vmatpush1.bf16.msra.mxu0 %v5439_v59  ;;  %v5403_v59 = vld [vmem:[%s7304_s1 + $0xd08] ss:$16 sps:$4 sm:$0xff]  }
 0x197   :  { %3348 = vmatpush1.bf16.msra.mxu1 %v5346_v57  ;;  %3841 = vmatprep.subr.bf16.mxu0 %v5444_v60  ;;  %v5472_v57 = vld [vmem:[%s7306_s3 + $0xf0] ss:$8 sps:$4 sm:$0xff]   ;;  %v5408_v60 = vld [vmem:[%s7304_s1 + $0xd2c] ss:$16 sps:$4 sm:$0xff]  }
 0x198   :  { %3349 = vmatprep.subr.bf16.mxu1 %v5351_v58  ;;  %v5405_v58 = vld [vmem:[%s7304_s1 + $0xd0c] ss:$16 sps:$4 sm:$0xff]  }
 0x19a   :  { %3842 = vmatpush1.bf16.msra.mxu0 %v5442_v62  ;;  %v5406_v62 = vld [vmem:[%s7304_s1 + $0xd28] ss:$16 sps:$4 sm:$0xff]  }
 0x19b   :  { %3350 = vmatpush1.bf16.msra.mxu1 %v5349_v61  ;;  %3843 = vmatprep.subr.bf16.mxu0 %v5447_v0  ;;  %v5477_v61 = vld [vmem:[%s7306_s3 + $0x104] ss:$8 sps:$4 sm:$0xff]   ;;  %v5409_v0 = vld [vmem:[%s7304_s1 + $0xd48] ss:$16 sps:$4 sm:$0xff]  }
 0x19c   :  { %3351 = vmatprep.subr.bf16.mxu1 %v5354_v63  ;;  %v5411_v63 = vld [vmem:[%s7304_s1 + $0xd4c] ss:$16 sps:$4 sm:$0xff]  }
 0x19e   :  { %3844 = vmatpush1.bf16.msra.mxu0 %v5445_v2  ;;  %v5412_v2 = vld [vmem:[%s7304_s1 + $0xd68] ss:$16 sps:$4 sm:$0xff]  }
 0x19f   :  { %3352 = vmatpush1.bf16.msra.mxu1 %v5352_v1  ;;  %3845 = vmatprep.subr.bf16.mxu0 %v5450_v6  ;;  %v5414_v1 = vld [vmem:[%s7304_s1 + $0xd6c] ss:$16 sps:$4 sm:$0xff]   ;;  %v5415_v6 = vld [vmem:[%s7304_s1 + $0xd88] ss:$16 sps:$4 sm:$0xff]  }
 0x1a0   :  { %3353 = vmatprep.subr.bf16.mxu1 %v5357_v3  ;;  %v5417_v3 = vld [vmem:[%s7304_s1 + $0xd8c] ss:$16 sps:$4 sm:$0xff]  }
 0x1a2   :  { %3846 = vmatpush1.bf16.msra.mxu0 %v5448_v8  ;;  %v5418_v8 = vld [vmem:[%s7304_s1 + $0xda8] ss:$16 sps:$4 sm:$0xff]  }
 0x1a3   :  { %3354 = vmatpush1.bf16.msra.mxu1 %v5355_v7  ;;  %3847 = vmatprep.subr.bf16.mxu0 %v5453_v11  ;;  %v5420_v7 = vld [vmem:[%s7304_s1 + $0xdac] ss:$16 sps:$4 sm:$0xff]   ;;  %v5421_v11 = vld [vmem:[%s7304_s1 + $0xdc8] ss:$16 sps:$4 sm:$0xff]  }
 0x1a4   :  { %3355 = vmatprep.subr.bf16.mxu1 %v5360_v9  ;;  %v5423_v9 = vld [vmem:[%s7304_s1 + $0xdcc] ss:$16 sps:$4 sm:$0xff]  }
 0x1a6   :  { %3848 = vmatpush1.bf16.msra.mxu0 %v5451_v13  ;;  %v5424_v13 = vld [vmem:[%s7304_s1 + $0xde8] ss:$16 sps:$4 sm:$0xff]  }
 0x1a7   :  { %3356 = vmatpush1.bf16.msra.mxu1 %v5358_v12  ;;  %3849 = vmatprep.subr.bf16.mxu0 %v5456_v16  ;;  %v5426_v12 = vld [vmem:[%s7304_s1 + $0xdec] ss:$16 sps:$4 sm:$0xff]  }
 0x1a8   :  { %3357 = vmatprep.subr.bf16.mxu1 %v5363_v14  ;;  %v491_v14 = vlaneseq }
 0x1aa   :  { %3850 = vmatpush1.bf16.msra.mxu0 %v5454_v18  ;;  %v7124_v16 = vshrl.u32 %v491_v14, 7  ;;  %v7130_v18 = vld [vmem:[%s7307_s2] sm:$0xf] }
 0x1ab   :  { %3358 = vmatpush1.bf16.msra.mxu1 %v5361_v17  ;;  %3851 = vmatprep.subr.bf16.mxu0 %v5459_v51  ;;  %v5517_v14 = vld [vmem:[%s7306_s3 + $0x1e0] ss:$8 sps:$4 sm:$0xff]  }
 0x1ac   :  { %3359 = vmatprep.subr.bf16.mxu1 %v5366_v19  ;;  %v493_v17 = vsub.s32 0, %v7124_v16  ;;  %v497_v19 = vsub.s32 1, %v7124_v16 }
 0x1ae   :  { %3852 = vmatpush1.bf16.msra.mxu0 %v5457_v5  ;;  %v494_v51 = vrot.slane %v7130_v18, %v493_v17 }
 0x1af   :  { %3360 = vmatpush1.bf16.msra.mxu1 %v5364_v22  ;;  %3853 = vmatprep.subr.bf16.mxu0 %v5462_v25 }
 0x1b0   :  { %3361 = vmatprep.subr.bf16.mxu1 %v5369_v23  ;;  %v2856_v22 = vadd.f32 %v6494_v43, %v494_v51  ;;  %v2860_v25 = vadd.f32 %v6504_v47, %v494_v51  ;;  %v5480_v47 = vld [vmem:[%s7306_s3 + $0x114] ss:$8 sps:$4 sm:$0xff]  }
 0x1b1   :  { %v5522_v51 = vld [vmem:[%s7306_s3 + $0x1f4] ss:$8 sps:$4 sm:$0xff]  }
 0x1b2   :  { %3854 = vmatpush1.bf16.msra.mxu0 %v5460_v26 }
 0x1b3   :  { %3362 = vmatpush1.bf16.msra.mxu1 %v5367_v34  ;;  %3855 = vmatprep.subr.bf16.mxu0 %v5465_v28 }
 0x1b4   :  { %3363 = vmatprep.subr.bf16.mxu1 %v5372_v10 }
 0x1b6   :  { %3856 = vmatpush1.bf16.msra.mxu0 %v5463_v4 }
 0x1b7   :  { %3364 = vmatpush1.bf16.msra.mxu1 %v5370_v29  ;;  %3857 = vmatprep.subr.bf16.mxu0 %v5468_v32 }
 0x1b8   :  { %3365 = vmatprep.subr.bf16.mxu1 %v5375_v30 }
 0x1ba   :  { %3858 = vmatpush1.bf16.msra.mxu0 %v5466_v35 }
 0x1bb   :  { %3366 = vmatpush1.bf16.msra.mxu1 %v5373_v33  ;;  %3859 = vmatprep.subr.bf16.mxu0 %v5471_v49  ;;  %v5487_v49 = vld [vmem:[%s7306_s3 + $0x140] ss:$8 sps:$4 sm:$0xff]  }
 0x1bc   :  { %3367 = vmatprep.subr.bf16.mxu1 %v5378_v36 }
 0x1be   :  { %3860 = vmatpush1.bf16.msra.mxu0 %v5469_v53  ;;  %v5492_v53 = vld [vmem:[%s7306_s3 + $0x154] ss:$8 sps:$4 sm:$0xff]  }
 0x1bf   :  { %3368 = vmatpush1.bf16.msra.mxu1 %v5376_v37  ;;  %3861 = vmatprep.subr.bf16.mxu0 %v5474_v55  ;;  %v5532_v55 = vld [vmem:[%s7308_s5 + $0x20] sm:$0xff]  }
 0x1c0   :  { %3380 = vmatprep.subr.bf16.mxu1 %v5381_v38 }
 0x1c2   :  { %3370 = vmatmul.mubr.bf16.vlgmr.msra.gmra.mrb[4].mxu1 %v6625_v27  ;;  %v5390_v27 = vld [vmem:[%s7304_s1 + $0xc6c] ss:$16 sps:$4 sm:$0xff]   ;;  %3862 = vmatpush1.bf16.msra.mxu0 %v5472_v57 }
 0x1c3   :  { %3381 = vmatpush1.bf16.msra.mxu1 %v5379_v20  ;;  %3412 = vmatprep.mubr.bf16.mxu1 %v6642_v31  ;;  %v5388_v31 = vld [vmem:[%s7304_s1 + $0xc68] ss:$16 sps:$4 sm:$0xff]   ;;  %v5483_v20 = vld [vmem:[%s7306_s3 + $0x124] ss:$8 sps:$4 sm:$0xff]  }
 0x1c4   :  { %3382 = vmatprep.subr.bf16.mxu1 %v5384_v39  ;;  %3874 = vmatprep.subr.bf16.mxu0 %v5477_v61  ;;  %v5523_v39 = vld [vmem:[%s7308_s5 + $0x40] sm:$0xff]   ;;  %v5533_v57 = vld [vmem:[%s7308_s5 + $0x68] sm:$0xff]   ;;  %v5496_v61 = vld [vmem:[%s7306_s3 + $0x170] ss:$8 sps:$4 sm:$0xff]  }
 0x1c7   :  { %3383 = vmatpush1.bf16.msra.mxu1 %v5382_v21  ;;  %v5524_v21 = vld [vmem:[%s7308_s5] sm:$0xff]  }
 0x1c8   :  { %3384 = vmatprep.subr.bf16.mxu1 %v5387_v40  ;;  %v5481_v40 = vld [vmem:[%s7306_s3 + $0x120] ss:$8 sps:$4 sm:$0xff]  }
 0x1cb   :  { %3385 = vmatpush1.bf16.msra.mxu1 %v5385_v41  ;;  %v5525_v41 = vld [vmem:[%s7308_s5 + $0x48] sm:$0xff]  }
 0x1cc   :  { %3386 = vmatprep.subr.bf16.mxu1 %v5390_v27  ;;  %v5526_v27 = vld [vmem:[%s7308_s5 + $0x8] sm:$0xff]  }
 0x1cf   :  { %3387 = vmatpush1.bf16.msra.mxu1 %v5388_v31  ;;  %v5527_v31 = vld [vmem:[%s7308_s5 + $0x50] sm:$0xff]  }
 0x1d0   :  { %3388 = vmatprep.subr.bf16.mxu1 %v5393_v24  ;;  %v5486_v24 = vld [vmem:[%s7306_s3 + $0x134] ss:$8 sps:$4 sm:$0xff]  }
 0x1d3   :  { %3389 = vmatpush1.bf16.msra.mxu1 %v5391_v42  ;;  %v5484_v42 = vld [vmem:[%s7306_s3 + $0x130] ss:$8 sps:$4 sm:$0xff]  }
 0x1d4   :  { %3390 = vmatprep.subr.bf16.mxu1 %v5396_v44  ;;  %v5528_v44 = vld [vmem:[%s7308_s5 + $0x10] sm:$0xff]  }
 0x1d7   :  { %3391 = vmatpush1.bf16.msra.mxu1 %v5394_v45  ;;  %v5529_v45 = vld [vmem:[%s7308_s5 + $0x58] sm:$0xff]  }
 0x1d8   :  { %3392 = vmatprep.subr.bf16.mxu1 %v5399_v48  ;;  %v5489_v48 = vld [vmem:[%s7306_s3 + $0x144] ss:$8 sps:$4 sm:$0xff]  }
 0x1db   :  { %3393 = vmatpush1.bf16.msra.mxu1 %v5397_v52  ;;  %v5530_v52 = vld [vmem:[%s7308_s5 + $0x18] sm:$0xff]  }
 0x1dc   :  { %3394 = vmatprep.subr.bf16.mxu1 %v5402_v54  ;;  %v5531_v54 = vld [vmem:[%s7308_s5 + $0x60] sm:$0xff]  }
 0x1df   :  { %3395 = vmatpush1.bf16.msra.mxu1 %v5400_v56  ;;  %v5490_v56 = vld [vmem:[%s7306_s3 + $0x150] ss:$8 sps:$4 sm:$0xff]  }
 0x1e0   :  { %3396 = vmatprep.subr.bf16.mxu1 %v5405_v58  ;;  %v5495_v58 = vld [vmem:[%s7306_s3 + $0x164] ss:$8 sps:$4 sm:$0xff]  }
 0x1e3   :  { %3397 = vmatpush1.bf16.msra.mxu1 %v5403_v59  ;;  %v5493_v59 = vld [vmem:[%s7306_s3 + $0x160] ss:$8 sps:$4 sm:$0xff]  }
 0x1e4   :  { %3398 = vmatprep.subr.bf16.mxu1 %v5408_v60  ;;  %v5498_v60 = vld [vmem:[%s7306_s3 + $0x174] ss:$8 sps:$4 sm:$0xff]  }
 0x1e7   :  { %3399 = vmatpush1.bf16.msra.mxu1 %v5406_v62  ;;  %v5501_v62 = vld [vmem:[%s7306_s3 + $0x184] ss:$8 sps:$4 sm:$0xff]  }
 0x1e8   :  { %3400 = vmatprep.subr.bf16.mxu1 %v5411_v63  ;;  %v5499_v63 = vld [vmem:[%s7306_s3 + $0x180] ss:$8 sps:$4 sm:$0xff]  }
 0x1eb   :  { %3401 = vmatpush1.bf16.msra.mxu1 %v5409_v0  ;;  %v5504_v0 = vld [vmem:[%s7306_s3 + $0x194] ss:$8 sps:$4 sm:$0xff]  }
 0x1ec   :  { %3402 = vmatprep.subr.bf16.mxu1 %v5414_v1  ;;  %v5502_v1 = vld [vmem:[%s7306_s3 + $0x190] ss:$8 sps:$4 sm:$0xff]  }
 0x1ef   :  { %3403 = vmatpush1.bf16.msra.mxu1 %v5412_v2  ;;  %v5507_v2 = vld [vmem:[%s7306_s3 + $0x1a4] ss:$8 sps:$4 sm:$0xff]  }
 0x1f0   :  { %3404 = vmatprep.subr.bf16.mxu1 %v5417_v3  ;;  %v5505_v3 = vld [vmem:[%s7306_s3 + $0x1a0] ss:$8 sps:$4 sm:$0xff]  }
 0x1f3   :  { %3405 = vmatpush1.bf16.msra.mxu1 %v5415_v6  ;;  %v5510_v6 = vld [vmem:[%s7306_s3 + $0x1b4] ss:$8 sps:$4 sm:$0xff]  }
 0x1f4   :  { %3406 = vmatprep.subr.bf16.mxu1 %v5420_v7  ;;  %v5508_v7 = vld [vmem:[%s7306_s3 + $0x1b0] ss:$8 sps:$4 sm:$0xff]  }
 0x1f7   :  { %3407 = vmatpush1.bf16.msra.mxu1 %v5418_v8  ;;  %v5513_v8 = vld [vmem:[%s7306_s3 + $0x1c4] ss:$8 sps:$4 sm:$0xff]  }
 0x1f8   :  { %3408 = vmatprep.subr.bf16.mxu1 %v5423_v9  ;;  %v5511_v9 = vld [vmem:[%s7306_s3 + $0x1c0] ss:$8 sps:$4 sm:$0xff]  }
 0x1fb   :  { %3409 = vmatpush1.bf16.msra.mxu1 %v5421_v11  ;;  %v5516_v11 = vld [vmem:[%s7306_s3 + $0x1d4] ss:$8 sps:$4 sm:$0xff]  }
 0x1fc   :  { %3410 = vmatprep.subr.bf16.mxu1 %v5426_v12  ;;  %v5514_v12 = vld [vmem:[%s7306_s3 + $0x1d0] ss:$8 sps:$4 sm:$0xff]  }
 0x1ff   :  { %3411 = vmatpush1.bf16.msra.mxu1 %v5424_v13  ;;  %v5519_v13 = vld [vmem:[%s7306_s3 + $0x1e4] ss:$8 sps:$4 sm:$0xff]  }
 0x200   :  { %4648 = vmatprep.subr.bf16.mxu1 %v5523_v39  ;;  %v3499_v39 = vld [vmem:[%s7309_s4] sm:$0x3] }
 0x202   :  { %3413 = vmatmul.mubr.bf16.vlgmr.msra.gmra.mrb[4].mxu1 %v6828_v15  ;;  %v498_v15 = vrot.slane %v7130_v18, %v497_v19 }
 0x203   :  { %4649 = vmatpush3.bf16.msra.mxu1 %v5524_v21  ;;  %v3504_v21 = vrot.slane %v3499_v39, %v493_v17 }
 0x204   :  { %v2858_v5 = vadd.f32 %v6502_v46, %v498_v15  ;;  %v2862_v10 = vadd.f32 %v6512_v50, %v498_v15  ;;  %v5475_v46 = vld [vmem:[%s7306_s3 + $0x100] ss:$8 sps:$4 sm:$0xff]   ;;  %v5478_v50 = vld [vmem:[%s7306_s3 + $0x110] ss:$8 sps:$4 sm:$0xff]   ;;  %4650 = vmatprep.subr.bf16.mxu1 %v5525_v41 }
 0x205   :  { %v5520_v15 = vld [vmem:[%s7306_s3 + $0x1f0] ss:$8 sps:$4 sm:$0xff]  }
 0x207   :  { %4651 = vmatpush3.bf16.msra.mxu1 %v5526_v27 }
 0x208   :  { %4652 = vmatprep.subr.bf16.mxu1 %v5527_v31 }
 0x20b   :  { %4653 = vmatpush3.bf16.msra.mxu1 %v5528_v44 }
 0x20c   :  { %4654 = vmatprep.subr.bf16.mxu1 %v5529_v45 }
 0x20f   :  { %4655 = vmatpush3.bf16.msra.mxu1 %v5530_v52 }
 0x210   :  { %4656 = vmatprep.subr.bf16.mxu1 %v5531_v54 }
 0x213   :  { %4657 = vmatpush3.bf16.msra.mxu1 %v5532_v55 }
 0x214   :  { %4658 = vmatprep.subr.bf16.mxu1 %v5533_v57 }
 0x256   :  { %v3113_v23 = vpop.f32.mrb[0].mxu0 }
 0x257   :  { %v4671_v34 = vadd.f32 %v3113_v23, %v2856_v22  ;;  %v3115_v26 = vpop.f32.mrb[1].mxu0  ;;  %v501_v22 = vsub.s32 2, %v7124_v16 }
 0x258   :  { %v4673_v28 = vadd.f32 %v3115_v26, %v2858_v5  ;;  %v3117_v29 = vpop.f32.mrb[2].mxu0  ;;  %v505_v5 = vsub.s32 3, %v7124_v16  ;;  %v4631_v16 = vld [vmem:[%s7310_s6] ss:$0 sm:$0xff] }
 0x259   :  { %v4675_v4 = vadd.f32 %v3117_v29, %v2860_v25  ;;  %v3119_v30 = vpop.f32.mrb[3].mxu0  ;;  %v3423_v33 = vmax.f32 %v4671_v34, 0.0  ;;  %v502_v23 = vrot.slane %v7130_v18, %v501_v22 }
 0x25a   :  { %v4677_v32 = vadd.f32 %v3119_v30, %v2862_v10  ;;  %v3424_v36 = vmax.f32 %v4673_v28, 0.0  ;;  %v506_v25 = vrot.slane %v7130_v18, %v505_v5  ;;  %v5534_v18 = vld [vmem:[%s7308_s5 + $0x28] sm:$0xff]  }
 0x25b   :  { %v3427_v35 = vmax.f32 %v4675_v4, 0.0  ;;  %4659 = vmatpush3.bf16.msra.mxu1 %v5534_v18 }
 0x25c   :  { %v3428_v37 = vmax.f32 %v4677_v32, 0.0 }
 0x25d   :  { %v3431_v38 = vpack.c.bf16 %v3427_v35, %v3423_v33 }
 0x25e   :  { %v3432_v43 = vpack.c.bf16 %v3428_v37, %v3424_v36 }
 0x260   :  { %3863 = vmatprep.mubr.bf16.mxu0 %v3432_v43 }
 0x261   :  { %3864 = vmatmul.mubr.bf16.vlgmr.msra.gmra.mrb[4].mxu0 %v3431_v38 }
 0x262   :  { %3875 = vmatpush1.bf16.msra.mxu0 %v5475_v46  ;;  %v5535_v46 = vld [vmem:[%s7308_s5 + $0x70] sm:$0xff]  }
 0x263   :  { %3876 = vmatprep.subr.bf16.mxu0 %v5480_v47  ;;  %v5536_v47 = vld [vmem:[%s7308_s5 + $0x30] sm:$0xff]   ;;  %4660 = vmatprep.subr.bf16.mxu1 %v5535_v46 }
 0x264   :  { %4661 = vmatpush3.bf16.msra.mxu1 %v5536_v47 }
 0x266   :  { %3877 = vmatpush1.bf16.msra.mxu0 %v5478_v50  ;;  %v5537_v50 = vld [vmem:[%s7308_s5 + $0x78] sm:$0xff]  }
 0x267   :  { %3878 = vmatprep.subr.bf16.mxu0 %v5483_v20  ;;  %v5538_v20 = vld [vmem:[%s7308_s5 + $0x38] sm:$0xff]   ;;  %4662 = vmatprep.subr.bf16.mxu1 %v5537_v50 }
 0x268   :  { %4663 = vmatpush3.bf16.msra.mxu1 %v5538_v20 }
 0x26a   :  { %3879 = vmatpush1.bf16.msra.mxu0 %v5481_v40  ;;  %v3508_v40 = vrot.slane %v3499_v39, %v497_v19 }
 0x26b   :  { %3880 = vmatprep.subr.bf16.mxu0 %v5486_v24 }
 0x26e   :  { %3881 = vmatpush1.bf16.msra.mxu0 %v5484_v42 }
 0x26f   :  { %3882 = vmatprep.subr.bf16.mxu0 %v5489_v48 }
 0x272   :  { %3883 = vmatpush1.bf16.msra.mxu0 %v5487_v49 }
 0x273   :  { %3884 = vmatprep.subr.bf16.mxu0 %v5492_v53 }
 0x276   :  { %3885 = vmatpush1.bf16.msra.mxu0 %v5490_v56 }
 0x277   :  { %3886 = vmatprep.subr.bf16.mxu0 %v5495_v58 }
 0x27a   :  { %3887 = vmatpush1.bf16.msra.mxu0 %v5493_v59 }
 0x27b   :  { %3888 = vmatprep.subr.bf16.mxu0 %v5498_v60 }
 0x27e   :  { %3889 = vmatpush1.bf16.msra.mxu0 %v5496_v61 }
 0x27f   :  { %3890 = vmatprep.subr.bf16.mxu0 %v5501_v62 }
 0x282   :  { %3891 = vmatpush1.bf16.msra.mxu0 %v5499_v63 }
 0x283   :  { %3892 = vmatprep.subr.bf16.mxu0 %v5504_v0 }
 0x286   :  { %3893 = vmatpush1.bf16.msra.mxu0 %v5502_v1 }
 0x287   :  { %3894 = vmatprep.subr.bf16.mxu0 %v5507_v2 }
 0x28a   :  { %3895 = vmatpush1.bf16.msra.mxu0 %v5505_v3 }
 0x28b   :  { %3896 = vmatprep.subr.bf16.mxu0 %v5510_v6 }
 0x28e   :  { %3897 = vmatpush1.bf16.msra.mxu0 %v5508_v7 }
 0x28f   :  { %3898 = vmatprep.subr.bf16.mxu0 %v5513_v8 }
 0x292   :  { %3899 = vmatpush1.bf16.msra.mxu0 %v5511_v9 }
 0x293   :  { %3900 = vmatprep.subr.bf16.mxu0 %v5516_v11 }
 0x296   :  { %3901 = vmatpush1.bf16.msra.mxu0 %v5514_v12 }
 0x297   :  { %3902 = vmatprep.subr.bf16.mxu0 %v5519_v13 }
 0x29a   :  { %3903 = vmatpush1.bf16.msra.mxu0 %v5517_v14 }
 0x29b   :  { %3904 = vmatprep.subr.bf16.mxu0 %v5522_v51 }
 0x29e   :  { %3905 = vmatpush1.bf16.msra.mxu0 %v5520_v15 }
 0x2d5   :  { %v3414_v34 = vpop.f32.mrb[4].mxu1 }
 0x2d6   :  { %v4678_v26 = vadd.f32 %v3414_v34, %v502_v23  ;;  %v3416_v10 = vpop.f32.mrb[5].mxu1 }
 0x2d7   :  { %v4679_v28 = vadd.f32 %v3416_v10, %v506_v25  ;;  %v3418_v29 = vpop.f32.mrb[6].mxu1 }
 0x2d8   :  { %v4680_v4 = vadd.f32 %v3418_v29, %v502_v23  ;;  %v3420_v30 = vpop.f32.mrb[7].mxu1  ;;  %v3425_v33 = vmax.f32 %v4678_v26, 0.0 }
 0x2d9   :  { %v4681_v32 = vadd.f32 %v3420_v30, %v506_v25  ;;  %v3426_v36 = vmax.f32 %v4679_v28, 0.0 }
 0x2da   :  { %v3429_v35 = vmax.f32 %v4680_v4, 0.0 }
 0x2db   :  { %v3430_v37 = vmax.f32 %v4681_v32, 0.0 }
 0x2dc   :  { %v3433_v38 = vpack.c.bf16 %v3429_v35, %v3425_v33 }
 0x2dd   :  { %v3434_v43 = vpack.c.bf16 %v3430_v37, %v3426_v36 }
 0x2df   :  { %3906 = vmatprep.mubr.bf16.mxu0 %v3434_v43 }
 0x2e0   :  { %3907 = vmatmul.mubr.bf16.vlgmr.msra.gmra.mrb[4].mxu0 %v3433_v38 }
 0x3b3   :  { %v3908_v41 = vpop.f32.mrb[4].mxu0 }
 0x3b4   :  { %v4682_v27 = vadd.f32 %v3908_v41, %v3504_v21  ;;  %v3910_v31 = vpop.f32.mrb[5].mxu0 }
 0x3b5   :  { %v4683_v24 = vadd.f32 %v3910_v31, %v3508_v40  ;;  %v3912_v42 = vpop.f32.mrb[6].mxu0 }
 0x3b6   :  { %v4684_v44 = vadd.f32 %v3912_v42, %v3504_v21  ;;  %v3914_v45 = vpop.f32.mrb[7].mxu0  ;;  %v3917_v49 = vmax.f32 %v4682_v27, 0.0 }
 0x3b7   :  { %v4685_v48 = vadd.f32 %v3914_v45, %v3508_v40  ;;  %v3918_v53 = vmax.f32 %v4683_v24, 0.0 }
 0x3b8   :  { %v3919_v52 = vmax.f32 %v4684_v44, 0.0 }
 0x3b9   :  { %v3920_v54 = vmax.f32 %v4685_v48, 0.0 }
 0x3ba   :  { %v3921_v55 = vpack.c.bf16 %v3919_v52, %v3917_v49 }
 0x3bb   :  { %v3922_v56 = vpack.c.bf16 %v3920_v54, %v3918_v53 }
 0x3bd   :  { %4090 = vmatprep.mubr.bf16.mxu1 %v3922_v56 }
 0x3be   :  { %4091 = vmatmul.mubr.bf16.vlgmr.msra.gmra.mrb[8].mxu1 %v3921_v55 }
 0x491   :  { %v4664_v17 = vpop.f32.mrb[8].mxu1 }
 0x492   :  { %v4665_v19 = vpop.f32.mrb[9].mxu1 }
 0x493   :  { %v4666_v57 = vadd.f32 %v4665_v19, %v4664_v17  ;;  %v4667_v58 = vpop.f32.mrb[10].mxu1 }
 0x494   :  { %v4668_v59 = vpop.f32.mrb[11].mxu1 }
 0x495   :  { %v4093_v60 = vadd.f32 %v4666_v57, %v4631_v16  ;;  %v4669_v61 = vadd.f32 %v4668_v59, %v4667_v58 }
 0x497   :  { %4099 = vst [vmem:[%s7311_s7] sm:$0xff] %v4093_v60  ;;  %v4096_v62 = vadd.f32 %v4669_v61, %v4631_v16 }
 0x499   :  { %4100 = vst [vmem:[%s7311_s7 + $0x8] sm:$0xff] %v4096_v62 }

// kernel: mnist_cnn_forward.4
= control target key start
LH: loop header
LB: loop body
LE: loop exit
PB: predicated region body
PF: predicated region fallthrough
CT: control target
= control target key end

     0   :  { %s14390_s1 = inlined_call_operand.vmem [shape: bf16[2,2,1536,256], index: 1, kind: input, shape index: {}]   ;;  %s14391_s0 = inlined_call_operand.vmem [shape: bf16[112,1536], index: 0, kind: input, shape index: {}]   ;;  %s14392_s2 = inlined_call_operand.vmem [shape: f32[1,256], index: 2, kind: input, shape index: {}]   ;;  %s14393_s3 = inlined_call_operand.vmem [shape: bf16[112,256], index: 3, kind: output, shape index: {}]  }
   0x1   :  { %v9871_v0 = vld [vmem:[%s14390_s1 + $0x4] ss:$8 sps:$4 sm:$0xff]   ;;  %v9875_v2 = vld [vmem:[%s14390_s1] ss:$8 sps:$4 sm:$0xff]   ;;  %v9877_v4 = vld [vmem:[%s14390_s1 + $0x14] ss:$8 sps:$4 sm:$0xff]  }
   0x2   :  { %v9873_v1 = vld [vmem:[%s14390_s1 + $0x604] ss:$8 sps:$4 sm:$0xff]   ;;  %1670 = vmatprep.subr.bf16.mxu0 %v9871_v0  ;;  %v9876_v3 = vld [vmem:[%s14390_s1 + $0x600] ss:$8 sps:$4 sm:$0xff]   ;;  %v9879_v5 = vld [vmem:[%s14390_s1 + $0x614] ss:$8 sps:$4 sm:$0xff]  }
   0x3   :  { %3441 = vmatprep.subr.bf16.mxu1 %v9873_v1  ;;  %1671 = vmatpush1.bf16.msra.mxu0 %v9875_v2  ;;  %v9881_v6 = vld [vmem:[%s14390_s1 + $0x10] ss:$8 sps:$4 sm:$0xff]   ;;  %v9883_v8 = vld [vmem:[%s14390_s1 + $0x24] ss:$8 sps:$4 sm:$0xff]   ;;  %v9887_v10 = vld [vmem:[%s14390_s1 + $0x20] ss:$8 sps:$4 sm:$0xff]  }
   0x4   :  { %3442 = vmatpush1.bf16.msra.mxu1 %v9876_v3  ;;  %1672 = vmatprep.subr.bf16.mxu0 %v9877_v4  ;;  %v9882_v7 = vld [vmem:[%s14390_s1 + $0x610] ss:$8 sps:$4 sm:$0xff]   ;;  %v9885_v9 = vld [vmem:[%s14390_s1 + $0x624] ss:$8 sps:$4 sm:$0xff]   ;;  %v9888_v11 = vld [vmem:[%s14390_s1 + $0x620] ss:$8 sps:$4 sm:$0xff]  }
   0x5   :  { %3443 = vmatprep.subr.bf16.mxu1 %v9879_v5  ;;  %v9889_v12 = vld [vmem:[%s14390_s1 + $0x34] ss:$8 sps:$4 sm:$0xff]   ;;  %v9893_v14 = vld [vmem:[%s14390_s1 + $0x30] ss:$8 sps:$4 sm:$0xff]   ;;  %v9895_v16 = vld [vmem:[%s14390_s1 + $0x44] ss:$8 sps:$4 sm:$0xff]  }
   0x6   :  { %v9891_v13 = vld [vmem:[%s14390_s1 + $0x634] ss:$8 sps:$4 sm:$0xff]   ;;  %v9894_v15 = vld [vmem:[%s14390_s1 + $0x630] ss:$8 sps:$4 sm:$0xff]   ;;  %v9897_v17 = vld [vmem:[%s14390_s1 + $0x644] ss:$8 sps:$4 sm:$0xff]  }
   0x7   :  { %1673 = vmatpush1.bf16.msra.mxu0 %v9881_v6  ;;  %v9899_v18 = vld [vmem:[%s14390_s1 + $0x40] ss:$8 sps:$4 sm:$0xff]   ;;  %v9901_v20 = vld [vmem:[%s14390_s1 + $0x54] ss:$8 sps:$4 sm:$0xff]   ;;  %v9905_v22 = vld [vmem:[%s14390_s1 + $0x50] ss:$8 sps:$4 sm:$0xff]  }
   0x8   :  { %3444 = vmatpush1.bf16.msra.mxu1 %v9882_v7  ;;  %1674 = vmatprep.subr.bf16.mxu0 %v9883_v8  ;;  %v9900_v19 = vld [vmem:[%s14390_s1 + $0x640] ss:$8 sps:$4 sm:$0xff]   ;;  %v9903_v21 = vld [vmem:[%s14390_s1 + $0x654] ss:$8 sps:$4 sm:$0xff]   ;;  %v9906_v23 = vld [vmem:[%s14390_s1 + $0x650] ss:$8 sps:$4 sm:$0xff]  }
   0x9   :  { %3445 = vmatprep.subr.bf16.mxu1 %v9885_v9  ;;  %v9907_v24 = vld [vmem:[%s14390_s1 + $0x64] ss:$8 sps:$4 sm:$0xff]   ;;  %v9911_v26 = vld [vmem:[%s14390_s1 + $0x60] ss:$8 sps:$4 sm:$0xff]   ;;  %v9913_v28 = vld [vmem:[%s14390_s1 + $0x74] ss:$8 sps:$4 sm:$0xff]  }
   0xa   :  { %v9909_v25 = vld [vmem:[%s14390_s1 + $0x664] ss:$8 sps:$4 sm:$0xff]   ;;  %v9912_v27 = vld [vmem:[%s14390_s1 + $0x660] ss:$8 sps:$4 sm:$0xff]   ;;  %v9915_v29 = vld [vmem:[%s14390_s1 + $0x674] ss:$8 sps:$4 sm:$0xff]  }
   0xb   :  { %1675 = vmatpush1.bf16.msra.mxu0 %v9887_v10  ;;  %v9917_v30 = vld [vmem:[%s14390_s1 + $0x70] ss:$8 sps:$4 sm:$0xff]   ;;  %v9919_v32 = vld [vmem:[%s14390_s1 + $0x84] ss:$8 sps:$4 sm:$0xff]   ;;  %v9923_v34 = vld [vmem:[%s14390_s1 + $0x80] ss:$8 sps:$4 sm:$0xff]  }
   0xc   :  { %3446 = vmatpush1.bf16.msra.mxu1 %v9888_v11  ;;  %1676 = vmatprep.subr.bf16.mxu0 %v9889_v12  ;;  %v9918_v31 = vld [vmem:[%s14390_s1 + $0x670] ss:$8 sps:$4 sm:$0xff]   ;;  %v9921_v33 = vld [vmem:[%s14390_s1 + $0x684] ss:$8 sps:$4 sm:$0xff]   ;;  %v9924_v35 = vld [vmem:[%s14390_s1 + $0x680] ss:$8 sps:$4 sm:$0xff]  }
   0xd   :  { %3447 = vmatprep.subr.bf16.mxu1 %v9891_v13  ;;  %v9925_v36 = vld [vmem:[%s14390_s1 + $0x94] ss:$8 sps:$4 sm:$0xff]   ;;  %v9929_v38 = vld [vmem:[%s14390_s1 + $0x90] ss:$8 sps:$4 sm:$0xff]   ;;  %v9931_v40 = vld [vmem:[%s14390_s1 + $0xa4] ss:$8 sps:$4 sm:$0xff]  }
   0xe   :  { %v9927_v37 = vld [vmem:[%s14390_s1 + $0x694] ss:$8 sps:$4 sm:$0xff]   ;;  %v9930_v39 = vld [vmem:[%s14390_s1 + $0x690] ss:$8 sps:$4 sm:$0xff]   ;;  %v9933_v41 = vld [vmem:[%s14390_s1 + $0x6a4] ss:$8 sps:$4 sm:$0xff]  }
   0xf   :  { %1677 = vmatpush1.bf16.msra.mxu0 %v9893_v14  ;;  %v9935_v42 = vld [vmem:[%s14390_s1 + $0xa0] ss:$8 sps:$4 sm:$0xff]   ;;  %v9937_v44 = vld [vmem:[%s14390_s1 + $0xb4] ss:$8 sps:$4 sm:$0xff]   ;;  %v9941_v46 = vld [vmem:[%s14390_s1 + $0xb0] ss:$8 sps:$4 sm:$0xff]  }
  0x10   :  { %3448 = vmatpush1.bf16.msra.mxu1 %v9894_v15  ;;  %1678 = vmatprep.subr.bf16.mxu0 %v9895_v16  ;;  %v9936_v43 = vld [vmem:[%s14390_s1 + $0x6a0] ss:$8 sps:$4 sm:$0xff]   ;;  %v9939_v45 = vld [vmem:[%s14390_s1 + $0x6b4] ss:$8 sps:$4 sm:$0xff]   ;;  %v9942_v48 = vld [vmem:[%s14390_s1 + $0x6b0] ss:$8 sps:$4 sm:$0xff]  }
  0x11   :  { %3449 = vmatprep.subr.bf16.mxu1 %v9897_v17  ;;  %v9967_v47 = vld [vmem:[%s14391_s0 + $0x4] ss:$48 sps:$4 sm:$0xff]   ;;  %v9947_v51 = vld [vmem:[%s14390_s1 + $0xc0] ss:$8 sps:$4 sm:$0xff]   ;;  %v9953_v55 = vld [vmem:[%s14390_s1 + $0xd0] ss:$8 sps:$4 sm:$0xff]  }
  0x12   :  { %v9943_v49 = vld [vmem:[%s14390_s1 + $0xc4] ss:$8 sps:$4 sm:$0xff]   ;;  %1702 = vmatprep.mubr.bf16.mxu0 %v9967_v47  ;;  %3473 = vmatprep.mubr.bf16.mxu1 %v9967_v47  ;;  %v9948_v52 = vld [vmem:[%s14390_s1 + $0x6c0] ss:$8 sps:$4 sm:$0xff]   ;;  %v9949_v53 = vld [vmem:[%s14390_s1 + $0xd4] ss:$8 sps:$4 sm:$0xff]  }
  0x13   :  { %1679 = vmatpush1.bf16.msra.mxu0 %v9899_v18  ;;  %v9945_v50 = vld [vmem:[%s14390_s1 + $0x6c4] ss:$8 sps:$4 sm:$0xff]   ;;  %v9951_v54 = vld [vmem:[%s14390_s1 + $0x6d4] ss:$8 sps:$4 sm:$0xff]   ;;  %v9954_v56 = vld [vmem:[%s14390_s1 + $0x6d0] ss:$8 sps:$4 sm:$0xff]  }
  0x14   :  { %3450 = vmatpush1.bf16.msra.mxu1 %v9900_v19  ;;  %1680 = vmatprep.subr.bf16.mxu0 %v9901_v20  ;;  %v9955_v57 = vld [vmem:[%s14390_s1 + $0xe4] ss:$8 sps:$4 sm:$0xff]   ;;  %v9959_v59 = vld [vmem:[%s14390_s1 + $0xe0] ss:$8 sps:$4 sm:$0xff]   ;;  %v9961_v61 = vld [vmem:[%s14390_s1 + $0xf4] ss:$8 sps:$4 sm:$0xff]  }
  0x15   :  { %3451 = vmatprep.subr.bf16.mxu1 %v9903_v21  ;;  %v9957_v58 = vld [vmem:[%s14390_s1 + $0x6e4] ss:$8 sps:$4 sm:$0xff]   ;;  %v9960_v60 = vld [vmem:[%s14390_s1 + $0x6e0] ss:$8 sps:$4 sm:$0xff]   ;;  %v9963_v62 = vld [vmem:[%s14390_s1 + $0x6f4] ss:$8 sps:$4 sm:$0xff]  }
  0x16   :  { %v9965_v63 = vld [vmem:[%s14390_s1 + $0xf0] ss:$8 sps:$4 sm:$0xff]   ;;  %v9971_v1 = vld [vmem:[%s14390_s1 + $0x104] ss:$8 sps:$4 sm:$0xff]   ;;  %v9969_v3 = vld [vmem:[%s14390_s1 + $0x100] ss:$8 sps:$4 sm:$0xff]  }
  0x17   :  { %1681 = vmatpush1.bf16.msra.mxu0 %v9905_v22  ;;  %v9966_v0 = vld [vmem:[%s14390_s1 + $0x6f0] ss:$8 sps:$4 sm:$0xff]   ;;  %v9974_v2 = vld [vmem:[%s14390_s1 + $0x704] ss:$8 sps:$4 sm:$0xff]   ;;  %v9972_v5 = vld [vmem:[%s14390_s1 + $0x700] ss:$8 sps:$4 sm:$0xff]  }
  0x18   :  { %3452 = vmatpush1.bf16.msra.mxu1 %v9906_v23  ;;  %1682 = vmatprep.subr.bf16.mxu0 %v9907_v24  ;;  %v9975_v4 = vld [vmem:[%s14391_s0] ss:$48 sps:$4 sm:$0xff]   ;;  %v9978_v6 = vld [vmem:[%s14390_s1 + $0x114] ss:$8 sps:$4 sm:$0xff]   ;;  %v9984_v11 = vld [vmem:[%s14390_s1 + $0x124] ss:$8 sps:$4 sm:$0xff]  }
  0x19   :  { %3453 = vmatprep.subr.bf16.mxu1 %v9909_v25  ;;  %v9981_v7 = vld [vmem:[%s14390_s1 + $0x714] ss:$8 sps:$4 sm:$0xff]   ;;  %v9976_v9 = vld [vmem:[%s14390_s1 + $0x110] ss:$8 sps:$4 sm:$0xff]   ;;  %v9987_v12 = vld [vmem:[%s14390_s1 + $0x724] ss:$8 sps:$4 sm:$0xff]  }
  0x1a   :  { %v9994_v8 = vld [vmem:[%s14391_s0 + $0x64] ss:$48 sps:$4 sm:$0xff]   ;;  %v9979_v10 = vld [vmem:[%s14390_s1 + $0x710] ss:$8 sps:$4 sm:$0xff]   ;;  %v9982_v13 = vld [vmem:[%s14390_s1 + $0x120] ss:$8 sps:$4 sm:$0xff]  }
  0x1b   :  { %1683 = vmatpush1.bf16.msra.mxu0 %v9911_v26  ;;  %v9985_v14 = vld [vmem:[%s14390_s1 + $0x720] ss:$8 sps:$4 sm:$0xff]   ;;  %v9990_v16 = vld [vmem:[%s14390_s1 + $0x134] ss:$8 sps:$4 sm:$0xff]   ;;  %v9988_v19 = vld [vmem:[%s14390_s1 + $0x130] ss:$8 sps:$4 sm:$0xff]  }
  0x1c   :  { %3454 = vmatpush1.bf16.msra.mxu1 %v9912_v27  ;;  %1684 = vmatprep.subr.bf16.mxu0 %v9913_v28  ;;  %v10002_v15 = vld [vmem:[%s14391_s0 + $0x60] ss:$48 sps:$4 sm:$0xff]   ;;  %v9993_v17 = vld [vmem:[%s14390_s1 + $0x734] ss:$8 sps:$4 sm:$0xff]   ;;  %v9998_v21 = vld [vmem:[%s14390_s1 + $0x144] ss:$8 sps:$4 sm:$0xff]  }
  0x1d   :  { %3455 = vmatprep.subr.bf16.mxu1 %v9915_v29  ;;  %v10009_v18 = vld [vmem:[%s14391_s0 + $0xc4] ss:$48 sps:$4 sm:$0xff]   ;;  %v9991_v20 = vld [vmem:[%s14390_s1 + $0x730] ss:$8 sps:$4 sm:$0xff]   ;;  %v9996_v23 = vld [vmem:[%s14390_s1 + $0x140] ss:$8 sps:$4 sm:$0xff]  }
  0x1e   :  { %v10001_v22 = vld [vmem:[%s14390_s1 + $0x744] ss:$8 sps:$4 sm:$0xff]   ;;  %v9999_v24 = vld [vmem:[%s14390_s1 + $0x740] ss:$8 sps:$4 sm:$0xff]   ;;  %v10005_v26 = vld [vmem:[%s14390_s1 + $0x154] ss:$8 sps:$4 sm:$0xff]  }
  0x1f   :  { %1685 = vmatpush1.bf16.msra.mxu0 %v9917_v30  ;;  %v10017_v25 = vld [vmem:[%s14391_s0 + $0xc0] ss:$48 sps:$4 sm:$0xff]   ;;  %v10008_v27 = vld [vmem:[%s14390_s1 + $0x754] ss:$8 sps:$4 sm:$0xff]  }
  0x20   :  { %3456 = vmatpush1.bf16.msra.mxu1 %v9918_v31  ;;  %1686 = vmatprep.subr.bf16.mxu0 %v9919_v32  ;;  %v10024_v28 = vld [vmem:[%s14391_s0 + $0x124] ss:$48 sps:$4 sm:$0xff]   ;;  %v10003_v29 = vld [vmem:[%s14390_s1 + $0x150] ss:$8 sps:$4 sm:$0xff]  }
  0x21   :  { %3457 = vmatprep.subr.bf16.mxu1 %v9921_v33  ;;  %v10006_v30 = vld [vmem:[%s14390_s1 + $0x750] ss:$8 sps:$4 sm:$0xff]   ;;  %v10013_v31 = vld [vmem:[%s14390_s1 + $0x164] ss:$8 sps:$4 sm:$0xff]   ;;  %v10011_v33 = vld [vmem:[%s14390_s1 + $0x160] ss:$8 sps:$4 sm:$0xff]  }
  0x22   :  { %v10016_v32 = vld [vmem:[%s14390_s1 + $0x764] ss:$8 sps:$4 sm:$0xff]   ;;  %v10038_v47 = vld [vmem:[%s14390_s1 + $0x794] ss:$8 sps:$4 sm:$0xff]  }
  0x23   :  { %1687 = vmatpush1.bf16.msra.mxu0 %v9923_v34  ;;  %v10014_v34 = vld [vmem:[%s14390_s1 + $0x760] ss:$8 sps:$4 sm:$0xff]  }
  0x24   :  { %3458 = vmatpush1.bf16.msra.mxu1 %v9924_v35  ;;  %1688 = vmatprep.subr.bf16.mxu0 %v9925_v36  ;;  %v10032_v35 = vld [vmem:[%s14391_s0 + $0x120] ss:$48 sps:$4 sm:$0xff]   ;;  %v10020_v36 = vld [vmem:[%s14390_s1 + $0x174] ss:$8 sps:$4 sm:$0xff]  }
  0x25   :  { %3459 = vmatprep.subr.bf16.mxu1 %v9927_v37  ;;  %v10023_v37 = vld [vmem:[%s14390_s1 + $0x774] ss:$8 sps:$4 sm:$0xff]  }
  0x27   :  { %1689 = vmatpush1.bf16.msra.mxu0 %v9929_v38  ;;  %v10039_v38 = vld [vmem:[%s14391_s0 + $0x184] ss:$48 sps:$4 sm:$0xff]  }
  0x28   :  { %3460 = vmatpush1.bf16.msra.mxu1 %v9930_v39  ;;  %1690 = vmatprep.subr.bf16.mxu0 %v9931_v40  ;;  %v10018_v39 = vld [vmem:[%s14390_s1 + $0x170] ss:$8 sps:$4 sm:$0xff]  }
  0x29   :  { %3461 = vmatprep.subr.bf16.mxu1 %v9933_v41  ;;  %v10021_v40 = vld [vmem:[%s14390_s1 + $0x770] ss:$8 sps:$4 sm:$0xff]   ;;  %v10028_v41 = vld [vmem:[%s14390_s1 + $0x184] ss:$8 sps:$4 sm:$0xff]  }
  0x2b   :  { %1691 = vmatpush1.bf16.msra.mxu0 %v9935_v42  ;;  %v10031_v42 = vld [vmem:[%s14390_s1 + $0x784] ss:$8 sps:$4 sm:$0xff]  }
  0x2c   :  { %3462 = vmatpush1.bf16.msra.mxu1 %v9936_v43  ;;  %1692 = vmatprep.subr.bf16.mxu0 %v9937_v44  ;;  %v10026_v43 = vld [vmem:[%s14390_s1 + $0x180] ss:$8 sps:$4 sm:$0xff]  }
  0x2d   :  { %3463 = vmatprep.subr.bf16.mxu1 %v9939_v45  ;;  %v10029_v44 = vld [vmem:[%s14390_s1 + $0x780] ss:$8 sps:$4 sm:$0xff]  }
  0x2e   :  { %v10047_v45 = vld [vmem:[%s14391_s0 + $0x180] ss:$48 sps:$4 sm:$0xff]  }
  0x2f   :  { %1693 = vmatpush1.bf16.msra.mxu0 %v9941_v46  ;;  %v10035_v46 = vld [vmem:[%s14390_s1 + $0x194] ss:$8 sps:$4 sm:$0xff]  }
  0x30   :  { %3464 = vmatpush1.bf16.msra.mxu1 %v9942_v48  ;;  %1694 = vmatprep.subr.bf16.mxu0 %v9943_v49  ;;  %v10054_v48 = vld [vmem:[%s14391_s0 + $0x1e4] ss:$48 sps:$4 sm:$0xff]   ;;  %v10033_v49 = vld [vmem:[%s14390_s1 + $0x190] ss:$8 sps:$4 sm:$0xff]  }
  0x31   :  { %3465 = vmatprep.subr.bf16.mxu1 %v9945_v50  ;;  %v10036_v50 = vld [vmem:[%s14390_s1 + $0x790] ss:$8 sps:$4 sm:$0xff]  }
  0x33   :  { %1695 = vmatpush1.bf16.msra.mxu0 %v9947_v51  ;;  %v10043_v51 = vld [vmem:[%s14390_s1 + $0x1a4] ss:$8 sps:$4 sm:$0xff]  }
  0x34   :  { %3466 = vmatpush1.bf16.msra.mxu1 %v9948_v52  ;;  %1696 = vmatprep.subr.bf16.mxu0 %v9949_v53  ;;  %v10046_v52 = vld [vmem:[%s14390_s1 + $0x7a4] ss:$8 sps:$4 sm:$0xff]   ;;  %v10041_v53 = vld [vmem:[%s14390_s1 + $0x1a0] ss:$8 sps:$4 sm:$0xff]  }
  0x35   :  { %3467 = vmatprep.subr.bf16.mxu1 %v9951_v54  ;;  %v10044_v54 = vld [vmem:[%s14390_s1 + $0x7a0] ss:$8 sps:$4 sm:$0xff]  }
  0x37   :  { %1697 = vmatpush1.bf16.msra.mxu0 %v9953_v55  ;;  %v10062_v55 = vld [vmem:[%s14391_s0 + $0x1e0] ss:$48 sps:$4 sm:$0xff]  }
  0x38   :  { %3468 = vmatpush1.bf16.msra.mxu1 %v9954_v56  ;;  %1698 = vmatprep.subr.bf16.mxu0 %v9955_v57  ;;  %v10050_v56 = vld [vmem:[%s14390_s1 + $0x1b4] ss:$8 sps:$4 sm:$0xff]  }
  0x39   :  { %3469 = vmatprep.subr.bf16.mxu1 %v9957_v58  ;;  %v10053_v57 = vld [vmem:[%s14390_s1 + $0x7b4] ss:$8 sps:$4 sm:$0xff]  }
  0x3a   :  { %v10069_v58 = vld [vmem:[%s14391_s0 + $0x244] ss:$48 sps:$4 sm:$0xff]  }
  0x3b   :  { %1699 = vmatpush1.bf16.msra.mxu0 %v9959_v59  ;;  %v10048_v59 = vld [vmem:[%s14390_s1 + $0x1b0] ss:$8 sps:$4 sm:$0xff]  }
  0x3c   :  { %3470 = vmatpush1.bf16.msra.mxu1 %v9960_v60  ;;  %1700 = vmatprep.subr.bf16.mxu0 %v9961_v61  ;;  %v10051_v60 = vld [vmem:[%s14390_s1 + $0x7b0] ss:$8 sps:$4 sm:$0xff]   ;;  %v10058_v61 = vld [vmem:[%s14390_s1 + $0x1c4] ss:$8 sps:$4 sm:$0xff]  }
  0x3d   :  { %3471 = vmatprep.subr.bf16.mxu1 %v9963_v62  ;;  %v10061_v62 = vld [vmem:[%s14390_s1 + $0x7c4] ss:$8 sps:$4 sm:$0xff]  }
  0x3f   :  { %1701 = vmatpush1.bf16.msra.mxu0 %v9965_v63  ;;  %v10056_v63 = vld [vmem:[%s14390_s1 + $0x1c0] ss:$8 sps:$4 sm:$0xff]  }
  0x40   :  { %3472 = vmatpush1.bf16.msra.mxu1 %v9966_v0  ;;  %1773 = vmatprep.subr.bf16.mxu0 %v9971_v1  ;;  %v10059_v0 = vld [vmem:[%s14390_s1 + $0x7c0] ss:$8 sps:$4 sm:$0xff]  }
  0x41   :  { %3544 = vmatprep.subr.bf16.mxu1 %v9974_v2  ;;  %v10077_v1 = vld [vmem:[%s14391_s0 + $0x240] ss:$48 sps:$4 sm:$0xff]   ;;  %v10065_v2 = vld [vmem:[%s14390_s1 + $0x1d4] ss:$8 sps:$4 sm:$0xff]  }
  0x42   :  { %1703 = vmatmul.mubr.bf16.vlgmr.msra.gmra.mrb[0].mxu0 %v9975_v4 }
  0x43   :  { %3474 = vmatmul.mubr.bf16.vlgmr.msra.gmra.mrb[0].mxu1 %v9975_v4  ;;  %1774 = vmatpush1.bf16.msra.mxu0 %v9969_v3  ;;  %v10068_v3 = vld [vmem:[%s14390_s1 + $0x7d4] ss:$8 sps:$4 sm:$0xff]  }
  0x44   :  { %3545 = vmatpush1.bf16.msra.mxu1 %v9972_v5  ;;  %1775 = vmatprep.subr.bf16.mxu0 %v9978_v6  ;;  %v10086_v4 = vld [vmem:[%s14391_s0 + $0xc] ss:$48 sps:$4 sm:$0xff]   ;;  %v10063_v5 = vld [vmem:[%s14390_s1 + $0x1d0] ss:$8 sps:$4 sm:$0xff]  }
  0x45   :  { %3546 = vmatprep.subr.bf16.mxu1 %v9981_v7  ;;  %1712 = vmatprep.mubr.bf16.mxu0 %v9994_v8  ;;  %v10066_v6 = vld [vmem:[%s14390_s1 + $0x7d0] ss:$8 sps:$4 sm:$0xff]   ;;  %v10073_v7 = vld [vmem:[%s14390_s1 + $0x1e4] ss:$8 sps:$4 sm:$0xff]  }
  0x46   :  { %3483 = vmatprep.mubr.bf16.mxu1 %v9994_v8  ;;  %v10076_v8 = vld [vmem:[%s14390_s1 + $0x7e4] ss:$8 sps:$4 sm:$0xff]  }
  0x47   :  { %1776 = vmatpush1.bf16.msra.mxu0 %v9976_v9  ;;  %v10071_v9 = vld [vmem:[%s14390_s1 + $0x1e0] ss:$8 sps:$4 sm:$0xff]  }
  0x48   :  { %3547 = vmatpush1.bf16.msra.mxu1 %v9979_v10  ;;  %1777 = vmatprep.subr.bf16.mxu0 %v9984_v11  ;;  %v10074_v10 = vld [vmem:[%s14390_s1 + $0x7e0] ss:$8 sps:$4 sm:$0xff]   ;;  %v10080_v11 = vld [vmem:[%s14390_s1 + $0x1f4] ss:$8 sps:$4 sm:$0xff]  }
  0x49   :  { %3548 = vmatprep.subr.bf16.mxu1 %v9987_v12  ;;  %v10083_v12 = vld [vmem:[%s14390_s1 + $0x7f4] ss:$8 sps:$4 sm:$0xff]  }
  0x4a   :  { %1713 = vmatmul.mubr.bf16.gmra.mrb[4].mxu0 %v10002_v15 }
  0x4b   :  { %3484 = vmatmul.mubr.bf16.gmra.mrb[4].mxu1 %v10002_v15  ;;  %1778 = vmatpush1.bf16.msra.mxu0 %v9982_v13  ;;  %v10078_v13 = vld [vmem:[%s14390_s1 + $0x1f0] ss:$8 sps:$4 sm:$0xff]   ;;  %v10089_v15 = vld [vmem:[%s14390_s1 + $0x204] ss:$8 sps:$4 sm:$0xff]  }
  0x4c   :  { %3549 = vmatpush1.bf16.msra.mxu1 %v9985_v14  ;;  %1779 = vmatprep.subr.bf16.mxu0 %v9990_v16  ;;  %v10081_v14 = vld [vmem:[%s14390_s1 + $0x7f0] ss:$8 sps:$4 sm:$0xff]   ;;  %v10092_v16 = vld [vmem:[%s14390_s1 + $0x804] ss:$8 sps:$4 sm:$0xff]  }
  0x4d   :  { %3550 = vmatprep.subr.bf16.mxu1 %v9993_v17  ;;  %1722 = vmatprep.mubr.bf16.mxu0 %v10009_v18  ;;  %v10084_v17 = vld [vmem:[%s14391_s0 + $0x8] ss:$48 sps:$4 sm:$0xff]  }
  0x4e   :  { %3493 = vmatprep.mubr.bf16.mxu1 %v10009_v18  ;;  %v10087_v18 = vld [vmem:[%s14390_s1 + $0x200] ss:$8 sps:$4 sm:$0xff]  }
  0x4f   :  { %1780 = vmatpush1.bf16.msra.mxu0 %v9988_v19  ;;  %v10090_v19 = vld [vmem:[%s14390_s1 + $0x800] ss:$8 sps:$4 sm:$0xff]  }
  0x50   :  { %3551 = vmatpush1.bf16.msra.mxu1 %v9991_v20  ;;  %1781 = vmatprep.subr.bf16.mxu0 %v9998_v21  ;;  %v10095_v20 = vld [vmem:[%s14390_s1 + $0x214] ss:$8 sps:$4 sm:$0xff]  }
  0x51   :  { %3552 = vmatprep.subr.bf16.mxu1 %v10001_v22  ;;  %v10098_v21 = vld [vmem:[%s14390_s1 + $0x814] ss:$8 sps:$4 sm:$0xff]  }
  0x52   :  { %1723 = vmatmul.mubr.bf16.gmra.mrb[8].mxu0 %v10017_v25  ;;  %v10111_v22 = vld [vmem:[%s14391_s0 + $0x6c] ss:$48 sps:$4 sm:$0xff]  }
  0x53   :  { %3494 = vmatmul.mubr.bf16.gmra.mrb[8].mxu1 %v10017_v25  ;;  %1782 = vmatpush1.bf16.msra.mxu0 %v9996_v23  ;;  %v10093_v23 = vld [vmem:[%s14390_s1 + $0x210] ss:$8 sps:$4 sm:$0xff]   ;;  %v10101_v25 = vld [vmem:[%s14390_s1 + $0x224] ss:$8 sps:$4 sm:$0xff]  }
  0x54   :  { %3553 = vmatpush1.bf16.msra.mxu1 %v9999_v24  ;;  %1783 = vmatprep.subr.bf16.mxu0 %v10005_v26  ;;  %v10096_v24 = vld [vmem:[%s14390_s1 + $0x810] ss:$8 sps:$4 sm:$0xff]   ;;  %v10104_v26 = vld [vmem:[%s14390_s1 + $0x824] ss:$8 sps:$4 sm:$0xff]  }
  0x55   :  { %3554 = vmatprep.subr.bf16.mxu1 %v10008_v27  ;;  %1732 = vmatprep.mubr.bf16.mxu0 %v10024_v28  ;;  %v10099_v27 = vld [vmem:[%s14390_s1 + $0x220] ss:$8 sps:$4 sm:$0xff]  }
  0x56   :  { %3503 = vmatprep.mubr.bf16.mxu1 %v10024_v28  ;;  %v10119_v28 = vld [vmem:[%s14391_s0 + $0x68] ss:$48 sps:$4 sm:$0xff]  }
  0x57   :  { %1784 = vmatpush1.bf16.msra.mxu0 %v10003_v29  ;;  %v10102_v29 = vld [vmem:[%s14390_s1 + $0x820] ss:$8 sps:$4 sm:$0xff]  }
  0x58   :  { %3555 = vmatpush1.bf16.msra.mxu1 %v10006_v30  ;;  %1785 = vmatprep.subr.bf16.mxu0 %v10013_v31  ;;  %v10107_v30 = vld [vmem:[%s14390_s1 + $0x234] ss:$8 sps:$4 sm:$0xff]  }
  0x59   :  { %3556 = vmatprep.subr.bf16.mxu1 %v10016_v32  ;;  %v10110_v31 = vld [vmem:[%s14390_s1 + $0x834] ss:$8 sps:$4 sm:$0xff]  }
  0x5a   :  { %1733 = vmatmul.mubr.bf16.gmra.mrb[12].mxu0 %v10032_v35  ;;  %v10126_v32 = vld [vmem:[%s14391_s0 + $0xcc] ss:$48 sps:$4 sm:$0xff]  }
  0x5b   :  { %3504 = vmatmul.mubr.bf16.gmra.mrb[12].mxu1 %v10032_v35  ;;  %1786 = vmatpush1.bf16.msra.mxu0 %v10011_v33  ;;  %v10105_v33 = vld [vmem:[%s14390_s1 + $0x230] ss:$8 sps:$4 sm:$0xff]   ;;  %v10115_v35 = vld [vmem:[%s14390_s1 + $0x244] ss:$8 sps:$4 sm:$0xff]  }
  0x5c   :  { %3557 = vmatpush1.bf16.msra.mxu1 %v10014_v34  ;;  %1787 = vmatprep.subr.bf16.mxu0 %v10020_v36  ;;  %v10108_v34 = vld [vmem:[%s14390_s1 + $0x830] ss:$8 sps:$4 sm:$0xff]   ;;  %v10118_v36 = vld [vmem:[%s14390_s1 + $0x844] ss:$8 sps:$4 sm:$0xff]  }
  0x5d   :  { %3558 = vmatprep.subr.bf16.mxu1 %v10023_v37  ;;  %1742 = vmatprep.mubr.bf16.mxu0 %v10039_v38  ;;  %v10113_v37 = vld [vmem:[%s14390_s1 + $0x240] ss:$8 sps:$4 sm:$0xff]  }
  0x5e   :  { %3513 = vmatprep.mubr.bf16.mxu1 %v10039_v38  ;;  %v10116_v38 = vld [vmem:[%s14390_s1 + $0x840] ss:$8 sps:$4 sm:$0xff]  }
  0x5f   :  { %1788 = vmatpush1.bf16.msra.mxu0 %v10018_v39  ;;  %v10134_v39 = vld [vmem:[%s14391_s0 + $0xc8] ss:$48 sps:$4 sm:$0xff]  }
  0x60   :  { %3559 = vmatpush1.bf16.msra.mxu1 %v10021_v40  ;;  %1789 = vmatprep.subr.bf16.mxu0 %v10028_v41  ;;  %v10122_v40 = vld [vmem:[%s14390_s1 + $0x254] ss:$8 sps:$4 sm:$0xff]  }
  0x61   :  { %3560 = vmatprep.subr.bf16.mxu1 %v10031_v42  ;;  %v10125_v41 = vld [vmem:[%s14390_s1 + $0x854] ss:$8 sps:$4 sm:$0xff]  }
  0x62   :  { %1743 = vmatmul.mubr.bf16.gmra.mrb[16].mxu0 %v10047_v45  ;;  %v10141_v42 = vld [vmem:[%s14391_s0 + $0x12c] ss:$48 sps:$4 sm:$0xff]  }
  0x63   :  { %3514 = vmatmul.mubr.bf16.gmra.mrb[16].mxu1 %v10047_v45  ;;  %1790 = vmatpush1.bf16.msra.mxu0 %v10026_v43  ;;  %v10120_v43 = vld [vmem:[%s14390_s1 + $0x250] ss:$8 sps:$4 sm:$0xff]   ;;  %v10130_v45 = vld [vmem:[%s14390_s1 + $0x264] ss:$8 sps:$4 sm:$0xff]  }
  0x64   :  { %3561 = vmatpush1.bf16.msra.mxu1 %v10029_v44  ;;  %1791 = vmatprep.subr.bf16.mxu0 %v10035_v46  ;;  %v10123_v44 = vld [vmem:[%s14390_s1 + $0x850] ss:$8 sps:$4 sm:$0xff]   ;;  %v10133_v46 = vld [vmem:[%s14390_s1 + $0x864] ss:$8 sps:$4 sm:$0xff]  }
  0x65   :  { %3562 = vmatprep.subr.bf16.mxu1 %v10038_v47  ;;  %1752 = vmatprep.mubr.bf16.mxu0 %v10054_v48  ;;  %v10128_v47 = vld [vmem:[%s14390_s1 + $0x260] ss:$8 sps:$4 sm:$0xff]  }
  0x66   :  { %3523 = vmatprep.mubr.bf16.mxu1 %v10054_v48  ;;  %v10131_v48 = vld [vmem:[%s14390_s1 + $0x860] ss:$8 sps:$4 sm:$0xff]  }
  0x67   :  { %1792 = vmatpush1.bf16.msra.mxu0 %v10033_v49  ;;  %v10149_v49 = vld [vmem:[%s14391_s0 + $0x128] ss:$48 sps:$4 sm:$0xff]  }
  0x68   :  { %3563 = vmatpush1.bf16.msra.mxu1 %v10036_v50  ;;  %1793 = vmatprep.subr.bf16.mxu0 %v10043_v51  ;;  %v10137_v50 = vld [vmem:[%s14390_s1 + $0x274] ss:$8 sps:$4 sm:$0xff]  }
  0x69   :  { %3564 = vmatprep.subr.bf16.mxu1 %v10046_v52  ;;  %v10140_v51 = vld [vmem:[%s14390_s1 + $0x874] ss:$8 sps:$4 sm:$0xff]  }
  0x6a   :  { %1753 = vmatmul.mubr.bf16.gmra.mrb[20].mxu0 %v10062_v55  ;;  %v10156_v52 = vld [vmem:[%s14391_s0 + $0x18c] ss:$48 sps:$4 sm:$0xff]  }
  0x6b   :  { %3524 = vmatmul.mubr.bf16.gmra.mrb[20].mxu1 %v10062_v55  ;;  %1794 = vmatpush1.bf16.msra.mxu0 %v10041_v53  ;;  %v10135_v53 = vld [vmem:[%s14390_s1 + $0x270] ss:$8 sps:$4 sm:$0xff]   ;;  %v10145_v55 = vld [vmem:[%s14390_s1 + $0x284] ss:$8 sps:$4 sm:$0xff]  }
  0x6c   :  { %3565 = vmatpush1.bf16.msra.mxu1 %v10044_v54  ;;  %1795 = vmatprep.subr.bf16.mxu0 %v10050_v56  ;;  %v10138_v54 = vld [vmem:[%s14390_s1 + $0x870] ss:$8 sps:$4 sm:$0xff]   ;;  %v10148_v56 = vld [vmem:[%s14390_s1 + $0x884] ss:$8 sps:$4 sm:$0xff]  }
  0x6d   :  { %3566 = vmatprep.subr.bf16.mxu1 %v10053_v57  ;;  %1762 = vmatprep.mubr.bf16.mxu0 %v10069_v58  ;;  %v10143_v57 = vld [vmem:[%s14390_s1 + $0x280] ss:$8 sps:$4 sm:$0xff]  }
  0x6e   :  { %3533 = vmatprep.mubr.bf16.mxu1 %v10069_v58  ;;  %v10164_v58 = vld [vmem:[%s14391_s0 + $0x188] ss:$48 sps:$4 sm:$0xff]  }
  0x6f   :  { %1796 = vmatpush1.bf16.msra.mxu0 %v10048_v59  ;;  %v10146_v59 = vld [vmem:[%s14390_s1 + $0x880] ss:$8 sps:$4 sm:$0xff]  }
  0x70   :  { %3567 = vmatpush1.bf16.msra.mxu1 %v10051_v60  ;;  %1797 = vmatprep.subr.bf16.mxu0 %v10058_v61  ;;  %v10152_v60 = vld [vmem:[%s14390_s1 + $0x294] ss:$8 sps:$4 sm:$0xff]  }
  0x71   :  { %3568 = vmatprep.subr.bf16.mxu1 %v10061_v62  ;;  %v10155_v61 = vld [vmem:[%s14390_s1 + $0x894] ss:$8 sps:$4 sm:$0xff]  }
  0x72   :  { %1763 = vmatmul.mubr.bf16.gmra.mrb[24].mxu0 %v10077_v1  ;;  %v10171_v62 = vld [vmem:[%s14391_s0 + $0x1ec] ss:$48 sps:$4 sm:$0xff]  }
  0x73   :  { %3534 = vmatmul.mubr.bf16.gmra.mrb[24].mxu1 %v10077_v1  ;;  %1798 = vmatpush1.bf16.msra.mxu0 %v10056_v63  ;;  %v10150_v63 = vld [vmem:[%s14390_s1 + $0x290] ss:$8 sps:$4 sm:$0xff]   ;;  %v10160_v1 = vld [vmem:[%s14390_s1 + $0x2a4] ss:$8 sps:$4 sm:$0xff]  }
  0x74   :  { %3569 = vmatpush1.bf16.msra.mxu1 %v10059_v0  ;;  %1799 = vmatprep.subr.bf16.mxu0 %v10065_v2  ;;  %v10153_v0 = vld [vmem:[%s14390_s1 + $0x890] ss:$8 sps:$4 sm:$0xff]   ;;  %v10163_v2 = vld [vmem:[%s14390_s1 + $0x8a4] ss:$8 sps:$4 sm:$0xff]  }
  0x75   :  { %3570 = vmatprep.subr.bf16.mxu1 %v10068_v3  ;;  %1805 = vmatprep.mubr.bf16.mxu0 %v10086_v4  ;;  %v10158_v3 = vld [vmem:[%s14390_s1 + $0x2a0] ss:$8 sps:$4 sm:$0xff]  }
  0x76   :  { %3576 = vmatprep.mubr.bf16.mxu1 %v10086_v4  ;;  %v10179_v4 = vld [vmem:[%s14391_s0 + $0x1e8] ss:$48 sps:$4 sm:$0xff]  }
  0x77   :  { %1800 = vmatpush1.bf16.msra.mxu0 %v10063_v5  ;;  %v10161_v5 = vld [vmem:[%s14390_s1 + $0x8a0] ss:$8 sps:$4 sm:$0xff]  }
  0x78   :  { %3571 = vmatpush1.bf16.msra.mxu1 %v10066_v6  ;;  %1801 = vmatprep.subr.bf16.mxu0 %v10073_v7  ;;  %v10167_v6 = vld [vmem:[%s14390_s1 + $0x2b4] ss:$8 sps:$4 sm:$0xff]  }
  0x79   :  { %3572 = vmatprep.subr.bf16.mxu1 %v10076_v8  ;;  %v10170_v7 = vld [vmem:[%s14390_s1 + $0x8b4] ss:$8 sps:$4 sm:$0xff]  }
  0x7a   :  { %v10186_v8 = vld [vmem:[%s14391_s0 + $0x24c] ss:$48 sps:$4 sm:$0xff]  }
  0x7b   :  { %1802 = vmatpush1.bf16.msra.mxu0 %v10071_v9  ;;  %v10165_v9 = vld [vmem:[%s14390_s1 + $0x2b0] ss:$8 sps:$4 sm:$0xff]  }
  0x7c   :  { %3573 = vmatpush1.bf16.msra.mxu1 %v10074_v10  ;;  %1803 = vmatprep.subr.bf16.mxu0 %v10080_v11  ;;  %v10168_v10 = vld [vmem:[%s14390_s1 + $0x8b0] ss:$8 sps:$4 sm:$0xff]   ;;  %v10175_v11 = vld [vmem:[%s14390_s1 + $0x2c4] ss:$8 sps:$4 sm:$0xff]  }
  0x7d   :  { %3574 = vmatprep.subr.bf16.mxu1 %v10083_v12  ;;  %v10178_v12 = vld [vmem:[%s14390_s1 + $0x8c4] ss:$8 sps:$4 sm:$0xff]  }
  0x7f   :  { %1804 = vmatpush1.bf16.msra.mxu0 %v10078_v13  ;;  %v10173_v13 = vld [vmem:[%s14390_s1 + $0x2c0] ss:$8 sps:$4 sm:$0xff]  }
  0x80   :  { %3575 = vmatpush1.bf16.msra.mxu1 %v10081_v14  ;;  %1876 = vmatprep.subr.bf16.mxu0 %v10089_v15  ;;  %v10176_v14 = vld [vmem:[%s14390_s1 + $0x8c0] ss:$8 sps:$4 sm:$0xff]  }
  0x81   :  { %3647 = vmatprep.subr.bf16.mxu1 %v10092_v16  ;;  %v10194_v15 = vld [vmem:[%s14391_s0 + $0x248] ss:$48 sps:$4 sm:$0xff]   ;;  %v10182_v16 = vld [vmem:[%s14390_s1 + $0x2d4] ss:$8 sps:$4 sm:$0xff]  }
  0x82   :  { %1806 = vmatmul.mubr.bf16.vlgmr.msra.gmra.mrb[0].mxu0 %v10084_v17 }
  0x83   :  { %3577 = vmatmul.mubr.bf16.vlgmr.msra.gmra.mrb[0].mxu1 %v10084_v17  ;;  %1877 = vmatpush1.bf16.msra.mxu0 %v10087_v18  ;;  %v10185_v17 = vld [vmem:[%s14390_s1 + $0x8d4] ss:$8 sps:$4 sm:$0xff]  }
  0x84   :  { %3648 = vmatpush1.bf16.msra.mxu1 %v10090_v19  ;;  %1878 = vmatprep.subr.bf16.mxu0 %v10095_v20  ;;  %v10203_v18 = vld [vmem:[%s14391_s0 + $0x14] ss:$48 sps:$4 sm:$0xff]   ;;  %v10180_v19 = vld [vmem:[%s14390_s1 + $0x2d0] ss:$8 sps:$4 sm:$0xff]  }
  0x85   :  { %3649 = vmatprep.subr.bf16.mxu1 %v10098_v21  ;;  %1815 = vmatprep.mubr.bf16.mxu0 %v10111_v22  ;;  %v10183_v20 = vld [vmem:[%s14390_s1 + $0x8d0] ss:$8 sps:$4 sm:$0xff]   ;;  %v10190_v21 = vld [vmem:[%s14390_s1 + $0x2e4] ss:$8 sps:$4 sm:$0xff]  }
  0x86   :  { %3586 = vmatprep.mubr.bf16.mxu1 %v10111_v22  ;;  %v10193_v22 = vld [vmem:[%s14390_s1 + $0x8e4] ss:$8 sps:$4 sm:$0xff]  }
  0x87   :  { %1879 = vmatpush1.bf16.msra.mxu0 %v10093_v23  ;;  %v10188_v23 = vld [vmem:[%s14390_s1 + $0x2e0] ss:$8 sps:$4 sm:$0xff]  }
  0x88   :  { %3650 = vmatpush1.bf16.msra.mxu1 %v10096_v24  ;;  %1880 = vmatprep.subr.bf16.mxu0 %v10101_v25  ;;  %v10191_v24 = vld [vmem:[%s14390_s1 + $0x8e0] ss:$8 sps:$4 sm:$0xff]   ;;  %v10197_v25 = vld [vmem:[%s14390_s1 + $0x2f4] ss:$8 sps:$4 sm:$0xff]  }
  0x89   :  { %3651 = vmatprep.subr.bf16.mxu1 %v10104_v26  ;;  %v10200_v26 = vld [vmem:[%s14390_s1 + $0x8f4] ss:$8 sps:$4 sm:$0xff]  }
  0x8a   :  { %1816 = vmatmul.mubr.bf16.gmra.mrb[4].mxu0 %v10119_v28 }
  0x8b   :  { %3587 = vmatmul.mubr.bf16.gmra.mrb[4].mxu1 %v10119_v28  ;;  %1881 = vmatpush1.bf16.msra.mxu0 %v10099_v27  ;;  %v10195_v27 = vld [vmem:[%s14390_s1 + $0x2f0] ss:$8 sps:$4 sm:$0xff]  }
  0x8c   :  { %3652 = vmatpush1.bf16.msra.mxu1 %v10102_v29  ;;  %1882 = vmatprep.subr.bf16.mxu0 %v10107_v30  ;;  %v10198_v28 = vld [vmem:[%s14390_s1 + $0x8f0] ss:$8 sps:$4 sm:$0xff]   ;;  %v10206_v29 = vld [vmem:[%s14390_s1 + $0x304] ss:$8 sps:$4 sm:$0xff]  }
  0x8d   :  { %3653 = vmatprep.subr.bf16.mxu1 %v10110_v31  ;;  %1825 = vmatprep.mubr.bf16.mxu0 %v10126_v32  ;;  %v10209_v30 = vld [vmem:[%s14390_s1 + $0x904] ss:$8 sps:$4 sm:$0xff]   ;;  %v10201_v31 = vld [vmem:[%s14391_s0 + $0x10] ss:$48 sps:$4 sm:$0xff]  }
  0x8e   :  { %3596 = vmatprep.mubr.bf16.mxu1 %v10126_v32  ;;  %v10204_v32 = vld [vmem:[%s14390_s1 + $0x300] ss:$8 sps:$4 sm:$0xff]  }
  0x8f   :  { %1883 = vmatpush1.bf16.msra.mxu0 %v10105_v33  ;;  %v10207_v33 = vld [vmem:[%s14390_s1 + $0x900] ss:$8 sps:$4 sm:$0xff]  }
  0x90   :  { %3654 = vmatpush1.bf16.msra.mxu1 %v10108_v34  ;;  %1884 = vmatprep.subr.bf16.mxu0 %v10115_v35  ;;  %v10212_v34 = vld [vmem:[%s14390_s1 + $0x314] ss:$8 sps:$4 sm:$0xff]  }
  0x91   :  { %3655 = vmatprep.subr.bf16.mxu1 %v10118_v36  ;;  %v10215_v35 = vld [vmem:[%s14390_s1 + $0x914] ss:$8 sps:$4 sm:$0xff]  }
  0x92   :  { %1826 = vmatmul.mubr.bf16.gmra.mrb[8].mxu0 %v10134_v39  ;;  %v10228_v36 = vld [vmem:[%s14391_s0 + $0x74] ss:$48 sps:$4 sm:$0xff]  }
  0x93   :  { %3597 = vmatmul.mubr.bf16.gmra.mrb[8].mxu1 %v10134_v39  ;;  %1885 = vmatpush1.bf16.msra.mxu0 %v10113_v37  ;;  %v10210_v37 = vld [vmem:[%s14390_s1 + $0x310] ss:$8 sps:$4 sm:$0xff]   ;;  %v10218_v39 = vld [vmem:[%s14390_s1 + $0x324] ss:$8 sps:$4 sm:$0xff]  }
  0x94   :  { %3656 = vmatpush1.bf16.msra.mxu1 %v10116_v38  ;;  %1886 = vmatprep.subr.bf16.mxu0 %v10122_v40  ;;  %v10213_v38 = vld [vmem:[%s14390_s1 + $0x910] ss:$8 sps:$4 sm:$0xff]   ;;  %v10221_v40 = vld [vmem:[%s14390_s1 + $0x924] ss:$8 sps:$4 sm:$0xff]  }
  0x95   :  { %3657 = vmatprep.subr.bf16.mxu1 %v10125_v41  ;;  %1835 = vmatprep.mubr.bf16.mxu0 %v10141_v42  ;;  %v10216_v41 = vld [vmem:[%s14390_s1 + $0x320] ss:$8 sps:$4 sm:$0xff]  }
  0x96   :  { %3606 = vmatprep.mubr.bf16.mxu1 %v10141_v42  ;;  %v10219_v42 = vld [vmem:[%s14390_s1 + $0x920] ss:$8 sps:$4 sm:$0xff]  }
  0x97   :  { %1887 = vmatpush1.bf16.msra.mxu0 %v10120_v43  ;;  %v10236_v43 = vld [vmem:[%s14391_s0 + $0x70] ss:$48 sps:$4 sm:$0xff]  }
  0x98   :  { %3658 = vmatpush1.bf16.msra.mxu1 %v10123_v44  ;;  %1888 = vmatprep.subr.bf16.mxu0 %v10130_v45  ;;  %v10224_v44 = vld [vmem:[%s14390_s1 + $0x334] ss:$8 sps:$4 sm:$0xff]  }
  0x99   :  { %3659 = vmatprep.subr.bf16.mxu1 %v10133_v46  ;;  %v10227_v45 = vld [vmem:[%s14390_s1 + $0x934] ss:$8 sps:$4 sm:$0xff]  }
  0x9a   :  { %1836 = vmatmul.mubr.bf16.gmra.mrb[12].mxu0 %v10149_v49  ;;  %v10243_v46 = vld [vmem:[%s14391_s0 + $0xd4] ss:$48 sps:$4 sm:$0xff]  }
  0x9b   :  { %3607 = vmatmul.mubr.bf16.gmra.mrb[12].mxu1 %v10149_v49  ;;  %1889 = vmatpush1.bf16.msra.mxu0 %v10128_v47  ;;  %v10222_v47 = vld [vmem:[%s14390_s1 + $0x330] ss:$8 sps:$4 sm:$0xff]   ;;  %v10232_v49 = vld [vmem:[%s14390_s1 + $0x344] ss:$8 sps:$4 sm:$0xff]  }
  0x9c   :  { %3660 = vmatpush1.bf16.msra.mxu1 %v10131_v48  ;;  %1890 = vmatprep.subr.bf16.mxu0 %v10137_v50  ;;  %v10225_v48 = vld [vmem:[%s14390_s1 + $0x930] ss:$8 sps:$4 sm:$0xff]   ;;  %v10235_v50 = vld [vmem:[%s14390_s1 + $0x944] ss:$8 sps:$4 sm:$0xff]  }
  0x9d   :  { %3661 = vmatprep.subr.bf16.mxu1 %v10140_v51  ;;  %1845 = vmatprep.mubr.bf16.mxu0 %v10156_v52  ;;  %v10230_v51 = vld [vmem:[%s14390_s1 + $0x340] ss:$8 sps:$4 sm:$0xff]  }
  0x9e   :  { %3616 = vmatprep.mubr.bf16.mxu1 %v10156_v52  ;;  %v10233_v52 = vld [vmem:[%s14390_s1 + $0x940] ss:$8 sps:$4 sm:$0xff]  }
  0x9f   :  { %1891 = vmatpush1.bf16.msra.mxu0 %v10135_v53  ;;  %v10251_v53 = vld [vmem:[%s14391_s0 + $0xd0] ss:$48 sps:$4 sm:$0xff]  }
  0xa0   :  { %3662 = vmatpush1.bf16.msra.mxu1 %v10138_v54  ;;  %1892 = vmatprep.subr.bf16.mxu0 %v10145_v55  ;;  %v10239_v54 = vld [vmem:[%s14390_s1 + $0x354] ss:$8 sps:$4 sm:$0xff]  }
  0xa1   :  { %3663 = vmatprep.subr.bf16.mxu1 %v10148_v56  ;;  %v10242_v55 = vld [vmem:[%s14390_s1 + $0x954] ss:$8 sps:$4 sm:$0xff]  }
  0xa2   :  { %1846 = vmatmul.mubr.bf16.gmra.mrb[16].mxu0 %v10164_v58  ;;  %v10258_v56 = vld [vmem:[%s14391_s0 + $0x134] ss:$48 sps:$4 sm:$0xff]  }
  0xa3   :  { %3617 = vmatmul.mubr.bf16.gmra.mrb[16].mxu1 %v10164_v58  ;;  %1893 = vmatpush1.bf16.msra.mxu0 %v10143_v57  ;;  %v10237_v57 = vld [vmem:[%s14390_s1 + $0x350] ss:$8 sps:$4 sm:$0xff]  }
  0xa4   :  { %3664 = vmatpush1.bf16.msra.mxu1 %v10146_v59  ;;  %1894 = vmatprep.subr.bf16.mxu0 %v10152_v60  ;;  %v10240_v58 = vld [vmem:[%s14390_s1 + $0x950] ss:$8 sps:$4 sm:$0xff]   ;;  %v10247_v59 = vld [vmem:[%s14390_s1 + $0x364] ss:$8 sps:$4 sm:$0xff]  }
  0xa5   :  { %3665 = vmatprep.subr.bf16.mxu1 %v10155_v61  ;;  %1855 = vmatprep.mubr.bf16.mxu0 %v10171_v62  ;;  %v10250_v60 = vld [vmem:[%s14390_s1 + $0x964] ss:$8 sps:$4 sm:$0xff]   ;;  %v10245_v61 = vld [vmem:[%s14390_s1 + $0x360] ss:$8 sps:$4 sm:$0xff]  }
  0xa6   :  { %3626 = vmatprep.mubr.bf16.mxu1 %v10171_v62  ;;  %v10248_v62 = vld [vmem:[%s14390_s1 + $0x960] ss:$8 sps:$4 sm:$0xff]  }
  0xa7   :  { %1895 = vmatpush1.bf16.msra.mxu0 %v10150_v63  ;;  %v10266_v63 = vld [vmem:[%s14391_s0 + $0x130] ss:$48 sps:$4 sm:$0xff]  }
  0xa8   :  { %3666 = vmatpush1.bf16.msra.mxu1 %v10153_v0  ;;  %1896 = vmatprep.subr.bf16.mxu0 %v10160_v1  ;;  %v10254_v0 = vld [vmem:[%s14390_s1 + $0x374] ss:$8 sps:$4 sm:$0xff]  }
  0xa9   :  { %3667 = vmatprep.subr.bf16.mxu1 %v10163_v2  ;;  %v10257_v1 = vld [vmem:[%s14390_s1 + $0x974] ss:$8 sps:$4 sm:$0xff]  }
  0xaa   :  { %1856 = vmatmul.mubr.bf16.gmra.mrb[20].mxu0 %v10179_v4  ;;  %v10273_v2 = vld [vmem:[%s14391_s0 + $0x194] ss:$48 sps:$4 sm:$0xff]  }
  0xab   :  { %3627 = vmatmul.mubr.bf16.gmra.mrb[20].mxu1 %v10179_v4  ;;  %1897 = vmatpush1.bf16.msra.mxu0 %v10158_v3  ;;  %v10252_v3 = vld [vmem:[%s14390_s1 + $0x370] ss:$8 sps:$4 sm:$0xff]  }
  0xac   :  { %3668 = vmatpush1.bf16.msra.mxu1 %v10161_v5  ;;  %1898 = vmatprep.subr.bf16.mxu0 %v10167_v6  ;;  %v10255_v4 = vld [vmem:[%s14390_s1 + $0x970] ss:$8 sps:$4 sm:$0xff]   ;;  %v10262_v5 = vld [vmem:[%s14390_s1 + $0x384] ss:$8 sps:$4 sm:$0xff]  }
  0xad   :  { %3669 = vmatprep.subr.bf16.mxu1 %v10170_v7  ;;  %1865 = vmatprep.mubr.bf16.mxu0 %v10186_v8  ;;  %v10265_v6 = vld [vmem:[%s14390_s1 + $0x984] ss:$8 sps:$4 sm:$0xff]   ;;  %v10260_v7 = vld [vmem:[%s14390_s1 + $0x380] ss:$8 sps:$4 sm:$0xff]  }
  0xae   :  { %3636 = vmatprep.mubr.bf16.mxu1 %v10186_v8  ;;  %v10263_v8 = vld [vmem:[%s14390_s1 + $0x980] ss:$8 sps:$4 sm:$0xff]  }
  0xaf   :  { %1899 = vmatpush1.bf16.msra.mxu0 %v10165_v9  ;;  %v10281_v9 = vld [vmem:[%s14391_s0 + $0x190] ss:$48 sps:$4 sm:$0xff]  }
  0xb0   :  { %3670 = vmatpush1.bf16.msra.mxu1 %v10168_v10  ;;  %1900 = vmatprep.subr.bf16.mxu0 %v10175_v11  ;;  %v10269_v10 = vld [vmem:[%s14390_s1 + $0x394] ss:$8 sps:$4 sm:$0xff]  }
  0xb1   :  { %3671 = vmatprep.subr.bf16.mxu1 %v10178_v12  ;;  %v10272_v11 = vld [vmem:[%s14390_s1 + $0x994] ss:$8 sps:$4 sm:$0xff]  }
  0xb2   :  { %1866 = vmatmul.mubr.bf16.gmra.mrb[24].mxu0 %v10194_v15  ;;  %v10288_v12 = vld [vmem:[%s14391_s0 + $0x1f4] ss:$48 sps:$4 sm:$0xff]  }
  0xb3   :  { %3637 = vmatmul.mubr.bf16.gmra.mrb[24].mxu1 %v10194_v15  ;;  %1901 = vmatpush1.bf16.msra.mxu0 %v10173_v13  ;;  %v10267_v13 = vld [vmem:[%s14390_s1 + $0x390] ss:$8 sps:$4 sm:$0xff]   ;;  %v10277_v15 = vld [vmem:[%s14390_s1 + $0x3a4] ss:$8 sps:$4 sm:$0xff]  }
  0xb4   :  { %3672 = vmatpush1.bf16.msra.mxu1 %v10176_v14  ;;  %1902 = vmatprep.subr.bf16.mxu0 %v10182_v16  ;;  %v10270_v14 = vld [vmem:[%s14390_s1 + $0x990] ss:$8 sps:$4 sm:$0xff]   ;;  %v10280_v16 = vld [vmem:[%s14390_s1 + $0x9a4] ss:$8 sps:$4 sm:$0xff]  }
  0xb5   :  { %3673 = vmatprep.subr.bf16.mxu1 %v10185_v17  ;;  %1908 = vmatprep.mubr.bf16.mxu0 %v10203_v18  ;;  %v10275_v17 = vld [vmem:[%s14390_s1 + $0x3a0] ss:$8 sps:$4 sm:$0xff]  }
  0xb6   :  { %3679 = vmatprep.mubr.bf16.mxu1 %v10203_v18  ;;  %v10296_v18 = vld [vmem:[%s14391_s0 + $0x1f0] ss:$48 sps:$4 sm:$0xff]  }
  0xb7   :  { %1903 = vmatpush1.bf16.msra.mxu0 %v10180_v19  ;;  %v10278_v19 = vld [vmem:[%s14390_s1 + $0x9a0] ss:$8 sps:$4 sm:$0xff]  }
  0xb8   :  { %3674 = vmatpush1.bf16.msra.mxu1 %v10183_v20  ;;  %1904 = vmatprep.subr.bf16.mxu0 %v10190_v21  ;;  %v10284_v20 = vld [vmem:[%s14390_s1 + $0x3b4] ss:$8 sps:$4 sm:$0xff]  }
  0xb9   :  { %3675 = vmatprep.subr.bf16.mxu1 %v10193_v22  ;;  %v10287_v21 = vld [vmem:[%s14390_s1 + $0x9b4] ss:$8 sps:$4 sm:$0xff]  }
  0xba   :  { %v10303_v22 = vld [vmem:[%s14391_s0 + $0x254] ss:$48 sps:$4 sm:$0xff]  }
  0xbb   :  { %1905 = vmatpush1.bf16.msra.mxu0 %v10188_v23  ;;  %v10282_v23 = vld [vmem:[%s14390_s1 + $0x3b0] ss:$8 sps:$4 sm:$0xff]  }
  0xbc   :  { %3676 = vmatpush1.bf16.msra.mxu1 %v10191_v24  ;;  %1906 = vmatprep.subr.bf16.mxu0 %v10197_v25  ;;  %v10285_v24 = vld [vmem:[%s14390_s1 + $0x9b0] ss:$8 sps:$4 sm:$0xff]   ;;  %v10292_v25 = vld [vmem:[%s14390_s1 + $0x3c4] ss:$8 sps:$4 sm:$0xff]  }
  0xbd   :  { %3677 = vmatprep.subr.bf16.mxu1 %v10200_v26  ;;  %v10295_v26 = vld [vmem:[%s14390_s1 + $0x9c4] ss:$8 sps:$4 sm:$0xff]  }
  0xbf   :  { %1907 = vmatpush1.bf16.msra.mxu0 %v10195_v27  ;;  %v10290_v27 = vld [vmem:[%s14390_s1 + $0x3c0] ss:$8 sps:$4 sm:$0xff]  }
  0xc0   :  { %3678 = vmatpush1.bf16.msra.mxu1 %v10198_v28  ;;  %1979 = vmatprep.subr.bf16.mxu0 %v10206_v29  ;;  %v10311_v28 = vld [vmem:[%s14391_s0 + $0x250] ss:$48 sps:$4 sm:$0xff]  }
  0xc1   :  { %3750 = vmatprep.subr.bf16.mxu1 %v10209_v30  ;;  %v10293_v29 = vld [vmem:[%s14390_s1 + $0x9c0] ss:$8 sps:$4 sm:$0xff]   ;;  %v10299_v30 = vld [vmem:[%s14390_s1 + $0x3d4] ss:$8 sps:$4 sm:$0xff]  }
  0xc2   :  { %1909 = vmatmul.mubr.bf16.vlgmr.msra.gmra.mrb[0].mxu0 %v10201_v31 }
  0xc3   :  { %3680 = vmatmul.mubr.bf16.vlgmr.msra.gmra.mrb[0].mxu1 %v10201_v31  ;;  %1980 = vmatpush1.bf16.msra.mxu0 %v10204_v32  ;;  %v10302_v31 = vld [vmem:[%s14390_s1 + $0x9d4] ss:$8 sps:$4 sm:$0xff]  }
  0xc4   :  { %3751 = vmatpush1.bf16.msra.mxu1 %v10207_v33  ;;  %1981 = vmatprep.subr.bf16.mxu0 %v10212_v34  ;;  %v10320_v32 = vld [vmem:[%s14391_s0 + $0x1c] ss:$48 sps:$4 sm:$0xff]   ;;  %v10297_v33 = vld [vmem:[%s14390_s1 + $0x3d0] ss:$8 sps:$4 sm:$0xff]  }
  0xc5   :  { %3752 = vmatprep.subr.bf16.mxu1 %v10215_v35  ;;  %1918 = vmatprep.mubr.bf16.mxu0 %v10228_v36  ;;  %v10300_v34 = vld [vmem:[%s14390_s1 + $0x9d0] ss:$8 sps:$4 sm:$0xff]   ;;  %v10307_v35 = vld [vmem:[%s14390_s1 + $0x3e4] ss:$8 sps:$4 sm:$0xff]  }
  0xc6   :  { %3689 = vmatprep.mubr.bf16.mxu1 %v10228_v36  ;;  %v10310_v36 = vld [vmem:[%s14390_s1 + $0x9e4] ss:$8 sps:$4 sm:$0xff]  }
  0xc7   :  { %1982 = vmatpush1.bf16.msra.mxu0 %v10210_v37  ;;  %v10305_v37 = vld [vmem:[%s14390_s1 + $0x3e0] ss:$8 sps:$4 sm:$0xff]  }
  0xc8   :  { %3753 = vmatpush1.bf16.msra.mxu1 %v10213_v38  ;;  %1983 = vmatprep.subr.bf16.mxu0 %v10218_v39  ;;  %v10308_v38 = vld [vmem:[%s14390_s1 + $0x9e0] ss:$8 sps:$4 sm:$0xff]   ;;  %v10314_v39 = vld [vmem:[%s14390_s1 + $0x3f4] ss:$8 sps:$4 sm:$0xff]  }
  0xc9   :  { %3754 = vmatprep.subr.bf16.mxu1 %v10221_v40  ;;  %v10317_v40 = vld [vmem:[%s14390_s1 + $0x9f4] ss:$8 sps:$4 sm:$0xff]  }
  0xca   :  { %1919 = vmatmul.mubr.bf16.gmra.mrb[4].mxu0 %v10236_v43 }
  0xcb   :  { %3690 = vmatmul.mubr.bf16.gmra.mrb[4].mxu1 %v10236_v43  ;;  %1984 = vmatpush1.bf16.msra.mxu0 %v10216_v41  ;;  %v10312_v41 = vld [vmem:[%s14390_s1 + $0x3f0] ss:$8 sps:$4 sm:$0xff]   ;;  %v10323_v43 = vld [vmem:[%s14390_s1 + $0x404] ss:$8 sps:$4 sm:$0xff]  }
  0xcc   :  { %3755 = vmatpush1.bf16.msra.mxu1 %v10219_v42  ;;  %1985 = vmatprep.subr.bf16.mxu0 %v10224_v44  ;;  %v10315_v42 = vld [vmem:[%s14390_s1 + $0x9f0] ss:$8 sps:$4 sm:$0xff]   ;;  %v10326_v44 = vld [vmem:[%s14390_s1 + $0xa04] ss:$8 sps:$4 sm:$0xff]  }
  0xcd   :  { %3756 = vmatprep.subr.bf16.mxu1 %v10227_v45  ;;  %1928 = vmatprep.mubr.bf16.mxu0 %v10243_v46  ;;  %v10318_v45 = vld [vmem:[%s14391_s0 + $0x18] ss:$48 sps:$4 sm:$0xff]  }
  0xce   :  { %3699 = vmatprep.mubr.bf16.mxu1 %v10243_v46  ;;  %v10321_v46 = vld [vmem:[%s14390_s1 + $0x400] ss:$8 sps:$4 sm:$0xff]  }
  0xcf   :  { %1986 = vmatpush1.bf16.msra.mxu0 %v10222_v47  ;;  %v10324_v47 = vld [vmem:[%s14390_s1 + $0xa00] ss:$8 sps:$4 sm:$0xff]  }
  0xd0   :  { %3757 = vmatpush1.bf16.msra.mxu1 %v10225_v48  ;;  %1987 = vmatprep.subr.bf16.mxu0 %v10232_v49  ;;  %v10329_v48 = vld [vmem:[%s14390_s1 + $0x414] ss:$8 sps:$4 sm:$0xff]  }
  0xd1   :  { %3758 = vmatprep.subr.bf16.mxu1 %v10235_v50  ;;  %v10332_v49 = vld [vmem:[%s14390_s1 + $0xa14] ss:$8 sps:$4 sm:$0xff]  }
  0xd2   :  { %1929 = vmatmul.mubr.bf16.gmra.mrb[8].mxu0 %v10251_v53  ;;  %v10345_v50 = vld [vmem:[%s14391_s0 + $0x7c] ss:$48 sps:$4 sm:$0xff]  }
  0xd3   :  { %3700 = vmatmul.mubr.bf16.gmra.mrb[8].mxu1 %v10251_v53  ;;  %1988 = vmatpush1.bf16.msra.mxu0 %v10230_v51  ;;  %v10327_v51 = vld [vmem:[%s14390_s1 + $0x410] ss:$8 sps:$4 sm:$0xff]   ;;  %v10335_v53 = vld [vmem:[%s14390_s1 + $0x424] ss:$8 sps:$4 sm:$0xff]  }
  0xd4   :  { %3759 = vmatpush1.bf16.msra.mxu1 %v10233_v52  ;;  %1989 = vmatprep.subr.bf16.mxu0 %v10239_v54  ;;  %v10330_v52 = vld [vmem:[%s14390_s1 + $0xa10] ss:$8 sps:$4 sm:$0xff]   ;;  %v10338_v54 = vld [vmem:[%s14390_s1 + $0xa24] ss:$8 sps:$4 sm:$0xff]  }
  0xd5   :  { %3760 = vmatprep.subr.bf16.mxu1 %v10242_v55  ;;  %1938 = vmatprep.mubr.bf16.mxu0 %v10258_v56  ;;  %v10333_v55 = vld [vmem:[%s14390_s1 + $0x420] ss:$8 sps:$4 sm:$0xff]  }
  0xd6   :  { %3709 = vmatprep.mubr.bf16.mxu1 %v10258_v56  ;;  %v10336_v56 = vld [vmem:[%s14390_s1 + $0xa20] ss:$8 sps:$4 sm:$0xff]  }
  0xd7   :  { %1990 = vmatpush1.bf16.msra.mxu0 %v10237_v57  ;;  %v10353_v57 = vld [vmem:[%s14391_s0 + $0x78] ss:$48 sps:$4 sm:$0xff]  }
  0xd8   :  { %3761 = vmatpush1.bf16.msra.mxu1 %v10240_v58  ;;  %1991 = vmatprep.subr.bf16.mxu0 %v10247_v59  ;;  %v10341_v58 = vld [vmem:[%s14390_s1 + $0x434] ss:$8 sps:$4 sm:$0xff]  }
  0xd9   :  { %3762 = vmatprep.subr.bf16.mxu1 %v10250_v60  ;;  %v10344_v59 = vld [vmem:[%s14390_s1 + $0xa34] ss:$8 sps:$4 sm:$0xff]  }
  0xda   :  { %1939 = vmatmul.mubr.bf16.gmra.mrb[12].mxu0 %v10266_v63  ;;  %v10360_v60 = vld [vmem:[%s14391_s0 + $0xdc] ss:$48 sps:$4 sm:$0xff]  }
  0xdb   :  { %3710 = vmatmul.mubr.bf16.gmra.mrb[12].mxu1 %v10266_v63  ;;  %1992 = vmatpush1.bf16.msra.mxu0 %v10245_v61  ;;  %v10339_v61 = vld [vmem:[%s14390_s1 + $0x430] ss:$8 sps:$4 sm:$0xff]   ;;  %v10349_v63 = vld [vmem:[%s14390_s1 + $0x444] ss:$8 sps:$4 sm:$0xff]  }
  0xdc   :  { %3763 = vmatpush1.bf16.msra.mxu1 %v10248_v62  ;;  %1993 = vmatprep.subr.bf16.mxu0 %v10254_v0  ;;  %v10342_v62 = vld [vmem:[%s14390_s1 + $0xa30] ss:$8 sps:$4 sm:$0xff]   ;;  %v10352_v0 = vld [vmem:[%s14390_s1 + $0xa44] ss:$8 sps:$4 sm:$0xff]  }
  0xdd   :  { %3764 = vmatprep.subr.bf16.mxu1 %v10257_v1  ;;  %1948 = vmatprep.mubr.bf16.mxu0 %v10273_v2  ;;  %v10347_v1 = vld [vmem:[%s14390_s1 + $0x440] ss:$8 sps:$4 sm:$0xff]  }
  0xde   :  { %3719 = vmatprep.mubr.bf16.mxu1 %v10273_v2  ;;  %v10350_v2 = vld [vmem:[%s14390_s1 + $0xa40] ss:$8 sps:$4 sm:$0xff]  }
  0xdf   :  { %1994 = vmatpush1.bf16.msra.mxu0 %v10252_v3  ;;  %v10368_v3 = vld [vmem:[%s14391_s0 + $0xd8] ss:$48 sps:$4 sm:$0xff]  }
  0xe0   :  { %3765 = vmatpush1.bf16.msra.mxu1 %v10255_v4  ;;  %1995 = vmatprep.subr.bf16.mxu0 %v10262_v5  ;;  %v10356_v4 = vld [vmem:[%s14390_s1 + $0x454] ss:$8 sps:$4 sm:$0xff]  }
  0xe1   :  { %3766 = vmatprep.subr.bf16.mxu1 %v10265_v6  ;;  %v10359_v5 = vld [vmem:[%s14390_s1 + $0xa54] ss:$8 sps:$4 sm:$0xff]  }
  0xe2   :  { %1949 = vmatmul.mubr.bf16.gmra.mrb[16].mxu0 %v10281_v9  ;;  %v10375_v6 = vld [vmem:[%s14391_s0 + $0x13c] ss:$48 sps:$4 sm:$0xff]  }
  0xe3   :  { %3720 = vmatmul.mubr.bf16.gmra.mrb[16].mxu1 %v10281_v9  ;;  %1996 = vmatpush1.bf16.msra.mxu0 %v10260_v7  ;;  %v10354_v7 = vld [vmem:[%s14390_s1 + $0x450] ss:$8 sps:$4 sm:$0xff]   ;;  %v10364_v9 = vld [vmem:[%s14390_s1 + $0x464] ss:$8 sps:$4 sm:$0xff]  }
  0xe4   :  { %3767 = vmatpush1.bf16.msra.mxu1 %v10263_v8  ;;  %1997 = vmatprep.subr.bf16.mxu0 %v10269_v10  ;;  %v10357_v8 = vld [vmem:[%s14390_s1 + $0xa50] ss:$8 sps:$4 sm:$0xff]   ;;  %v10367_v10 = vld [vmem:[%s14390_s1 + $0xa64] ss:$8 sps:$4 sm:$0xff]  }
  0xe5   :  { %3768 = vmatprep.subr.bf16.mxu1 %v10272_v11  ;;  %1958 = vmatprep.mubr.bf16.mxu0 %v10288_v12  ;;  %v10362_v11 = vld [vmem:[%s14390_s1 + $0x460] ss:$8 sps:$4 sm:$0xff]  }
  0xe6   :  { %3729 = vmatprep.mubr.bf16.mxu1 %v10288_v12  ;;  %v10365_v12 = vld [vmem:[%s14390_s1 + $0xa60] ss:$8 sps:$4 sm:$0xff]  }
  0xe7   :  { %1998 = vmatpush1.bf16.msra.mxu0 %v10267_v13  ;;  %v10383_v13 = vld [vmem:[%s14391_s0 + $0x138] ss:$48 sps:$4 sm:$0xff]  }
  0xe8   :  { %3769 = vmatpush1.bf16.msra.mxu1 %v10270_v14  ;;  %1999 = vmatprep.subr.bf16.mxu0 %v10277_v15  ;;  %v10371_v14 = vld [vmem:[%s14390_s1 + $0x474] ss:$8 sps:$4 sm:$0xff]  }
  0xe9   :  { %3770 = vmatprep.subr.bf16.mxu1 %v10280_v16  ;;  %v10374_v15 = vld [vmem:[%s14390_s1 + $0xa74] ss:$8 sps:$4 sm:$0xff]  }
  0xea   :  { %1959 = vmatmul.mubr.bf16.gmra.mrb[20].mxu0 %v10296_v18  ;;  %v10390_v16 = vld [vmem:[%s14391_s0 + $0x19c] ss:$48 sps:$4 sm:$0xff]  }
  0xeb   :  { %3730 = vmatmul.mubr.bf16.gmra.mrb[20].mxu1 %v10296_v18  ;;  %2000 = vmatpush1.bf16.msra.mxu0 %v10275_v17  ;;  %v10369_v17 = vld [vmem:[%s14390_s1 + $0x470] ss:$8 sps:$4 sm:$0xff]  }
  0xec   :  { %3771 = vmatpush1.bf16.msra.mxu1 %v10278_v19  ;;  %2001 = vmatprep.subr.bf16.mxu0 %v10284_v20  ;;  %v10372_v18 = vld [vmem:[%s14390_s1 + $0xa70] ss:$8 sps:$4 sm:$0xff]   ;;  %v10379_v19 = vld [vmem:[%s14390_s1 + $0x484] ss:$8 sps:$4 sm:$0xff]  }
  0xed   :  { %3772 = vmatprep.subr.bf16.mxu1 %v10287_v21  ;;  %1968 = vmatprep.mubr.bf16.mxu0 %v10303_v22  ;;  %v10382_v20 = vld [vmem:[%s14390_s1 + $0xa84] ss:$8 sps:$4 sm:$0xff]   ;;  %v10377_v21 = vld [vmem:[%s14390_s1 + $0x480] ss:$8 sps:$4 sm:$0xff]  }
  0xee   :  { %3739 = vmatprep.mubr.bf16.mxu1 %v10303_v22  ;;  %v10380_v22 = vld [vmem:[%s14390_s1 + $0xa80] ss:$8 sps:$4 sm:$0xff]  }
  0xef   :  { %2002 = vmatpush1.bf16.msra.mxu0 %v10282_v23  ;;  %v10398_v23 = vld [vmem:[%s14391_s0 + $0x198] ss:$48 sps:$4 sm:$0xff]  }
  0xf0   :  { %3773 = vmatpush1.bf16.msra.mxu1 %v10285_v24  ;;  %2003 = vmatprep.subr.bf16.mxu0 %v10292_v25  ;;  %v10386_v24 = vld [vmem:[%s14390_s1 + $0x494] ss:$8 sps:$4 sm:$0xff]  }
  0xf1   :  { %3774 = vmatprep.subr.bf16.mxu1 %v10295_v26  ;;  %v10389_v25 = vld [vmem:[%s14390_s1 + $0xa94] ss:$8 sps:$4 sm:$0xff]  }
  0xf2   :  { %1969 = vmatmul.mubr.bf16.gmra.mrb[24].mxu0 %v10311_v28  ;;  %v10405_v26 = vld [vmem:[%s14391_s0 + $0x1fc] ss:$48 sps:$4 sm:$0xff]  }
  0xf3   :  { %3740 = vmatmul.mubr.bf16.gmra.mrb[24].mxu1 %v10311_v28  ;;  %2004 = vmatpush1.bf16.msra.mxu0 %v10290_v27  ;;  %v10384_v27 = vld [vmem:[%s14390_s1 + $0x490] ss:$8 sps:$4 sm:$0xff]  }
  0xf4   :  { %3775 = vmatpush1.bf16.msra.mxu1 %v10293_v29  ;;  %2005 = vmatprep.subr.bf16.mxu0 %v10299_v30  ;;  %v10387_v28 = vld [vmem:[%s14390_s1 + $0xa90] ss:$8 sps:$4 sm:$0xff]   ;;  %v10394_v29 = vld [vmem:[%s14390_s1 + $0x4a4] ss:$8 sps:$4 sm:$0xff]  }
  0xf5   :  { %3776 = vmatprep.subr.bf16.mxu1 %v10302_v31  ;;  %2011 = vmatprep.mubr.bf16.mxu0 %v10320_v32  ;;  %v10397_v30 = vld [vmem:[%s14390_s1 + $0xaa4] ss:$8 sps:$4 sm:$0xff]   ;;  %v10392_v31 = vld [vmem:[%s14390_s1 + $0x4a0] ss:$8 sps:$4 sm:$0xff]  }
  0xf6   :  { %3782 = vmatprep.mubr.bf16.mxu1 %v10320_v32  ;;  %v10395_v32 = vld [vmem:[%s14390_s1 + $0xaa0] ss:$8 sps:$4 sm:$0xff]  }
  0xf7   :  { %2006 = vmatpush1.bf16.msra.mxu0 %v10297_v33  ;;  %v10413_v33 = vld [vmem:[%s14391_s0 + $0x1f8] ss:$48 sps:$4 sm:$0xff]  }
  0xf8   :  { %3777 = vmatpush1.bf16.msra.mxu1 %v10300_v34  ;;  %2007 = vmatprep.subr.bf16.mxu0 %v10307_v35  ;;  %v10401_v34 = vld [vmem:[%s14390_s1 + $0x4b4] ss:$8 sps:$4 sm:$0xff]  }
  0xf9   :  { %3778 = vmatprep.subr.bf16.mxu1 %v10310_v36  ;;  %v10404_v35 = vld [vmem:[%s14390_s1 + $0xab4] ss:$8 sps:$4 sm:$0xff]  }
  0xfa   :  { %v10420_v36 = vld [vmem:[%s14391_s0 + $0x25c] ss:$48 sps:$4 sm:$0xff]  }
  0xfb   :  { %2008 = vmatpush1.bf16.msra.mxu0 %v10305_v37  ;;  %v10399_v37 = vld [vmem:[%s14390_s1 + $0x4b0] ss:$8 sps:$4 sm:$0xff]  }
  0xfc   :  { %3779 = vmatpush1.bf16.msra.mxu1 %v10308_v38  ;;  %2009 = vmatprep.subr.bf16.mxu0 %v10314_v39  ;;  %v10402_v38 = vld [vmem:[%s14390_s1 + $0xab0] ss:$8 sps:$4 sm:$0xff]   ;;  %v10409_v39 = vld [vmem:[%s14390_s1 + $0x4c4] ss:$8 sps:$4 sm:$0xff]  }
  0xfd   :  { %3780 = vmatprep.subr.bf16.mxu1 %v10317_v40  ;;  %v10412_v40 = vld [vmem:[%s14390_s1 + $0xac4] ss:$8 sps:$4 sm:$0xff]  }
  0xff   :  { %2010 = vmatpush1.bf16.msra.mxu0 %v10312_v41  ;;  %v10407_v41 = vld [vmem:[%s14390_s1 + $0x4c0] ss:$8 sps:$4 sm:$0xff]  }
 0x100   :  { %3781 = vmatpush1.bf16.msra.mxu1 %v10315_v42  ;;  %2082 = vmatprep.subr.bf16.mxu0 %v10323_v43  ;;  %v10410_v42 = vld [vmem:[%s14390_s1 + $0xac0] ss:$8 sps:$4 sm:$0xff]  }
 0x101   :  { %3853 = vmatprep.subr.bf16.mxu1 %v10326_v44  ;;  %v10428_v43 = vld [vmem:[%s14391_s0 + $0x258] ss:$48 sps:$4 sm:$0xff]   ;;  %v10416_v44 = vld [vmem:[%s14390_s1 + $0x4d4] ss:$8 sps:$4 sm:$0xff]  }
 0x102   :  { %2012 = vmatmul.mubr.bf16.vlgmr.msra.gmra.mrb[0].mxu0 %v10318_v45 }
 0x103   :  { %3783 = vmatmul.mubr.bf16.vlgmr.msra.gmra.mrb[0].mxu1 %v10318_v45  ;;  %2083 = vmatpush1.bf16.msra.mxu0 %v10321_v46  ;;  %v10419_v45 = vld [vmem:[%s14390_s1 + $0xad4] ss:$8 sps:$4 sm:$0xff]  }
 0x104   :  { %3854 = vmatpush1.bf16.msra.mxu1 %v10324_v47  ;;  %2084 = vmatprep.subr.bf16.mxu0 %v10329_v48  ;;  %v10437_v46 = vld [vmem:[%s14391_s0 + $0x24] ss:$48 sps:$4 sm:$0xff]   ;;  %v10414_v47 = vld [vmem:[%s14390_s1 + $0x4d0] ss:$8 sps:$4 sm:$0xff]  }
 0x105   :  { %3855 = vmatprep.subr.bf16.mxu1 %v10332_v49  ;;  %2021 = vmatprep.mubr.bf16.mxu0 %v10345_v50  ;;  %v10417_v48 = vld [vmem:[%s14390_s1 + $0xad0] ss:$8 sps:$4 sm:$0xff]   ;;  %v10424_v49 = vld [vmem:[%s14390_s1 + $0x4e4] ss:$8 sps:$4 sm:$0xff]  }
 0x106   :  { %3792 = vmatprep.mubr.bf16.mxu1 %v10345_v50  ;;  %v10427_v50 = vld [vmem:[%s14390_s1 + $0xae4] ss:$8 sps:$4 sm:$0xff]  }
 0x107   :  { %2085 = vmatpush1.bf16.msra.mxu0 %v10327_v51  ;;  %v10422_v51 = vld [vmem:[%s14390_s1 + $0x4e0] ss:$8 sps:$4 sm:$0xff]  }
 0x108   :  { %3856 = vmatpush1.bf16.msra.mxu1 %v10330_v52  ;;  %2086 = vmatprep.subr.bf16.mxu0 %v10335_v53  ;;  %v10425_v52 = vld [vmem:[%s14390_s1 + $0xae0] ss:$8 sps:$4 sm:$0xff]   ;;  %v10431_v53 = vld [vmem:[%s14390_s1 + $0x4f4] ss:$8 sps:$4 sm:$0xff]  }
 0x109   :  { %3857 = vmatprep.subr.bf16.mxu1 %v10338_v54  ;;  %v10434_v54 = vld [vmem:[%s14390_s1 + $0xaf4] ss:$8 sps:$4 sm:$0xff]  }
 0x10a   :  { %2022 = vmatmul.mubr.bf16.gmra.mrb[4].mxu0 %v10353_v57 }
 0x10b   :  { %3793 = vmatmul.mubr.bf16.gmra.mrb[4].mxu1 %v10353_v57  ;;  %2087 = vmatpush1.bf16.msra.mxu0 %v10333_v55  ;;  %v10429_v55 = vld [vmem:[%s14390_s1 + $0x4f0] ss:$8 sps:$4 sm:$0xff]   ;;  %v10440_v57 = vld [vmem:[%s14390_s1 + $0x504] ss:$8 sps:$4 sm:$0xff]  }
 0x10c   :  { %3858 = vmatpush1.bf16.msra.mxu1 %v10336_v56  ;;  %2088 = vmatprep.subr.bf16.mxu0 %v10341_v58  ;;  %v10432_v56 = vld [vmem:[%s14390_s1 + $0xaf0] ss:$8 sps:$4 sm:$0xff]   ;;  %v10443_v58 = vld [vmem:[%s14390_s1 + $0xb04] ss:$8 sps:$4 sm:$0xff]  }
 0x10d   :  { %3859 = vmatprep.subr.bf16.mxu1 %v10344_v59  ;;  %2031 = vmatprep.mubr.bf16.mxu0 %v10360_v60  ;;  %v10435_v59 = vld [vmem:[%s14391_s0 + $0x20] ss:$48 sps:$4 sm:$0xff]  }
 0x10e   :  { %3802 = vmatprep.mubr.bf16.mxu1 %v10360_v60  ;;  %v10438_v60 = vld [vmem:[%s14390_s1 + $0x500] ss:$8 sps:$4 sm:$0xff]  }
 0x10f   :  { %2089 = vmatpush1.bf16.msra.mxu0 %v10339_v61  ;;  %v10441_v61 = vld [vmem:[%s14390_s1 + $0xb00] ss:$8 sps:$4 sm:$0xff]  }
 0x110   :  { %3860 = vmatpush1.bf16.msra.mxu1 %v10342_v62  ;;  %2090 = vmatprep.subr.bf16.mxu0 %v10349_v63  ;;  %v10446_v62 = vld [vmem:[%s14390_s1 + $0x514] ss:$8 sps:$4 sm:$0xff]  }
 0x111   :  { %3861 = vmatprep.subr.bf16.mxu1 %v10352_v0  ;;  %v10449_v63 = vld [vmem:[%s14390_s1 + $0xb14] ss:$8 sps:$4 sm:$0xff]  }
 0x112   :  { %2032 = vmatmul.mubr.bf16.gmra.mrb[8].mxu0 %v10368_v3  ;;  %v10462_v0 = vld [vmem:[%s14391_s0 + $0x84] ss:$48 sps:$4 sm:$0xff]  }
 0x113   :  { %3803 = vmatmul.mubr.bf16.gmra.mrb[8].mxu1 %v10368_v3  ;;  %2091 = vmatpush1.bf16.msra.mxu0 %v10347_v1  ;;  %v10444_v1 = vld [vmem:[%s14390_s1 + $0x510] ss:$8 sps:$4 sm:$0xff]   ;;  %v10452_v3 = vld [vmem:[%s14390_s1 + $0x524] ss:$8 sps:$4 sm:$0xff]  }
 0x114   :  { %3862 = vmatpush1.bf16.msra.mxu1 %v10350_v2  ;;  %2092 = vmatprep.subr.bf16.mxu0 %v10356_v4  ;;  %v10447_v2 = vld [vmem:[%s14390_s1 + $0xb10] ss:$8 sps:$4 sm:$0xff]   ;;  %v10455_v4 = vld [vmem:[%s14390_s1 + $0xb24] ss:$8 sps:$4 sm:$0xff]  }
 0x115   :  { %3863 = vmatprep.subr.bf16.mxu1 %v10359_v5  ;;  %2041 = vmatprep.mubr.bf16.mxu0 %v10375_v6  ;;  %v10450_v5 = vld [vmem:[%s14390_s1 + $0x520] ss:$8 sps:$4 sm:$0xff]  }
 0x116   :  { %3812 = vmatprep.mubr.bf16.mxu1 %v10375_v6  ;;  %v10453_v6 = vld [vmem:[%s14390_s1 + $0xb20] ss:$8 sps:$4 sm:$0xff]  }
 0x117   :  { %2093 = vmatpush1.bf16.msra.mxu0 %v10354_v7  ;;  %v10464_v7 = vld [vmem:[%s14391_s0 + $0x80] ss:$48 sps:$4 sm:$0xff]  }
 0x118   :  { %3864 = vmatpush1.bf16.msra.mxu1 %v10357_v8  ;;  %2094 = vmatprep.subr.bf16.mxu0 %v10364_v9  ;;  %v10458_v8 = vld [vmem:[%s14390_s1 + $0x534] ss:$8 sps:$4 sm:$0xff]  }
 0x119   :  { %3865 = vmatprep.subr.bf16.mxu1 %v10367_v10  ;;  %v10461_v9 = vld [vmem:[%s14390_s1 + $0xb34] ss:$8 sps:$4 sm:$0xff]  }
 0x11a   :  { %2042 = vmatmul.mubr.bf16.gmra.mrb[12].mxu0 %v10383_v13  ;;  %v10477_v10 = vld [vmem:[%s14391_s0 + $0xe4] ss:$48 sps:$4 sm:$0xff]  }
 0x11b   :  { %3813 = vmatmul.mubr.bf16.gmra.mrb[12].mxu1 %v10383_v13  ;;  %2095 = vmatpush1.bf16.msra.mxu0 %v10362_v11  ;;  %v10456_v11 = vld [vmem:[%s14390_s1 + $0x530] ss:$8 sps:$4 sm:$0xff]   ;;  %v10467_v13 = vld [vmem:[%s14390_s1 + $0x544] ss:$8 sps:$4 sm:$0xff]  }
 0x11c   :  { %3866 = vmatpush1.bf16.msra.mxu1 %v10365_v12  ;;  %2096 = vmatprep.subr.bf16.mxu0 %v10371_v14  ;;  %v10459_v12 = vld [vmem:[%s14390_s1 + $0xb30] ss:$8 sps:$4 sm:$0xff]   ;;  %v10470_v14 = vld [vmem:[%s14390_s1 + $0xb44] ss:$8 sps:$4 sm:$0xff]  }
 0x11d   :  { %3867 = vmatprep.subr.bf16.mxu1 %v10374_v15  ;;  %2051 = vmatprep.mubr.bf16.mxu0 %v10390_v16  ;;  %v10465_v15 = vld [vmem:[%s14390_s1 + $0x540] ss:$8 sps:$4 sm:$0xff]  }
 0x11e   :  { %3822 = vmatprep.mubr.bf16.mxu1 %v10390_v16  ;;  %v10468_v16 = vld [vmem:[%s14390_s1 + $0xb40] ss:$8 sps:$4 sm:$0xff]  }
 0x11f   :  { %2097 = vmatpush1.bf16.msra.mxu0 %v10369_v17  ;;  %v10479_v17 = vld [vmem:[%s14391_s0 + $0xe0] ss:$48 sps:$4 sm:$0xff]  }
 0x120   :  { %3868 = vmatpush1.bf16.msra.mxu1 %v10372_v18  ;;  %2098 = vmatprep.subr.bf16.mxu0 %v10379_v19  ;;  %v10473_v18 = vld [vmem:[%s14390_s1 + $0x554] ss:$8 sps:$4 sm:$0xff]  }
 0x121   :  { %3869 = vmatprep.subr.bf16.mxu1 %v10382_v20  ;;  %v10476_v19 = vld [vmem:[%s14390_s1 + $0xb54] ss:$8 sps:$4 sm:$0xff]  }
 0x122   :  { %2052 = vmatmul.mubr.bf16.gmra.mrb[16].mxu0 %v10398_v23  ;;  %v10492_v20 = vld [vmem:[%s14391_s0 + $0x144] ss:$48 sps:$4 sm:$0xff]  }
 0x123   :  { %3823 = vmatmul.mubr.bf16.gmra.mrb[16].mxu1 %v10398_v23  ;;  %2099 = vmatpush1.bf16.msra.mxu0 %v10377_v21  ;;  %v10471_v21 = vld [vmem:[%s14390_s1 + $0x550] ss:$8 sps:$4 sm:$0xff]   ;;  %v10482_v23 = vld [vmem:[%s14390_s1 + $0x564] ss:$8 sps:$4 sm:$0xff]  }
 0x124   :  { %3870 = vmatpush1.bf16.msra.mxu1 %v10380_v22  ;;  %2100 = vmatprep.subr.bf16.mxu0 %v10386_v24  ;;  %v10474_v22 = vld [vmem:[%s14390_s1 + $0xb50] ss:$8 sps:$4 sm:$0xff]   ;;  %v10485_v24 = vld [vmem:[%s14390_s1 + $0xb64] ss:$8 sps:$4 sm:$0xff]  }
 0x125   :  { %3871 = vmatprep.subr.bf16.mxu1 %v10389_v25  ;;  %2061 = vmatprep.mubr.bf16.mxu0 %v10405_v26  ;;  %v10480_v25 = vld [vmem:[%s14390_s1 + $0x560] ss:$8 sps:$4 sm:$0xff]  }
 0x126   :  { %3832 = vmatprep.mubr.bf16.mxu1 %v10405_v26  ;;  %v10483_v26 = vld [vmem:[%s14390_s1 + $0xb60] ss:$8 sps:$4 sm:$0xff]  }
 0x127   :  { %2101 = vmatpush1.bf16.msra.mxu0 %v10384_v27  ;;  %v10494_v27 = vld [vmem:[%s14391_s0 + $0x140] ss:$48 sps:$4 sm:$0xff]  }
 0x128   :  { %3872 = vmatpush1.bf16.msra.mxu1 %v10387_v28  ;;  %2102 = vmatprep.subr.bf16.mxu0 %v10394_v29  ;;  %v10488_v28 = vld [vmem:[%s14390_s1 + $0x574] ss:$8 sps:$4 sm:$0xff]  }
 0x129   :  { %3873 = vmatprep.subr.bf16.mxu1 %v10397_v30  ;;  %v10491_v29 = vld [vmem:[%s14390_s1 + $0xb74] ss:$8 sps:$4 sm:$0xff]  }
 0x12a   :  { %2062 = vmatmul.mubr.bf16.gmra.mrb[20].mxu0 %v10413_v33  ;;  %v10507_v30 = vld [vmem:[%s14391_s0 + $0x1a4] ss:$48 sps:$4 sm:$0xff]  }
 0x12b   :  { %3833 = vmatmul.mubr.bf16.gmra.mrb[20].mxu1 %v10413_v33  ;;  %2103 = vmatpush1.bf16.msra.mxu0 %v10392_v31  ;;  %v10486_v31 = vld [vmem:[%s14390_s1 + $0x570] ss:$8 sps:$4 sm:$0xff]   ;;  %v10497_v33 = vld [vmem:[%s14390_s1 + $0x584] ss:$8 sps:$4 sm:$0xff]  }
 0x12c   :  { %3874 = vmatpush1.bf16.msra.mxu1 %v10395_v32  ;;  %2104 = vmatprep.subr.bf16.mxu0 %v10401_v34  ;;  %v10489_v32 = vld [vmem:[%s14390_s1 + $0xb70] ss:$8 sps:$4 sm:$0xff]   ;;  %v10500_v34 = vld [vmem:[%s14390_s1 + $0xb84] ss:$8 sps:$4 sm:$0xff]  }
 0x12d   :  { %3875 = vmatprep.subr.bf16.mxu1 %v10404_v35  ;;  %2071 = vmatprep.mubr.bf16.mxu0 %v10420_v36  ;;  %v10495_v35 = vld [vmem:[%s14390_s1 + $0x580] ss:$8 sps:$4 sm:$0xff]  }
 0x12e   :  { %3842 = vmatprep.mubr.bf16.mxu1 %v10420_v36  ;;  %v10498_v36 = vld [vmem:[%s14390_s1 + $0xb80] ss:$8 sps:$4 sm:$0xff]  }
 0x12f   :  { %2105 = vmatpush1.bf16.msra.mxu0 %v10399_v37  ;;  %v10509_v37 = vld [vmem:[%s14391_s0 + $0x1a0] ss:$48 sps:$4 sm:$0xff]  }
 0x130   :  { %3876 = vmatpush1.bf16.msra.mxu1 %v10402_v38  ;;  %2106 = vmatprep.subr.bf16.mxu0 %v10409_v39  ;;  %v10503_v38 = vld [vmem:[%s14390_s1 + $0x594] ss:$8 sps:$4 sm:$0xff]  }
 0x131   :  { %3877 = vmatprep.subr.bf16.mxu1 %v10412_v40  ;;  %v10506_v39 = vld [vmem:[%s14390_s1 + $0xb94] ss:$8 sps:$4 sm:$0xff]  }
 0x132   :  { %2072 = vmatmul.mubr.bf16.gmra.mrb[24].mxu0 %v10428_v43  ;;  %v10522_v40 = vld [vmem:[%s14391_s0 + $0x204] ss:$48 sps:$4 sm:$0xff]  }
 0x133   :  { %3843 = vmatmul.mubr.bf16.gmra.mrb[24].mxu1 %v10428_v43  ;;  %2107 = vmatpush1.bf16.msra.mxu0 %v10407_v41  ;;  %v10501_v41 = vld [vmem:[%s14390_s1 + $0x590] ss:$8 sps:$4 sm:$0xff]   ;;  %v10512_v43 = vld [vmem:[%s14390_s1 + $0x5a4] ss:$8 sps:$4 sm:$0xff]  }
 0x134   :  { %3878 = vmatpush1.bf16.msra.mxu1 %v10410_v42  ;;  %2108 = vmatprep.subr.bf16.mxu0 %v10416_v44  ;;  %v10504_v42 = vld [vmem:[%s14390_s1 + $0xb90] ss:$8 sps:$4 sm:$0xff]   ;;  %v10515_v44 = vld [vmem:[%s14390_s1 + $0xba4] ss:$8 sps:$4 sm:$0xff]  }
 0x135   :  { %3879 = vmatprep.subr.bf16.mxu1 %v10419_v45  ;;  %2114 = vmatprep.mubr.bf16.mxu0 %v10437_v46  ;;  %v10510_v45 = vld [vmem:[%s14390_s1 + $0x5a0] ss:$8 sps:$4 sm:$0xff]  }
 0x136   :  { %3885 = vmatprep.mubr.bf16.mxu1 %v10437_v46  ;;  %v10513_v46 = vld [vmem:[%s14390_s1 + $0xba0] ss:$8 sps:$4 sm:$0xff]  }
 0x137   :  { %2109 = vmatpush1.bf16.msra.mxu0 %v10414_v47  ;;  %v10524_v47 = vld [vmem:[%s14391_s0 + $0x200] ss:$48 sps:$4 sm:$0xff]  }
 0x138   :  { %3880 = vmatpush1.bf16.msra.mxu1 %v10417_v48  ;;  %2110 = vmatprep.subr.bf16.mxu0 %v10424_v49  ;;  %v10518_v48 = vld [vmem:[%s14390_s1 + $0x5b4] ss:$8 sps:$4 sm:$0xff]  }
 0x139   :  { %3881 = vmatprep.subr.bf16.mxu1 %v10427_v50  ;;  %v10521_v49 = vld [vmem:[%s14390_s1 + $0xbb4] ss:$8 sps:$4 sm:$0xff]  }
 0x13a   :  { %v10537_v50 = vld [vmem:[%s14391_s0 + $0x264] ss:$48 sps:$4 sm:$0xff]  }
 0x13b   :  { %2111 = vmatpush1.bf16.msra.mxu0 %v10422_v51  ;;  %v10516_v51 = vld [vmem:[%s14390_s1 + $0x5b0] ss:$8 sps:$4 sm:$0xff]  }
 0x13c   :  { %3882 = vmatpush1.bf16.msra.mxu1 %v10425_v52  ;;  %2112 = vmatprep.subr.bf16.mxu0 %v10431_v53  ;;  %v10519_v52 = vld [vmem:[%s14390_s1 + $0xbb0] ss:$8 sps:$4 sm:$0xff]   ;;  %v10527_v53 = vld [vmem:[%s14390_s1 + $0x5c4] ss:$8 sps:$4 sm:$0xff]  }
 0x13d   :  { %3883 = vmatprep.subr.bf16.mxu1 %v10434_v54  ;;  %v10530_v54 = vld [vmem:[%s14390_s1 + $0xbc4] ss:$8 sps:$4 sm:$0xff]  }
 0x13f   :  { %2113 = vmatpush1.bf16.msra.mxu0 %v10429_v55  ;;  %v10525_v55 = vld [vmem:[%s14390_s1 + $0x5c0] ss:$8 sps:$4 sm:$0xff]  }
 0x140   :  { %3884 = vmatpush1.bf16.msra.mxu1 %v10432_v56  ;;  %2185 = vmatprep.subr.bf16.mxu0 %v10440_v57  ;;  %v10528_v56 = vld [vmem:[%s14390_s1 + $0xbc0] ss:$8 sps:$4 sm:$0xff]  }
 0x141   :  { %3956 = vmatprep.subr.bf16.mxu1 %v10443_v58  ;;  %v10539_v57 = vld [vmem:[%s14391_s0 + $0x260] ss:$48 sps:$4 sm:$0xff]   ;;  %v10533_v58 = vld [vmem:[%s14390_s1 + $0x5d4] ss:$8 sps:$4 sm:$0xff]  }
 0x142   :  { %2115 = vmatmul.mubr.bf16.vlgmr.msra.gmra.mrb[0].mxu0 %v10435_v59 }
 0x143   :  { %3886 = vmatmul.mubr.bf16.vlgmr.msra.gmra.mrb[0].mxu1 %v10435_v59  ;;  %2186 = vmatpush1.bf16.msra.mxu0 %v10438_v60  ;;  %v10536_v59 = vld [vmem:[%s14390_s1 + $0xbd4] ss:$8 sps:$4 sm:$0xff]  }
 0x144   :  { %3957 = vmatpush1.bf16.msra.mxu1 %v10441_v61  ;;  %2187 = vmatprep.subr.bf16.mxu0 %v10446_v62  ;;  %v10554_v60 = vld [vmem:[%s14391_s0 + $0x2c] ss:$48 sps:$4 sm:$0xff]   ;;  %v10531_v61 = vld [vmem:[%s14390_s1 + $0x5d0] ss:$8 sps:$4 sm:$0xff]  }
 0x145   :  { %3958 = vmatprep.subr.bf16.mxu1 %v10449_v63  ;;  %2124 = vmatprep.mubr.bf16.mxu0 %v10462_v0  ;;  %v10534_v62 = vld [vmem:[%s14390_s1 + $0xbd0] ss:$8 sps:$4 sm:$0xff]   ;;  %v10542_v63 = vld [vmem:[%s14390_s1 + $0x5e4] ss:$8 sps:$4 sm:$0xff]  }
 0x146   :  { %3895 = vmatprep.mubr.bf16.mxu1 %v10462_v0  ;;  %v10545_v0 = vld [vmem:[%s14390_s1 + $0xbe4] ss:$8 sps:$4 sm:$0xff]  }
 0x147   :  { %2188 = vmatpush1.bf16.msra.mxu0 %v10444_v1  ;;  %v10540_v1 = vld [vmem:[%s14390_s1 + $0x5e0] ss:$8 sps:$4 sm:$0xff]  }
 0x148   :  { %3959 = vmatpush1.bf16.msra.mxu1 %v10447_v2  ;;  %2189 = vmatprep.subr.bf16.mxu0 %v10452_v3  ;;  %v10543_v2 = vld [vmem:[%s14390_s1 + $0xbe0] ss:$8 sps:$4 sm:$0xff]   ;;  %v10548_v3 = vld [vmem:[%s14390_s1 + $0x5f4] ss:$8 sps:$4 sm:$0xff]  }
 0x149   :  { %3960 = vmatprep.subr.bf16.mxu1 %v10455_v4  ;;  %v10551_v4 = vld [vmem:[%s14390_s1 + $0xbf4] ss:$8 sps:$4 sm:$0xff]  }
 0x14a   :  { %2125 = vmatmul.mubr.bf16.gmra.mrb[4].mxu0 %v10464_v7 }
 0x14b   :  { %3896 = vmatmul.mubr.bf16.gmra.mrb[4].mxu1 %v10464_v7  ;;  %2190 = vmatpush1.bf16.msra.mxu0 %v10450_v5  ;;  %v10546_v5 = vld [vmem:[%s14390_s1 + $0x5f0] ss:$8 sps:$4 sm:$0xff]   ;;  %v10557_v7 = vld [vmem:[%s14390_s1 + $0xc04] ss:$8 sps:$4 sm:$0xff]  }
 0x14c   :  { %3961 = vmatpush1.bf16.msra.mxu1 %v10453_v6  ;;  %2191 = vmatprep.subr.bf16.mxu0 %v10458_v8  ;;  %v10549_v6 = vld [vmem:[%s14390_s1 + $0xbf0] ss:$8 sps:$4 sm:$0xff]   ;;  %v10560_v8 = vld [vmem:[%s14390_s1 + $0x1204] ss:$8 sps:$4 sm:$0xff]  }
 0x14d   :  { %3962 = vmatprep.subr.bf16.mxu1 %v10461_v9  ;;  %2134 = vmatprep.mubr.bf16.mxu0 %v10477_v10  ;;  %v10552_v9 = vld [vmem:[%s14391_s0 + $0x28] ss:$48 sps:$4 sm:$0xff]  }
 0x14e   :  { %3905 = vmatprep.mubr.bf16.mxu1 %v10477_v10  ;;  %v10555_v10 = vld [vmem:[%s14390_s1 + $0xc00] ss:$8 sps:$4 sm:$0xff]  }
 0x14f   :  { %2192 = vmatpush1.bf16.msra.mxu0 %v10456_v11  ;;  %v10558_v11 = vld [vmem:[%s14390_s1 + $0x1200] ss:$8 sps:$4 sm:$0xff]  }
 0x150   :  { %3963 = vmatpush1.bf16.msra.mxu1 %v10459_v12  ;;  %2193 = vmatprep.subr.bf16.mxu0 %v10467_v13  ;;  %v10563_v12 = vld [vmem:[%s14390_s1 + $0xc14] ss:$8 sps:$4 sm:$0xff]  }
 0x151   :  { %3964 = vmatprep.subr.bf16.mxu1 %v10470_v14  ;;  %v10566_v13 = vld [vmem:[%s14390_s1 + $0x1214] ss:$8 sps:$4 sm:$0xff]  }
 0x152   :  { %2135 = vmatmul.mubr.bf16.gmra.mrb[8].mxu0 %v10479_v17  ;;  %v10567_v14 = vld [vmem:[%s14391_s0 + $0x8c] ss:$48 sps:$4 sm:$0xff]  }
 0x153   :  { %3906 = vmatmul.mubr.bf16.gmra.mrb[8].mxu1 %v10479_v17  ;;  %2194 = vmatpush1.bf16.msra.mxu0 %v10465_v15  ;;  %v10561_v15 = vld [vmem:[%s14390_s1 + $0xc10] ss:$8 sps:$4 sm:$0xff]   ;;  %v10572_v17 = vld [vmem:[%s14390_s1 + $0xc24] ss:$8 sps:$4 sm:$0xff]  }
 0x154   :  { %3965 = vmatpush1.bf16.msra.mxu1 %v10468_v16  ;;  %2195 = vmatprep.subr.bf16.mxu0 %v10473_v18  ;;  %v10564_v16 = vld [vmem:[%s14390_s1 + $0x1210] ss:$8 sps:$4 sm:$0xff]   ;;  %v10575_v18 = vld [vmem:[%s14390_s1 + $0x1224] ss:$8 sps:$4 sm:$0xff]  }
 0x155   :  { %3966 = vmatprep.subr.bf16.mxu1 %v10476_v19  ;;  %2144 = vmatprep.mubr.bf16.mxu0 %v10492_v20  ;;  %v10569_v19 = vld [vmem:[%s14391_s0 + $0x88] ss:$48 sps:$4 sm:$0xff]  }
 0x156   :  { %3915 = vmatprep.mubr.bf16.mxu1 %v10492_v20  ;;  %v10570_v20 = vld [vmem:[%s14390_s1 + $0xc20] ss:$8 sps:$4 sm:$0xff]  }
 0x157   :  { %2196 = vmatpush1.bf16.msra.mxu0 %v10471_v21  ;;  %v10573_v21 = vld [vmem:[%s14390_s1 + $0x1220] ss:$8 sps:$4 sm:$0xff]  }
 0x158   :  { %3967 = vmatpush1.bf16.msra.mxu1 %v10474_v22  ;;  %2197 = vmatprep.subr.bf16.mxu0 %v10482_v23  ;;  %v10578_v22 = vld [vmem:[%s14390_s1 + $0xc34] ss:$8 sps:$4 sm:$0xff]  }
 0x159   :  { %3968 = vmatprep.subr.bf16.mxu1 %v10485_v24  ;;  %v10581_v23 = vld [vmem:[%s14390_s1 + $0x1234] ss:$8 sps:$4 sm:$0xff]  }
 0x15a   :  { %2145 = vmatmul.mubr.bf16.gmra.mrb[12].mxu0 %v10494_v27  ;;  %v10582_v24 = vld [vmem:[%s14391_s0 + $0xec] ss:$48 sps:$4 sm:$0xff]  }
 0x15b   :  { %3916 = vmatmul.mubr.bf16.gmra.mrb[12].mxu1 %v10494_v27  ;;  %2198 = vmatpush1.bf16.msra.mxu0 %v10480_v25  ;;  %v10576_v25 = vld [vmem:[%s14390_s1 + $0xc30] ss:$8 sps:$4 sm:$0xff]   ;;  %v10587_v27 = vld [vmem:[%s14390_s1 + $0xc44] ss:$8 sps:$4 sm:$0xff]  }
 0x15c   :  { %3969 = vmatpush1.bf16.msra.mxu1 %v10483_v26  ;;  %2199 = vmatprep.subr.bf16.mxu0 %v10488_v28  ;;  %v10579_v26 = vld [vmem:[%s14390_s1 + $0x1230] ss:$8 sps:$4 sm:$0xff]   ;;  %v10590_v28 = vld [vmem:[%s14390_s1 + $0x1244] ss:$8 sps:$4 sm:$0xff]  }
 0x15d   :  { %3970 = vmatprep.subr.bf16.mxu1 %v10491_v29  ;;  %2154 = vmatprep.mubr.bf16.mxu0 %v10507_v30  ;;  %v10584_v29 = vld [vmem:[%s14391_s0 + $0xe8] ss:$48 sps:$4 sm:$0xff]  }
 0x15e   :  { %3925 = vmatprep.mubr.bf16.mxu1 %v10507_v30  ;;  %v10585_v30 = vld [vmem:[%s14390_s1 + $0xc40] ss:$8 sps:$4 sm:$0xff]  }
 0x15f   :  { %2200 = vmatpush1.bf16.msra.mxu0 %v10486_v31  ;;  %v10588_v31 = vld [vmem:[%s14390_s1 + $0x1240] ss:$8 sps:$4 sm:$0xff]  }
 0x160   :  { %3971 = vmatpush1.bf16.msra.mxu1 %v10489_v32  ;;  %2201 = vmatprep.subr.bf16.mxu0 %v10497_v33  ;;  %v10593_v32 = vld [vmem:[%s14390_s1 + $0xc54] ss:$8 sps:$4 sm:$0xff]  }
 0x161   :  { %3972 = vmatprep.subr.bf16.mxu1 %v10500_v34  ;;  %v10596_v33 = vld [vmem:[%s14390_s1 + $0x1254] ss:$8 sps:$4 sm:$0xff]  }
 0x162   :  { %2155 = vmatmul.mubr.bf16.gmra.mrb[16].mxu0 %v10509_v37  ;;  %v10597_v34 = vld [vmem:[%s14391_s0 + $0x14c] ss:$48 sps:$4 sm:$0xff]  }
 0x163   :  { %3926 = vmatmul.mubr.bf16.gmra.mrb[16].mxu1 %v10509_v37  ;;  %2202 = vmatpush1.bf16.msra.mxu0 %v10495_v35  ;;  %v10591_v35 = vld [vmem:[%s14390_s1 + $0xc50] ss:$8 sps:$4 sm:$0xff]   ;;  %v10602_v37 = vld [vmem:[%s14390_s1 + $0xc64] ss:$8 sps:$4 sm:$0xff]  }
 0x164   :  { %3973 = vmatpush1.bf16.msra.mxu1 %v10498_v36  ;;  %2203 = vmatprep.subr.bf16.mxu0 %v10503_v38  ;;  %v10594_v36 = vld [vmem:[%s14390_s1 + $0x1250] ss:$8 sps:$4 sm:$0xff]   ;;  %v10605_v38 = vld [vmem:[%s14390_s1 + $0x1264] ss:$8 sps:$4 sm:$0xff]  }
 0x165   :  { %3974 = vmatprep.subr.bf16.mxu1 %v10506_v39  ;;  %2164 = vmatprep.mubr.bf16.mxu0 %v10522_v40  ;;  %v10599_v39 = vld [vmem:[%s14391_s0 + $0x148] ss:$48 sps:$4 sm:$0xff]  }
 0x166   :  { %3935 = vmatprep.mubr.bf16.mxu1 %v10522_v40  ;;  %v10600_v40 = vld [vmem:[%s14390_s1 + $0xc60] ss:$8 sps:$4 sm:$0xff]  }
 0x167   :  { %2204 = vmatpush1.bf16.msra.mxu0 %v10501_v41  ;;  %v10603_v41 = vld [vmem:[%s14390_s1 + $0x1260] ss:$8 sps:$4 sm:$0xff]  }
 0x168   :  { %3975 = vmatpush1.bf16.msra.mxu1 %v10504_v42  ;;  %2205 = vmatprep.subr.bf16.mxu0 %v10512_v43  ;;  %v10608_v42 = vld [vmem:[%s14390_s1 + $0xc74] ss:$8 sps:$4 sm:$0xff]  }
 0x169   :  { %3976 = vmatprep.subr.bf16.mxu1 %v10515_v44  ;;  %v10611_v43 = vld [vmem:[%s14390_s1 + $0x1274] ss:$8 sps:$4 sm:$0xff]  }
 0x16a   :  { %2165 = vmatmul.mubr.bf16.gmra.mrb[20].mxu0 %v10524_v47  ;;  %v10612_v44 = vld [vmem:[%s14391_s0 + $0x1ac] ss:$48 sps:$4 sm:$0xff]  }
 0x16b   :  { %3936 = vmatmul.mubr.bf16.gmra.mrb[20].mxu1 %v10524_v47  ;;  %2206 = vmatpush1.bf16.msra.mxu0 %v10510_v45  ;;  %v10606_v45 = vld [vmem:[%s14390_s1 + $0xc70] ss:$8 sps:$4 sm:$0xff]   ;;  %v10617_v47 = vld [vmem:[%s14390_s1 + $0xc84] ss:$8 sps:$4 sm:$0xff]  }
 0x16c   :  { %3977 = vmatpush1.bf16.msra.mxu1 %v10513_v46  ;;  %2207 = vmatprep.subr.bf16.mxu0 %v10518_v48  ;;  %v10609_v46 = vld [vmem:[%s14390_s1 + $0x1270] ss:$8 sps:$4 sm:$0xff]   ;;  %v10620_v48 = vld [vmem:[%s14390_s1 + $0x1284] ss:$8 sps:$4 sm:$0xff]  }
 0x16d   :  { %3978 = vmatprep.subr.bf16.mxu1 %v10521_v49  ;;  %2174 = vmatprep.mubr.bf16.mxu0 %v10537_v50  ;;  %v10614_v49 = vld [vmem:[%s14391_s0 + $0x1a8] ss:$48 sps:$4 sm:$0xff]  }
 0x16e   :  { %3945 = vmatprep.mubr.bf16.mxu1 %v10537_v50  ;;  %v10615_v50 = vld [vmem:[%s14390_s1 + $0xc80] ss:$8 sps:$4 sm:$0xff]  }
 0x16f   :  { %2208 = vmatpush1.bf16.msra.mxu0 %v10516_v51  ;;  %v10618_v51 = vld [vmem:[%s14390_s1 + $0x1280] ss:$8 sps:$4 sm:$0xff]  }
 0x170   :  { %3979 = vmatpush1.bf16.msra.mxu1 %v10519_v52  ;;  %2209 = vmatprep.subr.bf16.mxu0 %v10527_v53  ;;  %v10623_v52 = vld [vmem:[%s14390_s1 + $0xc94] ss:$8 sps:$4 sm:$0xff]  }
 0x171   :  { %3980 = vmatprep.subr.bf16.mxu1 %v10530_v54  ;;  %v10626_v53 = vld [vmem:[%s14390_s1 + $0x1294] ss:$8 sps:$4 sm:$0xff]  }
 0x172   :  { %2175 = vmatmul.mubr.bf16.gmra.mrb[24].mxu0 %v10539_v57  ;;  %v10627_v54 = vld [vmem:[%s14391_s0 + $0x20c] ss:$48 sps:$4 sm:$0xff]  }
 0x173   :  { %3946 = vmatmul.mubr.bf16.gmra.mrb[24].mxu1 %v10539_v57  ;;  %2210 = vmatpush1.bf16.msra.mxu0 %v10525_v55  ;;  %v10621_v55 = vld [vmem:[%s14390_s1 + $0xc90] ss:$8 sps:$4 sm:$0xff]   ;;  %v10632_v57 = vld [vmem:[%s14390_s1 + $0xca4] ss:$8 sps:$4 sm:$0xff]  }
 0x174   :  { %3981 = vmatpush1.bf16.msra.mxu1 %v10528_v56  ;;  %2211 = vmatprep.subr.bf16.mxu0 %v10533_v58  ;;  %v10624_v56 = vld [vmem:[%s14390_s1 + $0x1290] ss:$8 sps:$4 sm:$0xff]   ;;  %v10635_v58 = vld [vmem:[%s14390_s1 + $0x12a4] ss:$8 sps:$4 sm:$0xff]  }
 0x175   :  { %3982 = vmatprep.subr.bf16.mxu1 %v10536_v59  ;;  %2217 = vmatprep.mubr.bf16.mxu0 %v10554_v60  ;;  %v10629_v59 = vld [vmem:[%s14391_s0 + $0x208] ss:$48 sps:$4 sm:$0xff]  }
 0x176   :  { %3988 = vmatprep.mubr.bf16.mxu1 %v10554_v60  ;;  %v10630_v60 = vld [vmem:[%s14390_s1 + $0xca0] ss:$8 sps:$4 sm:$0xff]  }
 0x177   :  { %2212 = vmatpush1.bf16.msra.mxu0 %v10531_v61  ;;  %v10633_v61 = vld [vmem:[%s14390_s1 + $0x12a0] ss:$8 sps:$4 sm:$0xff]  }
 0x178   :  { %3983 = vmatpush1.bf16.msra.mxu1 %v10534_v62  ;;  %2213 = vmatprep.subr.bf16.mxu0 %v10542_v63  ;;  %v10638_v62 = vld [vmem:[%s14390_s1 + $0xcb4] ss:$8 sps:$4 sm:$0xff]  }
 0x179   :  { %3984 = vmatprep.subr.bf16.mxu1 %v10545_v0  ;;  %v10641_v63 = vld [vmem:[%s14390_s1 + $0x12b4] ss:$8 sps:$4 sm:$0xff]  }
 0x17a   :  { %v10642_v0 = vld [vmem:[%s14391_s0 + $0x26c] ss:$48 sps:$4 sm:$0xff]  }
 0x17b   :  { %2214 = vmatpush1.bf16.msra.mxu0 %v10540_v1  ;;  %v10636_v1 = vld [vmem:[%s14390_s1 + $0xcb0] ss:$8 sps:$4 sm:$0xff]  }
 0x17c   :  { %3985 = vmatpush1.bf16.msra.mxu1 %v10543_v2  ;;  %2215 = vmatprep.subr.bf16.mxu0 %v10548_v3  ;;  %v10639_v2 = vld [vmem:[%s14390_s1 + $0x12b0] ss:$8 sps:$4 sm:$0xff]  }
 0x17d   :  { %3986 = vmatprep.subr.bf16.mxu1 %v10551_v4  ;;  %v10644_v3 = vld [vmem:[%s14391_s0 + $0x268] ss:$48 sps:$4 sm:$0xff]   ;;  %v10647_v4 = vld [vmem:[%s14390_s1 + $0xcc4] ss:$8 sps:$4 sm:$0xff]  }
 0x17f   :  { %2216 = vmatpush1.bf16.msra.mxu0 %v10546_v5  ;;  %v10650_v5 = vld [vmem:[%s14390_s1 + $0x12c4] ss:$8 sps:$4 sm:$0xff]  }
 0x180   :  { %3987 = vmatpush1.bf16.msra.mxu1 %v10549_v6  ;;  %5240 = vmatprep.subr.bf16.mxu0 %v10557_v7  ;;  %v10645_v6 = vld [vmem:[%s14390_s1 + $0xcc0] ss:$8 sps:$4 sm:$0xff]  }
 0x181   :  { %7039 = vmatprep.subr.bf16.mxu1 %v10560_v8  ;;  %v10648_v7 = vld [vmem:[%s14390_s1 + $0x12c0] ss:$8 sps:$4 sm:$0xff]   ;;  %v10653_v8 = vld [vmem:[%s14390_s1 + $0xcd4] ss:$8 sps:$4 sm:$0xff]  }
 0x182   :  { %2218 = vmatmul.mubr.bf16.vlgmr.msra.gmra.mrb[0].mxu0 %v10552_v9 }
 0x183   :  { %3989 = vmatmul.mubr.bf16.vlgmr.msra.gmra.mrb[0].mxu1 %v10552_v9  ;;  %5241 = vmatpush1.bf16.msra.mxu0 %v10555_v10  ;;  %v10656_v9 = vld [vmem:[%s14390_s1 + $0x12d4] ss:$8 sps:$4 sm:$0xff]   ;;  %v10651_v10 = vld [vmem:[%s14390_s1 + $0xcd0] ss:$8 sps:$4 sm:$0xff]  }
 0x184   :  { %7040 = vmatpush1.bf16.msra.mxu1 %v10558_v11  ;;  %5242 = vmatprep.subr.bf16.mxu0 %v10563_v12  ;;  %v10654_v11 = vld [vmem:[%s14390_s1 + $0x12d0] ss:$8 sps:$4 sm:$0xff]   ;;  %v10659_v12 = vld [vmem:[%s14390_s1 + $0xce4] ss:$8 sps:$4 sm:$0xff]  }
 0x185   :  { %7041 = vmatprep.subr.bf16.mxu1 %v10566_v13  ;;  %2227 = vmatprep.mubr.bf16.mxu0 %v10567_v14  ;;  %v10662_v13 = vld [vmem:[%s14390_s1 + $0x12e4] ss:$8 sps:$4 sm:$0xff]  }
 0x186   :  { %3998 = vmatprep.mubr.bf16.mxu1 %v10567_v14  ;;  %v11149_v14 = vld [vmem:[%s14391_s0 + $0x4] ss:$48 sps:$4 sm:$0xff]  }
 0x187   :  { %5243 = vmatpush1.bf16.msra.mxu0 %v10561_v15  ;;  %v10657_v15 = vld [vmem:[%s14390_s1 + $0xce0] ss:$8 sps:$4 sm:$0xff]  }
 0x188   :  { %7042 = vmatpush1.bf16.msra.mxu1 %v10564_v16  ;;  %5244 = vmatprep.subr.bf16.mxu0 %v10572_v17  ;;  %v10660_v16 = vld [vmem:[%s14390_s1 + $0x12e0] ss:$8 sps:$4 sm:$0xff]   ;;  %v10665_v17 = vld [vmem:[%s14390_s1 + $0xcf4] ss:$8 sps:$4 sm:$0xff]  }
 0x189   :  { %7043 = vmatprep.subr.bf16.mxu1 %v10575_v18  ;;  %v10668_v18 = vld [vmem:[%s14390_s1 + $0x12f4] ss:$8 sps:$4 sm:$0xff]  }
 0x18a   :  { %2228 = vmatmul.mubr.bf16.gmra.mrb[4].mxu0 %v10569_v19 }
 0x18b   :  { %3999 = vmatmul.mubr.bf16.gmra.mrb[4].mxu1 %v10569_v19  ;;  %5245 = vmatpush1.bf16.msra.mxu0 %v10570_v20  ;;  %v10663_v19 = vld [vmem:[%s14390_s1 + $0xcf0] ss:$8 sps:$4 sm:$0xff]  }
 0x18c   :  { %7044 = vmatpush1.bf16.msra.mxu1 %v10573_v21  ;;  %5246 = vmatprep.subr.bf16.mxu0 %v10578_v22  ;;  %v10666_v20 = vld [vmem:[%s14390_s1 + $0x12f0] ss:$8 sps:$4 sm:$0xff]   ;;  %v10671_v21 = vld [vmem:[%s14390_s1 + $0xd04] ss:$8 sps:$4 sm:$0xff]  }
 0x18d   :  { %7045 = vmatprep.subr.bf16.mxu1 %v10581_v23  ;;  %2237 = vmatprep.mubr.bf16.mxu0 %v10582_v24  ;;  %v10674_v22 = vld [vmem:[%s14390_s1 + $0x1304] ss:$8 sps:$4 sm:$0xff]   ;;  %v10669_v23 = vld [vmem:[%s14390_s1 + $0xd00] ss:$8 sps:$4 sm:$0xff]  }
 0x18e   :  { %4008 = vmatprep.mubr.bf16.mxu1 %v10582_v24  ;;  %v10672_v24 = vld [vmem:[%s14390_s1 + $0x1300] ss:$8 sps:$4 sm:$0xff]  }
 0x18f   :  { %5247 = vmatpush1.bf16.msra.mxu0 %v10576_v25  ;;  %v10677_v25 = vld [vmem:[%s14390_s1 + $0xd14] ss:$8 sps:$4 sm:$0xff]  }
 0x190   :  { %7046 = vmatpush1.bf16.msra.mxu1 %v10579_v26  ;;  %5248 = vmatprep.subr.bf16.mxu0 %v10587_v27  ;;  %v10680_v26 = vld [vmem:[%s14390_s1 + $0x1314] ss:$8 sps:$4 sm:$0xff]   ;;  %v11150_v27 = vld [vmem:[%s14391_s0] ss:$48 sps:$4 sm:$0xff]  }
 0x191   :  { %7047 = vmatprep.subr.bf16.mxu1 %v10590_v28  ;;  %v10675_v28 = vld [vmem:[%s14390_s1 + $0xd10] ss:$8 sps:$4 sm:$0xff]  }
 0x192   :  { %2238 = vmatmul.mubr.bf16.gmra.mrb[8].mxu0 %v10584_v29 }
 0x193   :  { %4009 = vmatmul.mubr.bf16.gmra.mrb[8].mxu1 %v10584_v29  ;;  %5249 = vmatpush1.bf16.msra.mxu0 %v10585_v30  ;;  %v10678_v29 = vld [vmem:[%s14390_s1 + $0x1310] ss:$8 sps:$4 sm:$0xff]   ;;  %v10683_v30 = vld [vmem:[%s14390_s1 + $0xd24] ss:$8 sps:$4 sm:$0xff]  }
 0x194   :  { %7048 = vmatpush1.bf16.msra.mxu1 %v10588_v31  ;;  %5250 = vmatprep.subr.bf16.mxu0 %v10593_v32  ;;  %v10686_v31 = vld [vmem:[%s14390_s1 + $0x1324] ss:$8 sps:$4 sm:$0xff]  }
 0x195   :  { %7049 = vmatprep.subr.bf16.mxu1 %v10596_v33  ;;  %2247 = vmatprep.mubr.bf16.mxu0 %v10597_v34  ;;  %v11151_v32 = vld [vmem:[%s14391_s0 + $0x64] ss:$48 sps:$4 sm:$0xff]   ;;  %v10681_v33 = vld [vmem:[%s14390_s1 + $0xd20] ss:$8 sps:$4 sm:$0xff]  }
 0x196   :  { %4018 = vmatprep.mubr.bf16.mxu1 %v10597_v34  ;;  %v10684_v34 = vld [vmem:[%s14390_s1 + $0x1320] ss:$8 sps:$4 sm:$0xff]  }
 0x197   :  { %5251 = vmatpush1.bf16.msra.mxu0 %v10591_v35  ;;  %v10689_v35 = vld [vmem:[%s14390_s1 + $0xd34] ss:$8 sps:$4 sm:$0xff]  }
 0x198   :  { %7050 = vmatpush1.bf16.msra.mxu1 %v10594_v36  ;;  %5252 = vmatprep.subr.bf16.mxu0 %v10602_v37  ;;  %v10692_v36 = vld [vmem:[%s14390_s1 + $0x1334] ss:$8 sps:$4 sm:$0xff]   ;;  %v11152_v37 = vld [vmem:[%s14391_s0 + $0x60] ss:$48 sps:$4 sm:$0xff]  }
 0x199   :  { %7051 = vmatprep.subr.bf16.mxu1 %v10605_v38  ;;  %v10687_v38 = vld [vmem:[%s14390_s1 + $0xd30] ss:$8 sps:$4 sm:$0xff]  }
 0x19a   :  { %2248 = vmatmul.mubr.bf16.gmra.mrb[12].mxu0 %v10599_v39 }
 0x19b   :  { %4019 = vmatmul.mubr.bf16.gmra.mrb[12].mxu1 %v10599_v39  ;;  %5253 = vmatpush1.bf16.msra.mxu0 %v10600_v40  ;;  %v10690_v39 = vld [vmem:[%s14390_s1 + $0x1330] ss:$8 sps:$4 sm:$0xff]   ;;  %v10695_v40 = vld [vmem:[%s14390_s1 + $0xd44] ss:$8 sps:$4 sm:$0xff]  }
 0x19c   :  { %7052 = vmatpush1.bf16.msra.mxu1 %v10603_v41  ;;  %5254 = vmatprep.subr.bf16.mxu0 %v10608_v42  ;;  %v10698_v41 = vld [vmem:[%s14390_s1 + $0x1344] ss:$8 sps:$4 sm:$0xff]  }
 0x19d   :  { %7053 = vmatprep.subr.bf16.mxu1 %v10611_v43  ;;  %2257 = vmatprep.mubr.bf16.mxu0 %v10612_v44  ;;  %v11153_v42 = vld [vmem:[%s14391_s0 + $0xc4] ss:$48 sps:$4 sm:$0xff]   ;;  %v10693_v43 = vld [vmem:[%s14390_s1 + $0xd40] ss:$8 sps:$4 sm:$0xff]  }
 0x19e   :  { %4028 = vmatprep.mubr.bf16.mxu1 %v10612_v44  ;;  %v10696_v44 = vld [vmem:[%s14390_s1 + $0x1340] ss:$8 sps:$4 sm:$0xff]  }
 0x19f   :  { %5255 = vmatpush1.bf16.msra.mxu0 %v10606_v45  ;;  %v10701_v45 = vld [vmem:[%s14390_s1 + $0xd54] ss:$8 sps:$4 sm:$0xff]  }
 0x1a0   :  { %7054 = vmatpush1.bf16.msra.mxu1 %v10609_v46  ;;  %5256 = vmatprep.subr.bf16.mxu0 %v10617_v47  ;;  %v10704_v46 = vld [vmem:[%s14390_s1 + $0x1354] ss:$8 sps:$4 sm:$0xff]   ;;  %v10699_v47 = vld [vmem:[%s14390_s1 + $0xd50] ss:$8 sps:$4 sm:$0xff]  }
 0x1a1   :  { %7055 = vmatprep.subr.bf16.mxu1 %v10620_v48  ;;  %v10702_v48 = vld [vmem:[%s14390_s1 + $0x1350] ss:$8 sps:$4 sm:$0xff]  }
 0x1a2   :  { %2258 = vmatmul.mubr.bf16.gmra.mrb[16].mxu0 %v10614_v49 }
 0x1a3   :  { %4029 = vmatmul.mubr.bf16.gmra.mrb[16].mxu1 %v10614_v49  ;;  %5257 = vmatpush1.bf16.msra.mxu0 %v10615_v50  ;;  %v11154_v49 = vld [vmem:[%s14391_s0 + $0xc0] ss:$48 sps:$4 sm:$0xff]   ;;  %v10707_v50 = vld [vmem:[%s14390_s1 + $0xd64] ss:$8 sps:$4 sm:$0xff]  }
 0x1a4   :  { %7056 = vmatpush1.bf16.msra.mxu1 %v10618_v51  ;;  %5258 = vmatprep.subr.bf16.mxu0 %v10623_v52  ;;  %v10710_v51 = vld [vmem:[%s14390_s1 + $0x1364] ss:$8 sps:$4 sm:$0xff]   ;;  %v10705_v52 = vld [vmem:[%s14390_s1 + $0xd60] ss:$8 sps:$4 sm:$0xff]  }
 0x1a5   :  { %7057 = vmatprep.subr.bf16.mxu1 %v10626_v53  ;;  %2267 = vmatprep.mubr.bf16.mxu0 %v10627_v54  ;;  %v10708_v53 = vld [vmem:[%s14390_s1 + $0x1360] ss:$8 sps:$4 sm:$0xff]  }
 0x1a6   :  { %4038 = vmatprep.mubr.bf16.mxu1 %v10627_v54  ;;  %v11155_v54 = vld [vmem:[%s14391_s0 + $0x124] ss:$48 sps:$4 sm:$0xff]  }
 0x1a7   :  { %5259 = vmatpush1.bf16.msra.mxu0 %v10621_v55  ;;  %v10713_v55 = vld [vmem:[%s14390_s1 + $0xd74] ss:$8 sps:$4 sm:$0xff]  }
 0x1a8   :  { %7058 = vmatpush1.bf16.msra.mxu1 %v10624_v56  ;;  %5260 = vmatprep.subr.bf16.mxu0 %v10632_v57  ;;  %v10716_v56 = vld [vmem:[%s14390_s1 + $0x1374] ss:$8 sps:$4 sm:$0xff]   ;;  %v10711_v57 = vld [vmem:[%s14390_s1 + $0xd70] ss:$8 sps:$4 sm:$0xff]  }
 0x1a9   :  { %7059 = vmatprep.subr.bf16.mxu1 %v10635_v58  ;;  %v10714_v58 = vld [vmem:[%s14390_s1 + $0x1370] ss:$8 sps:$4 sm:$0xff]  }
 0x1aa   :  { %2268 = vmatmul.mubr.bf16.gmra.mrb[20].mxu0 %v10629_v59 }
 0x1ab   :  { %4039 = vmatmul.mubr.bf16.gmra.mrb[20].mxu1 %v10629_v59  ;;  %5261 = vmatpush1.bf16.msra.mxu0 %v10630_v60  ;;  %v11156_v59 = vld [vmem:[%s14391_s0 + $0x120] ss:$48 sps:$4 sm:$0xff]   ;;  %v10719_v60 = vld [vmem:[%s14390_s1 + $0xd84] ss:$8 sps:$4 sm:$0xff]  }
 0x1ac   :  { %7060 = vmatpush1.bf16.msra.mxu1 %v10633_v61  ;;  %5262 = vmatprep.subr.bf16.mxu0 %v10638_v62  ;;  %v10722_v61 = vld [vmem:[%s14390_s1 + $0x1384] ss:$8 sps:$4 sm:$0xff]   ;;  %v10717_v62 = vld [vmem:[%s14390_s1 + $0xd80] ss:$8 sps:$4 sm:$0xff]  }
 0x1ad   :  { %7061 = vmatprep.subr.bf16.mxu1 %v10641_v63  ;;  %2277 = vmatprep.mubr.bf16.mxu0 %v10642_v0  ;;  %v10720_v63 = vld [vmem:[%s14390_s1 + $0x1380] ss:$8 sps:$4 sm:$0xff]  }
 0x1ae   :  { %4048 = vmatprep.mubr.bf16.mxu1 %v10642_v0  ;;  %v11157_v0 = vld [vmem:[%s14391_s0 + $0x184] ss:$48 sps:$4 sm:$0xff]  }
 0x1af   :  { %5263 = vmatpush1.bf16.msra.mxu0 %v10636_v1  ;;  %v10725_v1 = vld [vmem:[%s14390_s1 + $0xd94] ss:$8 sps:$4 sm:$0xff]  }
 0x1b0   :  { %7062 = vmatpush1.bf16.msra.mxu1 %v10639_v2  ;;  %5264 = vmatprep.subr.bf16.mxu0 %v10647_v4  ;;  %v10728_v2 = vld [vmem:[%s14390_s1 + $0x1394] ss:$8 sps:$4 sm:$0xff]   ;;  %v10726_v4 = vld [vmem:[%s14390_s1 + $0x1390] ss:$8 sps:$4 sm:$0xff]  }
 0x1b1   :  { %7063 = vmatprep.subr.bf16.mxu1 %v10650_v5  ;;  %v11158_v5 = vld [vmem:[%s14391_s0 + $0x180] ss:$48 sps:$4 sm:$0xff]  }
 0x1b2   :  { %2278 = vmatmul.mubr.bf16.gmra.mrb[24].mxu0 %v10644_v3 }
 0x1b3   :  { %4049 = vmatmul.mubr.bf16.gmra.mrb[24].mxu1 %v10644_v3  ;;  %5265 = vmatpush1.bf16.msra.mxu0 %v10645_v6  ;;  %v10723_v3 = vld [vmem:[%s14390_s1 + $0xd90] ss:$8 sps:$4 sm:$0xff]   ;;  %v10731_v6 = vld [vmem:[%s14390_s1 + $0xda4] ss:$8 sps:$4 sm:$0xff]  }
 0x1b4   :  { %7064 = vmatpush1.bf16.msra.mxu1 %v10648_v7  ;;  %5266 = vmatprep.subr.bf16.mxu0 %v10653_v8  ;;  %v10734_v7 = vld [vmem:[%s14390_s1 + $0x13a4] ss:$8 sps:$4 sm:$0xff]   ;;  %v10729_v8 = vld [vmem:[%s14390_s1 + $0xda0] ss:$8 sps:$4 sm:$0xff]  }
 0x1b5   :  { %7065 = vmatprep.subr.bf16.mxu1 %v10656_v9  ;;  %5272 = vmatprep.mubr.bf16.mxu0 %v11149_v14  ;;  %v10732_v9 = vld [vmem:[%s14390_s1 + $0x13a0] ss:$8 sps:$4 sm:$0xff]  }
 0x1b6   :  { %7071 = vmatprep.mubr.bf16.mxu1 %v11149_v14  ;;  %v10738_v14 = vld [vmem:[%s14390_s1 + $0x13b0] ss:$8 sps:$4 sm:$0xff]  }
 0x1b7   :  { %5267 = vmatpush1.bf16.msra.mxu0 %v10651_v10  ;;  %v11159_v10 = vld [vmem:[%s14391_s0 + $0x1e4] ss:$48 sps:$4 sm:$0xff]  }
 0x1b8   :  { %7066 = vmatpush1.bf16.msra.mxu1 %v10654_v11  ;;  %5268 = vmatprep.subr.bf16.mxu0 %v10659_v12  ;;  %v10737_v11 = vld [vmem:[%s14390_s1 + $0xdb4] ss:$8 sps:$4 sm:$0xff]  }
 0x1b9   :  { %7067 = vmatprep.subr.bf16.mxu1 %v10662_v13  ;;  %v10740_v12 = vld [vmem:[%s14390_s1 + $0x13b4] ss:$8 sps:$4 sm:$0xff]   ;;  %v10735_v13 = vld [vmem:[%s14390_s1 + $0xdb0] ss:$8 sps:$4 sm:$0xff]  }
 0x1bb   :  { %5269 = vmatpush1.bf16.msra.mxu0 %v10657_v15  ;;  %v11160_v15 = vld [vmem:[%s14391_s0 + $0x1e0] ss:$48 sps:$4 sm:$0xff]  }
 0x1bc   :  { %7068 = vmatpush1.bf16.msra.mxu1 %v10660_v16  ;;  %5270 = vmatprep.subr.bf16.mxu0 %v10665_v17  ;;  %v10743_v16 = vld [vmem:[%s14390_s1 + $0xdc4] ss:$8 sps:$4 sm:$0xff]  }
 0x1bd   :  { %7069 = vmatprep.subr.bf16.mxu1 %v10668_v18  ;;  %v10746_v17 = vld [vmem:[%s14390_s1 + $0x13c4] ss:$8 sps:$4 sm:$0xff]   ;;  %v10741_v18 = vld [vmem:[%s14390_s1 + $0xdc0] ss:$8 sps:$4 sm:$0xff]  }
 0x1bf   :  { %5271 = vmatpush1.bf16.msra.mxu0 %v10663_v19  ;;  %v10744_v19 = vld [vmem:[%s14390_s1 + $0x13c0] ss:$8 sps:$4 sm:$0xff]  }
 0x1c0   :  { %7070 = vmatpush1.bf16.msra.mxu1 %v10666_v20  ;;  %5343 = vmatprep.subr.bf16.mxu0 %v10671_v21  ;;  %v11161_v20 = vld [vmem:[%s14391_s0 + $0x244] ss:$48 sps:$4 sm:$0xff]  }
 0x1c1   :  { %7142 = vmatprep.subr.bf16.mxu1 %v10674_v22  ;;  %v10749_v21 = vld [vmem:[%s14390_s1 + $0xdd4] ss:$8 sps:$4 sm:$0xff]  }
 0x1c2   :  { %5273 = vmatmul.mubr.bf16.vlgmr.msra.gmra.mrb[28].mxu0 %v11150_v27  ;;  %v10752_v22 = vld [vmem:[%s14390_s1 + $0x13d4] ss:$8 sps:$4 sm:$0xff]  }
 0x1c3   :  { %7072 = vmatmul.mubr.bf16.vlgmr.msra.gmra.mrb[28].mxu1 %v11150_v27  ;;  %5344 = vmatpush1.bf16.msra.mxu0 %v10669_v23  ;;  %v10747_v23 = vld [vmem:[%s14390_s1 + $0xdd0] ss:$8 sps:$4 sm:$0xff]   ;;  %v10758_v27 = vld [vmem:[%s14390_s1 + $0x13e4] ss:$8 sps:$4 sm:$0xff]  }
 0x1c4   :  { %7143 = vmatpush1.bf16.msra.mxu1 %v10672_v24  ;;  %5345 = vmatprep.subr.bf16.mxu0 %v10677_v25  ;;  %v10750_v24 = vld [vmem:[%s14390_s1 + $0x13d0] ss:$8 sps:$4 sm:$0xff]  }
 0x1c5   :  { %7144 = vmatprep.subr.bf16.mxu1 %v10680_v26  ;;  %5282 = vmatprep.mubr.bf16.mxu0 %v11151_v32  ;;  %v11162_v25 = vld [vmem:[%s14391_s0 + $0x240] ss:$48 sps:$4 sm:$0xff]   ;;  %v10755_v26 = vld [vmem:[%s14390_s1 + $0xde4] ss:$8 sps:$4 sm:$0xff]  }
 0x1c6   :  { %7081 = vmatprep.mubr.bf16.mxu1 %v11151_v32  ;;  %v10764_v32 = vld [vmem:[%s14390_s1 + $0x13f4] ss:$8 sps:$4 sm:$0xff]  }
 0x1c7   :  { %5346 = vmatpush1.bf16.msra.mxu0 %v10675_v28  ;;  %v10753_v28 = vld [vmem:[%s14390_s1 + $0xde0] ss:$8 sps:$4 sm:$0xff]  }
 0x1c8   :  { %7145 = vmatpush1.bf16.msra.mxu1 %v10678_v29  ;;  %5347 = vmatprep.subr.bf16.mxu0 %v10683_v30  ;;  %v10756_v29 = vld [vmem:[%s14390_s1 + $0x13e0] ss:$8 sps:$4 sm:$0xff]   ;;  %v11163_v30 = vld [vmem:[%s14391_s0 + $0xc] ss:$48 sps:$4 sm:$0xff]  }
 0x1c9   :  { %7146 = vmatprep.subr.bf16.mxu1 %v10686_v31  ;;  %v10761_v31 = vld [vmem:[%s14390_s1 + $0xdf4] ss:$8 sps:$4 sm:$0xff]  }
 0x1ca   :  { %5283 = vmatmul.mubr.bf16.gmra.mrb[32].mxu0 %v11152_v37 }
 0x1cb   :  { %7082 = vmatmul.mubr.bf16.gmra.mrb[32].mxu1 %v11152_v37  ;;  %5348 = vmatpush1.bf16.msra.mxu0 %v10681_v33  ;;  %v10759_v33 = vld [vmem:[%s14390_s1 + $0xdf0] ss:$8 sps:$4 sm:$0xff]   ;;  %v10765_v37 = vld [vmem:[%s14390_s1 + $0xe00] ss:$8 sps:$4 sm:$0xff]  }
 0x1cc   :  { %7147 = vmatpush1.bf16.msra.mxu1 %v10684_v34  ;;  %5349 = vmatprep.subr.bf16.mxu0 %v10689_v35  ;;  %v10762_v34 = vld [vmem:[%s14390_s1 + $0x13f0] ss:$8 sps:$4 sm:$0xff]   ;;  %v10767_v35 = vld [vmem:[%s14390_s1 + $0xe04] ss:$8 sps:$4 sm:$0xff]  }
 0x1cd   :  { %7148 = vmatprep.subr.bf16.mxu1 %v10692_v36  ;;  %5292 = vmatprep.mubr.bf16.mxu0 %v11153_v42  ;;  %v10770_v36 = vld [vmem:[%s14390_s1 + $0x1404] ss:$8 sps:$4 sm:$0xff]  }
 0x1ce   :  { %7091 = vmatprep.mubr.bf16.mxu1 %v11153_v42  ;;  %v10774_v42 = vld [vmem:[%s14390_s1 + $0x1410] ss:$8 sps:$4 sm:$0xff]  }
 0x1cf   :  { %5350 = vmatpush1.bf16.msra.mxu0 %v10687_v38  ;;  %v10768_v38 = vld [vmem:[%s14390_s1 + $0x1400] ss:$8 sps:$4 sm:$0xff]  }
 0x1d0   :  { %7149 = vmatpush1.bf16.msra.mxu1 %v10690_v39  ;;  %5351 = vmatprep.subr.bf16.mxu0 %v10695_v40  ;;  %v10773_v39 = vld [vmem:[%s14390_s1 + $0xe14] ss:$8 sps:$4 sm:$0xff]  }
 0x1d1   :  { %7150 = vmatprep.subr.bf16.mxu1 %v10698_v41  ;;  %v10776_v40 = vld [vmem:[%s14390_s1 + $0x1414] ss:$8 sps:$4 sm:$0xff]   ;;  %v10771_v41 = vld [vmem:[%s14390_s1 + $0xe10] ss:$8 sps:$4 sm:$0xff]  }
 0x1d2   :  { %5293 = vmatmul.mubr.bf16.gmra.mrb[36].mxu0 %v11154_v49 }
 0x1d3   :  { %7092 = vmatmul.mubr.bf16.gmra.mrb[36].mxu1 %v11154_v49  ;;  %5352 = vmatpush1.bf16.msra.mxu0 %v10693_v43  ;;  %v11164_v43 = vld [vmem:[%s14391_s0 + $0x8] ss:$48 sps:$4 sm:$0xff]   ;;  %v10785_v49 = vld [vmem:[%s14390_s1 + $0xe34] ss:$8 sps:$4 sm:$0xff]  }
 0x1d4   :  { %7151 = vmatpush1.bf16.msra.mxu1 %v10696_v44  ;;  %5353 = vmatprep.subr.bf16.mxu0 %v10701_v45  ;;  %v10779_v44 = vld [vmem:[%s14390_s1 + $0xe24] ss:$8 sps:$4 sm:$0xff]  }
 0x1d5   :  { %7152 = vmatprep.subr.bf16.mxu1 %v10704_v46  ;;  %5302 = vmatprep.mubr.bf16.mxu0 %v11155_v54  ;;  %v10782_v45 = vld [vmem:[%s14390_s1 + $0x1424] ss:$8 sps:$4 sm:$0xff]   ;;  %v10777_v46 = vld [vmem:[%s14390_s1 + $0xe20] ss:$8 sps:$4 sm:$0xff]  }
 0x1d6   :  { %7101 = vmatprep.mubr.bf16.mxu1 %v11155_v54  ;;  %v10791_v54 = vld [vmem:[%s14390_s1 + $0xe44] ss:$8 sps:$4 sm:$0xff]  }
 0x1d7   :  { %5354 = vmatpush1.bf16.msra.mxu0 %v10699_v47  ;;  %v10780_v47 = vld [vmem:[%s14390_s1 + $0x1420] ss:$8 sps:$4 sm:$0xff]  }
 0x1d8   :  { %7153 = vmatpush1.bf16.msra.mxu1 %v10702_v48  ;;  %5355 = vmatprep.subr.bf16.mxu0 %v10707_v50  ;;  %v11165_v48 = vld [vmem:[%s14391_s0 + $0x6c] ss:$48 sps:$4 sm:$0xff]  }
 0x1d9   :  { %7154 = vmatprep.subr.bf16.mxu1 %v10710_v51  ;;  %v10788_v50 = vld [vmem:[%s14390_s1 + $0x1434] ss:$8 sps:$4 sm:$0xff]   ;;  %v11166_v51 = vld [vmem:[%s14391_s0 + $0x68] ss:$48 sps:$4 sm:$0xff]  }
 0x1da   :  { %5303 = vmatmul.mubr.bf16.gmra.mrb[40].mxu0 %v11156_v59 }
 0x1db   :  { %7102 = vmatmul.mubr.bf16.gmra.mrb[40].mxu1 %v11156_v59  ;;  %5356 = vmatpush1.bf16.msra.mxu0 %v10705_v52  ;;  %v10783_v52 = vld [vmem:[%s14390_s1 + $0xe30] ss:$8 sps:$4 sm:$0xff]   ;;  %v10797_v59 = vld [vmem:[%s14390_s1 + $0xe54] ss:$8 sps:$4 sm:$0xff]  }
 0x1dc   :  { %7155 = vmatpush1.bf16.msra.mxu1 %v10708_v53  ;;  %5357 = vmatprep.subr.bf16.mxu0 %v10713_v55  ;;  %v10786_v53 = vld [vmem:[%s14390_s1 + $0x1430] ss:$8 sps:$4 sm:$0xff]   ;;  %v10794_v55 = vld [vmem:[%s14390_s1 + $0x1444] ss:$8 sps:$4 sm:$0xff]  }
 0x1dd   :  { %7156 = vmatprep.subr.bf16.mxu1 %v10716_v56  ;;  %5312 = vmatprep.mubr.bf16.mxu0 %v11157_v0  ;;  %v11167_v56 = vld [vmem:[%s14391_s0 + $0xcc] ss:$48 sps:$4 sm:$0xff]  }
 0x1de   :  { %7111 = vmatprep.mubr.bf16.mxu1 %v11157_v0  ;;  %v10803_v0 = vld [vmem:[%s14390_s1 + $0xe64] ss:$8 sps:$4 sm:$0xff]  }
 0x1df   :  { %5358 = vmatpush1.bf16.msra.mxu0 %v10711_v57  ;;  %v10789_v57 = vld [vmem:[%s14390_s1 + $0xe40] ss:$8 sps:$4 sm:$0xff]  }
 0x1e0   :  { %7157 = vmatpush1.bf16.msra.mxu1 %v10714_v58  ;;  %5359 = vmatprep.subr.bf16.mxu0 %v10719_v60  ;;  %v10792_v58 = vld [vmem:[%s14390_s1 + $0x1440] ss:$8 sps:$4 sm:$0xff]   ;;  %v10800_v60 = vld [vmem:[%s14390_s1 + $0x1454] ss:$8 sps:$4 sm:$0xff]  }
 0x1e1   :  { %7158 = vmatprep.subr.bf16.mxu1 %v10722_v61  ;;  %v11168_v61 = vld [vmem:[%s14391_s0 + $0xc8] ss:$48 sps:$4 sm:$0xff]  }
 0x1e2   :  { %5313 = vmatmul.mubr.bf16.gmra.mrb[44].mxu0 %v11158_v5 }
 0x1e3   :  { %7112 = vmatmul.mubr.bf16.gmra.mrb[44].mxu1 %v11158_v5  ;;  %5360 = vmatpush1.bf16.msra.mxu0 %v10717_v62  ;;  %v10795_v62 = vld [vmem:[%s14390_s1 + $0xe50] ss:$8 sps:$4 sm:$0xff]   ;;  %v10809_v5 = vld [vmem:[%s14390_s1 + $0xe74] ss:$8 sps:$4 sm:$0xff]  }
 0x1e4   :  { %7159 = vmatpush1.bf16.msra.mxu1 %v10720_v63  ;;  %5361 = vmatprep.subr.bf16.mxu0 %v10725_v1  ;;  %v10798_v63 = vld [vmem:[%s14390_s1 + $0x1450] ss:$8 sps:$4 sm:$0xff]   ;;  %v10806_v1 = vld [vmem:[%s14390_s1 + $0x1464] ss:$8 sps:$4 sm:$0xff]  }
 0x1e5   :  { %7160 = vmatprep.subr.bf16.mxu1 %v10728_v2  ;;  %5322 = vmatprep.mubr.bf16.mxu0 %v11159_v10  ;;  %v11169_v2 = vld [vmem:[%s14391_s0 + $0x12c] ss:$48 sps:$4 sm:$0xff]  }
 0x1e6   :  { %7121 = vmatprep.mubr.bf16.mxu1 %v11159_v10  ;;  %v10815_v10 = vld [vmem:[%s14390_s1 + $0xe84] ss:$8 sps:$4 sm:$0xff]  }
 0x1e7   :  { %5362 = vmatpush1.bf16.msra.mxu0 %v10723_v3  ;;  %v10801_v3 = vld [vmem:[%s14390_s1 + $0xe60] ss:$8 sps:$4 sm:$0xff]  }
 0x1e8   :  { %7161 = vmatpush1.bf16.msra.mxu1 %v10726_v4  ;;  %5363 = vmatprep.subr.bf16.mxu0 %v10731_v6  ;;  %v10804_v4 = vld [vmem:[%s14390_s1 + $0x1460] ss:$8 sps:$4 sm:$0xff]   ;;  %v10812_v6 = vld [vmem:[%s14390_s1 + $0x1474] ss:$8 sps:$4 sm:$0xff]  }
 0x1e9   :  { %7162 = vmatprep.subr.bf16.mxu1 %v10734_v7  ;;  %v11170_v7 = vld [vmem:[%s14391_s0 + $0x128] ss:$48 sps:$4 sm:$0xff]  }
 0x1ea   :  { %5323 = vmatmul.mubr.bf16.gmra.mrb[48].mxu0 %v11160_v15 }
 0x1eb   :  { %7122 = vmatmul.mubr.bf16.gmra.mrb[48].mxu1 %v11160_v15  ;;  %5364 = vmatpush1.bf16.msra.mxu0 %v10729_v8  ;;  %v10807_v8 = vld [vmem:[%s14390_s1 + $0xe70] ss:$8 sps:$4 sm:$0xff]   ;;  %v10821_v15 = vld [vmem:[%s14390_s1 + $0xe94] ss:$8 sps:$4 sm:$0xff]  }
 0x1ec   :  { %7163 = vmatpush1.bf16.msra.mxu1 %v10732_v9  ;;  %5365 = vmatprep.subr.bf16.mxu0 %v10737_v11  ;;  %v10810_v9 = vld [vmem:[%s14390_s1 + $0x1470] ss:$8 sps:$4 sm:$0xff]   ;;  %v10818_v11 = vld [vmem:[%s14390_s1 + $0x1484] ss:$8 sps:$4 sm:$0xff]  }
 0x1ed   :  { %7164 = vmatprep.subr.bf16.mxu1 %v10740_v12  ;;  %5332 = vmatprep.mubr.bf16.mxu0 %v11161_v20  ;;  %v11171_v12 = vld [vmem:[%s14391_s0 + $0x18c] ss:$48 sps:$4 sm:$0xff]  }
 0x1ee   :  { %7131 = vmatprep.mubr.bf16.mxu1 %v11161_v20  ;;  %v10827_v20 = vld [vmem:[%s14390_s1 + $0xea4] ss:$8 sps:$4 sm:$0xff]  }
 0x1ef   :  { %5366 = vmatpush1.bf16.msra.mxu0 %v10735_v13  ;;  %v10813_v13 = vld [vmem:[%s14390_s1 + $0xe80] ss:$8 sps:$4 sm:$0xff]  }
 0x1f0   :  { %7165 = vmatpush1.bf16.msra.mxu1 %v10738_v14  ;;  %5367 = vmatprep.subr.bf16.mxu0 %v10743_v16  ;;  %v10816_v14 = vld [vmem:[%s14390_s1 + $0x1480] ss:$8 sps:$4 sm:$0xff]   ;;  %v10824_v16 = vld [vmem:[%s14390_s1 + $0x1494] ss:$8 sps:$4 sm:$0xff]  }
 0x1f1   :  { %7166 = vmatprep.subr.bf16.mxu1 %v10746_v17  ;;  %v11172_v17 = vld [vmem:[%s14391_s0 + $0x188] ss:$48 sps:$4 sm:$0xff]  }
 0x1f2   :  { %5333 = vmatmul.mubr.bf16.gmra.mrb[52].mxu0 %v11162_v25 }
 0x1f3   :  { %7132 = vmatmul.mubr.bf16.gmra.mrb[52].mxu1 %v11162_v25  ;;  %5368 = vmatpush1.bf16.msra.mxu0 %v10741_v18  ;;  %v10819_v18 = vld [vmem:[%s14390_s1 + $0xe90] ss:$8 sps:$4 sm:$0xff]   ;;  %v10833_v25 = vld [vmem:[%s14390_s1 + $0xeb4] ss:$8 sps:$4 sm:$0xff]  }
 0x1f4   :  { %7167 = vmatpush1.bf16.msra.mxu1 %v10744_v19  ;;  %5369 = vmatprep.subr.bf16.mxu0 %v10749_v21  ;;  %v10822_v19 = vld [vmem:[%s14390_s1 + $0x1490] ss:$8 sps:$4 sm:$0xff]   ;;  %v10830_v21 = vld [vmem:[%s14390_s1 + $0x14a4] ss:$8 sps:$4 sm:$0xff]  }
 0x1f5   :  { %7168 = vmatprep.subr.bf16.mxu1 %v10752_v22  ;;  %5375 = vmatprep.mubr.bf16.mxu0 %v11163_v30  ;;  %v11173_v22 = vld [vmem:[%s14391_s0 + $0x1ec] ss:$48 sps:$4 sm:$0xff]  }
 0x1f6   :  { %7174 = vmatprep.mubr.bf16.mxu1 %v11163_v30  ;;  %v10839_v30 = vld [vmem:[%s14390_s1 + $0xec4] ss:$8 sps:$4 sm:$0xff]  }
 0x1f7   :  { %5370 = vmatpush1.bf16.msra.mxu0 %v10747_v23  ;;  %v10825_v23 = vld [vmem:[%s14390_s1 + $0xea0] ss:$8 sps:$4 sm:$0xff]  }
 0x1f8   :  { %7169 = vmatpush1.bf16.msra.mxu1 %v10750_v24  ;;  %5371 = vmatprep.subr.bf16.mxu0 %v10755_v26  ;;  %v10828_v24 = vld [vmem:[%s14390_s1 + $0x14a0] ss:$8 sps:$4 sm:$0xff]   ;;  %v10836_v26 = vld [vmem:[%s14390_s1 + $0x14b4] ss:$8 sps:$4 sm:$0xff]  }
 0x1f9   :  { %7170 = vmatprep.subr.bf16.mxu1 %v10758_v27  ;;  %v11174_v27 = vld [vmem:[%s14391_s0 + $0x1e8] ss:$48 sps:$4 sm:$0xff]  }
 0x1fb   :  { %5372 = vmatpush1.bf16.msra.mxu0 %v10753_v28  ;;  %v10831_v28 = vld [vmem:[%s14390_s1 + $0xeb0] ss:$8 sps:$4 sm:$0xff]  }
 0x1fc   :  { %7171 = vmatpush1.bf16.msra.mxu1 %v10756_v29  ;;  %5373 = vmatprep.subr.bf16.mxu0 %v10761_v31  ;;  %v10834_v29 = vld [vmem:[%s14390_s1 + $0x14b0] ss:$8 sps:$4 sm:$0xff]   ;;  %v10842_v31 = vld [vmem:[%s14390_s1 + $0x14c4] ss:$8 sps:$4 sm:$0xff]  }
 0x1fd   :  { %7172 = vmatprep.subr.bf16.mxu1 %v10764_v32  ;;  %v11175_v32 = vld [vmem:[%s14391_s0 + $0x24c] ss:$48 sps:$4 sm:$0xff]  }
 0x1ff   :  { %5374 = vmatpush1.bf16.msra.mxu0 %v10759_v33  ;;  %v10837_v33 = vld [vmem:[%s14390_s1 + $0xec0] ss:$8 sps:$4 sm:$0xff]  }
 0x200   :  { %7173 = vmatpush1.bf16.msra.mxu1 %v10762_v34  ;;  %5446 = vmatprep.subr.bf16.mxu0 %v10767_v35  ;;  %v10840_v34 = vld [vmem:[%s14390_s1 + $0x14c0] ss:$8 sps:$4 sm:$0xff]   ;;  %v10845_v35 = vld [vmem:[%s14390_s1 + $0xed4] ss:$8 sps:$4 sm:$0xff]  }
 0x201   :  { %7245 = vmatprep.subr.bf16.mxu1 %v10770_v36  ;;  %v10848_v36 = vld [vmem:[%s14390_s1 + $0x14d4] ss:$8 sps:$4 sm:$0xff]  }
 0x202   :  { %5376 = vmatmul.mubr.bf16.vlgmr.msra.gmra.mrb[28].mxu0 %v11164_v43 }
 0x203   :  { %7175 = vmatmul.mubr.bf16.vlgmr.msra.gmra.mrb[28].mxu1 %v11164_v43  ;;  %5447 = vmatpush1.bf16.msra.mxu0 %v10765_v37  ;;  %v11176_v37 = vld [vmem:[%s14391_s0 + $0x248] ss:$48 sps:$4 sm:$0xff]  }
 0x204   :  { %7246 = vmatpush1.bf16.msra.mxu1 %v10768_v38  ;;  %5448 = vmatprep.subr.bf16.mxu0 %v10773_v39  ;;  %v10843_v38 = vld [vmem:[%s14390_s1 + $0xed0] ss:$8 sps:$4 sm:$0xff]   ;;  %v10849_v43 = vld [vmem:[%s14390_s1 + $0xee0] ss:$8 sps:$4 sm:$0xff]  }
 0x205   :  { %7247 = vmatprep.subr.bf16.mxu1 %v10776_v40  ;;  %5385 = vmatprep.mubr.bf16.mxu0 %v11165_v48  ;;  %v10846_v39 = vld [vmem:[%s14390_s1 + $0x14d0] ss:$8 sps:$4 sm:$0xff]   ;;  %v10851_v40 = vld [vmem:[%s14390_s1 + $0xee4] ss:$8 sps:$4 sm:$0xff]  }
 0x206   :  { %7184 = vmatprep.mubr.bf16.mxu1 %v11165_v48  ;;  %v10858_v48 = vld [vmem:[%s14390_s1 + $0x14f0] ss:$8 sps:$4 sm:$0xff]  }
 0x207   :  { %5449 = vmatpush1.bf16.msra.mxu0 %v10771_v41  ;;  %v10854_v41 = vld [vmem:[%s14390_s1 + $0x14e4] ss:$8 sps:$4 sm:$0xff]  }
 0x208   :  { %7248 = vmatpush1.bf16.msra.mxu1 %v10774_v42  ;;  %5450 = vmatprep.subr.bf16.mxu0 %v10779_v44  ;;  %v11177_v42 = vld [vmem:[%s14391_s0 + $0x14] ss:$48 sps:$4 sm:$0xff]   ;;  %v10852_v44 = vld [vmem:[%s14390_s1 + $0x14e0] ss:$8 sps:$4 sm:$0xff]  }
 0x209   :  { %7249 = vmatprep.subr.bf16.mxu1 %v10782_v45  ;;  %v10857_v45 = vld [vmem:[%s14390_s1 + $0xef4] ss:$8 sps:$4 sm:$0xff]  }
 0x20a   :  { %5386 = vmatmul.mubr.bf16.gmra.mrb[32].mxu0 %v11166_v51 }
 0x20b   :  { %7185 = vmatmul.mubr.bf16.gmra.mrb[32].mxu1 %v11166_v51  ;;  %5451 = vmatpush1.bf16.msra.mxu0 %v10777_v46  ;;  %v10860_v46 = vld [vmem:[%s14390_s1 + $0x14f4] ss:$8 sps:$4 sm:$0xff]   ;;  %v10861_v51 = vld [vmem:[%s14390_s1 + $0xf00] ss:$8 sps:$4 sm:$0xff]  }
 0x20c   :  { %7250 = vmatpush1.bf16.msra.mxu1 %v10780_v47  ;;  %5452 = vmatprep.subr.bf16.mxu0 %v10785_v49  ;;  %v10855_v47 = vld [vmem:[%s14390_s1 + $0xef0] ss:$8 sps:$4 sm:$0xff]   ;;  %v10863_v49 = vld [vmem:[%s14390_s1 + $0xf04] ss:$8 sps:$4 sm:$0xff]  }
 0x20d   :  { %7251 = vmatprep.subr.bf16.mxu1 %v10788_v50  ;;  %5395 = vmatprep.mubr.bf16.mxu0 %v11167_v56  ;;  %v10866_v50 = vld [vmem:[%s14390_s1 + $0x1504] ss:$8 sps:$4 sm:$0xff]  }
 0x20e   :  { %7194 = vmatprep.mubr.bf16.mxu1 %v11167_v56  ;;  %v10867_v56 = vld [vmem:[%s14390_s1 + $0xf10] ss:$8 sps:$4 sm:$0xff]  }
 0x20f   :  { %5453 = vmatpush1.bf16.msra.mxu0 %v10783_v52  ;;  %v10864_v52 = vld [vmem:[%s14390_s1 + $0x1500] ss:$8 sps:$4 sm:$0xff]  }
 0x210   :  { %7252 = vmatpush1.bf16.msra.mxu1 %v10786_v53  ;;  %5454 = vmatprep.subr.bf16.mxu0 %v10791_v54  ;;  %v10869_v53 = vld [vmem:[%s14390_s1 + $0xf14] ss:$8 sps:$4 sm:$0xff]  }
 0x211   :  { %7253 = vmatprep.subr.bf16.mxu1 %v10794_v55  ;;  %v10872_v54 = vld [vmem:[%s14390_s1 + $0x1514] ss:$8 sps:$4 sm:$0xff]   ;;  %v11178_v55 = vld [vmem:[%s14391_s0 + $0x10] ss:$48 sps:$4 sm:$0xff]  }
 0x212   :  { %5396 = vmatmul.mubr.bf16.gmra.mrb[36].mxu0 %v11168_v61 }
 0x213   :  { %7195 = vmatmul.mubr.bf16.gmra.mrb[36].mxu1 %v11168_v61  ;;  %5455 = vmatpush1.bf16.msra.mxu0 %v10789_v57  ;;  %v10870_v57 = vld [vmem:[%s14390_s1 + $0x1510] ss:$8 sps:$4 sm:$0xff]   ;;  %v10873_v61 = vld [vmem:[%s14390_s1 + $0xf20] ss:$8 sps:$4 sm:$0xff]  }
 0x214   :  { %7254 = vmatpush1.bf16.msra.mxu1 %v10792_v58  ;;  %5456 = vmatprep.subr.bf16.mxu0 %v10797_v59  ;;  %v10875_v58 = vld [vmem:[%s14390_s1 + $0xf24] ss:$8 sps:$4 sm:$0xff]  }
 0x215   :  { %7255 = vmatprep.subr.bf16.mxu1 %v10800_v60  ;;  %5405 = vmatprep.mubr.bf16.mxu0 %v11169_v2  ;;  %v10878_v59 = vld [vmem:[%s14390_s1 + $0x1524] ss:$8 sps:$4 sm:$0xff]  }
 0x216   :  { %7204 = vmatprep.mubr.bf16.mxu1 %v11169_v2  ;;  %v11179_v60 = vld [vmem:[%s14391_s0 + $0x74] ss:$48 sps:$4 sm:$0xff]   ;;  %v10879_v2 = vld [vmem:[%s14390_s1 + $0xf30] ss:$8 sps:$4 sm:$0xff]  }
 0x217   :  { %5457 = vmatpush1.bf16.msra.mxu0 %v10795_v62  ;;  %v10876_v62 = vld [vmem:[%s14390_s1 + $0x1520] ss:$8 sps:$4 sm:$0xff]  }
 0x218   :  { %7256 = vmatpush1.bf16.msra.mxu1 %v10798_v63  ;;  %5458 = vmatprep.subr.bf16.mxu0 %v10803_v0  ;;  %v10881_v63 = vld [vmem:[%s14390_s1 + $0xf34] ss:$8 sps:$4 sm:$0xff]  }
 0x219   :  { %7257 = vmatprep.subr.bf16.mxu1 %v10806_v1  ;;  %v10884_v0 = vld [vmem:[%s14390_s1 + $0x1534] ss:$8 sps:$4 sm:$0xff]   ;;  %v11180_v1 = vld [vmem:[%s14391_s0 + $0x70] ss:$48 sps:$4 sm:$0xff]  }
 0x21a   :  { %5406 = vmatmul.mubr.bf16.gmra.mrb[40].mxu0 %v11170_v7 }
 0x21b   :  { %7205 = vmatmul.mubr.bf16.gmra.mrb[40].mxu1 %v11170_v7  ;;  %5459 = vmatpush1.bf16.msra.mxu0 %v10801_v3  ;;  %v10882_v3 = vld [vmem:[%s14390_s1 + $0x1530] ss:$8 sps:$4 sm:$0xff]   ;;  %v10885_v7 = vld [vmem:[%s14390_s1 + $0xf40] ss:$8 sps:$4 sm:$0xff]  }
 0x21c   :  { %7258 = vmatpush1.bf16.msra.mxu1 %v10804_v4  ;;  %5460 = vmatprep.subr.bf16.mxu0 %v10809_v5  ;;  %v10887_v4 = vld [vmem:[%s14390_s1 + $0xf44] ss:$8 sps:$4 sm:$0xff]  }
 0x21d   :  { %7259 = vmatprep.subr.bf16.mxu1 %v10812_v6  ;;  %5415 = vmatprep.mubr.bf16.mxu0 %v11171_v12  ;;  %v10890_v5 = vld [vmem:[%s14390_s1 + $0x1544] ss:$8 sps:$4 sm:$0xff]  }
 0x21e   :  { %7214 = vmatprep.mubr.bf16.mxu1 %v11171_v12  ;;  %v11181_v6 = vld [vmem:[%s14391_s0 + $0xd4] ss:$48 sps:$4 sm:$0xff]   ;;  %v10891_v12 = vld [vmem:[%s14390_s1 + $0xf50] ss:$8 sps:$4 sm:$0xff]  }
 0x21f   :  { %5461 = vmatpush1.bf16.msra.mxu0 %v10807_v8  ;;  %v10888_v8 = vld [vmem:[%s14390_s1 + $0x1540] ss:$8 sps:$4 sm:$0xff]  }
 0x220   :  { %7260 = vmatpush1.bf16.msra.mxu1 %v10810_v9  ;;  %5462 = vmatprep.subr.bf16.mxu0 %v10815_v10  ;;  %v10893_v9 = vld [vmem:[%s14390_s1 + $0xf54] ss:$8 sps:$4 sm:$0xff]  }
 0x221   :  { %7261 = vmatprep.subr.bf16.mxu1 %v10818_v11  ;;  %v10896_v10 = vld [vmem:[%s14390_s1 + $0x1554] ss:$8 sps:$4 sm:$0xff]   ;;  %v11182_v11 = vld [vmem:[%s14391_s0 + $0xd0] ss:$48 sps:$4 sm:$0xff]  }
 0x222   :  { %5416 = vmatmul.mubr.bf16.gmra.mrb[44].mxu0 %v11172_v17 }
 0x223   :  { %7215 = vmatmul.mubr.bf16.gmra.mrb[44].mxu1 %v11172_v17  ;;  %5463 = vmatpush1.bf16.msra.mxu0 %v10813_v13  ;;  %v10894_v13 = vld [vmem:[%s14390_s1 + $0x1550] ss:$8 sps:$4 sm:$0xff]  }
 0x224   :  { %7262 = vmatpush1.bf16.msra.mxu1 %v10816_v14  ;;  %5464 = vmatprep.subr.bf16.mxu0 %v10821_v15  ;;  %v10899_v14 = vld [vmem:[%s14390_s1 + $0xf64] ss:$8 sps:$4 sm:$0xff]  }
 0x225   :  { %7263 = vmatprep.subr.bf16.mxu1 %v10824_v16  ;;  %5425 = vmatprep.mubr.bf16.mxu0 %v11173_v22  ;;  %v10902_v15 = vld [vmem:[%s14390_s1 + $0x1564] ss:$8 sps:$4 sm:$0xff]  }
 0x226   :  { %7224 = vmatprep.mubr.bf16.mxu1 %v11173_v22 }
 0x227   :  { %5465 = vmatpush1.bf16.msra.mxu0 %v10819_v18  ;;  %v11183_v18 = vld [vmem:[%s14391_s0 + $0x134] ss:$48 sps:$4 sm:$0xff]  }
 0x228   :  { %7264 = vmatpush1.bf16.msra.mxu1 %v10822_v19  ;;  %5466 = vmatprep.subr.bf16.mxu0 %v10827_v20  ;;  %v10983_v19 = vld [vmem:[%s14390_s1 + $0x1044] ss:$8 sps:$4 sm:$0xff]  }
 0x229   :  { %7265 = vmatprep.subr.bf16.mxu1 %v10830_v21 }
 0x22a   :  { %5426 = vmatmul.mubr.bf16.gmra.mrb[48].mxu0 %v11174_v27 }
 0x22b   :  { %7225 = vmatmul.mubr.bf16.gmra.mrb[48].mxu1 %v11174_v27  ;;  %5467 = vmatpush1.bf16.msra.mxu0 %v10825_v23  ;;  %v11194_v27 = vld [vmem:[%s14391_s0 + $0x78] ss:$48 sps:$4 sm:$0xff]  }
 0x22c   :  { %7266 = vmatpush1.bf16.msra.mxu1 %v10828_v24  ;;  %5468 = vmatprep.subr.bf16.mxu0 %v10833_v25  ;;  %v10897_v25 = vld [vmem:[%s14390_s1 + $0xf60] ss:$8 sps:$4 sm:$0xff]  }
 0x22d   :  { %7267 = vmatprep.subr.bf16.mxu1 %v10836_v26  ;;  %5435 = vmatprep.mubr.bf16.mxu0 %v11175_v32  ;;  %v10900_v26 = vld [vmem:[%s14390_s1 + $0x1560] ss:$8 sps:$4 sm:$0xff]  }
 0x22e   :  { %7234 = vmatprep.mubr.bf16.mxu1 %v11175_v32 }
 0x22f   :  { %5469 = vmatpush1.bf16.msra.mxu0 %v10831_v28 }
 0x230   :  { %7268 = vmatpush1.bf16.msra.mxu1 %v10834_v29  ;;  %5470 = vmatprep.subr.bf16.mxu0 %v10839_v30  ;;  %v10905_v30 = vld [vmem:[%s14390_s1 + $0xf74] ss:$8 sps:$4 sm:$0xff]  }
 0x231   :  { %7269 = vmatprep.subr.bf16.mxu1 %v10842_v31  ;;  %v10908_v31 = vld [vmem:[%s14390_s1 + $0x1574] ss:$8 sps:$4 sm:$0xff]  }
 0x232   :  { %5436 = vmatmul.mubr.bf16.gmra.mrb[52].mxu0 %v11176_v37 }
 0x233   :  { %7235 = vmatmul.mubr.bf16.gmra.mrb[52].mxu1 %v11176_v37  ;;  %5471 = vmatpush1.bf16.msra.mxu0 %v10837_v33  ;;  %v11184_v33 = vld [vmem:[%s14391_s0 + $0x130] ss:$48 sps:$4 sm:$0xff]   ;;  %v10914_v37 = vld [vmem:[%s14390_s1 + $0x1584] ss:$8 sps:$4 sm:$0xff]  }
 0x234   :  { %7270 = vmatpush1.bf16.msra.mxu1 %v10840_v34  ;;  %5472 = vmatprep.subr.bf16.mxu0 %v10845_v35  ;;  %v10903_v34 = vld [vmem:[%s14390_s1 + $0xf70] ss:$8 sps:$4 sm:$0xff]  }
 0x235   :  { %7271 = vmatprep.subr.bf16.mxu1 %v10848_v36  ;;  %5478 = vmatprep.mubr.bf16.mxu0 %v11177_v42  ;;  %v10906_v35 = vld [vmem:[%s14390_s1 + $0x1570] ss:$8 sps:$4 sm:$0xff]   ;;  %v10911_v36 = vld [vmem:[%s14390_s1 + $0xf84] ss:$8 sps:$4 sm:$0xff]  }
 0x236   :  { %7277 = vmatprep.mubr.bf16.mxu1 %v11177_v42 }
 0x237   :  { %5473 = vmatpush1.bf16.msra.mxu0 %v10843_v38 }
 0x238   :  { %7272 = vmatpush1.bf16.msra.mxu1 %v10846_v39  ;;  %5474 = vmatprep.subr.bf16.mxu0 %v10851_v40  ;;  %v11185_v40 = vld [vmem:[%s14391_s0 + $0x194] ss:$48 sps:$4 sm:$0xff]  }
 0x239   :  { %7273 = vmatprep.subr.bf16.mxu1 %v10854_v41 }
 0x23b   :  { %5475 = vmatpush1.bf16.msra.mxu0 %v10849_v43 }
 0x23c   :  { %7274 = vmatpush1.bf16.msra.mxu1 %v10852_v44  ;;  %5476 = vmatprep.subr.bf16.mxu0 %v10857_v45 }
 0x23d   :  { %7275 = vmatprep.subr.bf16.mxu1 %v10860_v46 }
 0x23f   :  { %5477 = vmatpush1.bf16.msra.mxu0 %v10855_v47  ;;  %v10909_v47 = vld [vmem:[%s14390_s1 + $0xf80] ss:$8 sps:$4 sm:$0xff]  }
 0x240   :  { %7276 = vmatpush1.bf16.msra.mxu1 %v10858_v48  ;;  %5549 = vmatprep.subr.bf16.mxu0 %v10863_v49  ;;  %v10912_v48 = vld [vmem:[%s14390_s1 + $0x1580] ss:$8 sps:$4 sm:$0xff]  }
 0x241   :  { %7348 = vmatprep.subr.bf16.mxu1 %v10866_v50 }
 0x242   :  { %5479 = vmatmul.mubr.bf16.vlgmr.msra.gmra.mrb[28].mxu0 %v11178_v55 }
 0x243   :  { %7278 = vmatmul.mubr.bf16.vlgmr.msra.gmra.mrb[28].mxu1 %v11178_v55  ;;  %5550 = vmatpush1.bf16.msra.mxu0 %v10861_v51  ;;  %v11186_v55 = vld [vmem:[%s14391_s0 + $0x190] ss:$48 sps:$4 sm:$0xff]  }
 0x244   :  { %7349 = vmatpush1.bf16.msra.mxu1 %v10864_v52  ;;  %5551 = vmatprep.subr.bf16.mxu0 %v10869_v53  ;;  %v10917_v52 = vld [vmem:[%s14390_s1 + $0xf94] ss:$8 sps:$4 sm:$0xff]  }
 0x245   :  { %7350 = vmatprep.subr.bf16.mxu1 %v10872_v54  ;;  %5488 = vmatprep.mubr.bf16.mxu0 %v11179_v60  ;;  %v10920_v53 = vld [vmem:[%s14390_s1 + $0x1594] ss:$8 sps:$4 sm:$0xff]  }
 0x246   :  { %7287 = vmatprep.mubr.bf16.mxu1 %v11179_v60  ;;  %v11193_v54 = vld [vmem:[%s14391_s0 + $0x7c] ss:$48 sps:$4 sm:$0xff]  }
 0x247   :  { %5552 = vmatpush1.bf16.msra.mxu0 %v10867_v56  ;;  %v10915_v56 = vld [vmem:[%s14390_s1 + $0xf90] ss:$8 sps:$4 sm:$0xff]  }
 0x248   :  { %7351 = vmatpush1.bf16.msra.mxu1 %v10870_v57  ;;  %5553 = vmatprep.subr.bf16.mxu0 %v10875_v58  ;;  %v10918_v57 = vld [vmem:[%s14390_s1 + $0x1590] ss:$8 sps:$4 sm:$0xff]   ;;  %v10923_v58 = vld [vmem:[%s14390_s1 + $0xfa4] ss:$8 sps:$4 sm:$0xff]  }
 0x249   :  { %7352 = vmatprep.subr.bf16.mxu1 %v10878_v59  ;;  %v10926_v59 = vld [vmem:[%s14390_s1 + $0x15a4] ss:$8 sps:$4 sm:$0xff]  }
 0x24a   :  { %5489 = vmatmul.mubr.bf16.gmra.mrb[32].mxu0 %v11180_v1 }
 0x24b   :  { %7288 = vmatmul.mubr.bf16.gmra.mrb[32].mxu1 %v11180_v1  ;;  %5554 = vmatpush1.bf16.msra.mxu0 %v10873_v61 }
 0x24c   :  { %7353 = vmatpush1.bf16.msra.mxu1 %v10876_v62  ;;  %5555 = vmatprep.subr.bf16.mxu0 %v10881_v63  ;;  %v11187_v62 = vld [vmem:[%s14391_s0 + $0x1f4] ss:$48 sps:$4 sm:$0xff]  }
 0x24d   :  { %7354 = vmatprep.subr.bf16.mxu1 %v10884_v0  ;;  %5498 = vmatprep.mubr.bf16.mxu0 %v11181_v6  ;;  %v10971_v63 = vld [vmem:[%s14390_s1 + $0x1024] ss:$8 sps:$4 sm:$0xff]  }
 0x24e   :  { %7297 = vmatprep.mubr.bf16.mxu1 %v11181_v6  ;;  %v10924_v6 = vld [vmem:[%s14390_s1 + $0x15a0] ss:$8 sps:$4 sm:$0xff]  }
 0x24f   :  { %5556 = vmatpush1.bf16.msra.mxu0 %v10879_v2 }
 0x250   :  { %7355 = vmatpush1.bf16.msra.mxu1 %v10882_v3  ;;  %5557 = vmatprep.subr.bf16.mxu0 %v10887_v4 }
 0x251   :  { %7356 = vmatprep.subr.bf16.mxu1 %v10890_v5  ;;  %v10921_v5 = vld [vmem:[%s14390_s1 + $0xfa0] ss:$8 sps:$4 sm:$0xff]  }
 0x252   :  { %5499 = vmatmul.mubr.bf16.gmra.mrb[36].mxu0 %v11182_v11 }
 0x253   :  { %7298 = vmatmul.mubr.bf16.gmra.mrb[36].mxu1 %v11182_v11  ;;  %5558 = vmatpush1.bf16.msra.mxu0 %v10885_v7  ;;  %v10932_v11 = vld [vmem:[%s14390_s1 + $0x15b4] ss:$8 sps:$4 sm:$0xff]   ;;  %v11192_v7 = vld [vmem:[%s14391_s0 + $0x18] ss:$48 sps:$4 sm:$0xff]  }
 0x254   :  { %7357 = vmatpush1.bf16.msra.mxu1 %v10888_v8  ;;  %5559 = vmatprep.subr.bf16.mxu0 %v10893_v9 }
 0x255   :  { %7358 = vmatprep.subr.bf16.mxu1 %v10896_v10  ;;  %v13413_v16 = vpop.f32.mrb[0].mxu0  ;;  %5508 = vmatprep.mubr.bf16.mxu0 %v11183_v18  ;;  %v10929_v10 = vld [vmem:[%s14390_s1 + $0xfb4] ss:$8 sps:$4 sm:$0xff]  }
 0x256   :  { %v13415_v17 = vpop.f32.mrb[0].mxu1  ;;  %7307 = vmatprep.mubr.bf16.mxu1 %v11183_v18  ;;  %v13422_v20 = vpop.f32.mrb[1].mxu0  ;;  %v10935_v18 = vld [vmem:[%s14390_s1 + $0xfc4] ss:$8 sps:$4 sm:$0xff]  }
 0x257   :  { %v13424_v21 = vpop.f32.mrb[1].mxu1  ;;  %v13428_v23 = vpop.f32.mrb[2].mxu0  ;;  %5560 = vmatpush1.bf16.msra.mxu0 %v10891_v12  ;;  %v10957_v12 = vld [vmem:[%s14390_s1 + $0x1000] ss:$8 sps:$4 sm:$0xff]  }
 0x258   :  { %v13430_v24 = vpop.f32.mrb[2].mxu1  ;;  %7359 = vmatpush1.bf16.msra.mxu1 %v10894_v13  ;;  %v13440_v28 = vpop.f32.mrb[3].mxu0  ;;  %5561 = vmatprep.subr.bf16.mxu0 %v10899_v14  ;;  %v11188_v13 = vld [vmem:[%s14391_s0 + $0x1f0] ss:$48 sps:$4 sm:$0xff]  }
 0x259   :  { %v13442_v29 = vpop.f32.mrb[3].mxu1  ;;  %7360 = vmatprep.subr.bf16.mxu1 %v10902_v15  ;;  %v10927_v14 = vld [vmem:[%s14390_s1 + $0xfb0] ss:$8 sps:$4 sm:$0xff]  }
 0x25a   :  { %5509 = vmatmul.mubr.bf16.gmra.mrb[40].mxu0 %v11184_v33  ;;  %v10930_v15 = vld [vmem:[%s14390_s1 + $0x15b0] ss:$8 sps:$4 sm:$0xff]  }
 0x25b   :  { %7308 = vmatmul.mubr.bf16.gmra.mrb[40].mxu1 %v11184_v33  ;;  %5562 = vmatpush1.bf16.msra.mxu0 %v10897_v25  ;;  %v10938_v25 = vld [vmem:[%s14390_s1 + $0x15c4] ss:$8 sps:$4 sm:$0xff]  }
 0x25c   :  { %7361 = vmatpush1.bf16.msra.mxu1 %v10900_v26  ;;  %5563 = vmatprep.subr.bf16.mxu0 %v10905_v30 }
 0x25d   :  { %7362 = vmatprep.subr.bf16.mxu1 %v10908_v31  ;;  %v13467_v38 = vpop.f32.mrb[4].mxu0  ;;  %5518 = vmatprep.mubr.bf16.mxu0 %v11185_v40  ;;  %v11189_v31 = vld [vmem:[%s14391_s0 + $0x254] ss:$48 sps:$4 sm:$0xff]  }
 0x25e   :  { %v13469_v39 = vpop.f32.mrb[4].mxu1  ;;  %7317 = vmatprep.mubr.bf16.mxu1 %v11185_v40  ;;  %v13476_v42 = vpop.f32.mrb[5].mxu0 }
 0x25f   :  { %v13478_v43 = vpop.f32.mrb[5].mxu1  ;;  %v13482_v45 = vpop.f32.mrb[6].mxu0  ;;  %5564 = vmatpush1.bf16.msra.mxu0 %v10903_v34 }
 0x260   :  { %v13484_v46 = vpop.f32.mrb[6].mxu1  ;;  %7363 = vmatpush1.bf16.msra.mxu1 %v10906_v35  ;;  %v13494_v50 = vpop.f32.mrb[7].mxu0  ;;  %5565 = vmatprep.subr.bf16.mxu0 %v10911_v36 }
 0x261   :  { %v13496_v51 = vpop.f32.mrb[7].mxu1  ;;  %7364 = vmatprep.subr.bf16.mxu1 %v10914_v37 }
 0x262   :  { %5519 = vmatmul.mubr.bf16.gmra.mrb[44].mxu0 %v11186_v55 }
 0x263   :  { %7318 = vmatmul.mubr.bf16.gmra.mrb[44].mxu1 %v11186_v55  ;;  %5566 = vmatpush1.bf16.msra.mxu0 %v10909_v47  ;;  %v10933_v47 = vld [vmem:[%s14390_s1 + $0xfc0] ss:$8 sps:$4 sm:$0xff]  }
 0x264   :  { %7365 = vmatpush1.bf16.msra.mxu1 %v10912_v48  ;;  %5567 = vmatprep.subr.bf16.mxu0 %v10917_v52  ;;  %v10936_v48 = vld [vmem:[%s14390_s1 + $0x15c0] ss:$8 sps:$4 sm:$0xff]  }
 0x265   :  { %7366 = vmatprep.subr.bf16.mxu1 %v10920_v53  ;;  %v13521_v60 = vpop.f32.mrb[8].mxu0  ;;  %5528 = vmatprep.mubr.bf16.mxu0 %v11187_v62 }
 0x266   :  { %v13523_v61 = vpop.f32.mrb[8].mxu1  ;;  %7327 = vmatprep.mubr.bf16.mxu1 %v11187_v62  ;;  %v13530_v0 = vpop.f32.mrb[9].mxu0  ;;  %v10939_v62 = vld [vmem:[%s14390_s1 + $0xfd0] ss:$8 sps:$4 sm:$0xff]  }
 0x267   :  { %v13532_v1 = vpop.f32.mrb[9].mxu1  ;;  %v13536_v3 = vpop.f32.mrb[10].mxu0  ;;  %5568 = vmatpush1.bf16.msra.mxu0 %v10915_v56  ;;  %v10941_v56 = vld [vmem:[%s14390_s1 + $0xfd4] ss:$8 sps:$4 sm:$0xff]  }
 0x268   :  { %v13538_v4 = vpop.f32.mrb[10].mxu1  ;;  %7367 = vmatpush1.bf16.msra.mxu1 %v10918_v57  ;;  %v13548_v8 = vpop.f32.mrb[11].mxu0  ;;  %5569 = vmatprep.subr.bf16.mxu0 %v10923_v58  ;;  %v10944_v57 = vld [vmem:[%s14390_s1 + $0x15d4] ss:$8 sps:$4 sm:$0xff]   ;;  %v10960_v58 = vld [vmem:[%s14390_s1 + $0x1600] ss:$8 sps:$4 sm:$0xff]  }
 0x269   :  { %v13550_v9 = vpop.f32.mrb[11].mxu1  ;;  %7368 = vmatprep.subr.bf16.mxu1 %v10926_v59  ;;  %v11190_v59 = vld [vmem:[%s14391_s0 + $0x250] ss:$48 sps:$4 sm:$0xff]  }
 0x26a   :  { %5529 = vmatmul.mubr.bf16.gmra.mrb[48].mxu0 %v11188_v13 }
 0x26b   :  { %7328 = vmatmul.mubr.bf16.gmra.mrb[48].mxu1 %v11188_v13  ;;  %5570 = vmatpush1.bf16.msra.mxu0 %v10921_v5  ;;  %v10942_v5 = vld [vmem:[%s14390_s1 + $0x15d0] ss:$8 sps:$4 sm:$0xff]  }
 0x26c   :  { %7369 = vmatpush1.bf16.msra.mxu1 %v10924_v6  ;;  %5571 = vmatprep.subr.bf16.mxu0 %v10929_v10  ;;  %v10947_v6 = vld [vmem:[%s14390_s1 + $0xfe4] ss:$8 sps:$4 sm:$0xff]  }
 0x26d   :  { %7370 = vmatprep.subr.bf16.mxu1 %v10932_v11  ;;  %v13575_v26 = vpop.f32.mrb[12].mxu0  ;;  %5538 = vmatprep.mubr.bf16.mxu0 %v11189_v31  ;;  %v10950_v10 = vld [vmem:[%s14390_s1 + $0x15e4] ss:$8 sps:$4 sm:$0xff]  }
 0x26e   :  { %v13577_v30 = vpop.f32.mrb[12].mxu1  ;;  %7337 = vmatprep.mubr.bf16.mxu1 %v11189_v31  ;;  %v13584_v34 = vpop.f32.mrb[13].mxu0 }
 0x26f   :  { %v13586_v35 = vpop.f32.mrb[13].mxu1  ;;  %v13590_v37 = vpop.f32.mrb[14].mxu0  ;;  %5572 = vmatpush1.bf16.msra.mxu0 %v10927_v14  ;;  %v11191_v14 = vld [vmem:[%s14391_s0 + $0x1c] ss:$48 sps:$4 sm:$0xff]  }
 0x270   :  { %v13592_v40 = vpop.f32.mrb[14].mxu1  ;;  %7371 = vmatpush1.bf16.msra.mxu1 %v10930_v15  ;;  %v13602_v53 = vpop.f32.mrb[15].mxu0  ;;  %5573 = vmatprep.subr.bf16.mxu0 %v10935_v18  ;;  %v10962_v15 = vld [vmem:[%s14390_s1 + $0x1604] ss:$8 sps:$4 sm:$0xff]  }
 0x271   :  { %v13604_v55 = vpop.f32.mrb[15].mxu1  ;;  %7372 = vmatprep.subr.bf16.mxu1 %v10938_v25 }
 0x272   :  { %5539 = vmatmul.mubr.bf16.gmra.mrb[52].mxu0 %v11190_v59 }
 0x273   :  { %7338 = vmatmul.mubr.bf16.gmra.mrb[52].mxu1 %v11190_v59  ;;  %5574 = vmatpush1.bf16.msra.mxu0 %v10933_v47  ;;  %v10951_v59 = vld [vmem:[%s14390_s1 + $0xff0] ss:$8 sps:$4 sm:$0xff]  }
 0x274   :  { %7373 = vmatpush1.bf16.msra.mxu1 %v10936_v48  ;;  %5575 = vmatprep.subr.bf16.mxu0 %v10941_v56  ;;  %v10945_v56 = vld [vmem:[%s14390_s1 + $0xfe0] ss:$8 sps:$4 sm:$0xff]  }
 0x275   :  { %7374 = vmatprep.subr.bf16.mxu1 %v10944_v57  ;;  %v13629_v11 = vpop.f32.mrb[16].mxu0  ;;  %5581 = vmatprep.mubr.bf16.mxu0 %v11191_v14  ;;  %v10948_v57 = vld [vmem:[%s14390_s1 + $0x15e0] ss:$8 sps:$4 sm:$0xff]  }
 0x276   :  { %v13631_v13 = vpop.f32.mrb[16].mxu1  ;;  %7380 = vmatprep.mubr.bf16.mxu1 %v11191_v14  ;;  %v13638_v18 = vpop.f32.mrb[17].mxu0 }
 0x277   :  { %v13640_v25 = vpop.f32.mrb[17].mxu1  ;;  %v13644_v47 = vpop.f32.mrb[18].mxu0  ;;  %5576 = vmatpush1.bf16.msra.mxu0 %v10939_v62  ;;  %v10953_v62 = vld [vmem:[%s14390_s1 + $0xff4] ss:$8 sps:$4 sm:$0xff]  }
 0x278   :  { %v13646_v48 = vpop.f32.mrb[18].mxu1  ;;  %7375 = vmatpush1.bf16.msra.mxu1 %v10942_v5  ;;  %v13656_v14 = vpop.f32.mrb[19].mxu0  ;;  %5577 = vmatprep.subr.bf16.mxu0 %v10947_v6  ;;  %v10956_v5 = vld [vmem:[%s14390_s1 + $0x15f4] ss:$8 sps:$4 sm:$0xff]   ;;  %v10954_v6 = vld [vmem:[%s14390_s1 + $0x15f0] ss:$8 sps:$4 sm:$0xff]  }
 0x279   :  { %v13658_v31 = vpop.f32.mrb[19].mxu1  ;;  %7376 = vmatprep.subr.bf16.mxu1 %v10950_v10  ;;  %v10959_v10 = vld [vmem:[%s14390_s1 + $0x1004] ss:$8 sps:$4 sm:$0xff]  }
 0x27b   :  { %5578 = vmatpush1.bf16.msra.mxu0 %v10945_v56 }
 0x27c   :  { %7377 = vmatpush1.bf16.msra.mxu1 %v10948_v57  ;;  %5579 = vmatprep.subr.bf16.mxu0 %v10953_v62 }
 0x27d   :  { %7378 = vmatprep.subr.bf16.mxu1 %v10956_v5  ;;  %v13680_v56 = vpop.f32.mrb[20].mxu0 }
 0x27e   :  { %v13682_v57 = vpop.f32.mrb[20].mxu1  ;;  %v13686_v52 = vpop.f32.mrb[21].mxu0 }
 0x27f   :  { %v13688_v36 = vpop.f32.mrb[21].mxu1  ;;  %v13692_v5 = vpop.f32.mrb[22].mxu0  ;;  %5580 = vmatpush1.bf16.msra.mxu0 %v10951_v59  ;;  %v10965_v59 = vld [vmem:[%s14390_s1 + $0x1014] ss:$8 sps:$4 sm:$0xff]  }
 0x280   :  { %v13694_v33 = vpop.f32.mrb[22].mxu1  ;;  %7379 = vmatpush1.bf16.msra.mxu1 %v10954_v6  ;;  %v13704_v2 = vpop.f32.mrb[23].mxu0  ;;  %5652 = vmatprep.subr.bf16.mxu0 %v10959_v10  ;;  %v10968_v6 = vld [vmem:[%s14390_s1 + $0x1614] ss:$8 sps:$4 sm:$0xff]   ;;  %v10966_v10 = vld [vmem:[%s14390_s1 + $0x1610] ss:$8 sps:$4 sm:$0xff]  }
 0x281   :  { %14405 = vst [vmem:[#allocation2_spill] sm:$0xff] %v13694_v33  ;;  %14406 = vst [vmem:[#allocation3_spill] sm:$0xff] %v13704_v2  ;;  %v13706_v62 = vpop.f32.mrb[23].mxu1  ;;  %7451 = vmatprep.subr.bf16.mxu1 %v10962_v15  ;;  %v10963_v15 = vld [vmem:[%s14390_s1 + $0x1010] ss:$8 sps:$4 sm:$0xff]  }
 0x282   :  { %14407 = vst [vmem:[#allocation4_spill] sm:$0xff] %v13706_v62  ;;  %5582 = vmatmul.mubr.bf16.vlgmr.msra.gmra.mrb[28].mxu0 %v11192_v7 }
 0x283   :  { %7381 = vmatmul.mubr.bf16.vlgmr.msra.gmra.mrb[28].mxu1 %v11192_v7  ;;  %5653 = vmatpush1.bf16.msra.mxu0 %v10957_v12  ;;  %v10974_v7 = vld [vmem:[%s14390_s1 + $0x1624] ss:$8 sps:$4 sm:$0xff]  }
 0x284   :  { %7452 = vmatpush1.bf16.msra.mxu1 %v10960_v58  ;;  %5654 = vmatprep.subr.bf16.mxu0 %v10965_v59  ;;  %v10972_v59 = vld [vmem:[%s14390_s1 + $0x1620] ss:$8 sps:$4 sm:$0xff]  }
 0x285   :  { %7453 = vmatprep.subr.bf16.mxu1 %v10968_v6  ;;  %v13731_v12 = vpop.f32.mrb[24].mxu0  ;;  %5591 = vmatprep.mubr.bf16.mxu0 %v11193_v54 }
 0x286   :  { %14408 = vst [vmem:[#allocation5_spill] sm:$0xff] %v13731_v12  ;;  %v13733_v58 = vpop.f32.mrb[24].mxu1  ;;  %7390 = vmatprep.mubr.bf16.mxu1 %v11193_v54  ;;  %v13740_v6 = vpop.f32.mrb[25].mxu0  ;;  %v10969_v54 = vld [vmem:[%s14390_s1 + $0x1020] ss:$8 sps:$4 sm:$0xff]  }
 0x287   :  { %14409 = vst [vmem:[#allocation6_spill] sm:$0xff] %v13733_v58  ;;  %14410 = vst [vmem:[#allocation7_spill] sm:$0xff] %v13740_v6  ;;  %v13742_v49 = vpop.f32.mrb[25].mxu1  ;;  %v13746_v41 = vpop.f32.mrb[26].mxu0  ;;  %5655 = vmatpush1.bf16.msra.mxu0 %v10963_v15  ;;  %v10977_v15 = vld [vmem:[%s14390_s1 + $0x1034] ss:$8 sps:$4 sm:$0xff]  }
 0x288   :  { %14411 = vst [vmem:[#allocation8_spill] sm:$0xff] %v13742_v49  ;;  %14412 = vst [vmem:[#allocation9_spill] sm:$0xff] %v13746_v41  ;;  %v13748_v32 = vpop.f32.mrb[26].mxu1  ;;  %7454 = vmatpush1.bf16.msra.mxu1 %v10966_v10  ;;  %v13758_v22 = vpop.f32.mrb[27].mxu0  ;;  %5656 = vmatprep.subr.bf16.mxu0 %v10971_v63  ;;  %v10980_v10 = vld [vmem:[%s14390_s1 + $0x1634] ss:$8 sps:$4 sm:$0xff]  }
 0x289   :  { %14413 = vst [vmem:[#allocation10_spill] sm:$0xff] %v13748_v32  ;;  %14414 = vst [vmem:[#allocation11_spill] sm:$0xff] %v13758_v22  ;;  %v13760_v44 = vpop.f32.mrb[27].mxu1  ;;  %7455 = vmatprep.subr.bf16.mxu1 %v10974_v7  ;;  %v10975_v63 = vld [vmem:[%s14390_s1 + $0x1030] ss:$8 sps:$4 sm:$0xff]   ;;  %v14416_v22 = vmax.f32 %v13413_v16, %v13415_v17 }
 0x28a   :  { %14415 = vst [vmem:[#allocation12_spill] sm:$0xff] %v13760_v44  ;;  %5592 = vmatmul.mubr.bf16.gmra.mrb[32].mxu0 %v11194_v27  ;;  %v10978_v7 = vld [vmem:[%s14390_s1 + $0x1630] ss:$8 sps:$4 sm:$0xff]  }
 0x28b   :  { %7391 = vmatmul.mubr.bf16.gmra.mrb[32].mxu1 %v11194_v27  ;;  %5657 = vmatpush1.bf16.msra.mxu0 %v10969_v54  ;;  %v10986_v27 = vld [vmem:[%s14390_s1 + $0x1644] ss:$8 sps:$4 sm:$0xff]   ;;  %v10981_v54 = vld [vmem:[%s14390_s1 + $0x1040] ss:$8 sps:$4 sm:$0xff]  }
 0x28c   :  { %7456 = vmatpush1.bf16.msra.mxu1 %v10972_v59  ;;  %5658 = vmatprep.subr.bf16.mxu0 %v10977_v15  ;;  %v11195_v59 = vld [vmem:[%s14391_s0 + $0xdc] ss:$48 sps:$4 sm:$0xff]   ;;  %v10984_v15 = vld [vmem:[%s14390_s1 + $0x1640] ss:$8 sps:$4 sm:$0xff]  }
 0x28d   :  { %7457 = vmatprep.subr.bf16.mxu1 %v10980_v10  ;;  %5601 = vmatprep.mubr.bf16.mxu0 %v11195_v59  ;;  %v10989_v10 = vld [vmem:[%s14390_s1 + $0x1054] ss:$8 sps:$4 sm:$0xff]  }
 0x28e   :  { %7400 = vmatprep.mubr.bf16.mxu1 %v11195_v59  ;;  %v10992_v59 = vld [vmem:[%s14390_s1 + $0x1654] ss:$8 sps:$4 sm:$0xff]  }
 0x28f   :  { %5659 = vmatpush1.bf16.msra.mxu0 %v10975_v63  ;;  %v11196_v63 = vld [vmem:[%s14391_s0 + $0xd8] ss:$48 sps:$4 sm:$0xff]  }
 0x290   :  { %7458 = vmatpush1.bf16.msra.mxu1 %v10978_v7  ;;  %5660 = vmatprep.subr.bf16.mxu0 %v10983_v19  ;;  %v10987_v19 = vld [vmem:[%s14390_s1 + $0x1050] ss:$8 sps:$4 sm:$0xff]  }
 0x291   :  { %7459 = vmatprep.subr.bf16.mxu1 %v10986_v27  ;;  %v10990_v7 = vld [vmem:[%s14390_s1 + $0x1650] ss:$8 sps:$4 sm:$0xff]   ;;  %v10995_v27 = vld [vmem:[%s14390_s1 + $0x1064] ss:$8 sps:$4 sm:$0xff]  }
 0x292   :  { %5602 = vmatmul.mubr.bf16.gmra.mrb[36].mxu0 %v11196_v63 }
 0x293   :  { %7401 = vmatmul.mubr.bf16.gmra.mrb[36].mxu1 %v11196_v63  ;;  %5661 = vmatpush1.bf16.msra.mxu0 %v10981_v54  ;;  %v10998_v63 = vld [vmem:[%s14390_s1 + $0x1664] ss:$8 sps:$4 sm:$0xff]  }
 0x294   :  { %7460 = vmatpush1.bf16.msra.mxu1 %v10984_v15  ;;  %5662 = vmatprep.subr.bf16.mxu0 %v10989_v10  ;;  %v11197_v54 = vld [vmem:[%s14391_s0 + $0x13c] ss:$48 sps:$4 sm:$0xff]   ;;  %v10993_v15 = vld [vmem:[%s14390_s1 + $0x1060] ss:$8 sps:$4 sm:$0xff]  }
 0x295   :  { %7461 = vmatprep.subr.bf16.mxu1 %v10992_v59  ;;  %5611 = vmatprep.mubr.bf16.mxu0 %v11197_v54  ;;  %v10996_v10 = vld [vmem:[%s14390_s1 + $0x1660] ss:$8 sps:$4 sm:$0xff]   ;;  %v11001_v59 = vld [vmem:[%s14390_s1 + $0x1074] ss:$8 sps:$4 sm:$0xff]  }
 0x296   :  { %7410 = vmatprep.mubr.bf16.mxu1 %v11197_v54  ;;  %v11004_v54 = vld [vmem:[%s14390_s1 + $0x1674] ss:$8 sps:$4 sm:$0xff]  }
 0x297   :  { %5663 = vmatpush1.bf16.msra.mxu0 %v10987_v19  ;;  %v11198_v19 = vld [vmem:[%s14391_s0 + $0x138] ss:$48 sps:$4 sm:$0xff]  }
 0x298   :  { %7462 = vmatpush1.bf16.msra.mxu1 %v10990_v7  ;;  %5664 = vmatprep.subr.bf16.mxu0 %v10995_v27  ;;  %v10999_v7 = vld [vmem:[%s14390_s1 + $0x1070] ss:$8 sps:$4 sm:$0xff]  }
 0x299   :  { %7463 = vmatprep.subr.bf16.mxu1 %v10998_v63  ;;  %v11002_v27 = vld [vmem:[%s14390_s1 + $0x1670] ss:$8 sps:$4 sm:$0xff]   ;;  %v11007_v63 = vld [vmem:[%s14390_s1 + $0x1084] ss:$8 sps:$4 sm:$0xff]  }
 0x29a   :  { %5612 = vmatmul.mubr.bf16.gmra.mrb[40].mxu0 %v11198_v19 }
 0x29b   :  { %7411 = vmatmul.mubr.bf16.gmra.mrb[40].mxu1 %v11198_v19  ;;  %5665 = vmatpush1.bf16.msra.mxu0 %v10993_v15  ;;  %v11010_v19 = vld [vmem:[%s14390_s1 + $0x1684] ss:$8 sps:$4 sm:$0xff]  }
 0x29c   :  { %7464 = vmatpush1.bf16.msra.mxu1 %v10996_v10  ;;  %5666 = vmatprep.subr.bf16.mxu0 %v11001_v59  ;;  %v11199_v15 = vld [vmem:[%s14391_s0 + $0x19c] ss:$48 sps:$4 sm:$0xff]   ;;  %v11005_v10 = vld [vmem:[%s14390_s1 + $0x1080] ss:$8 sps:$4 sm:$0xff]  }
 0x29d   :  { %7465 = vmatprep.subr.bf16.mxu1 %v11004_v54  ;;  %5621 = vmatprep.mubr.bf16.mxu0 %v11199_v15  ;;  %v11008_v59 = vld [vmem:[%s14390_s1 + $0x1680] ss:$8 sps:$4 sm:$0xff]   ;;  %v11013_v54 = vld [vmem:[%s14390_s1 + $0x1094] ss:$8 sps:$4 sm:$0xff]  }
 0x29e   :  { %7420 = vmatprep.mubr.bf16.mxu1 %v11199_v15  ;;  %v11016_v15 = vld [vmem:[%s14390_s1 + $0x1694] ss:$8 sps:$4 sm:$0xff]  }
 0x29f   :  { %5667 = vmatpush1.bf16.msra.mxu0 %v10999_v7  ;;  %v11200_v7 = vld [vmem:[%s14391_s0 + $0x198] ss:$48 sps:$4 sm:$0xff]  }
 0x2a0   :  { %7466 = vmatpush1.bf16.msra.mxu1 %v11002_v27  ;;  %5668 = vmatprep.subr.bf16.mxu0 %v11007_v63  ;;  %v11011_v27 = vld [vmem:[%s14390_s1 + $0x1090] ss:$8 sps:$4 sm:$0xff]  }
 0x2a1   :  { %7467 = vmatprep.subr.bf16.mxu1 %v11010_v19  ;;  %v11014_v63 = vld [vmem:[%s14390_s1 + $0x1690] ss:$8 sps:$4 sm:$0xff]   ;;  %v11019_v19 = vld [vmem:[%s14390_s1 + $0x10a4] ss:$8 sps:$4 sm:$0xff]  }
 0x2a2   :  { %5622 = vmatmul.mubr.bf16.gmra.mrb[44].mxu0 %v11200_v7 }
 0x2a3   :  { %7421 = vmatmul.mubr.bf16.gmra.mrb[44].mxu1 %v11200_v7  ;;  %5669 = vmatpush1.bf16.msra.mxu0 %v11005_v10  ;;  %v11022_v7 = vld [vmem:[%s14390_s1 + $0x16a4] ss:$8 sps:$4 sm:$0xff]  }
 0x2a4   :  { %7468 = vmatpush1.bf16.msra.mxu1 %v11008_v59  ;;  %5670 = vmatprep.subr.bf16.mxu0 %v11013_v54  ;;  %v11201_v10 = vld [vmem:[%s14391_s0 + $0x1fc] ss:$48 sps:$4 sm:$0xff]   ;;  %v11017_v59 = vld [vmem:[%s14390_s1 + $0x10a0] ss:$8 sps:$4 sm:$0xff]  }
 0x2a5   :  { %7469 = vmatprep.subr.bf16.mxu1 %v11016_v15  ;;  %5631 = vmatprep.mubr.bf16.mxu0 %v11201_v10  ;;  %v11020_v54 = vld [vmem:[%s14390_s1 + $0x16a0] ss:$8 sps:$4 sm:$0xff]   ;;  %v11025_v15 = vld [vmem:[%s14390_s1 + $0x10b4] ss:$8 sps:$4 sm:$0xff]  }
 0x2a6   :  { %7430 = vmatprep.mubr.bf16.mxu1 %v11201_v10  ;;  %v11028_v10 = vld [vmem:[%s14390_s1 + $0x16b4] ss:$8 sps:$4 sm:$0xff]  }
 0x2a7   :  { %5671 = vmatpush1.bf16.msra.mxu0 %v11011_v27  ;;  %v11202_v27 = vld [vmem:[%s14391_s0 + $0x1f8] ss:$48 sps:$4 sm:$0xff]  }
 0x2a8   :  { %7470 = vmatpush1.bf16.msra.mxu1 %v11014_v63  ;;  %5672 = vmatprep.subr.bf16.mxu0 %v11019_v19  ;;  %v11023_v63 = vld [vmem:[%s14390_s1 + $0x10b0] ss:$8 sps:$4 sm:$0xff]  }
 0x2a9   :  { %7471 = vmatprep.subr.bf16.mxu1 %v11022_v7  ;;  %v11026_v19 = vld [vmem:[%s14390_s1 + $0x16b0] ss:$8 sps:$4 sm:$0xff]   ;;  %v11031_v7 = vld [vmem:[%s14390_s1 + $0x10c4] ss:$8 sps:$4 sm:$0xff]  }
 0x2aa   :  { %5632 = vmatmul.mubr.bf16.gmra.mrb[48].mxu0 %v11202_v27 }
 0x2ab   :  { %7431 = vmatmul.mubr.bf16.gmra.mrb[48].mxu1 %v11202_v27  ;;  %5673 = vmatpush1.bf16.msra.mxu0 %v11017_v59  ;;  %v11034_v27 = vld [vmem:[%s14390_s1 + $0x16c4] ss:$8 sps:$4 sm:$0xff]  }
 0x2ac   :  { %7472 = vmatpush1.bf16.msra.mxu1 %v11020_v54  ;;  %5674 = vmatprep.subr.bf16.mxu0 %v11025_v15  ;;  %v11203_v59 = vld [vmem:[%s14391_s0 + $0x25c] ss:$48 sps:$4 sm:$0xff]   ;;  %v11029_v54 = vld [vmem:[%s14390_s1 + $0x10c0] ss:$8 sps:$4 sm:$0xff]  }
 0x2ad   :  { %7473 = vmatprep.subr.bf16.mxu1 %v11028_v10  ;;  %5641 = vmatprep.mubr.bf16.mxu0 %v11203_v59  ;;  %v11032_v15 = vld [vmem:[%s14390_s1 + $0x16c0] ss:$8 sps:$4 sm:$0xff]   ;;  %v11037_v10 = vld [vmem:[%s14390_s1 + $0x10d4] ss:$8 sps:$4 sm:$0xff]  }
 0x2ae   :  { %7440 = vmatprep.mubr.bf16.mxu1 %v11203_v59  ;;  %v11040_v59 = vld [vmem:[%s14390_s1 + $0x16d4] ss:$8 sps:$4 sm:$0xff]  }
 0x2af   :  { %5675 = vmatpush1.bf16.msra.mxu0 %v11023_v63  ;;  %v11204_v63 = vld [vmem:[%s14391_s0 + $0x258] ss:$48 sps:$4 sm:$0xff]  }
 0x2b0   :  { %7474 = vmatpush1.bf16.msra.mxu1 %v11026_v19  ;;  %5676 = vmatprep.subr.bf16.mxu0 %v11031_v7  ;;  %v11035_v19 = vld [vmem:[%s14390_s1 + $0x10d0] ss:$8 sps:$4 sm:$0xff]  }
 0x2b1   :  { %7475 = vmatprep.subr.bf16.mxu1 %v11034_v27  ;;  %v11038_v7 = vld [vmem:[%s14390_s1 + $0x16d0] ss:$8 sps:$4 sm:$0xff]   ;;  %v11043_v27 = vld [vmem:[%s14390_s1 + $0x10e4] ss:$8 sps:$4 sm:$0xff]  }
 0x2b2   :  { %5642 = vmatmul.mubr.bf16.gmra.mrb[52].mxu0 %v11204_v63 }
 0x2b3   :  { %7441 = vmatmul.mubr.bf16.gmra.mrb[52].mxu1 %v11204_v63  ;;  %5677 = vmatpush1.bf16.msra.mxu0 %v11029_v54  ;;  %v11046_v63 = vld [vmem:[%s14390_s1 + $0x16e4] ss:$8 sps:$4 sm:$0xff]  }
 0x2b4   :  { %7476 = vmatpush1.bf16.msra.mxu1 %v11032_v15  ;;  %5678 = vmatprep.subr.bf16.mxu0 %v11037_v10  ;;  %v11205_v54 = vld [vmem:[%s14391_s0 + $0x24] ss:$48 sps:$4 sm:$0xff]   ;;  %v11041_v15 = vld [vmem:[%s14390_s1 + $0x10e0] ss:$8 sps:$4 sm:$0xff]  }
 0x2b5   :  { %7477 = vmatprep.subr.bf16.mxu1 %v11040_v59  ;;  %5684 = vmatprep.mubr.bf16.mxu0 %v11205_v54  ;;  %v11044_v10 = vld [vmem:[%s14390_s1 + $0x16e0] ss:$8 sps:$4 sm:$0xff]   ;;  %v11049_v59 = vld [vmem:[%s14390_s1 + $0x10f4] ss:$8 sps:$4 sm:$0xff]  }
 0x2b6   :  { %7483 = vmatprep.mubr.bf16.mxu1 %v11205_v54  ;;  %v11052_v54 = vld [vmem:[%s14390_s1 + $0x16f4] ss:$8 sps:$4 sm:$0xff]  }
 0x2b7   :  { %5679 = vmatpush1.bf16.msra.mxu0 %v11035_v19  ;;  %v11047_v19 = vld [vmem:[%s14390_s1 + $0x10f0] ss:$8 sps:$4 sm:$0xff]  }
 0x2b8   :  { %7478 = vmatpush1.bf16.msra.mxu1 %v11038_v7  ;;  %5680 = vmatprep.subr.bf16.mxu0 %v11043_v27  ;;  %v11050_v7 = vld [vmem:[%s14390_s1 + $0x16f0] ss:$8 sps:$4 sm:$0xff]   ;;  %v11055_v27 = vld [vmem:[%s14390_s1 + $0x1104] ss:$8 sps:$4 sm:$0xff]  }
 0x2b9   :  { %7479 = vmatprep.subr.bf16.mxu1 %v11046_v63  ;;  %v11058_v63 = vld [vmem:[%s14390_s1 + $0x1704] ss:$8 sps:$4 sm:$0xff]  }
 0x2bb   :  { %5681 = vmatpush1.bf16.msra.mxu0 %v11041_v15  ;;  %v11053_v15 = vld [vmem:[%s14390_s1 + $0x1100] ss:$8 sps:$4 sm:$0xff]  }
 0x2bc   :  { %7480 = vmatpush1.bf16.msra.mxu1 %v11044_v10  ;;  %5682 = vmatprep.subr.bf16.mxu0 %v11049_v59  ;;  %v11056_v10 = vld [vmem:[%s14390_s1 + $0x1700] ss:$8 sps:$4 sm:$0xff]   ;;  %v11061_v59 = vld [vmem:[%s14390_s1 + $0x1114] ss:$8 sps:$4 sm:$0xff]  }
 0x2bd   :  { %7481 = vmatprep.subr.bf16.mxu1 %v11052_v54  ;;  %v11064_v54 = vld [vmem:[%s14390_s1 + $0x1714] ss:$8 sps:$4 sm:$0xff]  }
 0x2bf   :  { %5683 = vmatpush1.bf16.msra.mxu0 %v11047_v19  ;;  %v11206_v19 = vld [vmem:[%s14391_s0 + $0x20] ss:$48 sps:$4 sm:$0xff]  }
 0x2c0   :  { %7482 = vmatpush1.bf16.msra.mxu1 %v11050_v7  ;;  %5755 = vmatprep.subr.bf16.mxu0 %v11055_v27  ;;  %v11059_v7 = vld [vmem:[%s14390_s1 + $0x1110] ss:$8 sps:$4 sm:$0xff]  }
 0x2c1   :  { %7554 = vmatprep.subr.bf16.mxu1 %v11058_v63  ;;  %v11062_v27 = vld [vmem:[%s14390_s1 + $0x1710] ss:$8 sps:$4 sm:$0xff]   ;;  %v11067_v63 = vld [vmem:[%s14390_s1 + $0x1124] ss:$8 sps:$4 sm:$0xff]  }
 0x2c2   :  { %5685 = vmatmul.mubr.bf16.vlgmr.msra.gmra.mrb[28].mxu0 %v11206_v19 }
 0x2c3   :  { %7484 = vmatmul.mubr.bf16.vlgmr.msra.gmra.mrb[28].mxu1 %v11206_v19  ;;  %5756 = vmatpush1.bf16.msra.mxu0 %v11053_v15  ;;  %v11070_v19 = vld [vmem:[%s14390_s1 + $0x1724] ss:$8 sps:$4 sm:$0xff]  }
 0x2c4   :  { %7555 = vmatpush1.bf16.msra.mxu1 %v11056_v10  ;;  %5757 = vmatprep.subr.bf16.mxu0 %v11061_v59  ;;  %v11207_v15 = vld [vmem:[%s14391_s0 + $0x84] ss:$48 sps:$4 sm:$0xff]   ;;  %v11065_v10 = vld [vmem:[%s14390_s1 + $0x1120] ss:$8 sps:$4 sm:$0xff]  }
 0x2c5   :  { %7556 = vmatprep.subr.bf16.mxu1 %v11064_v54  ;;  %5694 = vmatprep.mubr.bf16.mxu0 %v11207_v15  ;;  %v11068_v59 = vld [vmem:[%s14390_s1 + $0x1720] ss:$8 sps:$4 sm:$0xff]   ;;  %v11073_v54 = vld [vmem:[%s14390_s1 + $0x1134] ss:$8 sps:$4 sm:$0xff]  }
 0x2c6   :  { %7493 = vmatprep.mubr.bf16.mxu1 %v11207_v15  ;;  %v11076_v15 = vld [vmem:[%s14390_s1 + $0x1734] ss:$8 sps:$4 sm:$0xff]  }
 0x2c7   :  { %5758 = vmatpush1.bf16.msra.mxu0 %v11059_v7  ;;  %v11208_v7 = vld [vmem:[%s14391_s0 + $0x80] ss:$48 sps:$4 sm:$0xff]  }
 0x2c8   :  { %7557 = vmatpush1.bf16.msra.mxu1 %v11062_v27  ;;  %5759 = vmatprep.subr.bf16.mxu0 %v11067_v63  ;;  %v11071_v27 = vld [vmem:[%s14390_s1 + $0x1130] ss:$8 sps:$4 sm:$0xff]  }
 0x2c9   :  { %7558 = vmatprep.subr.bf16.mxu1 %v11070_v19  ;;  %v11074_v63 = vld [vmem:[%s14390_s1 + $0x1730] ss:$8 sps:$4 sm:$0xff]   ;;  %v11079_v19 = vld [vmem:[%s14390_s1 + $0x1144] ss:$8 sps:$4 sm:$0xff]  }
 0x2ca   :  { %5695 = vmatmul.mubr.bf16.gmra.mrb[32].mxu0 %v11208_v7 }
 0x2cb   :  { %7494 = vmatmul.mubr.bf16.gmra.mrb[32].mxu1 %v11208_v7  ;;  %5760 = vmatpush1.bf16.msra.mxu0 %v11065_v10  ;;  %v11082_v7 = vld [vmem:[%s14390_s1 + $0x1744] ss:$8 sps:$4 sm:$0xff]  }
 0x2cc   :  { %7559 = vmatpush1.bf16.msra.mxu1 %v11068_v59  ;;  %5761 = vmatprep.subr.bf16.mxu0 %v11073_v54  ;;  %v11209_v10 = vld [vmem:[%s14391_s0 + $0xe4] ss:$48 sps:$4 sm:$0xff]   ;;  %v11077_v59 = vld [vmem:[%s14390_s1 + $0x1140] ss:$8 sps:$4 sm:$0xff]  }
 0x2cd   :  { %7560 = vmatprep.subr.bf16.mxu1 %v11076_v15  ;;  %5704 = vmatprep.mubr.bf16.mxu0 %v11209_v10  ;;  %v11080_v54 = vld [vmem:[%s14390_s1 + $0x1740] ss:$8 sps:$4 sm:$0xff]   ;;  %v11085_v15 = vld [vmem:[%s14390_s1 + $0x1154] ss:$8 sps:$4 sm:$0xff]  }
 0x2ce   :  { %7503 = vmatprep.mubr.bf16.mxu1 %v11209_v10  ;;  %v11088_v10 = vld [vmem:[%s14390_s1 + $0x1754] ss:$8 sps:$4 sm:$0xff]  }
 0x2cf   :  { %5762 = vmatpush1.bf16.msra.mxu0 %v11071_v27  ;;  %v11210_v27 = vld [vmem:[%s14391_s0 + $0xe0] ss:$48 sps:$4 sm:$0xff]  }
 0x2d0   :  { %7561 = vmatpush1.bf16.msra.mxu1 %v11074_v63  ;;  %5763 = vmatprep.subr.bf16.mxu0 %v11079_v19  ;;  %v11083_v63 = vld [vmem:[%s14390_s1 + $0x1150] ss:$8 sps:$4 sm:$0xff]  }
 0x2d1   :  { %7562 = vmatprep.subr.bf16.mxu1 %v11082_v7  ;;  %v11086_v19 = vld [vmem:[%s14390_s1 + $0x1750] ss:$8 sps:$4 sm:$0xff]   ;;  %v11091_v7 = vld [vmem:[%s14390_s1 + $0x1164] ss:$8 sps:$4 sm:$0xff]  }
 0x2d2   :  { %5705 = vmatmul.mubr.bf16.gmra.mrb[36].mxu0 %v11210_v27 }
 0x2d3   :  { %7504 = vmatmul.mubr.bf16.gmra.mrb[36].mxu1 %v11210_v27  ;;  %5764 = vmatpush1.bf16.msra.mxu0 %v11077_v59  ;;  %v11094_v27 = vld [vmem:[%s14390_s1 + $0x1764] ss:$8 sps:$4 sm:$0xff]  }
 0x2d4   :  { %7563 = vmatpush1.bf16.msra.mxu1 %v11080_v54  ;;  %5765 = vmatprep.subr.bf16.mxu0 %v11085_v15  ;;  %v11211_v59 = vld [vmem:[%s14391_s0 + $0x144] ss:$48 sps:$4 sm:$0xff]   ;;  %v11089_v54 = vld [vmem:[%s14390_s1 + $0x1160] ss:$8 sps:$4 sm:$0xff]  }
 0x2d5   :  { %7564 = vmatprep.subr.bf16.mxu1 %v11088_v10  ;;  %5714 = vmatprep.mubr.bf16.mxu0 %v11211_v59  ;;  %v11092_v15 = vld [vmem:[%s14390_s1 + $0x1760] ss:$8 sps:$4 sm:$0xff]   ;;  %v11097_v10 = vld [vmem:[%s14390_s1 + $0x1174] ss:$8 sps:$4 sm:$0xff]  }
 0x2d6   :  { %7513 = vmatprep.mubr.bf16.mxu1 %v11211_v59  ;;  %v11100_v59 = vld [vmem:[%s14390_s1 + $0x1774] ss:$8 sps:$4 sm:$0xff]  }
 0x2d7   :  { %5766 = vmatpush1.bf16.msra.mxu0 %v11083_v63  ;;  %v11212_v63 = vld [vmem:[%s14391_s0 + $0x140] ss:$48 sps:$4 sm:$0xff]  }
 0x2d8   :  { %7565 = vmatpush1.bf16.msra.mxu1 %v11086_v19  ;;  %5767 = vmatprep.subr.bf16.mxu0 %v11091_v7  ;;  %v11095_v19 = vld [vmem:[%s14390_s1 + $0x1170] ss:$8 sps:$4 sm:$0xff]  }
 0x2d9   :  { %7566 = vmatprep.subr.bf16.mxu1 %v11094_v27  ;;  %v11098_v7 = vld [vmem:[%s14390_s1 + $0x1770] ss:$8 sps:$4 sm:$0xff]   ;;  %v11103_v27 = vld [vmem:[%s14390_s1 + $0x1184] ss:$8 sps:$4 sm:$0xff]  }
 0x2da   :  { %5715 = vmatmul.mubr.bf16.gmra.mrb[40].mxu0 %v11212_v63 }
 0x2db   :  { %7514 = vmatmul.mubr.bf16.gmra.mrb[40].mxu1 %v11212_v63  ;;  %5768 = vmatpush1.bf16.msra.mxu0 %v11089_v54  ;;  %v11106_v63 = vld [vmem:[%s14390_s1 + $0x1784] ss:$8 sps:$4 sm:$0xff]  }
 0x2dc   :  { %7567 = vmatpush1.bf16.msra.mxu1 %v11092_v15  ;;  %5769 = vmatprep.subr.bf16.mxu0 %v11097_v10  ;;  %v11213_v54 = vld [vmem:[%s14391_s0 + $0x1a4] ss:$48 sps:$4 sm:$0xff]   ;;  %v11101_v15 = vld [vmem:[%s14390_s1 + $0x1180] ss:$8 sps:$4 sm:$0xff]  }
 0x2dd   :  { %7568 = vmatprep.subr.bf16.mxu1 %v11100_v59  ;;  %5724 = vmatprep.mubr.bf16.mxu0 %v11213_v54  ;;  %v11104_v10 = vld [vmem:[%s14390_s1 + $0x1780] ss:$8 sps:$4 sm:$0xff]   ;;  %v11109_v59 = vld [vmem:[%s14390_s1 + $0x1194] ss:$8 sps:$4 sm:$0xff]  }
 0x2de   :  { %7523 = vmatprep.mubr.bf16.mxu1 %v11213_v54  ;;  %v11112_v54 = vld [vmem:[%s14390_s1 + $0x1794] ss:$8 sps:$4 sm:$0xff]  }
 0x2df   :  { %5770 = vmatpush1.bf16.msra.mxu0 %v11095_v19  ;;  %v11214_v19 = vld [vmem:[%s14391_s0 + $0x1a0] ss:$48 sps:$4 sm:$0xff]  }
 0x2e0   :  { %7569 = vmatpush1.bf16.msra.mxu1 %v11098_v7  ;;  %5771 = vmatprep.subr.bf16.mxu0 %v11103_v27  ;;  %v11107_v7 = vld [vmem:[%s14390_s1 + $0x1190] ss:$8 sps:$4 sm:$0xff]  }
 0x2e1   :  { %7570 = vmatprep.subr.bf16.mxu1 %v11106_v63  ;;  %v11110_v27 = vld [vmem:[%s14390_s1 + $0x1790] ss:$8 sps:$4 sm:$0xff]   ;;  %v11115_v63 = vld [vmem:[%s14390_s1 + $0x11a4] ss:$8 sps:$4 sm:$0xff]  }
 0x2e2   :  { %5725 = vmatmul.mubr.bf16.gmra.mrb[44].mxu0 %v11214_v19 }
 0x2e3   :  { %7524 = vmatmul.mubr.bf16.gmra.mrb[44].mxu1 %v11214_v19  ;;  %5772 = vmatpush1.bf16.msra.mxu0 %v11101_v15  ;;  %v11118_v19 = vld [vmem:[%s14390_s1 + $0x17a4] ss:$8 sps:$4 sm:$0xff]  }
 0x2e4   :  { %7571 = vmatpush1.bf16.msra.mxu1 %v11104_v10  ;;  %5773 = vmatprep.subr.bf16.mxu0 %v11109_v59  ;;  %v11215_v15 = vld [vmem:[%s14391_s0 + $0x204] ss:$48 sps:$4 sm:$0xff]   ;;  %v11113_v10 = vld [vmem:[%s14390_s1 + $0x11a0] ss:$8 sps:$4 sm:$0xff]  }
 0x2e5   :  { %7572 = vmatprep.subr.bf16.mxu1 %v11112_v54  ;;  %5734 = vmatprep.mubr.bf16.mxu0 %v11215_v15  ;;  %v11116_v59 = vld [vmem:[%s14390_s1 + $0x17a0] ss:$8 sps:$4 sm:$0xff]   ;;  %v11121_v54 = vld [vmem:[%s14390_s1 + $0x11b4] ss:$8 sps:$4 sm:$0xff]  }
 0x2e6   :  { %7533 = vmatprep.mubr.bf16.mxu1 %v11215_v15  ;;  %v11124_v15 = vld [vmem:[%s14390_s1 + $0x17b4] ss:$8 sps:$4 sm:$0xff]  }
 0x2e7   :  { %5774 = vmatpush1.bf16.msra.mxu0 %v11107_v7  ;;  %v11216_v7 = vld [vmem:[%s14391_s0 + $0x200] ss:$48 sps:$4 sm:$0xff]  }
 0x2e8   :  { %7573 = vmatpush1.bf16.msra.mxu1 %v11110_v27  ;;  %5775 = vmatprep.subr.bf16.mxu0 %v11115_v63  ;;  %v11119_v27 = vld [vmem:[%s14390_s1 + $0x11b0] ss:$8 sps:$4 sm:$0xff]  }
 0x2e9   :  { %7574 = vmatprep.subr.bf16.mxu1 %v11118_v19  ;;  %v11122_v63 = vld [vmem:[%s14390_s1 + $0x17b0] ss:$8 sps:$4 sm:$0xff]   ;;  %v11127_v19 = vld [vmem:[%s14390_s1 + $0x11c4] ss:$8 sps:$4 sm:$0xff]  }
 0x2ea   :  { %5735 = vmatmul.mubr.bf16.gmra.mrb[48].mxu0 %v11216_v7 }
 0x2eb   :  { %7534 = vmatmul.mubr.bf16.gmra.mrb[48].mxu1 %v11216_v7  ;;  %5776 = vmatpush1.bf16.msra.mxu0 %v11113_v10  ;;  %v11130_v7 = vld [vmem:[%s14390_s1 + $0x17c4] ss:$8 sps:$4 sm:$0xff]  }
 0x2ec   :  { %7575 = vmatpush1.bf16.msra.mxu1 %v11116_v59  ;;  %5777 = vmatprep.subr.bf16.mxu0 %v11121_v54  ;;  %v11217_v10 = vld [vmem:[%s14391_s0 + $0x264] ss:$48 sps:$4 sm:$0xff]   ;;  %v11125_v59 = vld [vmem:[%s14390_s1 + $0x11c0] ss:$8 sps:$4 sm:$0xff]  }
 0x2ed   :  { %7576 = vmatprep.subr.bf16.mxu1 %v11124_v15  ;;  %5744 = vmatprep.mubr.bf16.mxu0 %v11217_v10  ;;  %v11128_v54 = vld [vmem:[%s14390_s1 + $0x17c0] ss:$8 sps:$4 sm:$0xff]   ;;  %v11133_v15 = vld [vmem:[%s14390_s1 + $0x11d4] ss:$8 sps:$4 sm:$0xff]  }
 0x2ee   :  { %7543 = vmatprep.mubr.bf16.mxu1 %v11217_v10  ;;  %v11136_v10 = vld [vmem:[%s14390_s1 + $0x17d4] ss:$8 sps:$4 sm:$0xff]  }
 0x2ef   :  { %5778 = vmatpush1.bf16.msra.mxu0 %v11119_v27  ;;  %v11218_v27 = vld [vmem:[%s14391_s0 + $0x260] ss:$48 sps:$4 sm:$0xff]  }
 0x2f0   :  { %7577 = vmatpush1.bf16.msra.mxu1 %v11122_v63  ;;  %5779 = vmatprep.subr.bf16.mxu0 %v11127_v19  ;;  %v11131_v63 = vld [vmem:[%s14390_s1 + $0x11d0] ss:$8 sps:$4 sm:$0xff]  }
 0x2f1   :  { %7578 = vmatprep.subr.bf16.mxu1 %v11130_v7  ;;  %v11134_v19 = vld [vmem:[%s14390_s1 + $0x17d0] ss:$8 sps:$4 sm:$0xff]   ;;  %v11139_v7 = vld [vmem:[%s14390_s1 + $0x11e4] ss:$8 sps:$4 sm:$0xff]  }
 0x2f2   :  { %5745 = vmatmul.mubr.bf16.gmra.mrb[52].mxu0 %v11218_v27 }
 0x2f3   :  { %7544 = vmatmul.mubr.bf16.gmra.mrb[52].mxu1 %v11218_v27  ;;  %5780 = vmatpush1.bf16.msra.mxu0 %v11125_v59  ;;  %v11142_v27 = vld [vmem:[%s14390_s1 + $0x17e4] ss:$8 sps:$4 sm:$0xff]  }
 0x2f4   :  { %7579 = vmatpush1.bf16.msra.mxu1 %v11128_v54  ;;  %5781 = vmatprep.subr.bf16.mxu0 %v11133_v15  ;;  %v11219_v59 = vld [vmem:[%s14391_s0 + $0x2c] ss:$48 sps:$4 sm:$0xff]   ;;  %v11137_v54 = vld [vmem:[%s14390_s1 + $0x11e0] ss:$8 sps:$4 sm:$0xff]  }
 0x2f5   :  { %7580 = vmatprep.subr.bf16.mxu1 %v11136_v10  ;;  %5787 = vmatprep.mubr.bf16.mxu0 %v11219_v59  ;;  %v11140_v15 = vld [vmem:[%s14390_s1 + $0x17e0] ss:$8 sps:$4 sm:$0xff]   ;;  %v11145_v10 = vld [vmem:[%s14390_s1 + $0x11f4] ss:$8 sps:$4 sm:$0xff]  }
 0x2f6   :  { %7586 = vmatprep.mubr.bf16.mxu1 %v11219_v59  ;;  %v11148_v59 = vld [vmem:[%s14390_s1 + $0x17f4] ss:$8 sps:$4 sm:$0xff]  }
 0x2f7   :  { %5782 = vmatpush1.bf16.msra.mxu0 %v11131_v63  ;;  %v11143_v63 = vld [vmem:[%s14390_s1 + $0x11f0] ss:$8 sps:$4 sm:$0xff]  }
 0x2f8   :  { %7581 = vmatpush1.bf16.msra.mxu1 %v11134_v19  ;;  %5783 = vmatprep.subr.bf16.mxu0 %v11139_v7  ;;  %v11146_v19 = vld [vmem:[%s14390_s1 + $0x17f0] ss:$8 sps:$4 sm:$0xff]  }
 0x2f9   :  { %7582 = vmatprep.subr.bf16.mxu1 %v11142_v27  ;;  %v11220_v7 = vld [vmem:[%s14391_s0 + $0x28] ss:$48 sps:$4 sm:$0xff]   ;;  %v11221_v27 = vld [vmem:[%s14391_s0 + $0x8c] ss:$48 sps:$4 sm:$0xff]  }
 0x2fb   :  { %5784 = vmatpush1.bf16.msra.mxu0 %v11137_v54  ;;  %v11222_v54 = vld [vmem:[%s14391_s0 + $0x88] ss:$48 sps:$4 sm:$0xff]  }
 0x2fc   :  { %7583 = vmatpush1.bf16.msra.mxu1 %v11140_v15  ;;  %5785 = vmatprep.subr.bf16.mxu0 %v11145_v10  ;;  %v11223_v15 = vld [vmem:[%s14391_s0 + $0xec] ss:$48 sps:$4 sm:$0xff]   ;;  %v11224_v10 = vld [vmem:[%s14391_s0 + $0xe8] ss:$48 sps:$4 sm:$0xff]  }
 0x2fd   :  { %7584 = vmatprep.subr.bf16.mxu1 %v11148_v59  ;;  %v11225_v59 = vld [vmem:[%s14391_s0 + $0x14c] ss:$48 sps:$4 sm:$0xff]  }
 0x2ff   :  { %5786 = vmatpush1.bf16.msra.mxu0 %v11143_v63  ;;  %v11226_v63 = vld [vmem:[%s14391_s0 + $0x148] ss:$48 sps:$4 sm:$0xff]  }
 0x300   :  { %7585 = vmatpush1.bf16.msra.mxu1 %v11146_v19  ;;  %v11227_v19 = vld [vmem:[%s14391_s0 + $0x1ac] ss:$48 sps:$4 sm:$0xff]  }
 0x302   :  { %5788 = vmatmul.mubr.bf16.vlgmr.msra.gmra.mrb[28].mxu0 %v11220_v7 }
 0x303   :  { %7587 = vmatmul.mubr.bf16.vlgmr.msra.gmra.mrb[28].mxu1 %v11220_v7  ;;  %5797 = vmatprep.mubr.bf16.mxu0 %v11221_v27  ;;  %v11228_v7 = vld [vmem:[%s14391_s0 + $0x1a8] ss:$48 sps:$4 sm:$0xff]  }
 0x304   :  { %7596 = vmatprep.mubr.bf16.mxu1 %v11221_v27  ;;  %v11229_v27 = vld [vmem:[%s14391_s0 + $0x20c] ss:$48 sps:$4 sm:$0xff]  }
 0x30a   :  { %5798 = vmatmul.mubr.bf16.gmra.mrb[32].mxu0 %v11222_v54 }
 0x30b   :  { %7597 = vmatmul.mubr.bf16.gmra.mrb[32].mxu1 %v11222_v54  ;;  %5807 = vmatprep.mubr.bf16.mxu0 %v11223_v15  ;;  %v11230_v54 = vld [vmem:[%s14391_s0 + $0x208] ss:$48 sps:$4 sm:$0xff]  }
 0x30c   :  { %7606 = vmatprep.mubr.bf16.mxu1 %v11223_v15  ;;  %v11231_v15 = vld [vmem:[%s14391_s0 + $0x26c] ss:$48 sps:$4 sm:$0xff]  }
 0x312   :  { %5808 = vmatmul.mubr.bf16.gmra.mrb[36].mxu0 %v11224_v10 }
 0x313   :  { %7607 = vmatmul.mubr.bf16.gmra.mrb[36].mxu1 %v11224_v10  ;;  %5817 = vmatprep.mubr.bf16.mxu0 %v11225_v59  ;;  %v11232_v10 = vld [vmem:[%s14391_s0 + $0x268] ss:$48 sps:$4 sm:$0xff]  }
 0x314   :  { %7616 = vmatprep.mubr.bf16.mxu1 %v11225_v59  ;;  %v7687_v59 = vlaneseq }
 0x31a   :  { %5818 = vmatmul.mubr.bf16.gmra.mrb[40].mxu0 %v11226_v63 }
 0x31b   :  { %7617 = vmatmul.mubr.bf16.gmra.mrb[40].mxu1 %v11226_v63  ;;  %5827 = vmatprep.mubr.bf16.mxu0 %v11227_v19  ;;  %v7688_v63 = vshrl.u32 %v7687_v59, 7 }
 0x31c   :  { %7626 = vmatprep.mubr.bf16.mxu1 %v11227_v19 }
 0x31d   :  { %v7689_v19 = vsub.s32 0, %v7688_v63 }
 0x322   :  { %5828 = vmatmul.mubr.bf16.gmra.mrb[44].mxu0 %v11228_v7 }
 0x323   :  { %7627 = vmatmul.mubr.bf16.gmra.mrb[44].mxu1 %v11228_v7  ;;  %5837 = vmatprep.mubr.bf16.mxu0 %v11229_v27  ;;  %v7685_v7 = vld [vmem:[%s14392_s2] sm:$0x3] }
 0x324   :  { %7636 = vmatprep.mubr.bf16.mxu1 %v11229_v27  ;;  %v7693_v27 = vsub.s32 1, %v7688_v63  ;;  %v14235_v32 = vrot.slane %v7685_v7, %v7689_v19  ;;  %v14418_v63 = vmax.f32 %v13428_v23, %v13430_v24 }
 0x326   :  { %v14240_v6 = vrot.slane %v7685_v7, %v7693_v27 }
 0x32a   :  { %5838 = vmatmul.mubr.bf16.gmra.mrb[48].mxu0 %v11230_v54 }
 0x32b   :  { %7637 = vmatmul.mubr.bf16.gmra.mrb[48].mxu1 %v11230_v54  ;;  %5847 = vmatprep.mubr.bf16.mxu0 %v11231_v15 }
 0x32c   :  { %7646 = vmatprep.mubr.bf16.mxu1 %v11231_v15 }
 0x332   :  { %5848 = vmatmul.mubr.bf16.gmra.mrb[52].mxu0 %v11232_v10 }
 0x333   :  { %7647 = vmatmul.mubr.bf16.gmra.mrb[52].mxu1 %v11232_v10  ;;  %v14417_v10 = vmax.f32 %v13422_v20, %v13424_v21 }
 0x3d5   :  { %v5789_v54 = vpop.f32.mrb[28].mxu0 }
 0x3d6   :  { %v7588_v44 = vpop.f32.mrb[28].mxu1  ;;  %v5858_v15 = vmax.f32 %v14416_v22, %v5789_v54  ;;  %v5791_v41 = vpop.f32.mrb[29].mxu0  ;;  %v14419_v22 = vmax.f32 %v13440_v28, %v13442_v29 }
 0x3d7   :  { %v7590_v49 = vpop.f32.mrb[29].mxu1  ;;  %v5859_v59 = vmax.f32 %v14417_v10, %v5791_v41  ;;  %v5793_v58 = vpop.f32.mrb[30].mxu0 }
 0x3d8   :  { %v7592_v12 = vpop.f32.mrb[30].mxu1  ;;  %v7657_v62 = vmax.f32 %v5858_v15, %v7588_v44  ;;  %v5860_v2 = vmax.f32 %v14418_v63, %v5793_v58  ;;  %v5795_v33 = vpop.f32.mrb[31].mxu0 }
 0x3d9   :  { %v7594_v16 = vpop.f32.mrb[31].mxu1  ;;  %v7658_v17 = vmax.f32 %v5859_v59, %v7590_v49  ;;  %v5861_v19 = vmax.f32 %v14419_v22, %v5795_v33  ;;  %v14420_v49 = vmax.f32 %v13467_v38, %v13469_v39 }
 0x3da   :  { %v7697_v54 = vadd.f32 %v14235_v32, %v7657_v62  ;;  %v7659_v20 = vmax.f32 %v5860_v2, %v7592_v12  ;;  %v14421_v12 = vmax.f32 %v13476_v42, %v13478_v43 }
 0x3db   :  { %v7698_v21 = vadd.f32 %v14240_v6, %v7658_v17  ;;  %v7660_v41 = vmax.f32 %v5861_v19, %v7594_v16  ;;  %v14422_v17 = vmax.f32 %v13482_v45, %v13484_v46 }
 0x3dc   :  { %v7725_v7 = vmax.f32 %v7697_v54, 0.0  ;;  %v7699_v44 = vadd.f32 %v14235_v32, %v7659_v20  ;;  %v14423_v20 = vmax.f32 %v13494_v50, %v13496_v51  ;;  %v14424_v51 = vmax.f32 %v13521_v60, %v13523_v61 }
 0x3dd   :  { %v7726_v27 = vmax.f32 %v7698_v21, 0.0  ;;  %v7700_v23 = vadd.f32 %v14240_v6, %v7660_v41  ;;  %v5799_v24 = vpop.f32.mrb[32].mxu0 }
 0x3de   :  { %v7598_v58 = vpop.f32.mrb[32].mxu1  ;;  %v7727_v15 = vmax.f32 %v7699_v44, 0.0  ;;  %v5862_v28 = vmax.f32 %v14420_v49, %v5799_v24  ;;  %v5801_v29 = vpop.f32.mrb[33].mxu0 }
 0x3df   :  { %v7600_v33 = vpop.f32.mrb[33].mxu1  ;;  %v9297_v62 = vpack.c.bf16 %v7726_v27, %v7725_v7  ;;  %v7728_v2 = vmax.f32 %v7700_v23, 0.0  ;;  %v5863_v10 = vmax.f32 %v14421_v12, %v5801_v29  ;;  %v5803_v59 = vpop.f32.mrb[34].mxu0 }
 0x3e0   :  { %v7602_v63 = vpop.f32.mrb[34].mxu1  ;;  %v7661_v16 = vmax.f32 %v5862_v28, %v7598_v58  ;;  %v5864_v22 = vmax.f32 %v14422_v17, %v5803_v59  ;;  %v5805_v19 = vpop.f32.mrb[35].mxu0  ;;  %v14426_v59 = vmax.f32 %v13536_v3, %v13538_v4 }
 0x3e1   :  { %v7604_v54 = vpop.f32.mrb[35].mxu1  ;;  %7837 = vst [vmem:[%s14393_s3] sm:$0xff] %v9297_v62  ;;  %v9298_v38 = vpack.c.bf16 %v7728_v2, %v7727_v15  ;;  %v7662_v39 = vmax.f32 %v5863_v10, %v7600_v33  ;;  %v5865_v42 = vmax.f32 %v14423_v20, %v5805_v19  ;;  %v14425_v33 = vmax.f32 %v13530_v0, %v13532_v1 }
 0x3e2   :  { %v7701_v43 = vadd.f32 %v14235_v32, %v7661_v16  ;;  %v7663_v21 = vmax.f32 %v5864_v22, %v7602_v63  ;;  %v14427_v22 = vmax.f32 %v13548_v8, %v13550_v9  ;;  %v14428_v9 = vmax.f32 %v13575_v26, %v13577_v30 }
 0x3e3   :  { %7838 = vst [vmem:[%s14393_s3 + $0x8] sm:$0xff] %v9298_v38  ;;  %v7702_v45 = vadd.f32 %v14240_v6, %v7662_v39  ;;  %v7664_v46 = vmax.f32 %v5865_v42, %v7604_v54 }
 0x3e4   :  { %v7729_v41 = vmax.f32 %v7701_v43, 0.0  ;;  %v7703_v7 = vadd.f32 %v14235_v32, %v7663_v21 }
 0x3e5   :  { %v7730_v44 = vmax.f32 %v7702_v45, 0.0  ;;  %v7704_v27 = vadd.f32 %v14240_v6, %v7664_v46  ;;  %v5809_v23 = vpop.f32.mrb[36].mxu0 }
 0x3e6   :  { %v7608_v24 = vpop.f32.mrb[36].mxu1  ;;  %v7731_v50 = vmax.f32 %v7703_v7, 0.0  ;;  %v5866_v58 = vmax.f32 %v14424_v51, %v5809_v23  ;;  %v5811_v15 = vpop.f32.mrb[37].mxu0  ;;  %v14430_v51 = vmax.f32 %v13590_v37, %v13592_v40 }
 0x3e7   :  { %v7610_v49 = vpop.f32.mrb[37].mxu1  ;;  %v9299_v28 = vpack.c.bf16 %v7730_v44, %v7729_v41  ;;  %v7732_v29 = vmax.f32 %v7704_v27, 0.0  ;;  %v5867_v62 = vmax.f32 %v14425_v33, %v5811_v15  ;;  %v5813_v2 = vpop.f32.mrb[38].mxu0  ;;  %v14429_v44 = vmax.f32 %v13584_v34, %v13586_v35 }
 0x3e8   :  { %v7612_v12 = vpop.f32.mrb[38].mxu1  ;;  %v7665_v10 = vmax.f32 %v5866_v58, %v7608_v24  ;;  %v5868_v63 = vmax.f32 %v14426_v59, %v5813_v2  ;;  %v5815_v16 = vpop.f32.mrb[39].mxu0 }
 0x3e9   :  { %v7614_v17 = vpop.f32.mrb[39].mxu1  ;;  %7839 = vst [vmem:[%s14393_s3 + $0x10] sm:$0xff] %v9299_v28  ;;  %v9300_v60 = vpack.c.bf16 %v7732_v29, %v7731_v50  ;;  %v7666_v61 = vmax.f32 %v5867_v62, %v7610_v49  ;;  %v5869_v0 = vmax.f32 %v14427_v22, %v5815_v16  ;;  %v14431_v28 = vmax.f32 %v13602_v53, %v13604_v55 }
 0x3ea   :  { %v7705_v1 = vadd.f32 %v14235_v32, %v7665_v10  ;;  %v7667_v19 = vmax.f32 %v5868_v63, %v7612_v12  ;;  %v14432_v55 = vmax.f32 %v13629_v11, %v13631_v13  ;;  %v14433_v22 = vmax.f32 %v13638_v18, %v13640_v25 }
 0x3eb   :  { %7840 = vst [vmem:[%s14393_s3 + $0x18] sm:$0xff] %v9300_v60  ;;  %v7706_v3 = vadd.f32 %v14240_v6, %v7666_v61  ;;  %v7668_v4 = vmax.f32 %v5869_v0, %v7614_v17 }
 0x3ec   :  { %v7733_v54 = vmax.f32 %v7705_v1, 0.0  ;;  %v7707_v38 = vadd.f32 %v14235_v32, %v7667_v19 }
 0x3ed   :  { %v7734_v39 = vmax.f32 %v7706_v3, 0.0  ;;  %v7708_v20 = vadd.f32 %v14240_v6, %v7668_v4  ;;  %v5819_v42 = vpop.f32.mrb[40].mxu0  ;;  %v14434_v4 = vmax.f32 %v13644_v47, %v13646_v48 }
 0x3ee   :  { %v7618_v43 = vpop.f32.mrb[40].mxu1  ;;  %v7735_v8 = vmax.f32 %v7707_v38, 0.0  ;;  %v5870_v21 = vmax.f32 %v14428_v9, %v5819_v42  ;;  %v5821_v45 = vpop.f32.mrb[41].mxu0 }
 0x3ef   :  { %v7620_v46 = vpop.f32.mrb[41].mxu1  ;;  %v9301_v41 = vpack.c.bf16 %v7734_v39, %v7733_v54  ;;  %v7736_v7 = vmax.f32 %v7708_v20, 0.0  ;;  %v5871_v27 = vmax.f32 %v14429_v44, %v5821_v45  ;;  %v5823_v23 = vpop.f32.mrb[42].mxu0  ;;  %v14435_v20 = vmax.f32 %v13656_v14, %v13658_v31 }
 0x3f0   :  { %v7622_v24 = vpop.f32.mrb[42].mxu1  ;;  %v7669_v50 = vmax.f32 %v5870_v21, %v7618_v43  ;;  %v5872_v58 = vmax.f32 %v14430_v51, %v5823_v23  ;;  %v5825_v15 = vpop.f32.mrb[43].mxu0  ;;  %v14436_v14 = vmax.f32 %v13680_v56, %v13682_v57 }
 0x3f1   :  { %v7624_v49 = vpop.f32.mrb[43].mxu1  ;;  %7841 = vst [vmem:[%s14393_s3 + $0x20] sm:$0xff] %v9301_v41  ;;  %v9302_v26 = vpack.c.bf16 %v7736_v7, %v7735_v8  ;;  %v7670_v30 = vmax.f32 %v5871_v27, %v7620_v46  ;;  %v5873_v34 = vmax.f32 %v14431_v28, %v5825_v15 }
 0x3f2   :  { %v7709_v35 = vadd.f32 %v14235_v32, %v7669_v50  ;;  %v7671_v29 = vmax.f32 %v5872_v58, %v7622_v24  ;;  %v14437_v24 = vmax.f32 %v13686_v52, %v13688_v36 }
 0x3f3   :  { %7842 = vst [vmem:[%s14393_s3 + $0x28] sm:$0xff] %v9302_v26  ;;  %v7710_v37 = vadd.f32 %v14240_v6, %v7670_v30  ;;  %v7672_v40 = vmax.f32 %v5873_v34, %v7624_v49  ;;  %v14438_v49 = vld [vmem:[#allocation2_spill] sm:$0xff] }
 0x3f4   :  { %v7737_v33 = vmax.f32 %v7709_v35, 0.0  ;;  %v7711_v62 = vadd.f32 %v14235_v32, %v7671_v29  ;;  %v14439_v26 = vmax.f32 %v13692_v5, %v14438_v49  ;;  %v14440_v35 = vld [vmem:[#allocation3_spill] sm:$0xff]  ;;  %v14441_v29 = vld [vmem:[#allocation4_spill] sm:$0xff] }
 0x3f5   :  { %v7738_v2 = vmax.f32 %v7710_v37, 0.0  ;;  %v7712_v12 = vadd.f32 %v14240_v6, %v7672_v40  ;;  %v5829_v10 = vpop.f32.mrb[44].mxu0  ;;  %v14442_v37 = vmax.f32 %v14440_v35, %v14441_v29 }
 0x3f6   :  { %v7628_v59 = vpop.f32.mrb[44].mxu1  ;;  %v7739_v53 = vmax.f32 %v7711_v62, 0.0  ;;  %v5874_v63 = vmax.f32 %v14432_v55, %v5829_v10  ;;  %v5831_v16 = vpop.f32.mrb[45].mxu0 }
 0x3f7   :  { %v7630_v17 = vpop.f32.mrb[45].mxu1  ;;  %v9303_v60 = vpack.c.bf16 %v7738_v2, %v7737_v33  ;;  %v7740_v61 = vmax.f32 %v7712_v12, 0.0  ;;  %v5875_v0 = vmax.f32 %v14433_v22, %v5831_v16  ;;  %v5833_v1 = vpop.f32.mrb[46].mxu0  ;;  %v14444_v16 = vld [vmem:[#allocation6_spill] sm:$0xff] }
 0x3f8   :  { %v7632_v19 = vpop.f32.mrb[46].mxu1  ;;  %v7673_v3 = vmax.f32 %v5874_v63, %v7628_v59  ;;  %v5876_v54 = vmax.f32 %v14434_v4, %v5833_v1  ;;  %v5835_v38 = vpop.f32.mrb[47].mxu0  ;;  %v14443_v63 = vld [vmem:[#allocation5_spill] sm:$0xff] }
 0x3f9   :  { %v7634_v39 = vpop.f32.mrb[47].mxu1  ;;  %7843 = vst [vmem:[%s14393_s3 + $0x30] sm:$0xff] %v9303_v60  ;;  %v9304_v11 = vpack.c.bf16 %v7740_v61, %v7739_v53  ;;  %v7674_v13 = vmax.f32 %v5875_v0, %v7630_v17  ;;  %v5877_v18 = vmax.f32 %v14435_v20, %v5835_v38  ;;  %v14445_v17 = vmax.f32 %v14443_v63, %v14444_v16  ;;  %v14450_v20 = vld [vmem:[#allocation10_spill] sm:$0xff] }
 0x3fa   :  { %v7713_v25 = vadd.f32 %v14235_v32, %v7673_v3  ;;  %v7675_v42 = vmax.f32 %v5876_v54, %v7632_v19  ;;  %v14446_v19 = vld [vmem:[#allocation7_spill] sm:$0xff]  ;;  %v14447_v3 = vld [vmem:[#allocation8_spill] sm:$0xff] }
 0x3fb   :  { %7844 = vst [vmem:[%s14393_s3 + $0x38] sm:$0xff] %v9304_v11  ;;  %v7714_v47 = vadd.f32 %v14240_v6, %v7674_v13  ;;  %v7676_v48 = vmax.f32 %v5877_v18, %v7634_v39  ;;  %v14448_v4 = vmax.f32 %v14446_v19, %v14447_v3  ;;  %v14449_v13 = vld [vmem:[#allocation9_spill] sm:$0xff] }
 0x3fc   :  { %v7741_v43 = vmax.f32 %v7713_v25, 0.0  ;;  %v7715_v8 = vadd.f32 %v14235_v32, %v7675_v42  ;;  %v14451_v18 = vmax.f32 %v14449_v13, %v14450_v20 }
 0x3fd   :  { %v7742_v9 = vmax.f32 %v7714_v47, 0.0  ;;  %v7716_v21 = vadd.f32 %v14240_v6, %v7676_v48  ;;  %v5839_v45 = vpop.f32.mrb[48].mxu0 }
 0x3fe   :  { %v7638_v46 = vpop.f32.mrb[48].mxu1  ;;  %v7743_v31 = vmax.f32 %v7715_v8, 0.0  ;;  %v5878_v41 = vmax.f32 %v14436_v14, %v5839_v45  ;;  %v5841_v7 = vpop.f32.mrb[49].mxu0  ;;  %v14452_v8 = vld [vmem:[#allocation11_spill] sm:$0xff] }
 0x3ff   :  { %v7640_v44 = vpop.f32.mrb[49].mxu1  ;;  %v9305_v27 = vpack.c.bf16 %v7742_v9, %v7741_v43  ;;  %v7744_v23 = vmax.f32 %v7716_v21, 0.0  ;;  %v5879_v50 = vmax.f32 %v14437_v24, %v5841_v7  ;;  %v5843_v51 = vpop.f32.mrb[50].mxu0  ;;  %v14453_v9 = vld [vmem:[#allocation12_spill] sm:$0xff] }
 0x400   :  { %v7642_v58 = vpop.f32.mrb[50].mxu1  ;;  %v7677_v15 = vmax.f32 %v5878_v41, %v7638_v46  ;;  %v5880_v30 = vmax.f32 %v14439_v26, %v5843_v51  ;;  %v5845_v28 = vpop.f32.mrb[51].mxu0  ;;  %v14454_v21 = vmax.f32 %v14452_v8, %v14453_v9 }
 0x401   :  { %v7644_v34 = vpop.f32.mrb[51].mxu1  ;;  %7845 = vst [vmem:[%s14393_s3 + $0x40] sm:$0xff] %v9305_v27  ;;  %v9306_v56 = vpack.c.bf16 %v7744_v23, %v7743_v31  ;;  %v7678_v57 = vmax.f32 %v5879_v50, %v7640_v44  ;;  %v5881_v36 = vmax.f32 %v14442_v37, %v5845_v28 }
 0x402   :  { %v7717_v52 = vadd.f32 %v14235_v32, %v7677_v15  ;;  %v7679_v40 = vmax.f32 %v5880_v30, %v7642_v58 }
 0x403   :  { %7846 = vst [vmem:[%s14393_s3 + $0x48] sm:$0xff] %v9306_v56  ;;  %v7718_v5 = vadd.f32 %v14240_v6, %v7678_v57  ;;  %v7680_v33 = vmax.f32 %v5881_v36, %v7644_v34 }
 0x404   :  { %v7745_v62 = vmax.f32 %v7717_v52, 0.0  ;;  %v7719_v2 = vadd.f32 %v14235_v32, %v7679_v40 }
 0x405   :  { %v7746_v12 = vmax.f32 %v7718_v5, 0.0  ;;  %v7720_v10 = vadd.f32 %v14240_v6, %v7680_v33  ;;  %v5849_v59 = vpop.f32.mrb[52].mxu0 }
 0x406   :  { %v7648_v53 = vpop.f32.mrb[52].mxu1  ;;  %v7747_v55 = vmax.f32 %v7719_v2, 0.0  ;;  %v5882_v60 = vmax.f32 %v14445_v17, %v5849_v59  ;;  %v5851_v61 = vpop.f32.mrb[53].mxu0 }
 0x407   :  { %v7650_v22 = vpop.f32.mrb[53].mxu1  ;;  %v9307_v0 = vpack.c.bf16 %v7746_v12, %v7745_v62  ;;  %v7748_v1 = vmax.f32 %v7720_v10, 0.0  ;;  %v5883_v54 = vmax.f32 %v14448_v4, %v5851_v61  ;;  %v5853_v38 = vpop.f32.mrb[54].mxu0 }
 0x408   :  { %v7652_v39 = vpop.f32.mrb[54].mxu1  ;;  %v7681_v11 = vmax.f32 %v5882_v60, %v7648_v53  ;;  %v5884_v25 = vmax.f32 %v14451_v18, %v5853_v38  ;;  %v5855_v42 = vpop.f32.mrb[55].mxu0 }
 0x409   :  { %v7654_v47 = vpop.f32.mrb[55].mxu1  ;;  %7847 = vst [vmem:[%s14393_s3 + $0x50] sm:$0xff] %v9307_v0  ;;  %v9308_v48 = vpack.c.bf16 %v7748_v1, %v7747_v55  ;;  %v7682_v43 = vmax.f32 %v5883_v54, %v7650_v22  ;;  %v5885_v45 = vmax.f32 %v14454_v21, %v5855_v42 }
 0x40a   :  { %v7721_v46 = vadd.f32 %v14235_v32, %v7681_v11  ;;  %v7683_v31 = vmax.f32 %v5884_v25, %v7652_v39 }
 0x40b   :  { %7848 = vst [vmem:[%s14393_s3 + $0x58] sm:$0xff] %v9308_v48  ;;  %v7722_v14 = vadd.f32 %v14240_v6, %v7682_v43  ;;  %v7684_v41 = vmax.f32 %v5885_v45, %v7654_v47 }
 0x40c   :  { %v7749_v7 = vmax.f32 %v7721_v46, 0.0  ;;  %v7723_v44 = vadd.f32 %v14235_v32, %v7683_v31 }
 0x40d   :  { %v7750_v27 = vmax.f32 %v7722_v14, 0.0  ;;  %v7724_v23 = vadd.f32 %v14240_v6, %v7684_v41 }
 0x40e   :  { %v7751_v24 = vmax.f32 %v7723_v44, 0.0 }
 0x40f   :  { %v9309_v50 = vpack.c.bf16 %v7750_v27, %v7749_v7  ;;  %v7752_v51 = vmax.f32 %v7724_v23, 0.0 }
 0x411   :  { %7849 = vst [vmem:[%s14393_s3 + $0x60] sm:$0xff] %v9309_v50  ;;  %v9310_v58 = vpack.c.bf16 %v7752_v51, %v7751_v24 }
 0x413   :  { %7850 = vst [vmem:[%s14393_s3 + $0x68] sm:$0xff] %v9310_v58 }

</bundles_post_ra>
